<compile_context>
chip_gen: v5e
topology: v5e:2x2
jax: 0.10.0
libtpu: 0.0.40
codegen_flags: <defaults>
</compile_context>

<pallas_src>
import numpy as np
import jax
import jax.numpy as jnp
from jax.experimental import pallas as pl
from jax.experimental.pallas import tpu as pltpu


# ----------------------------------------------------------------------------
# Deterministic configuration (grid / Viscosity / PredictorCorrector / Block)
# ----------------------------------------------------------------------------
NY, NX = 16, 32                  # grid.ny, grid.nx  (ny must be a power of 2)
HALO = 1
DX = 1.0                         # grid.dx
DT = 0.05                        # time_stepping.dt
NU = 0.01                        # viscosity.nu
UB = 1.0                         # grid.ub (inflow velocity)
NITER = 5                        # niteration
NLEVEL = int(np.log2(NY)) + 1    # multigrid levels (= 5)
TIMESCALE = 1e-8                 # Block.timescale

# --- 3x3 stencil weights (get_weights_linear_2D(dx)), cross-correlation ---
W_DIFF = (np.array([[1.0,  1.0, 1.0],
                    [1.0, -8.0, 1.0],
                    [1.0,  1.0, 1.0]], np.float64) / 3.0) / DX ** 2
W_XADV = (np.array([[1.0, 0.0, -1.0],
                    [4.0, 0.0, -4.0],
                    [1.0, 0.0, -1.0]], np.float64) / 12.0) / DX
W_YADV = (np.array([[-1.0, -4.0, -1.0],
                    [0.0,  0.0,  0.0],
                    [1.0,  4.0,  1.0]], np.float64) / 12.0) / DX
W_A = -W_DIFF                                   # pressure operator A
DIAG = float(W_A[1, 1])                         # diagonal of A

# --- Block.sigma (bluff body), built exactly like Block.create_solid_body_2D
cor_x, cor_y = NX // 4, NY // 2
size_x, size_y = max(NX // 32, 1), max(NY // 8, 1)
_sigma_full = np.zeros((NY + 2 * HALO, NX + 2 * HALO), np.float32)
_sigma_full[cor_y - size_y:cor_y + size_y,
            cor_x - size_x:cor_x + size_x] = 1.0 / TIMESCALE
SIGMA = _sigma_full[HALO:-HALO, HALO:-HALO]     # interior slice, (NY, NX)
# Precomputed solid-body reciprocal: all in-kernel "/ (1 + dt*sigma)" become "*"
INV_DENOM = (1.0 / (1.0 + DT * SIGMA)).astype(np.float32)


# --- multigrid transfer operators as small dense matrices -------------------
# Level-l restriction / prolongation operators are the top-left blocks of
# these full-size matrices (the 2x2-stride-2 / nearest-x2 patterns are
# self-similar), so only 4 constant matrices are needed for all levels.
def _mg_matrices():
    r_row = np.zeros((NY // 2, NY), np.float32)      # 2x2 mean: rows
    for i in range(NY // 2):
        r_row[i, 2 * i] = 0.5
        r_row[i, 2 * i + 1] = 0.5
    r_colT = np.zeros((NX, NX // 2), np.float32)     # 2x2 mean: cols (transposed)
    for j in range(NX // 2):
        r_colT[2 * j, j] = 0.5
        r_colT[2 * j + 1, j] = 0.5
    p_row = np.zeros((NY, NY // 2), np.float32)      # nearest x2: rows
    for i in range(NY // 2):
        p_row[2 * i, i] = 1.0
        p_row[2 * i + 1, i] = 1.0
    p_colT = np.zeros((NX // 2, NX), np.float32)     # nearest x2: cols (transposed)
    for j in range(NX // 2):
        p_colT[j, 2 * j] = 1.0
        p_colT[j, 2 * j + 1] = 1.0
    return r_row, r_colT, p_row, p_colT


R_ROW, R_COLT, P_ROW, P_COLT = _mg_matrices()


# ----------------------------------------------------------------------------
# The single fused Pallas kernel: one full FlowPastBlock time step
# ----------------------------------------------------------------------------
def _step_kernel(u_ref, v_ref, p_ref, invd_ref,
                 rrow_ref, rcolT_ref, prow_ref, pcolT_ref,
                 out_ref, pad_ref):
    H, W = NY, NX
    dt, nu = DT, NU
    inv_diag = 1.0 / DIAG

    u = u_ref[...]
    v = v_ref[...]
    p = p_ref[...]
    invd = invd_ref[...]

    # ---- halo fills into the shared (H+2, W+2) VMEM scratch -----------------
    # TODO(synk): the exact ai4pdes boundary_condition_2D_{u,v,p,cw} halo
    # values are not in the provided source; the same inflow / no-slip /
    # Neumann (edge-replicate) / zero halos as the previously validated
    # version are used.
    def fill_edge(x):                      # replicate ("edge") padding
        pad_ref[1:H + 1, 1:W + 1] = x
        pad_ref[1:H + 1, 0:1] = pad_ref[1:H + 1, 1:2]
        pad_ref[1:H + 1, W + 1:W + 2] = pad_ref[1:H + 1, W:W + 1]
        pad_ref[0:1, :] = pad_ref[1:2, :]
        pad_ref[H + 1:H + 2, :] = pad_ref[H:H + 1, :]

    def fill_u(x):                         # inflow u = ub on the left boundary
        fill_edge(x)
        pad_ref[:, 0:1] = jnp.full((H + 2, 1), UB, jnp.float32)

    def fill_v(x):                         # v = 0 on left / top / bottom
        fill_edge(x)
        pad_ref[:, 0:1] = jnp.zeros((H + 2, 1), jnp.float32)
        pad_ref[0:1, :] = jnp.zeros((1, W + 2), jnp.float32)
        pad_ref[H + 1:H + 2, :] = jnp.zeros((1, W + 2), jnp.float32)

    fill_p = fill_edge                     # Neumann-style (edge replicate)

    def fill_zero(x, h, w):                # boundary_condition_2D_cw: zero halo
        pad_ref[0:h + 2, 0:w + 2] = jnp.zeros((h + 2, w + 2), jnp.float32)
        pad_ref[1:h + 1, 1:w + 1] = x

    # ---- 3x3 valid cross-correlations over pad_ref[0:h+2, 0:w+2] ------------
    # Weights are Python float immediates (no SMEM traffic), zero taps are
    # skipped, and the 9 window loads are shared across every stencil applied
    # to the same padded field.
    def stencils(weight_list, h=H, w=W):
        taps = {}
        outs = []
        for wgt in weight_list:
            acc = None
            for di in range(3):
                for dj in range(3):
                    c = float(wgt[di, dj])
                    if c == 0.0:
                        continue
                    if (di, dj) not in taps:
                        taps[(di, dj)] = pad_ref[di:di + h, dj:dj + w]
                    term = taps[(di, dj)] * c
                    acc = term if acc is None else acc + term
            outs.append(acc)
        return outs

    # ---- multigrid transfer operators (exact 0.25 / 1.0 weights, MXU) -------
    def restrict(r, h, w):                 # (h, w) -> (h//2, w//2), 2x2 mean
        t = jnp.dot(rrow_ref[0:h // 2, 0:h], r,
                    preferred_element_type=jnp.float32)
        return jnp.dot(t, rcolT_ref[0:w, 0:w // 2],
                       preferred_element_type=jnp.float32)

    def prolong(a, h, w):                  # (h//2, w//2) -> (h, w), nearest x2
        t = jnp.dot(a, pcolT_ref[0:w // 2, 0:w],
                    preferred_element_type=jnp.float32)
        if h // 2 == 1:                    # coarsest level: row duplication
            return jnp.broadcast_to(t, (h, w))
        return jnp.dot(prow_ref[0:h, 0:h // 2], t,
                       preferred_element_type=jnp.float32)

    # ============================ predictor ==================================
    fill_p(p)
    gx, gy = stencils([W_XADV * dt, W_YADV * dt])     # Grapx_p, Grapy_p

    fill_u(u)
    adx_u, ady_u, ad2_u = stencils(
        [W_XADV * dt, W_YADV * dt, W_DIFF * (nu * dt)])
    fill_v(v)
    adx_v, ady_v, ad2_v = stencils(
        [W_XADV * dt, W_YADV * dt, W_DIFF * (nu * dt)])

    bu = (u + 0.5 * (ad2_u - u * adx_u - v * ady_u) - gx) * invd
    bv = (v + 0.5 * (ad2_v - u * adx_v - v * ady_v) - gy) * invd

    # ============================ corrector ==================================
    fill_u(bu)
    adx_u, ady_u, ad2_u = stencils(
        [W_XADV * dt, W_YADV * dt, W_DIFF * (nu * dt)])
    fill_v(bv)
    adx_v, ady_v, ad2_v = stencils(
        [W_XADV * dt, W_YADV * dt, W_DIFF * (nu * dt)])

    un = (u + ad2_u - bu * adx_u - bv * ady_u - gx) * invd
    vn = (v + ad2_v - bu * adx_v - bv * ady_v - gy) * invd

    # ================ pressure solve: multigrid F-cycle ======================
    fill_u(un)
    (bx,) = stencils([W_XADV * (-1.0 / dt)])
    fill_v(vn)
    (by,) = stencils([W_YADV * (-1.0 / dt)])
    b = bx + by                             # b = -(xadv(uu) + yadv(vv)) / dt

    shapes = [(H >> lvl, W >> lvl) for lvl in range(NLEVEL)]

    pcur = p
    for _mg in range(NITER):                # statically unrolled F-cycle
        # residual on the finest level: r = A(bc_p(p)) - b
        fill_p(pcur)
        (ap,) = stencils([W_A])
        r = ap - b
        r_s = [r]
        for lvl in range(1, NLEVEL):
            r = restrict(r, *shapes[lvl - 1])
            r_s.append(r)
        # coarse-to-fine correction sweep
        a = None
        for i in reversed(range(1, NLEVEL)):
            h, w = shapes[i]
            if i == NLEVEL - 1:
                a = r_s[i] * inv_diag
            else:
                fill_zero(a, h, w)
                (aa,) = stencils([W_A * (-inv_diag)], h, w)
                a = a + aa + r_s[i] * inv_diag
            a = prolong(a, *shapes[i - 1])
        pcur = pcur - a
        # fine-level smoothing: p - A(bc_p(p))/diag + b/diag
        fill_p(pcur)
        (ap,) = stencils([W_A * (-inv_diag)])
        pcur = pcur + ap + b * inv_diag

    # ========== final pressure-gradient correction + solid body ==============
    fill_p(pcur)
    gx, gy = stencils([W_XADV * dt, W_YADV * dt])
    un = (un - gx) * invd
    vn = (vn - gy) * invd

    # ---- lane-dense packed output: [ u | v | p | p ] -> (NY, 4*NX) ----------
    out_ref[:, 0 * W:1 * W] = un
    out_ref[:, 1 * W:2 * W] = vn
    out_ref[:, 2 * W:3 * W] = pcur
    out_ref[:, 3 * W:4 * W] = pcur          # filler so the slab is fully init'd


# ----------------------------------------------------------------------------
# Wrapper: one pallas_call for the whole time step.  No grid needed: the full
# working set is a few KiB, far under VMEM on v5e / v6e / v7x.  The solid-body
# reciprocal and the multigrid transfer matrices are jit-closure constants.
# ----------------------------------------------------------------------------
def _vmem():
    return pl.BlockSpec(memory_space=pltpu.MemorySpace.VMEM)


@jax.jit
def flow_past_block_step(u, v, p):
    inv_denom = jnp.asarray(INV_DENOM)      # 1 / (1 + dt * sigma)
    r_row = jnp.asarray(R_ROW)
    r_colT = jnp.asarray(R_COLT)
    p_row = jnp.asarray(P_ROW)
    p_colT = jnp.asarray(P_COLT)

    packed = pl.pallas_call(
        _step_kernel,
        out_shape=jax.ShapeDtypeStruct((NY, 4 * NX), jnp.float32),
        in_specs=[_vmem()] * 8,
        out_specs=_vmem(),
        scratch_shapes=[pltpu.VMEM((NY + 2, NX + 2), jnp.float32)],
    )(u, v, p, inv_denom, r_row, r_colT, p_row, p_colT)
    return (packed[:, 0:NX],
            packed[:, NX:2 * NX],
            packed[:, 2 * NX:3 * NX])


# ----------------------------------------------------------------------------
if __name__ == "__main__":
    key = jax.random.PRNGKey(0)
    k1, k2, k3 = jax.random.split(key, 3)
    u0 = UB + 0.1 * jax.random.normal(k1, (NY, NX), jnp.float32)
    v0 = 0.1 * jax.random.normal(k2, (NY, NX), jnp.float32)
    p0 = 0.01 * jax.random.normal(k3, (NY, NX), jnp.float32)

    u1, v1, p1 = flow_past_block_step(u0, v0, p0)
    jax.block_until_ready((u1, v1, p1))

    assert u1.shape == (NY, NX) and v1.shape == (NY, NX) and p1.shape == (NY, NX)
    assert np.all(np.isfinite(np.asarray(u1)))
    assert np.all(np.isfinite(np.asarray(v1)))
    assert np.all(np.isfinite(np.asarray(p1)))
    print("KERNEL_OK")
</pallas_src>

<mosaic_0001>
module attributes {stable_mosaic.version = 11 : i64} {
  func.func @_step_kernel(%arg0: memref<16x32xf32, #tpu.memory_space<vmem>>, %arg1: memref<16x32xf32, #tpu.memory_space<vmem>>, %arg2: memref<16x32xf32, #tpu.memory_space<vmem>>, %arg3: memref<16x32xf32, #tpu.memory_space<vmem>>, %arg4: memref<8x16xf32, #tpu.memory_space<vmem>>, %arg5: memref<32x16xf32, #tpu.memory_space<vmem>>, %arg6: memref<16x8xf32, #tpu.memory_space<vmem>>, %arg7: memref<16x32xf32, #tpu.memory_space<vmem>>, %arg8: memref<16x128xf32, #tpu.memory_space<vmem>>, %arg9: memref<18x34xf32, #tpu.memory_space<vmem>>) attributes {dimension_semantics = [], scalar_prefetch = 0 : i64, scratch_operands = 1 : i64, tpu.core_type = #tpu.core_type<tc>} {
    %c0 = arith.constant 0 : index
    %c0_0 = arith.constant 0 : index
    %0 = vector.load %arg0[%c0, %c0_0] : memref<16x32xf32, #tpu.memory_space<vmem>>, vector<16x32xf32>
    %c0_1 = arith.constant 0 : index
    %c0_2 = arith.constant 0 : index
    %1 = vector.load %arg1[%c0_1, %c0_2] : memref<16x32xf32, #tpu.memory_space<vmem>>, vector<16x32xf32>
    %c0_3 = arith.constant 0 : index
    %c0_4 = arith.constant 0 : index
    %2 = vector.load %arg2[%c0_3, %c0_4] : memref<16x32xf32, #tpu.memory_space<vmem>>, vector<16x32xf32>
    %c0_5 = arith.constant 0 : index
    %c0_6 = arith.constant 0 : index
    %3 = vector.load %arg3[%c0_5, %c0_6] : memref<16x32xf32, #tpu.memory_space<vmem>>, vector<16x32xf32>
    %c1 = arith.constant 1 : index
    %c1_7 = arith.constant 1 : index
    %4 = vector.load %arg9[%c1, %c1_7] : memref<18x34xf32, #tpu.memory_space<vmem>>, vector<16x32xf32>
    tpu.vector_store %arg9[%c1, %c1_7], %2 {strides = array<i32>} : memref<18x34xf32, #tpu.memory_space<vmem>>, vector<16x32xf32>,
    %c1_8 = arith.constant 1 : index
    %c1_9 = arith.constant 1 : index
    %5 = vector.load %arg9[%c1_8, %c1_9] : memref<18x34xf32, #tpu.memory_space<vmem>>, vector<16x1xf32>
    %c1_10 = arith.constant 1 : index
    %c0_11 = arith.constant 0 : index
    %6 = vector.load %arg9[%c1_10, %c0_11] : memref<18x34xf32, #tpu.memory_space<vmem>>, vector<16x1xf32>
    tpu.vector_store %arg9[%c1_10, %c0_11], %5 {strides = array<i32>} : memref<18x34xf32, #tpu.memory_space<vmem>>, vector<16x1xf32>,
    %c1_12 = arith.constant 1 : index
    %c32 = arith.constant 32 : index
    %7 = vector.load %arg9[%c1_12, %c32] : memref<18x34xf32, #tpu.memory_space<vmem>>, vector<16x1xf32>
    %c1_13 = arith.constant 1 : index
    %c33 = arith.constant 33 : index
    %8 = vector.load %arg9[%c1_13, %c33] : memref<18x34xf32, #tpu.memory_space<vmem>>, vector<16x1xf32>
    tpu.vector_store %arg9[%c1_13, %c33], %7 {strides = array<i32>} : memref<18x34xf32, #tpu.memory_space<vmem>>, vector<16x1xf32>,
    %c1_14 = arith.constant 1 : index
    %c0_15 = arith.constant 0 : index
    %9 = vector.load %arg9[%c1_14, %c0_15] : memref<18x34xf32, #tpu.memory_space<vmem>>, vector<1x34xf32>
    %c0_16 = arith.constant 0 : index
    %c0_17 = arith.constant 0 : index
    %10 = vector.load %arg9[%c0_16, %c0_17] : memref<18x34xf32, #tpu.memory_space<vmem>>, vector<1x34xf32>
    tpu.vector_store %arg9[%c0_16, %c0_17], %9 {strides = array<i32>} : memref<18x34xf32, #tpu.memory_space<vmem>>, vector<1x34xf32>,
    %c16 = arith.constant 16 : index
    %c0_18 = arith.constant 0 : index
    %11 = vector.load %arg9[%c16, %c0_18] : memref<18x34xf32, #tpu.memory_space<vmem>>, vector<1x34xf32>
    %c17 = arith.constant 17 : index
    %c0_19 = arith.constant 0 : index
    %12 = vector.load %arg9[%c17, %c0_19] : memref<18x34xf32, #tpu.memory_space<vmem>>, vector<1x34xf32>
    tpu.vector_store %arg9[%c17, %c0_19], %11 {strides = array<i32>} : memref<18x34xf32, #tpu.memory_space<vmem>>, vector<1x34xf32>,
    %c0_20 = arith.constant 0 : index
    %c0_21 = arith.constant 0 : index
    %13 = vector.load %arg9[%c0_20, %c0_21] : memref<18x34xf32, #tpu.memory_space<vmem>>, vector<16x32xf32>
    %cst = arith.constant 0.00416666688 : f32
    %14 = vector.broadcast %cst : f32 to vector<16x32xf32>
    %15 = arith.mulf %13, %14 : vector<16x32xf32>
    %c0_22 = arith.constant 0 : index
    %c2 = arith.constant 2 : index
    %16 = vector.load %arg9[%c0_22, %c2] : memref<18x34xf32, #tpu.memory_space<vmem>>, vector<16x32xf32>
    %cst_23 = arith.constant -0.00416666688 : f32
    %17 = vector.broadcast %cst_23 : f32 to vector<16x32xf32>
    %18 = arith.mulf %16, %17 : vector<16x32xf32>
    %19 = arith.addf %15, %18 : vector<16x32xf32>
    %c1_24 = arith.constant 1 : index
    %c0_25 = arith.constant 0 : index
    %20 = vector.load %arg9[%c1_24, %c0_25] : memref<18x34xf32, #tpu.memory_space<vmem>>, vector<16x32xf32>
    %cst_26 = arith.constant 0.0166666675 : f32
    %21 = vector.broadcast %cst_26 : f32 to vector<16x32xf32>
    %22 = arith.mulf %20, %21 : vector<16x32xf32>
    %23 = arith.addf %19, %22 : vector<16x32xf32>
    %c1_27 = arith.constant 1 : index
    %c2_28 = arith.constant 2 : index
    %24 = vector.load %arg9[%c1_27, %c2_28] : memref<18x34xf32, #tpu.memory_space<vmem>>, vector<16x32xf32>
    %cst_29 = arith.constant -0.0166666675 : f32
    %25 = vector.broadcast %cst_29 : f32 to vector<16x32xf32>
    %26 = arith.mulf %24, %25 : vector<16x32xf32>
    %27 = arith.addf %23, %26 : vector<16x32xf32>
    %c2_30 = arith.constant 2 : index
    %c0_31 = arith.constant 0 : index
    %28 = vector.load %arg9[%c2_30, %c0_31] : memref<18x34xf32, #tpu.memory_space<vmem>>, vector<16x32xf32>
    %cst_32 = arith.constant 0.00416666688 : f32
    %29 = vector.broadcast %cst_32 : f32 to vector<16x32xf32>
    %30 = arith.mulf %28, %29 : vector<16x32xf32>
    %31 = arith.addf %27, %30 : vector<16x32xf32>
    %c2_33 = arith.constant 2 : index
    %c2_34 = arith.constant 2 : index
    %32 = vector.load %arg9[%c2_33, %c2_34] : memref<18x34xf32, #tpu.memory_space<vmem>>, vector<16x32xf32>
    %cst_35 = arith.constant -0.00416666688 : f32
    %33 = vector.broadcast %cst_35 : f32 to vector<16x32xf32>
    %34 = arith.mulf %32, %33 : vector<16x32xf32>
    %35 = arith.addf %31, %34 : vector<16x32xf32>
    %cst_36 = arith.constant -0.00416666688 : f32
    %36 = vector.broadcast %cst_36 : f32 to vector<16x32xf32>
    %37 = arith.mulf %13, %36 : vector<16x32xf32>
    %c0_37 = arith.constant 0 : index
    %c1_38 = arith.constant 1 : index
    %38 = vector.load %arg9[%c0_37, %c1_38] : memref<18x34xf32, #tpu.memory_space<vmem>>, vector<16x32xf32>
    %cst_39 = arith.constant -0.0166666675 : f32
    %39 = vector.broadcast %cst_39 : f32 to vector<16x32xf32>
    %40 = arith.mulf %38, %39 : vector<16x32xf32>
    %41 = arith.addf %37, %40 : vector<16x32xf32>
    %cst_40 = arith.constant -0.00416666688 : f32
    %42 = vector.broadcast %cst_40 : f32 to vector<16x32xf32>
    %43 = arith.mulf %16, %42 : vector<16x32xf32>
    %44 = arith.addf %41, %43 : vector<16x32xf32>
    %cst_41 = arith.constant 0.00416666688 : f32
    %45 = vector.broadcast %cst_41 : f32 to vector<16x32xf32>
    %46 = arith.mulf %28, %45 : vector<16x32xf32>
    %47 = arith.addf %44, %46 : vector<16x32xf32>
    %c2_42 = arith.constant 2 : index
    %c1_43 = arith.constant 1 : index
    %48 = vector.load %arg9[%c2_42, %c1_43] : memref<18x34xf32, #tpu.memory_space<vmem>>, vector<16x32xf32>
    %cst_44 = arith.constant 0.0166666675 : f32
    %49 = vector.broadcast %cst_44 : f32 to vector<16x32xf32>
    %50 = arith.mulf %48, %49 : vector<16x32xf32>
    %51 = arith.addf %47, %50 : vector<16x32xf32>
    %cst_45 = arith.constant 0.00416666688 : f32
    %52 = vector.broadcast %cst_45 : f32 to vector<16x32xf32>
    %53 = arith.mulf %32, %52 : vector<16x32xf32>
    %54 = arith.addf %51, %53 : vector<16x32xf32>
    %c1_46 = arith.constant 1 : index
    %c1_47 = arith.constant 1 : index
    %55 = vector.load %arg9[%c1_46, %c1_47] : memref<18x34xf32, #tpu.memory_space<vmem>>, vector<16x32xf32>
    tpu.vector_store %arg9[%c1_46, %c1_47], %0 {strides = array<i32>} : memref<18x34xf32, #tpu.memory_space<vmem>>, vector<16x32xf32>,
    %c1_48 = arith.constant 1 : index
    %c1_49 = arith.constant 1 : index
    %56 = vector.load %arg9[%c1_48, %c1_49] : memref<18x34xf32, #tpu.memory_space<vmem>>, vector<16x1xf32>
    %c1_50 = arith.constant 1 : index
    %c0_51 = arith.constant 0 : index
    %57 = vector.load %arg9[%c1_50, %c0_51] : memref<18x34xf32, #tpu.memory_space<vmem>>, vector<16x1xf32>
    tpu.vector_store %arg9[%c1_50, %c0_51], %56 {strides = array<i32>} : memref<18x34xf32, #tpu.memory_space<vmem>>, vector<16x1xf32>,
    %c1_52 = arith.constant 1 : index
    %c32_53 = arith.constant 32 : index
    %58 = vector.load %arg9[%c1_52, %c32_53] : memref<18x34xf32, #tpu.memory_space<vmem>>, vector<16x1xf32>
    %c1_54 = arith.constant 1 : index
    %c33_55 = arith.constant 33 : index
    %59 = vector.load %arg9[%c1_54, %c33_55] : memref<18x34xf32, #tpu.memory_space<vmem>>, vector<16x1xf32>
    tpu.vector_store %arg9[%c1_54, %c33_55], %58 {strides = array<i32>} : memref<18x34xf32, #tpu.memory_space<vmem>>, vector<16x1xf32>,
    %c1_56 = arith.constant 1 : index
    %c0_57 = arith.constant 0 : index
    %60 = vector.load %arg9[%c1_56, %c0_57] : memref<18x34xf32, #tpu.memory_space<vmem>>, vector<1x34xf32>
    %c0_58 = arith.constant 0 : index
    %c0_59 = arith.constant 0 : index
    %61 = vector.load %arg9[%c0_58, %c0_59] : memref<18x34xf32, #tpu.memory_space<vmem>>, vector<1x34xf32>
    tpu.vector_store %arg9[%c0_58, %c0_59], %60 {strides = array<i32>} : memref<18x34xf32, #tpu.memory_space<vmem>>, vector<1x34xf32>,
    %c16_60 = arith.constant 16 : index
    %c0_61 = arith.constant 0 : index
    %62 = vector.load %arg9[%c16_60, %c0_61] : memref<18x34xf32, #tpu.memory_space<vmem>>, vector<1x34xf32>
    %c17_62 = arith.constant 17 : index
    %c0_63 = arith.constant 0 : index
    %63 = vector.load %arg9[%c17_62, %c0_63] : memref<18x34xf32, #tpu.memory_space<vmem>>, vector<1x34xf32>
    tpu.vector_store %arg9[%c17_62, %c0_63], %62 {strides = array<i32>} : memref<18x34xf32, #tpu.memory_space<vmem>>, vector<1x34xf32>,
    %cst_64 = arith.constant 1.000000e+00 : f32
    %64 = vector.broadcast %cst_64 : f32 to vector<18x1xf32>
    %c0_65 = arith.constant 0 : index
    %c0_66 = arith.constant 0 : index
    %65 = vector.load %arg9[%c0_65, %c0_66] : memref<18x34xf32, #tpu.memory_space<vmem>>, vector<18x1xf32>
    tpu.vector_store %arg9[%c0_65, %c0_66], %64 {strides = array<i32>} : memref<18x34xf32, #tpu.memory_space<vmem>>, vector<18x1xf32>,
    %c0_67 = arith.constant 0 : index
    %c0_68 = arith.constant 0 : index
    %66 = vector.load %arg9[%c0_67, %c0_68] : memref<18x34xf32, #tpu.memory_space<vmem>>, vector<16x32xf32>
    %cst_69 = arith.constant 0.00416666688 : f32
    %67 = vector.broadcast %cst_69 : f32 to vector<16x32xf32>
    %68 = arith.mulf %66, %67 : vector<16x32xf32>
    %c0_70 = arith.constant 0 : index
    %c2_71 = arith.constant 2 : index
    %69 = vector.load %arg9[%c0_70, %c2_71] : memref<18x34xf32, #tpu.memory_space<vmem>>, vector<16x32xf32>
    %cst_72 = arith.constant -0.00416666688 : f32
    %70 = vector.broadcast %cst_72 : f32 to vector<16x32xf32>
    %71 = arith.mulf %69, %70 : vector<16x32xf32>
    %72 = arith.addf %68, %71 : vector<16x32xf32>
    %c1_73 = arith.constant 1 : index
    %c0_74 = arith.constant 0 : index
    %73 = vector.load %arg9[%c1_73, %c0_74] : memref<18x34xf32, #tpu.memory_space<vmem>>, vector<16x32xf32>
    %cst_75 = arith.constant 0.0166666675 : f32
    %74 = vector.broadcast %cst_75 : f32 to vector<16x32xf32>
    %75 = arith.mulf %73, %74 : vector<16x32xf32>
    %76 = arith.addf %72, %75 : vector<16x32xf32>
    %c1_76 = arith.constant 1 : index
    %c2_77 = arith.constant 2 : index
    %77 = vector.load %arg9[%c1_76, %c2_77] : memref<18x34xf32, #tpu.memory_space<vmem>>, vector<16x32xf32>
    %cst_78 = arith.constant -0.0166666675 : f32
    %78 = vector.broadcast %cst_78 : f32 to vector<16x32xf32>
    %79 = arith.mulf %77, %78 : vector<16x32xf32>
    %80 = arith.addf %76, %79 : vector<16x32xf32>
    %c2_79 = arith.constant 2 : index
    %c0_80 = arith.constant 0 : index
    %81 = vector.load %arg9[%c2_79, %c0_80] : memref<18x34xf32, #tpu.memory_space<vmem>>, vector<16x32xf32>
    %cst_81 = arith.constant 0.00416666688 : f32
    %82 = vector.broadcast %cst_81 : f32 to vector<16x32xf32>
    %83 = arith.mulf %81, %82 : vector<16x32xf32>
    %84 = arith.addf %80, %83 : vector<16x32xf32>
    %c2_82 = arith.constant 2 : index
    %c2_83 = arith.constant 2 : index
    %85 = vector.load %arg9[%c2_82, %c2_83] : memref<18x34xf32, #tpu.memory_space<vmem>>, vector<16x32xf32>
    %cst_84 = arith.constant -0.00416666688 : f32
    %86 = vector.broadcast %cst_84 : f32 to vector<16x32xf32>
    %87 = arith.mulf %85, %86 : vector<16x32xf32>
    %88 = arith.addf %84, %87 : vector<16x32xf32>
    %cst_85 = arith.constant -0.00416666688 : f32
    %89 = vector.broadcast %cst_85 : f32 to vector<16x32xf32>
    %90 = arith.mulf %66, %89 : vector<16x32xf32>
    %c0_86 = arith.constant 0 : index
    %c1_87 = arith.constant 1 : index
    %91 = vector.load %arg9[%c0_86, %c1_87] : memref<18x34xf32, #tpu.memory_space<vmem>>, vector<16x32xf32>
    %cst_88 = arith.constant -0.0166666675 : f32
    %92 = vector.broadcast %cst_88 : f32 to vector<16x32xf32>
    %93 = arith.mulf %91, %92 : vector<16x32xf32>
    %94 = arith.addf %90, %93 : vector<16x32xf32>
    %cst_89 = arith.constant -0.00416666688 : f32
    %95 = vector.broadcast %cst_89 : f32 to vector<16x32xf32>
    %96 = arith.mulf %69, %95 : vector<16x32xf32>
    %97 = arith.addf %94, %96 : vector<16x32xf32>
    %cst_90 = arith.constant 0.00416666688 : f32
    %98 = vector.broadcast %cst_90 : f32 to vector<16x32xf32>
    %99 = arith.mulf %81, %98 : vector<16x32xf32>
    %100 = arith.addf %97, %99 : vector<16x32xf32>
    %c2_91 = arith.constant 2 : index
    %c1_92 = arith.constant 1 : index
    %101 = vector.load %arg9[%c2_91, %c1_92] : memref<18x34xf32, #tpu.memory_space<vmem>>, vector<16x32xf32>
    %cst_93 = arith.constant 0.0166666675 : f32
    %102 = vector.broadcast %cst_93 : f32 to vector<16x32xf32>
    %103 = arith.mulf %101, %102 : vector<16x32xf32>
    %104 = arith.addf %100, %103 : vector<16x32xf32>
    %cst_94 = arith.constant 0.00416666688 : f32
    %105 = vector.broadcast %cst_94 : f32 to vector<16x32xf32>
    %106 = arith.mulf %85, %105 : vector<16x32xf32>
    %107 = arith.addf %104, %106 : vector<16x32xf32>
    %cst_95 = arith.constant 1.66666665E-4 : f32
    %108 = vector.broadcast %cst_95 : f32 to vector<16x32xf32>
    %109 = arith.mulf %66, %108 : vector<16x32xf32>
    %cst_96 = arith.constant 1.66666665E-4 : f32
    %110 = vector.broadcast %cst_96 : f32 to vector<16x32xf32>
    %111 = arith.mulf %91, %110 : vector<16x32xf32>
    %112 = arith.addf %109, %111 : vector<16x32xf32>
    %cst_97 = arith.constant 1.66666665E-4 : f32
    %113 = vector.broadcast %cst_97 : f32 to vector<16x32xf32>
    %114 = arith.mulf %69, %113 : vector<16x32xf32>
    %115 = arith.addf %112, %114 : vector<16x32xf32>
    %cst_98 = arith.constant 1.66666665E-4 : f32
    %116 = vector.broadcast %cst_98 : f32 to vector<16x32xf32>
    %117 = arith.mulf %73, %116 : vector<16x32xf32>
    %118 = arith.addf %115, %117 : vector<16x32xf32>
    %c1_99 = arith.constant 1 : index
    %c1_100 = arith.constant 1 : index
    %119 = vector.load %arg9[%c1_99, %c1_100] : memref<18x34xf32, #tpu.memory_space<vmem>>, vector<16x32xf32>
    %cst_101 = arith.constant -0.00133333332 : f32
    %120 = vector.broadcast %cst_101 : f32 to vector<16x32xf32>
    %121 = arith.mulf %119, %120 : vector<16x32xf32>
    %122 = arith.addf %118, %121 : vector<16x32xf32>
    %cst_102 = arith.constant 1.66666665E-4 : f32
    %123 = vector.broadcast %cst_102 : f32 to vector<16x32xf32>
    %124 = arith.mulf %77, %123 : vector<16x32xf32>
    %125 = arith.addf %122, %124 : vector<16x32xf32>
    %cst_103 = arith.constant 1.66666665E-4 : f32
    %126 = vector.broadcast %cst_103 : f32 to vector<16x32xf32>
    %127 = arith.mulf %81, %126 : vector<16x32xf32>
    %128 = arith.addf %125, %127 : vector<16x32xf32>
    %cst_104 = arith.constant 1.66666665E-4 : f32
    %129 = vector.broadcast %cst_104 : f32 to vector<16x32xf32>
    %130 = arith.mulf %101, %129 : vector<16x32xf32>
    %131 = arith.addf %128, %130 : vector<16x32xf32>
    %cst_105 = arith.constant 1.66666665E-4 : f32
    %132 = vector.broadcast %cst_105 : f32 to vector<16x32xf32>
    %133 = arith.mulf %85, %132 : vector<16x32xf32>
    %134 = arith.addf %131, %133 : vector<16x32xf32>
    %c1_106 = arith.constant 1 : index
    %c1_107 = arith.constant 1 : index
    %135 = vector.load %arg9[%c1_106, %c1_107] : memref<18x34xf32, #tpu.memory_space<vmem>>, vector<16x32xf32>
    tpu.vector_store %arg9[%c1_106, %c1_107], %1 {strides = array<i32>} : memref<18x34xf32, #tpu.memory_space<vmem>>, vector<16x32xf32>,
    %c1_108 = arith.constant 1 : index
    %c1_109 = arith.constant 1 : index
    %136 = vector.load %arg9[%c1_108, %c1_109] : memref<18x34xf32, #tpu.memory_space<vmem>>, vector<16x1xf32>
    %c1_110 = arith.constant 1 : index
    %c0_111 = arith.constant 0 : index
    %137 = vector.load %arg9[%c1_110, %c0_111] : memref<18x34xf32, #tpu.memory_space<vmem>>, vector<16x1xf32>
    tpu.vector_store %arg9[%c1_110, %c0_111], %136 {strides = array<i32>} : memref<18x34xf32, #tpu.memory_space<vmem>>, vector<16x1xf32>,
    %c1_112 = arith.constant 1 : index
    %c32_113 = arith.constant 32 : index
    %138 = vector.load %arg9[%c1_112, %c32_113] : memref<18x34xf32, #tpu.memory_space<vmem>>, vector<16x1xf32>
    %c1_114 = arith.constant 1 : index
    %c33_115 = arith.constant 33 : index
    %139 = vector.load %arg9[%c1_114, %c33_115] : memref<18x34xf32, #tpu.memory_space<vmem>>, vector<16x1xf32>
    tpu.vector_store %arg9[%c1_114, %c33_115], %138 {strides = array<i32>} : memref<18x34xf32, #tpu.memory_space<vmem>>, vector<16x1xf32>,
    %c1_116 = arith.constant 1 : index
    %c0_117 = arith.constant 0 : index
    %140 = vector.load %arg9[%c1_116, %c0_117] : memref<18x34xf32, #tpu.memory_space<vmem>>, vector<1x34xf32>
    %c0_118 = arith.constant 0 : index
    %c0_119 = arith.constant 0 : index
    %141 = vector.load %arg9[%c0_118, %c0_119] : memref<18x34xf32, #tpu.memory_space<vmem>>, vector<1x34xf32>
    tpu.vector_store %arg9[%c0_118, %c0_119], %140 {strides = array<i32>} : memref<18x34xf32, #tpu.memory_space<vmem>>, vector<1x34xf32>,
    %c16_120 = arith.constant 16 : index
    %c0_121 = arith.constant 0 : index
    %142 = vector.load %arg9[%c16_120, %c0_121] : memref<18x34xf32, #tpu.memory_space<vmem>>, vector<1x34xf32>
    %c17_122 = arith.constant 17 : index
    %c0_123 = arith.constant 0 : index
    %143 = vector.load %arg9[%c17_122, %c0_123] : memref<18x34xf32, #tpu.memory_space<vmem>>, vector<1x34xf32>
    tpu.vector_store %arg9[%c17_122, %c0_123], %142 {strides = array<i32>} : memref<18x34xf32, #tpu.memory_space<vmem>>, vector<1x34xf32>,
    %cst_124 = arith.constant 0.000000e+00 : f32
    %144 = vector.broadcast %cst_124 : f32 to vector<18x1xf32>
    %c0_125 = arith.constant 0 : index
    %c0_126 = arith.constant 0 : index
    %145 = vector.load %arg9[%c0_125, %c0_126] : memref<18x34xf32, #tpu.memory_space<vmem>>, vector<18x1xf32>
    tpu.vector_store %arg9[%c0_125, %c0_126], %144 {strides = array<i32>} : memref<18x34xf32, #tpu.memory_space<vmem>>, vector<18x1xf32>,
    %cst_127 = arith.constant 0.000000e+00 : f32
    %146 = vector.broadcast %cst_127 : f32 to vector<1x34xf32>
    %c0_128 = arith.constant 0 : index
    %c0_129 = arith.constant 0 : index
    %147 = vector.load %arg9[%c0_128, %c0_129] : memref<18x34xf32, #tpu.memory_space<vmem>>, vector<1x34xf32>
    tpu.vector_store %arg9[%c0_128, %c0_129], %146 {strides = array<i32>} : memref<18x34xf32, #tpu.memory_space<vmem>>, vector<1x34xf32>,
    %cst_130 = arith.constant 0.000000e+00 : f32
    %148 = vector.broadcast %cst_130 : f32 to vector<1x34xf32>
    %c17_131 = arith.constant 17 : index
    %c0_132 = arith.constant 0 : index
    %149 = vector.load %arg9[%c17_131, %c0_132] : memref<18x34xf32, #tpu.memory_space<vmem>>, vector<1x34xf32>
    tpu.vector_store %arg9[%c17_131, %c0_132], %148 {strides = array<i32>} : memref<18x34xf32, #tpu.memory_space<vmem>>, vector<1x34xf32>,
    %c0_133 = arith.constant 0 : index
    %c0_134 = arith.constant 0 : index
    %150 = vector.load %arg9[%c0_133, %c0_134] : memref<18x34xf32, #tpu.memory_space<vmem>>, vector<16x32xf32>
    %cst_135 = arith.constant 0.00416666688 : f32
    %151 = vector.broadcast %cst_135 : f32 to vector<16x32xf32>
    %152 = arith.mulf %150, %151 : vector<16x32xf32>
    %c0_136 = arith.constant 0 : index
    %c2_137 = arith.constant 2 : index
    %153 = vector.load %arg9[%c0_136, %c2_137] : memref<18x34xf32, #tpu.memory_space<vmem>>, vector<16x32xf32>
    %cst_138 = arith.constant -0.00416666688 : f32
    %154 = vector.broadcast %cst_138 : f32 to vector<16x32xf32>
    %155 = arith.mulf %153, %154 : vector<16x32xf32>
    %156 = arith.addf %152, %155 : vector<16x32xf32>
    %c1_139 = arith.constant 1 : index
    %c0_140 = arith.constant 0 : index
    %157 = vector.load %arg9[%c1_139, %c0_140] : memref<18x34xf32, #tpu.memory_space<vmem>>, vector<16x32xf32>
    %cst_141 = arith.constant 0.0166666675 : f32
    %158 = vector.broadcast %cst_141 : f32 to vector<16x32xf32>
    %159 = arith.mulf %157, %158 : vector<16x32xf32>
    %160 = arith.addf %156, %159 : vector<16x32xf32>
    %c1_142 = arith.constant 1 : index
    %c2_143 = arith.constant 2 : index
    %161 = vector.load %arg9[%c1_142, %c2_143] : memref<18x34xf32, #tpu.memory_space<vmem>>, vector<16x32xf32>
    %cst_144 = arith.constant -0.0166666675 : f32
    %162 = vector.broadcast %cst_144 : f32 to vector<16x32xf32>
    %163 = arith.mulf %161, %162 : vector<16x32xf32>
    %164 = arith.addf %160, %163 : vector<16x32xf32>
    %c2_145 = arith.constant 2 : index
    %c0_146 = arith.constant 0 : index
    %165 = vector.load %arg9[%c2_145, %c0_146] : memref<18x34xf32, #tpu.memory_space<vmem>>, vector<16x32xf32>
    %cst_147 = arith.constant 0.00416666688 : f32
    %166 = vector.broadcast %cst_147 : f32 to vector<16x32xf32>
    %167 = arith.mulf %165, %166 : vector<16x32xf32>
    %168 = arith.addf %164, %167 : vector<16x32xf32>
    %c2_148 = arith.constant 2 : index
    %c2_149 = arith.constant 2 : index
    %169 = vector.load %arg9[%c2_148, %c2_149] : memref<18x34xf32, #tpu.memory_space<vmem>>, vector<16x32xf32>
    %cst_150 = arith.constant -0.00416666688 : f32
    %170 = vector.broadcast %cst_150 : f32 to vector<16x32xf32>
    %171 = arith.mulf %169, %170 : vector<16x32xf32>
    %172 = arith.addf %168, %171 : vector<16x32xf32>
    %cst_151 = arith.constant -0.00416666688 : f32
    %173 = vector.broadcast %cst_151 : f32 to vector<16x32xf32>
    %174 = arith.mulf %150, %173 : vector<16x32xf32>
    %c0_152 = arith.constant 0 : index
    %c1_153 = arith.constant 1 : index
    %175 = vector.load %arg9[%c0_152, %c1_153] : memref<18x34xf32, #tpu.memory_space<vmem>>, vector<16x32xf32>
    %cst_154 = arith.constant -0.0166666675 : f32
    %176 = vector.broadcast %cst_154 : f32 to vector<16x32xf32>
    %177 = arith.mulf %175, %176 : vector<16x32xf32>
    %178 = arith.addf %174, %177 : vector<16x32xf32>
    %cst_155 = arith.constant -0.00416666688 : f32
    %179 = vector.broadcast %cst_155 : f32 to vector<16x32xf32>
    %180 = arith.mulf %153, %179 : vector<16x32xf32>
    %181 = arith.addf %178, %180 : vector<16x32xf32>
    %cst_156 = arith.constant 0.00416666688 : f32
    %182 = vector.broadcast %cst_156 : f32 to vector<16x32xf32>
    %183 = arith.mulf %165, %182 : vector<16x32xf32>
    %184 = arith.addf %181, %183 : vector<16x32xf32>
    %c2_157 = arith.constant 2 : index
    %c1_158 = arith.constant 1 : index
    %185 = vector.load %arg9[%c2_157, %c1_158] : memref<18x34xf32, #tpu.memory_space<vmem>>, vector<16x32xf32>
    %cst_159 = arith.constant 0.0166666675 : f32
    %186 = vector.broadcast %cst_159 : f32 to vector<16x32xf32>
    %187 = arith.mulf %185, %186 : vector<16x32xf32>
    %188 = arith.addf %184, %187 : vector<16x32xf32>
    %cst_160 = arith.constant 0.00416666688 : f32
    %189 = vector.broadcast %cst_160 : f32 to vector<16x32xf32>
    %190 = arith.mulf %169, %189 : vector<16x32xf32>
    %191 = arith.addf %188, %190 : vector<16x32xf32>
    %cst_161 = arith.constant 1.66666665E-4 : f32
    %192 = vector.broadcast %cst_161 : f32 to vector<16x32xf32>
    %193 = arith.mulf %150, %192 : vector<16x32xf32>
    %cst_162 = arith.constant 1.66666665E-4 : f32
    %194 = vector.broadcast %cst_162 : f32 to vector<16x32xf32>
    %195 = arith.mulf %175, %194 : vector<16x32xf32>
    %196 = arith.addf %193, %195 : vector<16x32xf32>
    %cst_163 = arith.constant 1.66666665E-4 : f32
    %197 = vector.broadcast %cst_163 : f32 to vector<16x32xf32>
    %198 = arith.mulf %153, %197 : vector<16x32xf32>
    %199 = arith.addf %196, %198 : vector<16x32xf32>
    %cst_164 = arith.constant 1.66666665E-4 : f32
    %200 = vector.broadcast %cst_164 : f32 to vector<16x32xf32>
    %201 = arith.mulf %157, %200 : vector<16x32xf32>
    %202 = arith.addf %199, %201 : vector<16x32xf32>
    %c1_165 = arith.constant 1 : index
    %c1_166 = arith.constant 1 : index
    %203 = vector.load %arg9[%c1_165, %c1_166] : memref<18x34xf32, #tpu.memory_space<vmem>>, vector<16x32xf32>
    %cst_167 = arith.constant -0.00133333332 : f32
    %204 = vector.broadcast %cst_167 : f32 to vector<16x32xf32>
    %205 = arith.mulf %203, %204 : vector<16x32xf32>
    %206 = arith.addf %202, %205 : vector<16x32xf32>
    %cst_168 = arith.constant 1.66666665E-4 : f32
    %207 = vector.broadcast %cst_168 : f32 to vector<16x32xf32>
    %208 = arith.mulf %161, %207 : vector<16x32xf32>
    %209 = arith.addf %206, %208 : vector<16x32xf32>
    %cst_169 = arith.constant 1.66666665E-4 : f32
    %210 = vector.broadcast %cst_169 : f32 to vector<16x32xf32>
    %211 = arith.mulf %165, %210 : vector<16x32xf32>
    %212 = arith.addf %209, %211 : vector<16x32xf32>
    %cst_170 = arith.constant 1.66666665E-4 : f32
    %213 = vector.broadcast %cst_170 : f32 to vector<16x32xf32>
    %214 = arith.mulf %185, %213 : vector<16x32xf32>
    %215 = arith.addf %212, %214 : vector<16x32xf32>
    %cst_171 = arith.constant 1.66666665E-4 : f32
    %216 = vector.broadcast %cst_171 : f32 to vector<16x32xf32>
    %217 = arith.mulf %169, %216 : vector<16x32xf32>
    %218 = arith.addf %215, %217 : vector<16x32xf32>
    %219 = arith.mulf %0, %88 : vector<16x32xf32>
    %220 = arith.subf %134, %219 : vector<16x32xf32>
    %221 = arith.mulf %1, %107 : vector<16x32xf32>
    %222 = arith.subf %220, %221 : vector<16x32xf32>
    %cst_172 = arith.constant 5.000000e-01 : f32
    %223 = vector.broadcast %cst_172 : f32 to vector<16x32xf32>
    %224 = arith.mulf %223, %222 : vector<16x32xf32>
    %225 = arith.addf %0, %224 : vector<16x32xf32>
    %226 = arith.subf %225, %35 : vector<16x32xf32>
    %227 = arith.mulf %226, %3 : vector<16x32xf32>
    %228 = arith.mulf %0, %172 : vector<16x32xf32>
    %229 = arith.subf %218, %228 : vector<16x32xf32>
    %230 = arith.mulf %1, %191 : vector<16x32xf32>
    %231 = arith.subf %229, %230 : vector<16x32xf32>
    %cst_173 = arith.constant 5.000000e-01 : f32
    %232 = vector.broadcast %cst_173 : f32 to vector<16x32xf32>
    %233 = arith.mulf %232, %231 : vector<16x32xf32>
    %234 = arith.addf %1, %233 : vector<16x32xf32>
    %235 = arith.subf %234, %54 : vector<16x32xf32>
    %236 = arith.mulf %235, %3 : vector<16x32xf32>
    %c1_174 = arith.constant 1 : index
    %c1_175 = arith.constant 1 : index
    %237 = vector.load %arg9[%c1_174, %c1_175] : memref<18x34xf32, #tpu.memory_space<vmem>>, vector<16x32xf32>
    tpu.vector_store %arg9[%c1_174, %c1_175], %227 {strides = array<i32>} : memref<18x34xf32, #tpu.memory_space<vmem>>, vector<16x32xf32>,
    %c1_176 = arith.constant 1 : index
    %c1_177 = arith.constant 1 : index
    %238 = vector.load %arg9[%c1_176, %c1_177] : memref<18x34xf32, #tpu.memory_space<vmem>>, vector<16x1xf32>
    %c1_178 = arith.constant 1 : index
    %c0_179 = arith.constant 0 : index
    %239 = vector.load %arg9[%c1_178, %c0_179] : memref<18x34xf32, #tpu.memory_space<vmem>>, vector<16x1xf32>
    tpu.vector_store %arg9[%c1_178, %c0_179], %238 {strides = array<i32>} : memref<18x34xf32, #tpu.memory_space<vmem>>, vector<16x1xf32>,
    %c1_180 = arith.constant 1 : index
    %c32_181 = arith.constant 32 : index
    %240 = vector.load %arg9[%c1_180, %c32_181] : memref<18x34xf32, #tpu.memory_space<vmem>>, vector<16x1xf32>
    %c1_182 = arith.constant 1 : index
    %c33_183 = arith.constant 33 : index
    %241 = vector.load %arg9[%c1_182, %c33_183] : memref<18x34xf32, #tpu.memory_space<vmem>>, vector<16x1xf32>
    tpu.vector_store %arg9[%c1_182, %c33_183], %240 {strides = array<i32>} : memref<18x34xf32, #tpu.memory_space<vmem>>, vector<16x1xf32>,
    %c1_184 = arith.constant 1 : index
    %c0_185 = arith.constant 0 : index
    %242 = vector.load %arg9[%c1_184, %c0_185] : memref<18x34xf32, #tpu.memory_space<vmem>>, vector<1x34xf32>
    %c0_186 = arith.constant 0 : index
    %c0_187 = arith.constant 0 : index
    %243 = vector.load %arg9[%c0_186, %c0_187] : memref<18x34xf32, #tpu.memory_space<vmem>>, vector<1x34xf32>
    tpu.vector_store %arg9[%c0_186, %c0_187], %242 {strides = array<i32>} : memref<18x34xf32, #tpu.memory_space<vmem>>, vector<1x34xf32>,
    %c16_188 = arith.constant 16 : index
    %c0_189 = arith.constant 0 : index
    %244 = vector.load %arg9[%c16_188, %c0_189] : memref<18x34xf32, #tpu.memory_space<vmem>>, vector<1x34xf32>
    %c17_190 = arith.constant 17 : index
    %c0_191 = arith.constant 0 : index
    %245 = vector.load %arg9[%c17_190, %c0_191] : memref<18x34xf32, #tpu.memory_space<vmem>>, vector<1x34xf32>
    tpu.vector_store %arg9[%c17_190, %c0_191], %244 {strides = array<i32>} : memref<18x34xf32, #tpu.memory_space<vmem>>, vector<1x34xf32>,
    %cst_192 = arith.constant 1.000000e+00 : f32
    %246 = vector.broadcast %cst_192 : f32 to vector<18x1xf32>
    %c0_193 = arith.constant 0 : index
    %c0_194 = arith.constant 0 : index
    %247 = vector.load %arg9[%c0_193, %c0_194] : memref<18x34xf32, #tpu.memory_space<vmem>>, vector<18x1xf32>
    tpu.vector_store %arg9[%c0_193, %c0_194], %246 {strides = array<i32>} : memref<18x34xf32, #tpu.memory_space<vmem>>, vector<18x1xf32>,
    %c0_195 = arith.constant 0 : index
    %c0_196 = arith.constant 0 : index
    %248 = vector.load %arg9[%c0_195, %c0_196] : memref<18x34xf32, #tpu.memory_space<vmem>>, vector<16x32xf32>
    %cst_197 = arith.constant 0.00416666688 : f32
    %249 = vector.broadcast %cst_197 : f32 to vector<16x32xf32>
    %250 = arith.mulf %248, %249 : vector<16x32xf32>
    %c0_198 = arith.constant 0 : index
    %c2_199 = arith.constant 2 : index
    %251 = vector.load %arg9[%c0_198, %c2_199] : memref<18x34xf32, #tpu.memory_space<vmem>>, vector<16x32xf32>
    %cst_200 = arith.constant -0.00416666688 : f32
    %252 = vector.broadcast %cst_200 : f32 to vector<16x32xf32>
    %253 = arith.mulf %251, %252 : vector<16x32xf32>
    %254 = arith.addf %250, %253 : vector<16x32xf32>
    %c1_201 = arith.constant 1 : index
    %c0_202 = arith.constant 0 : index
    %255 = vector.load %arg9[%c1_201, %c0_202] : memref<18x34xf32, #tpu.memory_space<vmem>>, vector<16x32xf32>
    %cst_203 = arith.constant 0.0166666675 : f32
    %256 = vector.broadcast %cst_203 : f32 to vector<16x32xf32>
    %257 = arith.mulf %255, %256 : vector<16x32xf32>
    %258 = arith.addf %254, %257 : vector<16x32xf32>
    %c1_204 = arith.constant 1 : index
    %c2_205 = arith.constant 2 : index
    %259 = vector.load %arg9[%c1_204, %c2_205] : memref<18x34xf32, #tpu.memory_space<vmem>>, vector<16x32xf32>
    %cst_206 = arith.constant -0.0166666675 : f32
    %260 = vector.broadcast %cst_206 : f32 to vector<16x32xf32>
    %261 = arith.mulf %259, %260 : vector<16x32xf32>
    %262 = arith.addf %258, %261 : vector<16x32xf32>
    %c2_207 = arith.constant 2 : index
    %c0_208 = arith.constant 0 : index
    %263 = vector.load %arg9[%c2_207, %c0_208] : memref<18x34xf32, #tpu.memory_space<vmem>>, vector<16x32xf32>
    %cst_209 = arith.constant 0.00416666688 : f32
    %264 = vector.broadcast %cst_209 : f32 to vector<16x32xf32>
    %265 = arith.mulf %263, %264 : vector<16x32xf32>
    %266 = arith.addf %262, %265 : vector<16x32xf32>
    %c2_210 = arith.constant 2 : index
    %c2_211 = arith.constant 2 : index
    %267 = vector.load %arg9[%c2_210, %c2_211] : memref<18x34xf32, #tpu.memory_space<vmem>>, vector<16x32xf32>
    %cst_212 = arith.constant -0.00416666688 : f32
    %268 = vector.broadcast %cst_212 : f32 to vector<16x32xf32>
    %269 = arith.mulf %267, %268 : vector<16x32xf32>
    %270 = arith.addf %266, %269 : vector<16x32xf32>
    %cst_213 = arith.constant -0.00416666688 : f32
    %271 = vector.broadcast %cst_213 : f32 to vector<16x32xf32>
    %272 = arith.mulf %248, %271 : vector<16x32xf32>
    %c0_214 = arith.constant 0 : index
    %c1_215 = arith.constant 1 : index
    %273 = vector.load %arg9[%c0_214, %c1_215] : memref<18x34xf32, #tpu.memory_space<vmem>>, vector<16x32xf32>
    %cst_216 = arith.constant -0.0166666675 : f32
    %274 = vector.broadcast %cst_216 : f32 to vector<16x32xf32>
    %275 = arith.mulf %273, %274 : vector<16x32xf32>
    %276 = arith.addf %272, %275 : vector<16x32xf32>
    %cst_217 = arith.constant -0.00416666688 : f32
    %277 = vector.broadcast %cst_217 : f32 to vector<16x32xf32>
    %278 = arith.mulf %251, %277 : vector<16x32xf32>
    %279 = arith.addf %276, %278 : vector<16x32xf32>
    %cst_218 = arith.constant 0.00416666688 : f32
    %280 = vector.broadcast %cst_218 : f32 to vector<16x32xf32>
    %281 = arith.mulf %263, %280 : vector<16x32xf32>
    %282 = arith.addf %279, %281 : vector<16x32xf32>
    %c2_219 = arith.constant 2 : index
    %c1_220 = arith.constant 1 : index
    %283 = vector.load %arg9[%c2_219, %c1_220] : memref<18x34xf32, #tpu.memory_space<vmem>>, vector<16x32xf32>
    %cst_221 = arith.constant 0.0166666675 : f32
    %284 = vector.broadcast %cst_221 : f32 to vector<16x32xf32>
    %285 = arith.mulf %283, %284 : vector<16x32xf32>
    %286 = arith.addf %282, %285 : vector<16x32xf32>
    %cst_222 = arith.constant 0.00416666688 : f32
    %287 = vector.broadcast %cst_222 : f32 to vector<16x32xf32>
    %288 = arith.mulf %267, %287 : vector<16x32xf32>
    %289 = arith.addf %286, %288 : vector<16x32xf32>
    %cst_223 = arith.constant 1.66666665E-4 : f32
    %290 = vector.broadcast %cst_223 : f32 to vector<16x32xf32>
    %291 = arith.mulf %248, %290 : vector<16x32xf32>
    %cst_224 = arith.constant 1.66666665E-4 : f32
    %292 = vector.broadcast %cst_224 : f32 to vector<16x32xf32>
    %293 = arith.mulf %273, %292 : vector<16x32xf32>
    %294 = arith.addf %291, %293 : vector<16x32xf32>
    %cst_225 = arith.constant 1.66666665E-4 : f32
    %295 = vector.broadcast %cst_225 : f32 to vector<16x32xf32>
    %296 = arith.mulf %251, %295 : vector<16x32xf32>
    %297 = arith.addf %294, %296 : vector<16x32xf32>
    %cst_226 = arith.constant 1.66666665E-4 : f32
    %298 = vector.broadcast %cst_226 : f32 to vector<16x32xf32>
    %299 = arith.mulf %255, %298 : vector<16x32xf32>
    %300 = arith.addf %297, %299 : vector<16x32xf32>
    %c1_227 = arith.constant 1 : index
    %c1_228 = arith.constant 1 : index
    %301 = vector.load %arg9[%c1_227, %c1_228] : memref<18x34xf32, #tpu.memory_space<vmem>>, vector<16x32xf32>
    %cst_229 = arith.constant -0.00133333332 : f32
    %302 = vector.broadcast %cst_229 : f32 to vector<16x32xf32>
    %303 = arith.mulf %301, %302 : vector<16x32xf32>
    %304 = arith.addf %300, %303 : vector<16x32xf32>
    %cst_230 = arith.constant 1.66666665E-4 : f32
    %305 = vector.broadcast %cst_230 : f32 to vector<16x32xf32>
    %306 = arith.mulf %259, %305 : vector<16x32xf32>
    %307 = arith.addf %304, %306 : vector<16x32xf32>
    %cst_231 = arith.constant 1.66666665E-4 : f32
    %308 = vector.broadcast %cst_231 : f32 to vector<16x32xf32>
    %309 = arith.mulf %263, %308 : vector<16x32xf32>
    %310 = arith.addf %307, %309 : vector<16x32xf32>
    %cst_232 = arith.constant 1.66666665E-4 : f32
    %311 = vector.broadcast %cst_232 : f32 to vector<16x32xf32>
    %312 = arith.mulf %283, %311 : vector<16x32xf32>
    %313 = arith.addf %310, %312 : vector<16x32xf32>
    %cst_233 = arith.constant 1.66666665E-4 : f32
    %314 = vector.broadcast %cst_233 : f32 to vector<16x32xf32>
    %315 = arith.mulf %267, %314 : vector<16x32xf32>
    %316 = arith.addf %313, %315 : vector<16x32xf32>
    %c1_234 = arith.constant 1 : index
    %c1_235 = arith.constant 1 : index
    %317 = vector.load %arg9[%c1_234, %c1_235] : memref<18x34xf32, #tpu.memory_space<vmem>>, vector<16x32xf32>
    tpu.vector_store %arg9[%c1_234, %c1_235], %236 {strides = array<i32>} : memref<18x34xf32, #tpu.memory_space<vmem>>, vector<16x32xf32>,
    %c1_236 = arith.constant 1 : index
    %c1_237 = arith.constant 1 : index
    %318 = vector.load %arg9[%c1_236, %c1_237] : memref<18x34xf32, #tpu.memory_space<vmem>>, vector<16x1xf32>
    %c1_238 = arith.constant 1 : index
    %c0_239 = arith.constant 0 : index
    %319 = vector.load %arg9[%c1_238, %c0_239] : memref<18x34xf32, #tpu.memory_space<vmem>>, vector<16x1xf32>
    tpu.vector_store %arg9[%c1_238, %c0_239], %318 {strides = array<i32>} : memref<18x34xf32, #tpu.memory_space<vmem>>, vector<16x1xf32>,
    %c1_240 = arith.constant 1 : index
    %c32_241 = arith.constant 32 : index
    %320 = vector.load %arg9[%c1_240, %c32_241] : memref<18x34xf32, #tpu.memory_space<vmem>>, vector<16x1xf32>
    %c1_242 = arith.constant 1 : index
    %c33_243 = arith.constant 33 : index
    %321 = vector.load %arg9[%c1_242, %c33_243] : memref<18x34xf32, #tpu.memory_space<vmem>>, vector<16x1xf32>
    tpu.vector_store %arg9[%c1_242, %c33_243], %320 {strides = array<i32>} : memref<18x34xf32, #tpu.memory_space<vmem>>, vector<16x1xf32>,
    %c1_244 = arith.constant 1 : index
    %c0_245 = arith.constant 0 : index
    %322 = vector.load %arg9[%c1_244, %c0_245] : memref<18x34xf32, #tpu.memory_space<vmem>>, vector<1x34xf32>
    %c0_246 = arith.constant 0 : index
    %c0_247 = arith.constant 0 : index
    %323 = vector.load %arg9[%c0_246, %c0_247] : memref<18x34xf32, #tpu.memory_space<vmem>>, vector<1x34xf32>
    tpu.vector_store %arg9[%c0_246, %c0_247], %322 {strides = array<i32>} : memref<18x34xf32, #tpu.memory_space<vmem>>, vector<1x34xf32>,
    %c16_248 = arith.constant 16 : index
    %c0_249 = arith.constant 0 : index
    %324 = vector.load %arg9[%c16_248, %c0_249] : memref<18x34xf32, #tpu.memory_space<vmem>>, vector<1x34xf32>
    %c17_250 = arith.constant 17 : index
    %c0_251 = arith.constant 0 : index
    %325 = vector.load %arg9[%c17_250, %c0_251] : memref<18x34xf32, #tpu.memory_space<vmem>>, vector<1x34xf32>
    tpu.vector_store %arg9[%c17_250, %c0_251], %324 {strides = array<i32>} : memref<18x34xf32, #tpu.memory_space<vmem>>, vector<1x34xf32>,
    %cst_252 = arith.constant 0.000000e+00 : f32
    %326 = vector.broadcast %cst_252 : f32 to vector<18x1xf32>
    %c0_253 = arith.constant 0 : index
    %c0_254 = arith.constant 0 : index
    %327 = vector.load %arg9[%c0_253, %c0_254] : memref<18x34xf32, #tpu.memory_space<vmem>>, vector<18x1xf32>
    tpu.vector_store %arg9[%c0_253, %c0_254], %326 {strides = array<i32>} : memref<18x34xf32, #tpu.memory_space<vmem>>, vector<18x1xf32>,
    %cst_255 = arith.constant 0.000000e+00 : f32
    %328 = vector.broadcast %cst_255 : f32 to vector<1x34xf32>
    %c0_256 = arith.constant 0 : index
    %c0_257 = arith.constant 0 : index
    %329 = vector.load %arg9[%c0_256, %c0_257] : memref<18x34xf32, #tpu.memory_space<vmem>>, vector<1x34xf32>
    tpu.vector_store %arg9[%c0_256, %c0_257], %328 {strides = array<i32>} : memref<18x34xf32, #tpu.memory_space<vmem>>, vector<1x34xf32>,
    %cst_258 = arith.constant 0.000000e+00 : f32
    %330 = vector.broadcast %cst_258 : f32 to vector<1x34xf32>
    %c17_259 = arith.constant 17 : index
    %c0_260 = arith.constant 0 : index
    %331 = vector.load %arg9[%c17_259, %c0_260] : memref<18x34xf32, #tpu.memory_space<vmem>>, vector<1x34xf32>
    tpu.vector_store %arg9[%c17_259, %c0_260], %330 {strides = array<i32>} : memref<18x34xf32, #tpu.memory_space<vmem>>, vector<1x34xf32>,
    %c0_261 = arith.constant 0 : index
    %c0_262 = arith.constant 0 : index
    %332 = vector.load %arg9[%c0_261, %c0_262] : memref<18x34xf32, #tpu.memory_space<vmem>>, vector<16x32xf32>
    %cst_263 = arith.constant 0.00416666688 : f32
    %333 = vector.broadcast %cst_263 : f32 to vector<16x32xf32>
    %334 = arith.mulf %332, %333 : vector<16x32xf32>
    %c0_264 = arith.constant 0 : index
    %c2_265 = arith.constant 2 : index
    %335 = vector.load %arg9[%c0_264, %c2_265] : memref<18x34xf32, #tpu.memory_space<vmem>>, vector<16x32xf32>
    %cst_266 = arith.constant -0.00416666688 : f32
    %336 = vector.broadcast %cst_266 : f32 to vector<16x32xf32>
    %337 = arith.mulf %335, %336 : vector<16x32xf32>
    %338 = arith.addf %334, %337 : vector<16x32xf32>
    %c1_267 = arith.constant 1 : index
    %c0_268 = arith.constant 0 : index
    %339 = vector.load %arg9[%c1_267, %c0_268] : memref<18x34xf32, #tpu.memory_space<vmem>>, vector<16x32xf32>
    %cst_269 = arith.constant 0.0166666675 : f32
    %340 = vector.broadcast %cst_269 : f32 to vector<16x32xf32>
    %341 = arith.mulf %339, %340 : vector<16x32xf32>
    %342 = arith.addf %338, %341 : vector<16x32xf32>
    %c1_270 = arith.constant 1 : index
    %c2_271 = arith.constant 2 : index
    %343 = vector.load %arg9[%c1_270, %c2_271] : memref<18x34xf32, #tpu.memory_space<vmem>>, vector<16x32xf32>
    %cst_272 = arith.constant -0.0166666675 : f32
    %344 = vector.broadcast %cst_272 : f32 to vector<16x32xf32>
    %345 = arith.mulf %343, %344 : vector<16x32xf32>
    %346 = arith.addf %342, %345 : vector<16x32xf32>
    %c2_273 = arith.constant 2 : index
    %c0_274 = arith.constant 0 : index
    %347 = vector.load %arg9[%c2_273, %c0_274] : memref<18x34xf32, #tpu.memory_space<vmem>>, vector<16x32xf32>
    %cst_275 = arith.constant 0.00416666688 : f32
    %348 = vector.broadcast %cst_275 : f32 to vector<16x32xf32>
    %349 = arith.mulf %347, %348 : vector<16x32xf32>
    %350 = arith.addf %346, %349 : vector<16x32xf32>
    %c2_276 = arith.constant 2 : index
    %c2_277 = arith.constant 2 : index
    %351 = vector.load %arg9[%c2_276, %c2_277] : memref<18x34xf32, #tpu.memory_space<vmem>>, vector<16x32xf32>
    %cst_278 = arith.constant -0.00416666688 : f32
    %352 = vector.broadcast %cst_278 : f32 to vector<16x32xf32>
    %353 = arith.mulf %351, %352 : vector<16x32xf32>
    %354 = arith.addf %350, %353 : vector<16x32xf32>
    %cst_279 = arith.constant -0.00416666688 : f32
    %355 = vector.broadcast %cst_279 : f32 to vector<16x32xf32>
    %356 = arith.mulf %332, %355 : vector<16x32xf32>
    %c0_280 = arith.constant 0 : index
    %c1_281 = arith.constant 1 : index
    %357 = vector.load %arg9[%c0_280, %c1_281] : memref<18x34xf32, #tpu.memory_space<vmem>>, vector<16x32xf32>
    %cst_282 = arith.constant -0.0166666675 : f32
    %358 = vector.broadcast %cst_282 : f32 to vector<16x32xf32>
    %359 = arith.mulf %357, %358 : vector<16x32xf32>
    %360 = arith.addf %356, %359 : vector<16x32xf32>
    %cst_283 = arith.constant -0.00416666688 : f32
    %361 = vector.broadcast %cst_283 : f32 to vector<16x32xf32>
    %362 = arith.mulf %335, %361 : vector<16x32xf32>
    %363 = arith.addf %360, %362 : vector<16x32xf32>
    %cst_284 = arith.constant 0.00416666688 : f32
    %364 = vector.broadcast %cst_284 : f32 to vector<16x32xf32>
    %365 = arith.mulf %347, %364 : vector<16x32xf32>
    %366 = arith.addf %363, %365 : vector<16x32xf32>
    %c2_285 = arith.constant 2 : index
    %c1_286 = arith.constant 1 : index
    %367 = vector.load %arg9[%c2_285, %c1_286] : memref<18x34xf32, #tpu.memory_space<vmem>>, vector<16x32xf32>
    %cst_287 = arith.constant 0.0166666675 : f32
    %368 = vector.broadcast %cst_287 : f32 to vector<16x32xf32>
    %369 = arith.mulf %367, %368 : vector<16x32xf32>
    %370 = arith.addf %366, %369 : vector<16x32xf32>
    %cst_288 = arith.constant 0.00416666688 : f32
    %371 = vector.broadcast %cst_288 : f32 to vector<16x32xf32>
    %372 = arith.mulf %351, %371 : vector<16x32xf32>
    %373 = arith.addf %370, %372 : vector<16x32xf32>
    %cst_289 = arith.constant 1.66666665E-4 : f32
    %374 = vector.broadcast %cst_289 : f32 to vector<16x32xf32>
    %375 = arith.mulf %332, %374 : vector<16x32xf32>
    %cst_290 = arith.constant 1.66666665E-4 : f32
    %376 = vector.broadcast %cst_290 : f32 to vector<16x32xf32>
    %377 = arith.mulf %357, %376 : vector<16x32xf32>
    %378 = arith.addf %375, %377 : vector<16x32xf32>
    %cst_291 = arith.constant 1.66666665E-4 : f32
    %379 = vector.broadcast %cst_291 : f32 to vector<16x32xf32>
    %380 = arith.mulf %335, %379 : vector<16x32xf32>
    %381 = arith.addf %378, %380 : vector<16x32xf32>
    %cst_292 = arith.constant 1.66666665E-4 : f32
    %382 = vector.broadcast %cst_292 : f32 to vector<16x32xf32>
    %383 = arith.mulf %339, %382 : vector<16x32xf32>
    %384 = arith.addf %381, %383 : vector<16x32xf32>
    %c1_293 = arith.constant 1 : index
    %c1_294 = arith.constant 1 : index
    %385 = vector.load %arg9[%c1_293, %c1_294] : memref<18x34xf32, #tpu.memory_space<vmem>>, vector<16x32xf32>
    %cst_295 = arith.constant -0.00133333332 : f32
    %386 = vector.broadcast %cst_295 : f32 to vector<16x32xf32>
    %387 = arith.mulf %385, %386 : vector<16x32xf32>
    %388 = arith.addf %384, %387 : vector<16x32xf32>
    %cst_296 = arith.constant 1.66666665E-4 : f32
    %389 = vector.broadcast %cst_296 : f32 to vector<16x32xf32>
    %390 = arith.mulf %343, %389 : vector<16x32xf32>
    %391 = arith.addf %388, %390 : vector<16x32xf32>
    %cst_297 = arith.constant 1.66666665E-4 : f32
    %392 = vector.broadcast %cst_297 : f32 to vector<16x32xf32>
    %393 = arith.mulf %347, %392 : vector<16x32xf32>
    %394 = arith.addf %391, %393 : vector<16x32xf32>
    %cst_298 = arith.constant 1.66666665E-4 : f32
    %395 = vector.broadcast %cst_298 : f32 to vector<16x32xf32>
    %396 = arith.mulf %367, %395 : vector<16x32xf32>
    %397 = arith.addf %394, %396 : vector<16x32xf32>
    %cst_299 = arith.constant 1.66666665E-4 : f32
    %398 = vector.broadcast %cst_299 : f32 to vector<16x32xf32>
    %399 = arith.mulf %351, %398 : vector<16x32xf32>
    %400 = arith.addf %397, %399 : vector<16x32xf32>
    %401 = arith.addf %0, %316 : vector<16x32xf32>
    %402 = arith.mulf %227, %270 : vector<16x32xf32>
    %403 = arith.subf %401, %402 : vector<16x32xf32>
    %404 = arith.mulf %236, %289 : vector<16x32xf32>
    %405 = arith.subf %403, %404 : vector<16x32xf32>
    %406 = arith.subf %405, %35 : vector<16x32xf32>
    %407 = arith.mulf %406, %3 : vector<16x32xf32>
    %408 = arith.addf %1, %400 : vector<16x32xf32>
    %409 = arith.mulf %227, %354 : vector<16x32xf32>
    %410 = arith.subf %408, %409 : vector<16x32xf32>
    %411 = arith.mulf %236, %373 : vector<16x32xf32>
    %412 = arith.subf %410, %411 : vector<16x32xf32>
    %413 = arith.subf %412, %54 : vector<16x32xf32>
    %414 = arith.mulf %413, %3 : vector<16x32xf32>
    %c1_300 = arith.constant 1 : index
    %c1_301 = arith.constant 1 : index
    %415 = vector.load %arg9[%c1_300, %c1_301] : memref<18x34xf32, #tpu.memory_space<vmem>>, vector<16x32xf32>
    tpu.vector_store %arg9[%c1_300, %c1_301], %407 {strides = array<i32>} : memref<18x34xf32, #tpu.memory_space<vmem>>, vector<16x32xf32>,
    %c1_302 = arith.constant 1 : index
    %c1_303 = arith.constant 1 : index
    %416 = vector.load %arg9[%c1_302, %c1_303] : memref<18x34xf32, #tpu.memory_space<vmem>>, vector<16x1xf32>
    %c1_304 = arith.constant 1 : index
    %c0_305 = arith.constant 0 : index
    %417 = vector.load %arg9[%c1_304, %c0_305] : memref<18x34xf32, #tpu.memory_space<vmem>>, vector<16x1xf32>
    tpu.vector_store %arg9[%c1_304, %c0_305], %416 {strides = array<i32>} : memref<18x34xf32, #tpu.memory_space<vmem>>, vector<16x1xf32>,
    %c1_306 = arith.constant 1 : index
    %c32_307 = arith.constant 32 : index
    %418 = vector.load %arg9[%c1_306, %c32_307] : memref<18x34xf32, #tpu.memory_space<vmem>>, vector<16x1xf32>
    %c1_308 = arith.constant 1 : index
    %c33_309 = arith.constant 33 : index
    %419 = vector.load %arg9[%c1_308, %c33_309] : memref<18x34xf32, #tpu.memory_space<vmem>>, vector<16x1xf32>
    tpu.vector_store %arg9[%c1_308, %c33_309], %418 {strides = array<i32>} : memref<18x34xf32, #tpu.memory_space<vmem>>, vector<16x1xf32>,
    %c1_310 = arith.constant 1 : index
    %c0_311 = arith.constant 0 : index
    %420 = vector.load %arg9[%c1_310, %c0_311] : memref<18x34xf32, #tpu.memory_space<vmem>>, vector<1x34xf32>
    %c0_312 = arith.constant 0 : index
    %c0_313 = arith.constant 0 : index
    %421 = vector.load %arg9[%c0_312, %c0_313] : memref<18x34xf32, #tpu.memory_space<vmem>>, vector<1x34xf32>
    tpu.vector_store %arg9[%c0_312, %c0_313], %420 {strides = array<i32>} : memref<18x34xf32, #tpu.memory_space<vmem>>, vector<1x34xf32>,
    %c16_314 = arith.constant 16 : index
    %c0_315 = arith.constant 0 : index
    %422 = vector.load %arg9[%c16_314, %c0_315] : memref<18x34xf32, #tpu.memory_space<vmem>>, vector<1x34xf32>
    %c17_316 = arith.constant 17 : index
    %c0_317 = arith.constant 0 : index
    %423 = vector.load %arg9[%c17_316, %c0_317] : memref<18x34xf32, #tpu.memory_space<vmem>>, vector<1x34xf32>
    tpu.vector_store %arg9[%c17_316, %c0_317], %422 {strides = array<i32>} : memref<18x34xf32, #tpu.memory_space<vmem>>, vector<1x34xf32>,
    %cst_318 = arith.constant 1.000000e+00 : f32
    %424 = vector.broadcast %cst_318 : f32 to vector<18x1xf32>
    %c0_319 = arith.constant 0 : index
    %c0_320 = arith.constant 0 : index
    %425 = vector.load %arg9[%c0_319, %c0_320] : memref<18x34xf32, #tpu.memory_space<vmem>>, vector<18x1xf32>
    tpu.vector_store %arg9[%c0_319, %c0_320], %424 {strides = array<i32>} : memref<18x34xf32, #tpu.memory_space<vmem>>, vector<18x1xf32>,
    %c0_321 = arith.constant 0 : index
    %c0_322 = arith.constant 0 : index
    %426 = vector.load %arg9[%c0_321, %c0_322] : memref<18x34xf32, #tpu.memory_space<vmem>>, vector<16x32xf32>
    %cst_323 = arith.constant -1.66666663 : f32
    %427 = vector.broadcast %cst_323 : f32 to vector<16x32xf32>
    %428 = arith.mulf %426, %427 : vector<16x32xf32>
    %c0_324 = arith.constant 0 : index
    %c2_325 = arith.constant 2 : index
    %429 = vector.load %arg9[%c0_324, %c2_325] : memref<18x34xf32, #tpu.memory_space<vmem>>, vector<16x32xf32>
    %cst_326 = arith.constant 1.66666663 : f32
    %430 = vector.broadcast %cst_326 : f32 to vector<16x32xf32>
    %431 = arith.mulf %429, %430 : vector<16x32xf32>
    %432 = arith.addf %428, %431 : vector<16x32xf32>
    %c1_327 = arith.constant 1 : index
    %c0_328 = arith.constant 0 : index
    %433 = vector.load %arg9[%c1_327, %c0_328] : memref<18x34xf32, #tpu.memory_space<vmem>>, vector<16x32xf32>
    %cst_329 = arith.constant -6.66666651 : f32
    %434 = vector.broadcast %cst_329 : f32 to vector<16x32xf32>
    %435 = arith.mulf %433, %434 : vector<16x32xf32>
    %436 = arith.addf %432, %435 : vector<16x32xf32>
    %c1_330 = arith.constant 1 : index
    %c2_331 = arith.constant 2 : index
    %437 = vector.load %arg9[%c1_330, %c2_331] : memref<18x34xf32, #tpu.memory_space<vmem>>, vector<16x32xf32>
    %cst_332 = arith.constant 6.66666651 : f32
    %438 = vector.broadcast %cst_332 : f32 to vector<16x32xf32>
    %439 = arith.mulf %437, %438 : vector<16x32xf32>
    %440 = arith.addf %436, %439 : vector<16x32xf32>
    %c2_333 = arith.constant 2 : index
    %c0_334 = arith.constant 0 : index
    %441 = vector.load %arg9[%c2_333, %c0_334] : memref<18x34xf32, #tpu.memory_space<vmem>>, vector<16x32xf32>
    %cst_335 = arith.constant -1.66666663 : f32
    %442 = vector.broadcast %cst_335 : f32 to vector<16x32xf32>
    %443 = arith.mulf %441, %442 : vector<16x32xf32>
    %444 = arith.addf %440, %443 : vector<16x32xf32>
    %c2_336 = arith.constant 2 : index
    %c2_337 = arith.constant 2 : index
    %445 = vector.load %arg9[%c2_336, %c2_337] : memref<18x34xf32, #tpu.memory_space<vmem>>, vector<16x32xf32>
    %cst_338 = arith.constant 1.66666663 : f32
    %446 = vector.broadcast %cst_338 : f32 to vector<16x32xf32>
    %447 = arith.mulf %445, %446 : vector<16x32xf32>
    %448 = arith.addf %444, %447 : vector<16x32xf32>
    %c1_339 = arith.constant 1 : index
    %c1_340 = arith.constant 1 : index
    %449 = vector.load %arg9[%c1_339, %c1_340] : memref<18x34xf32, #tpu.memory_space<vmem>>, vector<16x32xf32>
    tpu.vector_store %arg9[%c1_339, %c1_340], %414 {strides = array<i32>} : memref<18x34xf32, #tpu.memory_space<vmem>>, vector<16x32xf32>,
    %c1_341 = arith.constant 1 : index
    %c1_342 = arith.constant 1 : index
    %450 = vector.load %arg9[%c1_341, %c1_342] : memref<18x34xf32, #tpu.memory_space<vmem>>, vector<16x1xf32>
    %c1_343 = arith.constant 1 : index
    %c0_344 = arith.constant 0 : index
    %451 = vector.load %arg9[%c1_343, %c0_344] : memref<18x34xf32, #tpu.memory_space<vmem>>, vector<16x1xf32>
    tpu.vector_store %arg9[%c1_343, %c0_344], %450 {strides = array<i32>} : memref<18x34xf32, #tpu.memory_space<vmem>>, vector<16x1xf32>,
    %c1_345 = arith.constant 1 : index
    %c32_346 = arith.constant 32 : index
    %452 = vector.load %arg9[%c1_345, %c32_346] : memref<18x34xf32, #tpu.memory_space<vmem>>, vector<16x1xf32>
    %c1_347 = arith.constant 1 : index
    %c33_348 = arith.constant 33 : index
    %453 = vector.load %arg9[%c1_347, %c33_348] : memref<18x34xf32, #tpu.memory_space<vmem>>, vector<16x1xf32>
    tpu.vector_store %arg9[%c1_347, %c33_348], %452 {strides = array<i32>} : memref<18x34xf32, #tpu.memory_space<vmem>>, vector<16x1xf32>,
    %c1_349 = arith.constant 1 : index
    %c0_350 = arith.constant 0 : index
    %454 = vector.load %arg9[%c1_349, %c0_350] : memref<18x34xf32, #tpu.memory_space<vmem>>, vector<1x34xf32>
    %c0_351 = arith.constant 0 : index
    %c0_352 = arith.constant 0 : index
    %455 = vector.load %arg9[%c0_351, %c0_352] : memref<18x34xf32, #tpu.memory_space<vmem>>, vector<1x34xf32>
    tpu.vector_store %arg9[%c0_351, %c0_352], %454 {strides = array<i32>} : memref<18x34xf32, #tpu.memory_space<vmem>>, vector<1x34xf32>,
    %c16_353 = arith.constant 16 : index
    %c0_354 = arith.constant 0 : index
    %456 = vector.load %arg9[%c16_353, %c0_354] : memref<18x34xf32, #tpu.memory_space<vmem>>, vector<1x34xf32>
    %c17_355 = arith.constant 17 : index
    %c0_356 = arith.constant 0 : index
    %457 = vector.load %arg9[%c17_355, %c0_356] : memref<18x34xf32, #tpu.memory_space<vmem>>, vector<1x34xf32>
    tpu.vector_store %arg9[%c17_355, %c0_356], %456 {strides = array<i32>} : memref<18x34xf32, #tpu.memory_space<vmem>>, vector<1x34xf32>,
    %cst_357 = arith.constant 0.000000e+00 : f32
    %458 = vector.broadcast %cst_357 : f32 to vector<18x1xf32>
    %c0_358 = arith.constant 0 : index
    %c0_359 = arith.constant 0 : index
    %459 = vector.load %arg9[%c0_358, %c0_359] : memref<18x34xf32, #tpu.memory_space<vmem>>, vector<18x1xf32>
    tpu.vector_store %arg9[%c0_358, %c0_359], %458 {strides = array<i32>} : memref<18x34xf32, #tpu.memory_space<vmem>>, vector<18x1xf32>,
    %cst_360 = arith.constant 0.000000e+00 : f32
    %460 = vector.broadcast %cst_360 : f32 to vector<1x34xf32>
    %c0_361 = arith.constant 0 : index
    %c0_362 = arith.constant 0 : index
    %461 = vector.load %arg9[%c0_361, %c0_362] : memref<18x34xf32, #tpu.memory_space<vmem>>, vector<1x34xf32>
    tpu.vector_store %arg9[%c0_361, %c0_362], %460 {strides = array<i32>} : memref<18x34xf32, #tpu.memory_space<vmem>>, vector<1x34xf32>,
    %cst_363 = arith.constant 0.000000e+00 : f32
    %462 = vector.broadcast %cst_363 : f32 to vector<1x34xf32>
    %c17_364 = arith.constant 17 : index
    %c0_365 = arith.constant 0 : index
    %463 = vector.load %arg9[%c17_364, %c0_365] : memref<18x34xf32, #tpu.memory_space<vmem>>, vector<1x34xf32>
    tpu.vector_store %arg9[%c17_364, %c0_365], %462 {strides = array<i32>} : memref<18x34xf32, #tpu.memory_space<vmem>>, vector<1x34xf32>,
    %c0_366 = arith.constant 0 : index
    %c0_367 = arith.constant 0 : index
    %464 = vector.load %arg9[%c0_366, %c0_367] : memref<18x34xf32, #tpu.memory_space<vmem>>, vector<16x32xf32>
    %cst_368 = arith.constant 1.66666663 : f32
    %465 = vector.broadcast %cst_368 : f32 to vector<16x32xf32>
    %466 = arith.mulf %464, %465 : vector<16x32xf32>
    %c0_369 = arith.constant 0 : index
    %c1_370 = arith.constant 1 : index
    %467 = vector.load %arg9[%c0_369, %c1_370] : memref<18x34xf32, #tpu.memory_space<vmem>>, vector<16x32xf32>
    %cst_371 = arith.constant 6.66666651 : f32
    %468 = vector.broadcast %cst_371 : f32 to vector<16x32xf32>
    %469 = arith.mulf %467, %468 : vector<16x32xf32>
    %470 = arith.addf %466, %469 : vector<16x32xf32>
    %c0_372 = arith.constant 0 : index
    %c2_373 = arith.constant 2 : index
    %471 = vector.load %arg9[%c0_372, %c2_373] : memref<18x34xf32, #tpu.memory_space<vmem>>, vector<16x32xf32>
    %cst_374 = arith.constant 1.66666663 : f32
    %472 = vector.broadcast %cst_374 : f32 to vector<16x32xf32>
    %473 = arith.mulf %471, %472 : vector<16x32xf32>
    %474 = arith.addf %470, %473 : vector<16x32xf32>
    %c2_375 = arith.constant 2 : index
    %c0_376 = arith.constant 0 : index
    %475 = vector.load %arg9[%c2_375, %c0_376] : memref<18x34xf32, #tpu.memory_space<vmem>>, vector<16x32xf32>
    %cst_377 = arith.constant -1.66666663 : f32
    %476 = vector.broadcast %cst_377 : f32 to vector<16x32xf32>
    %477 = arith.mulf %475, %476 : vector<16x32xf32>
    %478 = arith.addf %474, %477 : vector<16x32xf32>
    %c2_378 = arith.constant 2 : index
    %c1_379 = arith.constant 1 : index
    %479 = vector.load %arg9[%c2_378, %c1_379] : memref<18x34xf32, #tpu.memory_space<vmem>>, vector<16x32xf32>
    %cst_380 = arith.constant -6.66666651 : f32
    %480 = vector.broadcast %cst_380 : f32 to vector<16x32xf32>
    %481 = arith.mulf %479, %480 : vector<16x32xf32>
    %482 = arith.addf %478, %481 : vector<16x32xf32>
    %c2_381 = arith.constant 2 : index
    %c2_382 = arith.constant 2 : index
    %483 = vector.load %arg9[%c2_381, %c2_382] : memref<18x34xf32, #tpu.memory_space<vmem>>, vector<16x32xf32>
    %cst_383 = arith.constant -1.66666663 : f32
    %484 = vector.broadcast %cst_383 : f32 to vector<16x32xf32>
    %485 = arith.mulf %483, %484 : vector<16x32xf32>
    %486 = arith.addf %482, %485 : vector<16x32xf32>
    %487 = arith.addf %448, %486 : vector<16x32xf32>
    %c1_384 = arith.constant 1 : index
    %c1_385 = arith.constant 1 : index
    %488 = vector.load %arg9[%c1_384, %c1_385] : memref<18x34xf32, #tpu.memory_space<vmem>>, vector<16x32xf32>
    tpu.vector_store %arg9[%c1_384, %c1_385], %2 {strides = array<i32>} : memref<18x34xf32, #tpu.memory_space<vmem>>, vector<16x32xf32>,
    %c1_386 = arith.constant 1 : index
    %c1_387 = arith.constant 1 : index
    %489 = vector.load %arg9[%c1_386, %c1_387] : memref<18x34xf32, #tpu.memory_space<vmem>>, vector<16x1xf32>
    %c1_388 = arith.constant 1 : index
    %c0_389 = arith.constant 0 : index
    %490 = vector.load %arg9[%c1_388, %c0_389] : memref<18x34xf32, #tpu.memory_space<vmem>>, vector<16x1xf32>
    tpu.vector_store %arg9[%c1_388, %c0_389], %489 {strides = array<i32>} : memref<18x34xf32, #tpu.memory_space<vmem>>, vector<16x1xf32>,
    %c1_390 = arith.constant 1 : index
    %c32_391 = arith.constant 32 : index
    %491 = vector.load %arg9[%c1_390, %c32_391] : memref<18x34xf32, #tpu.memory_space<vmem>>, vector<16x1xf32>
    %c1_392 = arith.constant 1 : index
    %c33_393 = arith.constant 33 : index
    %492 = vector.load %arg9[%c1_392, %c33_393] : memref<18x34xf32, #tpu.memory_space<vmem>>, vector<16x1xf32>
    tpu.vector_store %arg9[%c1_392, %c33_393], %491 {strides = array<i32>} : memref<18x34xf32, #tpu.memory_space<vmem>>, vector<16x1xf32>,
    %c1_394 = arith.constant 1 : index
    %c0_395 = arith.constant 0 : index
    %493 = vector.load %arg9[%c1_394, %c0_395] : memref<18x34xf32, #tpu.memory_space<vmem>>, vector<1x34xf32>
    %c0_396 = arith.constant 0 : index
    %c0_397 = arith.constant 0 : index
    %494 = vector.load %arg9[%c0_396, %c0_397] : memref<18x34xf32, #tpu.memory_space<vmem>>, vector<1x34xf32>
    tpu.vector_store %arg9[%c0_396, %c0_397], %493 {strides = array<i32>} : memref<18x34xf32, #tpu.memory_space<vmem>>, vector<1x34xf32>,
    %c16_398 = arith.constant 16 : index
    %c0_399 = arith.constant 0 : index
    %495 = vector.load %arg9[%c16_398, %c0_399] : memref<18x34xf32, #tpu.memory_space<vmem>>, vector<1x34xf32>
    %c17_400 = arith.constant 17 : index
    %c0_401 = arith.constant 0 : index
    %496 = vector.load %arg9[%c17_400, %c0_401] : memref<18x34xf32, #tpu.memory_space<vmem>>, vector<1x34xf32>
    tpu.vector_store %arg9[%c17_400, %c0_401], %495 {strides = array<i32>} : memref<18x34xf32, #tpu.memory_space<vmem>>, vector<1x34xf32>,
    %c0_402 = arith.constant 0 : index
    %c0_403 = arith.constant 0 : index
    %497 = vector.load %arg9[%c0_402, %c0_403] : memref<18x34xf32, #tpu.memory_space<vmem>>, vector<16x32xf32>
    %cst_404 = arith.constant -0.333333343 : f32
    %498 = vector.broadcast %cst_404 : f32 to vector<16x32xf32>
    %499 = arith.mulf %497, %498 : vector<16x32xf32>
    %c0_405 = arith.constant 0 : index
    %c1_406 = arith.constant 1 : index
    %500 = vector.load %arg9[%c0_405, %c1_406] : memref<18x34xf32, #tpu.memory_space<vmem>>, vector<16x32xf32>
    %cst_407 = arith.constant -0.333333343 : f32
    %501 = vector.broadcast %cst_407 : f32 to vector<16x32xf32>
    %502 = arith.mulf %500, %501 : vector<16x32xf32>
    %503 = arith.addf %499, %502 : vector<16x32xf32>
    %c0_408 = arith.constant 0 : index
    %c2_409 = arith.constant 2 : index
    %504 = vector.load %arg9[%c0_408, %c2_409] : memref<18x34xf32, #tpu.memory_space<vmem>>, vector<16x32xf32>
    %cst_410 = arith.constant -0.333333343 : f32
    %505 = vector.broadcast %cst_410 : f32 to vector<16x32xf32>
    %506 = arith.mulf %504, %505 : vector<16x32xf32>
    %507 = arith.addf %503, %506 : vector<16x32xf32>
    %c1_411 = arith.constant 1 : index
    %c0_412 = arith.constant 0 : index
    %508 = vector.load %arg9[%c1_411, %c0_412] : memref<18x34xf32, #tpu.memory_space<vmem>>, vector<16x32xf32>
    %cst_413 = arith.constant -0.333333343 : f32
    %509 = vector.broadcast %cst_413 : f32 to vector<16x32xf32>
    %510 = arith.mulf %508, %509 : vector<16x32xf32>
    %511 = arith.addf %507, %510 : vector<16x32xf32>
    %c1_414 = arith.constant 1 : index
    %c1_415 = arith.constant 1 : index
    %512 = vector.load %arg9[%c1_414, %c1_415] : memref<18x34xf32, #tpu.memory_space<vmem>>, vector<16x32xf32>
    %cst_416 = arith.constant 2.66666675 : f32
    %513 = vector.broadcast %cst_416 : f32 to vector<16x32xf32>
    %514 = arith.mulf %512, %513 : vector<16x32xf32>
    %515 = arith.addf %511, %514 : vector<16x32xf32>
    %c1_417 = arith.constant 1 : index
    %c2_418 = arith.constant 2 : index
    %516 = vector.load %arg9[%c1_417, %c2_418] : memref<18x34xf32, #tpu.memory_space<vmem>>, vector<16x32xf32>
    %cst_419 = arith.constant -0.333333343 : f32
    %517 = vector.broadcast %cst_419 : f32 to vector<16x32xf32>
    %518 = arith.mulf %516, %517 : vector<16x32xf32>
    %519 = arith.addf %515, %518 : vector<16x32xf32>
    %c2_420 = arith.constant 2 : index
    %c0_421 = arith.constant 0 : index
    %520 = vector.load %arg9[%c2_420, %c0_421] : memref<18x34xf32, #tpu.memory_space<vmem>>, vector<16x32xf32>
    %cst_422 = arith.constant -0.333333343 : f32
    %521 = vector.broadcast %cst_422 : f32 to vector<16x32xf32>
    %522 = arith.mulf %520, %521 : vector<16x32xf32>
    %523 = arith.addf %519, %522 : vector<16x32xf32>
    %c2_423 = arith.constant 2 : index
    %c1_424 = arith.constant 1 : index
    %524 = vector.load %arg9[%c2_423, %c1_424] : memref<18x34xf32, #tpu.memory_space<vmem>>, vector<16x32xf32>
    %cst_425 = arith.constant -0.333333343 : f32
    %525 = vector.broadcast %cst_425 : f32 to vector<16x32xf32>
    %526 = arith.mulf %524, %525 : vector<16x32xf32>
    %527 = arith.addf %523, %526 : vector<16x32xf32>
    %c2_426 = arith.constant 2 : index
    %c2_427 = arith.constant 2 : index
    %528 = vector.load %arg9[%c2_426, %c2_427] : memref<18x34xf32, #tpu.memory_space<vmem>>, vector<16x32xf32>
    %cst_428 = arith.constant -0.333333343 : f32
    %529 = vector.broadcast %cst_428 : f32 to vector<16x32xf32>
    %530 = arith.mulf %528, %529 : vector<16x32xf32>
    %531 = arith.addf %527, %530 : vector<16x32xf32>
    %532 = arith.subf %531, %487 : vector<16x32xf32>
    %c0_429 = arith.constant 0 : index
    %c0_430 = arith.constant 0 : index
    %533 = vector.load %arg4[%c0_429, %c0_430] : memref<8x16xf32, #tpu.memory_space<vmem>>, vector<8x16xf32>
    %cst_431 = arith.constant dense<0.000000e+00> : vector<8x32xf32>
    %534 = tpu.matmul %533, %532, %cst_431 {dimension_numbers = #tpu.dot_dimension_numbers<[1], [0], [0], [1], [0, 0, 1, 1], [], []>} : vector<8x16xf32>, vector<16x32xf32>, vector<8x32xf32> -> vector<8x32xf32>
    %c0_432 = arith.constant 0 : index
    %c0_433 = arith.constant 0 : index
    %535 = vector.load %arg5[%c0_432, %c0_433] : memref<32x16xf32, #tpu.memory_space<vmem>>, vector<32x16xf32>
    %cst_434 = arith.constant dense<0.000000e+00> : vector<8x16xf32>
    %536 = tpu.matmul %534, %535, %cst_434 {dimension_numbers = #tpu.dot_dimension_numbers<[1], [0], [0], [1], [0, 0, 1, 1], [], []>} : vector<8x32xf32>, vector<32x16xf32>, vector<8x16xf32> -> vector<8x16xf32>
    %c0_435 = arith.constant 0 : index
    %c0_436 = arith.constant 0 : index
    %537 = vector.load %arg4[%c0_435, %c0_436] : memref<8x16xf32, #tpu.memory_space<vmem>>, vector<4x8xf32>
    %cst_437 = arith.constant dense<0.000000e+00> : vector<4x16xf32>
    %538 = tpu.matmul %537, %536, %cst_437 {dimension_numbers = #tpu.dot_dimension_numbers<[1], [0], [0], [1], [0, 0, 1, 1], [], []>} : vector<4x8xf32>, vector<8x16xf32>, vector<4x16xf32> -> vector<4x16xf32>
    %c0_438 = arith.constant 0 : index
    %c0_439 = arith.constant 0 : index
    %539 = vector.load %arg5[%c0_438, %c0_439] : memref<32x16xf32, #tpu.memory_space<vmem>>, vector<16x8xf32>
    %cst_440 = arith.constant dense<0.000000e+00> : vector<4x8xf32>
    %540 = tpu.matmul %538, %539, %cst_440 {dimension_numbers = #tpu.dot_dimension_numbers<[1], [0], [0], [1], [0, 0, 1, 1], [], []>} : vector<4x16xf32>, vector<16x8xf32>, vector<4x8xf32> -> vector<4x8xf32>
    %c0_441 = arith.constant 0 : index
    %c0_442 = arith.constant 0 : index
    %541 = vector.load %arg4[%c0_441, %c0_442] : memref<8x16xf32, #tpu.memory_space<vmem>>, vector<2x4xf32>
    %cst_443 = arith.constant dense<0.000000e+00> : vector<2x8xf32>
    %542 = tpu.matmul %541, %540, %cst_443 {dimension_numbers = #tpu.dot_dimension_numbers<[1], [0], [0], [1], [0, 0, 1, 1], [], []>} : vector<2x4xf32>, vector<4x8xf32>, vector<2x8xf32> -> vector<2x8xf32>
    %c0_444 = arith.constant 0 : index
    %c0_445 = arith.constant 0 : index
    %543 = vector.load %arg5[%c0_444, %c0_445] : memref<32x16xf32, #tpu.memory_space<vmem>>, vector<8x4xf32>
    %cst_446 = arith.constant dense<0.000000e+00> : vector<2x4xf32>
    %544 = tpu.matmul %542, %543, %cst_446 {dimension_numbers = #tpu.dot_dimension_numbers<[1], [0], [0], [1], [0, 0, 1, 1], [], []>} : vector<2x8xf32>, vector<8x4xf32>, vector<2x4xf32> -> vector<2x4xf32>
    %c0_447 = arith.constant 0 : index
    %c0_448 = arith.constant 0 : index
    %545 = vector.load %arg4[%c0_447, %c0_448] : memref<8x16xf32, #tpu.memory_space<vmem>>, vector<1x2xf32>
    %cst_449 = arith.constant dense<0.000000e+00> : vector<1x4xf32>
    %546 = tpu.matmul %545, %544, %cst_449 {dimension_numbers = #tpu.dot_dimension_numbers<[1], [0], [0], [1], [0, 0, 1, 1], [], []>} : vector<1x2xf32>, vector<2x4xf32>, vector<1x4xf32> -> vector<1x4xf32>
    %c0_450 = arith.constant 0 : index
    %c0_451 = arith.constant 0 : index
    %547 = vector.load %arg5[%c0_450, %c0_451] : memref<32x16xf32, #tpu.memory_space<vmem>>, vector<4x2xf32>
    %cst_452 = arith.constant dense<0.000000e+00> : vector<1x2xf32>
    %548 = tpu.matmul %546, %547, %cst_452 {dimension_numbers = #tpu.dot_dimension_numbers<[1], [0], [0], [1], [0, 0, 1, 1], [], []>} : vector<1x4xf32>, vector<4x2xf32>, vector<1x2xf32> -> vector<1x2xf32>
    %cst_453 = arith.constant 3.750000e-01 : f32
    %549 = vector.broadcast %cst_453 : f32 to vector<1x2xf32>
    %550 = arith.mulf %548, %549 : vector<1x2xf32>
    %c0_454 = arith.constant 0 : index
    %c0_455 = arith.constant 0 : index
    %551 = vector.load %arg7[%c0_454, %c0_455] : memref<16x32xf32, #tpu.memory_space<vmem>>, vector<2x4xf32>
    %cst_456 = arith.constant dense<0.000000e+00> : vector<1x4xf32>
    %552 = tpu.matmul %550, %551, %cst_456 {dimension_numbers = #tpu.dot_dimension_numbers<[1], [0], [0], [1], [0, 0, 1, 1], [], []>} : vector<1x2xf32>, vector<2x4xf32>, vector<1x4xf32> -> vector<1x4xf32>
    %553 = vector.shape_cast %552 : vector<1x4xf32> to vector<1x4xf32>
    %554 = vector.broadcast %553 : vector<1x4xf32> to vector<2x4xf32>
    %cst_457 = arith.constant 0.000000e+00 : f32
    %555 = vector.broadcast %cst_457 : f32 to vector<4x6xf32>
    %c0_458 = arith.constant 0 : index
    %c0_459 = arith.constant 0 : index
    %556 = vector.load %arg9[%c0_458, %c0_459] : memref<18x34xf32, #tpu.memory_space<vmem>>, vector<4x6xf32>
    tpu.vector_store %arg9[%c0_458, %c0_459], %555 {strides = array<i32>} : memref<18x34xf32, #tpu.memory_space<vmem>>, vector<4x6xf32>,
    %c1_460 = arith.constant 1 : index
    %c1_461 = arith.constant 1 : index
    %557 = vector.load %arg9[%c1_460, %c1_461] : memref<18x34xf32, #tpu.memory_space<vmem>>, vector<2x4xf32>
    tpu.vector_store %arg9[%c1_460, %c1_461], %554 {strides = array<i32>} : memref<18x34xf32, #tpu.memory_space<vmem>>, vector<2x4xf32>,
    %c0_462 = arith.constant 0 : index
    %c0_463 = arith.constant 0 : index
    %558 = vector.load %arg9[%c0_462, %c0_463] : memref<18x34xf32, #tpu.memory_space<vmem>>, vector<2x4xf32>
    %cst_464 = arith.constant 1.250000e-01 : f32
    %559 = vector.broadcast %cst_464 : f32 to vector<2x4xf32>
    %560 = arith.mulf %558, %559 : vector<2x4xf32>
    %c0_465 = arith.constant 0 : index
    %c1_466 = arith.constant 1 : index
    %561 = vector.load %arg9[%c0_465, %c1_466] : memref<18x34xf32, #tpu.memory_space<vmem>>, vector<2x4xf32>
    %cst_467 = arith.constant 1.250000e-01 : f32
    %562 = vector.broadcast %cst_467 : f32 to vector<2x4xf32>
    %563 = arith.mulf %561, %562 : vector<2x4xf32>
    %564 = arith.addf %560, %563 : vector<2x4xf32>
    %c0_468 = arith.constant 0 : index
    %c2_469 = arith.constant 2 : index
    %565 = vector.load %arg9[%c0_468, %c2_469] : memref<18x34xf32, #tpu.memory_space<vmem>>, vector<2x4xf32>
    %cst_470 = arith.constant 1.250000e-01 : f32
    %566 = vector.broadcast %cst_470 : f32 to vector<2x4xf32>
    %567 = arith.mulf %565, %566 : vector<2x4xf32>
    %568 = arith.addf %564, %567 : vector<2x4xf32>
    %c1_471 = arith.constant 1 : index
    %c0_472 = arith.constant 0 : index
    %569 = vector.load %arg9[%c1_471, %c0_472] : memref<18x34xf32, #tpu.memory_space<vmem>>, vector<2x4xf32>
    %cst_473 = arith.constant 1.250000e-01 : f32
    %570 = vector.broadcast %cst_473 : f32 to vector<2x4xf32>
    %571 = arith.mulf %569, %570 : vector<2x4xf32>
    %572 = arith.addf %568, %571 : vector<2x4xf32>
    %c1_474 = arith.constant 1 : index
    %c1_475 = arith.constant 1 : index
    %573 = vector.load %arg9[%c1_474, %c1_475] : memref<18x34xf32, #tpu.memory_space<vmem>>, vector<2x4xf32>
    %cst_476 = arith.constant -1.000000e+00 : f32
    %574 = vector.broadcast %cst_476 : f32 to vector<2x4xf32>
    %575 = arith.mulf %573, %574 : vector<2x4xf32>
    %576 = arith.addf %572, %575 : vector<2x4xf32>
    %c1_477 = arith.constant 1 : index
    %c2_478 = arith.constant 2 : index
    %577 = vector.load %arg9[%c1_477, %c2_478] : memref<18x34xf32, #tpu.memory_space<vmem>>, vector<2x4xf32>
    %cst_479 = arith.constant 1.250000e-01 : f32
    %578 = vector.broadcast %cst_479 : f32 to vector<2x4xf32>
    %579 = arith.mulf %577, %578 : vector<2x4xf32>
    %580 = arith.addf %576, %579 : vector<2x4xf32>
    %c2_480 = arith.constant 2 : index
    %c0_481 = arith.constant 0 : index
    %581 = vector.load %arg9[%c2_480, %c0_481] : memref<18x34xf32, #tpu.memory_space<vmem>>, vector<2x4xf32>
    %cst_482 = arith.constant 1.250000e-01 : f32
    %582 = vector.broadcast %cst_482 : f32 to vector<2x4xf32>
    %583 = arith.mulf %581, %582 : vector<2x4xf32>
    %584 = arith.addf %580, %583 : vector<2x4xf32>
    %c2_483 = arith.constant 2 : index
    %c1_484 = arith.constant 1 : index
    %585 = vector.load %arg9[%c2_483, %c1_484] : memref<18x34xf32, #tpu.memory_space<vmem>>, vector<2x4xf32>
    %cst_485 = arith.constant 1.250000e-01 : f32
    %586 = vector.broadcast %cst_485 : f32 to vector<2x4xf32>
    %587 = arith.mulf %585, %586 : vector<2x4xf32>
    %588 = arith.addf %584, %587 : vector<2x4xf32>
    %c2_486 = arith.constant 2 : index
    %c2_487 = arith.constant 2 : index
    %589 = vector.load %arg9[%c2_486, %c2_487] : memref<18x34xf32, #tpu.memory_space<vmem>>, vector<2x4xf32>
    %cst_488 = arith.constant 1.250000e-01 : f32
    %590 = vector.broadcast %cst_488 : f32 to vector<2x4xf32>
    %591 = arith.mulf %589, %590 : vector<2x4xf32>
    %592 = arith.addf %588, %591 : vector<2x4xf32>
    %593 = arith.addf %554, %592 : vector<2x4xf32>
    %cst_489 = arith.constant 3.750000e-01 : f32
    %594 = vector.broadcast %cst_489 : f32 to vector<2x4xf32>
    %595 = arith.mulf %544, %594 : vector<2x4xf32>
    %596 = arith.addf %593, %595 : vector<2x4xf32>
    %c0_490 = arith.constant 0 : index
    %c0_491 = arith.constant 0 : index
    %597 = vector.load %arg7[%c0_490, %c0_491] : memref<16x32xf32, #tpu.memory_space<vmem>>, vector<4x8xf32>
    %cst_492 = arith.constant dense<0.000000e+00> : vector<2x8xf32>
    %598 = tpu.matmul %596, %597, %cst_492 {dimension_numbers = #tpu.dot_dimension_numbers<[1], [0], [0], [1], [0, 0, 1, 1], [], []>} : vector<2x4xf32>, vector<4x8xf32>, vector<2x8xf32> -> vector<2x8xf32>
    %c0_493 = arith.constant 0 : index
    %c0_494 = arith.constant 0 : index
    %599 = vector.load %arg6[%c0_493, %c0_494] : memref<16x8xf32, #tpu.memory_space<vmem>>, vector<4x2xf32>
    %cst_495 = arith.constant dense<0.000000e+00> : vector<4x8xf32>
    %600 = tpu.matmul %599, %598, %cst_495 {dimension_numbers = #tpu.dot_dimension_numbers<[1], [0], [0], [1], [0, 0, 1, 1], [], []>} : vector<4x2xf32>, vector<2x8xf32>, vector<4x8xf32> -> vector<4x8xf32>
    %cst_496 = arith.constant 0.000000e+00 : f32
    %601 = vector.broadcast %cst_496 : f32 to vector<6x10xf32>
    %c0_497 = arith.constant 0 : index
    %c0_498 = arith.constant 0 : index
    %602 = vector.load %arg9[%c0_497, %c0_498] : memref<18x34xf32, #tpu.memory_space<vmem>>, vector<6x10xf32>
    tpu.vector_store %arg9[%c0_497, %c0_498], %601 {strides = array<i32>} : memref<18x34xf32, #tpu.memory_space<vmem>>, vector<6x10xf32>,
    %c1_499 = arith.constant 1 : index
    %c1_500 = arith.constant 1 : index
    %603 = vector.load %arg9[%c1_499, %c1_500] : memref<18x34xf32, #tpu.memory_space<vmem>>, vector<4x8xf32>
    tpu.vector_store %arg9[%c1_499, %c1_500], %600 {strides = array<i32>} : memref<18x34xf32, #tpu.memory_space<vmem>>, vector<4x8xf32>,
    %c0_501 = arith.constant 0 : index
    %c0_502 = arith.constant 0 : index
    %604 = vector.load %arg9[%c0_501, %c0_502] : memref<18x34xf32, #tpu.memory_space<vmem>>, vector<4x8xf32>
    %cst_503 = arith.constant 1.250000e-01 : f32
    %605 = vector.broadcast %cst_503 : f32 to vector<4x8xf32>
    %606 = arith.mulf %604, %605 : vector<4x8xf32>
    %c0_504 = arith.constant 0 : index
    %c1_505 = arith.constant 1 : index
    %607 = vector.load %arg9[%c0_504, %c1_505] : memref<18x34xf32, #tpu.memory_space<vmem>>, vector<4x8xf32>
    %cst_506 = arith.constant 1.250000e-01 : f32
    %608 = vector.broadcast %cst_506 : f32 to vector<4x8xf32>
    %609 = arith.mulf %607, %608 : vector<4x8xf32>
    %610 = arith.addf %606, %609 : vector<4x8xf32>
    %c0_507 = arith.constant 0 : index
    %c2_508 = arith.constant 2 : index
    %611 = vector.load %arg9[%c0_507, %c2_508] : memref<18x34xf32, #tpu.memory_space<vmem>>, vector<4x8xf32>
    %cst_509 = arith.constant 1.250000e-01 : f32
    %612 = vector.broadcast %cst_509 : f32 to vector<4x8xf32>
    %613 = arith.mulf %611, %612 : vector<4x8xf32>
    %614 = arith.addf %610, %613 : vector<4x8xf32>
    %c1_510 = arith.constant 1 : index
    %c0_511 = arith.constant 0 : index
    %615 = vector.load %arg9[%c1_510, %c0_511] : memref<18x34xf32, #tpu.memory_space<vmem>>, vector<4x8xf32>
    %cst_512 = arith.constant 1.250000e-01 : f32
    %616 = vector.broadcast %cst_512 : f32 to vector<4x8xf32>
    %617 = arith.mulf %615, %616 : vector<4x8xf32>
    %618 = arith.addf %614, %617 : vector<4x8xf32>
    %c1_513 = arith.constant 1 : index
    %c1_514 = arith.constant 1 : index
    %619 = vector.load %arg9[%c1_513, %c1_514] : memref<18x34xf32, #tpu.memory_space<vmem>>, vector<4x8xf32>
    %cst_515 = arith.constant -1.000000e+00 : f32
    %620 = vector.broadcast %cst_515 : f32 to vector<4x8xf32>
    %621 = arith.mulf %619, %620 : vector<4x8xf32>
    %622 = arith.addf %618, %621 : vector<4x8xf32>
    %c1_516 = arith.constant 1 : index
    %c2_517 = arith.constant 2 : index
    %623 = vector.load %arg9[%c1_516, %c2_517] : memref<18x34xf32, #tpu.memory_space<vmem>>, vector<4x8xf32>
    %cst_518 = arith.constant 1.250000e-01 : f32
    %624 = vector.broadcast %cst_518 : f32 to vector<4x8xf32>
    %625 = arith.mulf %623, %624 : vector<4x8xf32>
    %626 = arith.addf %622, %625 : vector<4x8xf32>
    %c2_519 = arith.constant 2 : index
    %c0_520 = arith.constant 0 : index
    %627 = vector.load %arg9[%c2_519, %c0_520] : memref<18x34xf32, #tpu.memory_space<vmem>>, vector<4x8xf32>
    %cst_521 = arith.constant 1.250000e-01 : f32
    %628 = vector.broadcast %cst_521 : f32 to vector<4x8xf32>
    %629 = arith.mulf %627, %628 : vector<4x8xf32>
    %630 = arith.addf %626, %629 : vector<4x8xf32>
    %c2_522 = arith.constant 2 : index
    %c1_523 = arith.constant 1 : index
    %631 = vector.load %arg9[%c2_522, %c1_523] : memref<18x34xf32, #tpu.memory_space<vmem>>, vector<4x8xf32>
    %cst_524 = arith.constant 1.250000e-01 : f32
    %632 = vector.broadcast %cst_524 : f32 to vector<4x8xf32>
    %633 = arith.mulf %631, %632 : vector<4x8xf32>
    %634 = arith.addf %630, %633 : vector<4x8xf32>
    %c2_525 = arith.constant 2 : index
    %c2_526 = arith.constant 2 : index
    %635 = vector.load %arg9[%c2_525, %c2_526] : memref<18x34xf32, #tpu.memory_space<vmem>>, vector<4x8xf32>
    %cst_527 = arith.constant 1.250000e-01 : f32
    %636 = vector.broadcast %cst_527 : f32 to vector<4x8xf32>
    %637 = arith.mulf %635, %636 : vector<4x8xf32>
    %638 = arith.addf %634, %637 : vector<4x8xf32>
    %639 = arith.addf %600, %638 : vector<4x8xf32>
    %cst_528 = arith.constant 3.750000e-01 : f32
    %640 = vector.broadcast %cst_528 : f32 to vector<4x8xf32>
    %641 = arith.mulf %540, %640 : vector<4x8xf32>
    %642 = arith.addf %639, %641 : vector<4x8xf32>
    %c0_529 = arith.constant 0 : index
    %c0_530 = arith.constant 0 : index
    %643 = vector.load %arg7[%c0_529, %c0_530] : memref<16x32xf32, #tpu.memory_space<vmem>>, vector<8x16xf32>
    %cst_531 = arith.constant dense<0.000000e+00> : vector<4x16xf32>
    %644 = tpu.matmul %642, %643, %cst_531 {dimension_numbers = #tpu.dot_dimension_numbers<[1], [0], [0], [1], [0, 0, 1, 1], [], []>} : vector<4x8xf32>, vector<8x16xf32>, vector<4x16xf32> -> vector<4x16xf32>
    %c0_532 = arith.constant 0 : index
    %c0_533 = arith.constant 0 : index
    %645 = vector.load %arg6[%c0_532, %c0_533] : memref<16x8xf32, #tpu.memory_space<vmem>>, vector<8x4xf32>
    %cst_534 = arith.constant dense<0.000000e+00> : vector<8x16xf32>
    %646 = tpu.matmul %645, %644, %cst_534 {dimension_numbers = #tpu.dot_dimension_numbers<[1], [0], [0], [1], [0, 0, 1, 1], [], []>} : vector<8x4xf32>, vector<4x16xf32>, vector<8x16xf32> -> vector<8x16xf32>
    %cst_535 = arith.constant 0.000000e+00 : f32
    %647 = vector.broadcast %cst_535 : f32 to vector<10x18xf32>
    %c0_536 = arith.constant 0 : index
    %c0_537 = arith.constant 0 : index
    %648 = vector.load %arg9[%c0_536, %c0_537] : memref<18x34xf32, #tpu.memory_space<vmem>>, vector<10x18xf32>
    tpu.vector_store %arg9[%c0_536, %c0_537], %647 {strides = array<i32>} : memref<18x34xf32, #tpu.memory_space<vmem>>, vector<10x18xf32>,
    %c1_538 = arith.constant 1 : index
    %c1_539 = arith.constant 1 : index
    %649 = vector.load %arg9[%c1_538, %c1_539] : memref<18x34xf32, #tpu.memory_space<vmem>>, vector<8x16xf32>
    tpu.vector_store %arg9[%c1_538, %c1_539], %646 {strides = array<i32>} : memref<18x34xf32, #tpu.memory_space<vmem>>, vector<8x16xf32>,
    %c0_540 = arith.constant 0 : index
    %c0_541 = arith.constant 0 : index
    %650 = vector.load %arg9[%c0_540, %c0_541] : memref<18x34xf32, #tpu.memory_space<vmem>>, vector<8x16xf32>
    %cst_542 = arith.constant 1.250000e-01 : f32
    %651 = vector.broadcast %cst_542 : f32 to vector<8x16xf32>
    %652 = arith.mulf %650, %651 : vector<8x16xf32>
    %c0_543 = arith.constant 0 : index
    %c1_544 = arith.constant 1 : index
    %653 = vector.load %arg9[%c0_543, %c1_544] : memref<18x34xf32, #tpu.memory_space<vmem>>, vector<8x16xf32>
    %cst_545 = arith.constant 1.250000e-01 : f32
    %654 = vector.broadcast %cst_545 : f32 to vector<8x16xf32>
    %655 = arith.mulf %653, %654 : vector<8x16xf32>
    %656 = arith.addf %652, %655 : vector<8x16xf32>
    %c0_546 = arith.constant 0 : index
    %c2_547 = arith.constant 2 : index
    %657 = vector.load %arg9[%c0_546, %c2_547] : memref<18x34xf32, #tpu.memory_space<vmem>>, vector<8x16xf32>
    %cst_548 = arith.constant 1.250000e-01 : f32
    %658 = vector.broadcast %cst_548 : f32 to vector<8x16xf32>
    %659 = arith.mulf %657, %658 : vector<8x16xf32>
    %660 = arith.addf %656, %659 : vector<8x16xf32>
    %c1_549 = arith.constant 1 : index
    %c0_550 = arith.constant 0 : index
    %661 = vector.load %arg9[%c1_549, %c0_550] : memref<18x34xf32, #tpu.memory_space<vmem>>, vector<8x16xf32>
    %cst_551 = arith.constant 1.250000e-01 : f32
    %662 = vector.broadcast %cst_551 : f32 to vector<8x16xf32>
    %663 = arith.mulf %661, %662 : vector<8x16xf32>
    %664 = arith.addf %660, %663 : vector<8x16xf32>
    %c1_552 = arith.constant 1 : index
    %c1_553 = arith.constant 1 : index
    %665 = vector.load %arg9[%c1_552, %c1_553] : memref<18x34xf32, #tpu.memory_space<vmem>>, vector<8x16xf32>
    %cst_554 = arith.constant -1.000000e+00 : f32
    %666 = vector.broadcast %cst_554 : f32 to vector<8x16xf32>
    %667 = arith.mulf %665, %666 : vector<8x16xf32>
    %668 = arith.addf %664, %667 : vector<8x16xf32>
    %c1_555 = arith.constant 1 : index
    %c2_556 = arith.constant 2 : index
    %669 = vector.load %arg9[%c1_555, %c2_556] : memref<18x34xf32, #tpu.memory_space<vmem>>, vector<8x16xf32>
    %cst_557 = arith.constant 1.250000e-01 : f32
    %670 = vector.broadcast %cst_557 : f32 to vector<8x16xf32>
    %671 = arith.mulf %669, %670 : vector<8x16xf32>
    %672 = arith.addf %668, %671 : vector<8x16xf32>
    %c2_558 = arith.constant 2 : index
    %c0_559 = arith.constant 0 : index
    %673 = vector.load %arg9[%c2_558, %c0_559] : memref<18x34xf32, #tpu.memory_space<vmem>>, vector<8x16xf32>
    %cst_560 = arith.constant 1.250000e-01 : f32
    %674 = vector.broadcast %cst_560 : f32 to vector<8x16xf32>
    %675 = arith.mulf %673, %674 : vector<8x16xf32>
    %676 = arith.addf %672, %675 : vector<8x16xf32>
    %c2_561 = arith.constant 2 : index
    %c1_562 = arith.constant 1 : index
    %677 = vector.load %arg9[%c2_561, %c1_562] : memref<18x34xf32, #tpu.memory_space<vmem>>, vector<8x16xf32>
    %cst_563 = arith.constant 1.250000e-01 : f32
    %678 = vector.broadcast %cst_563 : f32 to vector<8x16xf32>
    %679 = arith.mulf %677, %678 : vector<8x16xf32>
    %680 = arith.addf %676, %679 : vector<8x16xf32>
    %c2_564 = arith.constant 2 : index
    %c2_565 = arith.constant 2 : index
    %681 = vector.load %arg9[%c2_564, %c2_565] : memref<18x34xf32, #tpu.memory_space<vmem>>, vector<8x16xf32>
    %cst_566 = arith.constant 1.250000e-01 : f32
    %682 = vector.broadcast %cst_566 : f32 to vector<8x16xf32>
    %683 = arith.mulf %681, %682 : vector<8x16xf32>
    %684 = arith.addf %680, %683 : vector<8x16xf32>
    %685 = arith.addf %646, %684 : vector<8x16xf32>
    %cst_567 = arith.constant 3.750000e-01 : f32
    %686 = vector.broadcast %cst_567 : f32 to vector<8x16xf32>
    %687 = arith.mulf %536, %686 : vector<8x16xf32>
    %688 = arith.addf %685, %687 : vector<8x16xf32>
    %c0_568 = arith.constant 0 : index
    %c0_569 = arith.constant 0 : index
    %689 = vector.load %arg7[%c0_568, %c0_569] : memref<16x32xf32, #tpu.memory_space<vmem>>, vector<16x32xf32>
    %cst_570 = arith.constant dense<0.000000e+00> : vector<8x32xf32>
    %690 = tpu.matmul %688, %689, %cst_570 {dimension_numbers = #tpu.dot_dimension_numbers<[1], [0], [0], [1], [0, 0, 1, 1], [], []>} : vector<8x16xf32>, vector<16x32xf32>, vector<8x32xf32> -> vector<8x32xf32>
    %c0_571 = arith.constant 0 : index
    %c0_572 = arith.constant 0 : index
    %691 = vector.load %arg6[%c0_571, %c0_572] : memref<16x8xf32, #tpu.memory_space<vmem>>, vector<16x8xf32>
    %cst_573 = arith.constant dense<0.000000e+00> : vector<16x32xf32>
    %692 = tpu.matmul %691, %690, %cst_573 {dimension_numbers = #tpu.dot_dimension_numbers<[1], [0], [0], [1], [0, 0, 1, 1], [], []>} : vector<16x8xf32>, vector<8x32xf32>, vector<16x32xf32> -> vector<16x32xf32>
    %693 = arith.subf %2, %692 : vector<16x32xf32>
    %c1_574 = arith.constant 1 : index
    %c1_575 = arith.constant 1 : index
    %694 = vector.load %arg9[%c1_574, %c1_575] : memref<18x34xf32, #tpu.memory_space<vmem>>, vector<16x32xf32>
    tpu.vector_store %arg9[%c1_574, %c1_575], %693 {strides = array<i32>} : memref<18x34xf32, #tpu.memory_space<vmem>>, vector<16x32xf32>,
    %c1_576 = arith.constant 1 : index
    %c1_577 = arith.constant 1 : index
    %695 = vector.load %arg9[%c1_576, %c1_577] : memref<18x34xf32, #tpu.memory_space<vmem>>, vector<16x1xf32>
    %c1_578 = arith.constant 1 : index
    %c0_579 = arith.constant 0 : index
    %696 = vector.load %arg9[%c1_578, %c0_579] : memref<18x34xf32, #tpu.memory_space<vmem>>, vector<16x1xf32>
    tpu.vector_store %arg9[%c1_578, %c0_579], %695 {strides = array<i32>} : memref<18x34xf32, #tpu.memory_space<vmem>>, vector<16x1xf32>,
    %c1_580 = arith.constant 1 : index
    %c32_581 = arith.constant 32 : index
    %697 = vector.load %arg9[%c1_580, %c32_581] : memref<18x34xf32, #tpu.memory_space<vmem>>, vector<16x1xf32>
    %c1_582 = arith.constant 1 : index
    %c33_583 = arith.constant 33 : index
    %698 = vector.load %arg9[%c1_582, %c33_583] : memref<18x34xf32, #tpu.memory_space<vmem>>, vector<16x1xf32>
    tpu.vector_store %arg9[%c1_582, %c33_583], %697 {strides = array<i32>} : memref<18x34xf32, #tpu.memory_space<vmem>>, vector<16x1xf32>,
    %c1_584 = arith.constant 1 : index
    %c0_585 = arith.constant 0 : index
    %699 = vector.load %arg9[%c1_584, %c0_585] : memref<18x34xf32, #tpu.memory_space<vmem>>, vector<1x34xf32>
    %c0_586 = arith.constant 0 : index
    %c0_587 = arith.constant 0 : index
    %700 = vector.load %arg9[%c0_586, %c0_587] : memref<18x34xf32, #tpu.memory_space<vmem>>, vector<1x34xf32>
    tpu.vector_store %arg9[%c0_586, %c0_587], %699 {strides = array<i32>} : memref<18x34xf32, #tpu.memory_space<vmem>>, vector<1x34xf32>,
    %c16_588 = arith.constant 16 : index
    %c0_589 = arith.constant 0 : index
    %701 = vector.load %arg9[%c16_588, %c0_589] : memref<18x34xf32, #tpu.memory_space<vmem>>, vector<1x34xf32>
    %c17_590 = arith.constant 17 : index
    %c0_591 = arith.constant 0 : index
    %702 = vector.load %arg9[%c17_590, %c0_591] : memref<18x34xf32, #tpu.memory_space<vmem>>, vector<1x34xf32>
    tpu.vector_store %arg9[%c17_590, %c0_591], %701 {strides = array<i32>} : memref<18x34xf32, #tpu.memory_space<vmem>>, vector<1x34xf32>,
    %c0_592 = arith.constant 0 : index
    %c0_593 = arith.constant 0 : index
    %703 = vector.load %arg9[%c0_592, %c0_593] : memref<18x34xf32, #tpu.memory_space<vmem>>, vector<16x32xf32>
    %cst_594 = arith.constant 1.250000e-01 : f32
    %704 = vector.broadcast %cst_594 : f32 to vector<16x32xf32>
    %705 = arith.mulf %703, %704 : vector<16x32xf32>
    %c0_595 = arith.constant 0 : index
    %c1_596 = arith.constant 1 : index
    %706 = vector.load %arg9[%c0_595, %c1_596] : memref<18x34xf32, #tpu.memory_space<vmem>>, vector<16x32xf32>
    %cst_597 = arith.constant 1.250000e-01 : f32
    %707 = vector.broadcast %cst_597 : f32 to vector<16x32xf32>
    %708 = arith.mulf %706, %707 : vector<16x32xf32>
    %709 = arith.addf %705, %708 : vector<16x32xf32>
    %c0_598 = arith.constant 0 : index
    %c2_599 = arith.constant 2 : index
    %710 = vector.load %arg9[%c0_598, %c2_599] : memref<18x34xf32, #tpu.memory_space<vmem>>, vector<16x32xf32>
    %cst_600 = arith.constant 1.250000e-01 : f32
    %711 = vector.broadcast %cst_600 : f32 to vector<16x32xf32>
    %712 = arith.mulf %710, %711 : vector<16x32xf32>
    %713 = arith.addf %709, %712 : vector<16x32xf32>
    %c1_601 = arith.constant 1 : index
    %c0_602 = arith.constant 0 : index
    %714 = vector.load %arg9[%c1_601, %c0_602] : memref<18x34xf32, #tpu.memory_space<vmem>>, vector<16x32xf32>
    %cst_603 = arith.constant 1.250000e-01 : f32
    %715 = vector.broadcast %cst_603 : f32 to vector<16x32xf32>
    %716 = arith.mulf %714, %715 : vector<16x32xf32>
    %717 = arith.addf %713, %716 : vector<16x32xf32>
    %c1_604 = arith.constant 1 : index
    %c1_605 = arith.constant 1 : index
    %718 = vector.load %arg9[%c1_604, %c1_605] : memref<18x34xf32, #tpu.memory_space<vmem>>, vector<16x32xf32>
    %cst_606 = arith.constant -1.000000e+00 : f32
    %719 = vector.broadcast %cst_606 : f32 to vector<16x32xf32>
    %720 = arith.mulf %718, %719 : vector<16x32xf32>
    %721 = arith.addf %717, %720 : vector<16x32xf32>
    %c1_607 = arith.constant 1 : index
    %c2_608 = arith.constant 2 : index
    %722 = vector.load %arg9[%c1_607, %c2_608] : memref<18x34xf32, #tpu.memory_space<vmem>>, vector<16x32xf32>
    %cst_609 = arith.constant 1.250000e-01 : f32
    %723 = vector.broadcast %cst_609 : f32 to vector<16x32xf32>
    %724 = arith.mulf %722, %723 : vector<16x32xf32>
    %725 = arith.addf %721, %724 : vector<16x32xf32>
    %c2_610 = arith.constant 2 : index
    %c0_611 = arith.constant 0 : index
    %726 = vector.load %arg9[%c2_610, %c0_611] : memref<18x34xf32, #tpu.memory_space<vmem>>, vector<16x32xf32>
    %cst_612 = arith.constant 1.250000e-01 : f32
    %727 = vector.broadcast %cst_612 : f32 to vector<16x32xf32>
    %728 = arith.mulf %726, %727 : vector<16x32xf32>
    %729 = arith.addf %725, %728 : vector<16x32xf32>
    %c2_613 = arith.constant 2 : index
    %c1_614 = arith.constant 1 : index
    %730 = vector.load %arg9[%c2_613, %c1_614] : memref<18x34xf32, #tpu.memory_space<vmem>>, vector<16x32xf32>
    %cst_615 = arith.constant 1.250000e-01 : f32
    %731 = vector.broadcast %cst_615 : f32 to vector<16x32xf32>
    %732 = arith.mulf %730, %731 : vector<16x32xf32>
    %733 = arith.addf %729, %732 : vector<16x32xf32>
    %c2_616 = arith.constant 2 : index
    %c2_617 = arith.constant 2 : index
    %734 = vector.load %arg9[%c2_616, %c2_617] : memref<18x34xf32, #tpu.memory_space<vmem>>, vector<16x32xf32>
    %cst_618 = arith.constant 1.250000e-01 : f32
    %735 = vector.broadcast %cst_618 : f32 to vector<16x32xf32>
    %736 = arith.mulf %734, %735 : vector<16x32xf32>
    %737 = arith.addf %733, %736 : vector<16x32xf32>
    %738 = arith.addf %693, %737 : vector<16x32xf32>
    %cst_619 = arith.constant 3.750000e-01 : f32
    %739 = vector.broadcast %cst_619 : f32 to vector<16x32xf32>
    %740 = arith.mulf %487, %739 : vector<16x32xf32>
    %741 = arith.addf %738, %740 : vector<16x32xf32>
    %c1_620 = arith.constant 1 : index
    %c1_621 = arith.constant 1 : index
    %742 = vector.load %arg9[%c1_620, %c1_621] : memref<18x34xf32, #tpu.memory_space<vmem>>, vector<16x32xf32>
    tpu.vector_store %arg9[%c1_620, %c1_621], %741 {strides = array<i32>} : memref<18x34xf32, #tpu.memory_space<vmem>>, vector<16x32xf32>,
    %c1_622 = arith.constant 1 : index
    %c1_623 = arith.constant 1 : index
    %743 = vector.load %arg9[%c1_622, %c1_623] : memref<18x34xf32, #tpu.memory_space<vmem>>, vector<16x1xf32>
    %c1_624 = arith.constant 1 : index
    %c0_625 = arith.constant 0 : index
    %744 = vector.load %arg9[%c1_624, %c0_625] : memref<18x34xf32, #tpu.memory_space<vmem>>, vector<16x1xf32>
    tpu.vector_store %arg9[%c1_624, %c0_625], %743 {strides = array<i32>} : memref<18x34xf32, #tpu.memory_space<vmem>>, vector<16x1xf32>,
    %c1_626 = arith.constant 1 : index
    %c32_627 = arith.constant 32 : index
    %745 = vector.load %arg9[%c1_626, %c32_627] : memref<18x34xf32, #tpu.memory_space<vmem>>, vector<16x1xf32>
    %c1_628 = arith.constant 1 : index
    %c33_629 = arith.constant 33 : index
    %746 = vector.load %arg9[%c1_628, %c33_629] : memref<18x34xf32, #tpu.memory_space<vmem>>, vector<16x1xf32>
    tpu.vector_store %arg9[%c1_628, %c33_629], %745 {strides = array<i32>} : memref<18x34xf32, #tpu.memory_space<vmem>>, vector<16x1xf32>,
    %c1_630 = arith.constant 1 : index
    %c0_631 = arith.constant 0 : index
    %747 = vector.load %arg9[%c1_630, %c0_631] : memref<18x34xf32, #tpu.memory_space<vmem>>, vector<1x34xf32>
    %c0_632 = arith.constant 0 : index
    %c0_633 = arith.constant 0 : index
    %748 = vector.load %arg9[%c0_632, %c0_633] : memref<18x34xf32, #tpu.memory_space<vmem>>, vector<1x34xf32>
    tpu.vector_store %arg9[%c0_632, %c0_633], %747 {strides = array<i32>} : memref<18x34xf32, #tpu.memory_space<vmem>>, vector<1x34xf32>,
    %c16_634 = arith.constant 16 : index
    %c0_635 = arith.constant 0 : index
    %749 = vector.load %arg9[%c16_634, %c0_635] : memref<18x34xf32, #tpu.memory_space<vmem>>, vector<1x34xf32>
    %c17_636 = arith.constant 17 : index
    %c0_637 = arith.constant 0 : index
    %750 = vector.load %arg9[%c17_636, %c0_637] : memref<18x34xf32, #tpu.memory_space<vmem>>, vector<1x34xf32>
    tpu.vector_store %arg9[%c17_636, %c0_637], %749 {strides = array<i32>} : memref<18x34xf32, #tpu.memory_space<vmem>>, vector<1x34xf32>,
    %c0_638 = arith.constant 0 : index
    %c0_639 = arith.constant 0 : index
    %751 = vector.load %arg9[%c0_638, %c0_639] : memref<18x34xf32, #tpu.memory_space<vmem>>, vector<16x32xf32>
    %cst_640 = arith.constant -0.333333343 : f32
    %752 = vector.broadcast %cst_640 : f32 to vector<16x32xf32>
    %753 = arith.mulf %751, %752 : vector<16x32xf32>
    %c0_641 = arith.constant 0 : index
    %c1_642 = arith.constant 1 : index
    %754 = vector.load %arg9[%c0_641, %c1_642] : memref<18x34xf32, #tpu.memory_space<vmem>>, vector<16x32xf32>
    %cst_643 = arith.constant -0.333333343 : f32
    %755 = vector.broadcast %cst_643 : f32 to vector<16x32xf32>
    %756 = arith.mulf %754, %755 : vector<16x32xf32>
    %757 = arith.addf %753, %756 : vector<16x32xf32>
    %c0_644 = arith.constant 0 : index
    %c2_645 = arith.constant 2 : index
    %758 = vector.load %arg9[%c0_644, %c2_645] : memref<18x34xf32, #tpu.memory_space<vmem>>, vector<16x32xf32>
    %cst_646 = arith.constant -0.333333343 : f32
    %759 = vector.broadcast %cst_646 : f32 to vector<16x32xf32>
    %760 = arith.mulf %758, %759 : vector<16x32xf32>
    %761 = arith.addf %757, %760 : vector<16x32xf32>
    %c1_647 = arith.constant 1 : index
    %c0_648 = arith.constant 0 : index
    %762 = vector.load %arg9[%c1_647, %c0_648] : memref<18x34xf32, #tpu.memory_space<vmem>>, vector<16x32xf32>
    %cst_649 = arith.constant -0.333333343 : f32
    %763 = vector.broadcast %cst_649 : f32 to vector<16x32xf32>
    %764 = arith.mulf %762, %763 : vector<16x32xf32>
    %765 = arith.addf %761, %764 : vector<16x32xf32>
    %c1_650 = arith.constant 1 : index
    %c1_651 = arith.constant 1 : index
    %766 = vector.load %arg9[%c1_650, %c1_651] : memref<18x34xf32, #tpu.memory_space<vmem>>, vector<16x32xf32>
    %cst_652 = arith.constant 2.66666675 : f32
    %767 = vector.broadcast %cst_652 : f32 to vector<16x32xf32>
    %768 = arith.mulf %766, %767 : vector<16x32xf32>
    %769 = arith.addf %765, %768 : vector<16x32xf32>
    %c1_653 = arith.constant 1 : index
    %c2_654 = arith.constant 2 : index
    %770 = vector.load %arg9[%c1_653, %c2_654] : memref<18x34xf32, #tpu.memory_space<vmem>>, vector<16x32xf32>
    %cst_655 = arith.constant -0.333333343 : f32
    %771 = vector.broadcast %cst_655 : f32 to vector<16x32xf32>
    %772 = arith.mulf %770, %771 : vector<16x32xf32>
    %773 = arith.addf %769, %772 : vector<16x32xf32>
    %c2_656 = arith.constant 2 : index
    %c0_657 = arith.constant 0 : index
    %774 = vector.load %arg9[%c2_656, %c0_657] : memref<18x34xf32, #tpu.memory_space<vmem>>, vector<16x32xf32>
    %cst_658 = arith.constant -0.333333343 : f32
    %775 = vector.broadcast %cst_658 : f32 to vector<16x32xf32>
    %776 = arith.mulf %774, %775 : vector<16x32xf32>
    %777 = arith.addf %773, %776 : vector<16x32xf32>
    %c2_659 = arith.constant 2 : index
    %c1_660 = arith.constant 1 : index
    %778 = vector.load %arg9[%c2_659, %c1_660] : memref<18x34xf32, #tpu.memory_space<vmem>>, vector<16x32xf32>
    %cst_661 = arith.constant -0.333333343 : f32
    %779 = vector.broadcast %cst_661 : f32 to vector<16x32xf32>
    %780 = arith.mulf %778, %779 : vector<16x32xf32>
    %781 = arith.addf %777, %780 : vector<16x32xf32>
    %c2_662 = arith.constant 2 : index
    %c2_663 = arith.constant 2 : index
    %782 = vector.load %arg9[%c2_662, %c2_663] : memref<18x34xf32, #tpu.memory_space<vmem>>, vector<16x32xf32>
    %cst_664 = arith.constant -0.333333343 : f32
    %783 = vector.broadcast %cst_664 : f32 to vector<16x32xf32>
    %784 = arith.mulf %782, %783 : vector<16x32xf32>
    %785 = arith.addf %781, %784 : vector<16x32xf32>
    %786 = arith.subf %785, %487 : vector<16x32xf32>
    %c0_665 = arith.constant 0 : index
    %c0_666 = arith.constant 0 : index
    %787 = vector.load %arg4[%c0_665, %c0_666] : memref<8x16xf32, #tpu.memory_space<vmem>>, vector<8x16xf32>
    %cst_667 = arith.constant dense<0.000000e+00> : vector<8x32xf32>
    %788 = tpu.matmul %787, %786, %cst_667 {dimension_numbers = #tpu.dot_dimension_numbers<[1], [0], [0], [1], [0, 0, 1, 1], [], []>} : vector<8x16xf32>, vector<16x32xf32>, vector<8x32xf32> -> vector<8x32xf32>
    %c0_668 = arith.constant 0 : index
    %c0_669 = arith.constant 0 : index
    %789 = vector.load %arg5[%c0_668, %c0_669] : memref<32x16xf32, #tpu.memory_space<vmem>>, vector<32x16xf32>
    %cst_670 = arith.constant dense<0.000000e+00> : vector<8x16xf32>
    %790 = tpu.matmul %788, %789, %cst_670 {dimension_numbers = #tpu.dot_dimension_numbers<[1], [0], [0], [1], [0, 0, 1, 1], [], []>} : vector<8x32xf32>, vector<32x16xf32>, vector<8x16xf32> -> vector<8x16xf32>
    %c0_671 = arith.constant 0 : index
    %c0_672 = arith.constant 0 : index
    %791 = vector.load %arg4[%c0_671, %c0_672] : memref<8x16xf32, #tpu.memory_space<vmem>>, vector<4x8xf32>
    %cst_673 = arith.constant dense<0.000000e+00> : vector<4x16xf32>
    %792 = tpu.matmul %791, %790, %cst_673 {dimension_numbers = #tpu.dot_dimension_numbers<[1], [0], [0], [1], [0, 0, 1, 1], [], []>} : vector<4x8xf32>, vector<8x16xf32>, vector<4x16xf32> -> vector<4x16xf32>
    %c0_674 = arith.constant 0 : index
    %c0_675 = arith.constant 0 : index
    %793 = vector.load %arg5[%c0_674, %c0_675] : memref<32x16xf32, #tpu.memory_space<vmem>>, vector<16x8xf32>
    %cst_676 = arith.constant dense<0.000000e+00> : vector<4x8xf32>
    %794 = tpu.matmul %792, %793, %cst_676 {dimension_numbers = #tpu.dot_dimension_numbers<[1], [0], [0], [1], [0, 0, 1, 1], [], []>} : vector<4x16xf32>, vector<16x8xf32>, vector<4x8xf32> -> vector<4x8xf32>
    %c0_677 = arith.constant 0 : index
    %c0_678 = arith.constant 0 : index
    %795 = vector.load %arg4[%c0_677, %c0_678] : memref<8x16xf32, #tpu.memory_space<vmem>>, vector<2x4xf32>
    %cst_679 = arith.constant dense<0.000000e+00> : vector<2x8xf32>
    %796 = tpu.matmul %795, %794, %cst_679 {dimension_numbers = #tpu.dot_dimension_numbers<[1], [0], [0], [1], [0, 0, 1, 1], [], []>} : vector<2x4xf32>, vector<4x8xf32>, vector<2x8xf32> -> vector<2x8xf32>
    %c0_680 = arith.constant 0 : index
    %c0_681 = arith.constant 0 : index
    %797 = vector.load %arg5[%c0_680, %c0_681] : memref<32x16xf32, #tpu.memory_space<vmem>>, vector<8x4xf32>
    %cst_682 = arith.constant dense<0.000000e+00> : vector<2x4xf32>
    %798 = tpu.matmul %796, %797, %cst_682 {dimension_numbers = #tpu.dot_dimension_numbers<[1], [0], [0], [1], [0, 0, 1, 1], [], []>} : vector<2x8xf32>, vector<8x4xf32>, vector<2x4xf32> -> vector<2x4xf32>
    %c0_683 = arith.constant 0 : index
    %c0_684 = arith.constant 0 : index
    %799 = vector.load %arg4[%c0_683, %c0_684] : memref<8x16xf32, #tpu.memory_space<vmem>>, vector<1x2xf32>
    %cst_685 = arith.constant dense<0.000000e+00> : vector<1x4xf32>
    %800 = tpu.matmul %799, %798, %cst_685 {dimension_numbers = #tpu.dot_dimension_numbers<[1], [0], [0], [1], [0, 0, 1, 1], [], []>} : vector<1x2xf32>, vector<2x4xf32>, vector<1x4xf32> -> vector<1x4xf32>
    %c0_686 = arith.constant 0 : index
    %c0_687 = arith.constant 0 : index
    %801 = vector.load %arg5[%c0_686, %c0_687] : memref<32x16xf32, #tpu.memory_space<vmem>>, vector<4x2xf32>
    %cst_688 = arith.constant dense<0.000000e+00> : vector<1x2xf32>
    %802 = tpu.matmul %800, %801, %cst_688 {dimension_numbers = #tpu.dot_dimension_numbers<[1], [0], [0], [1], [0, 0, 1, 1], [], []>} : vector<1x4xf32>, vector<4x2xf32>, vector<1x2xf32> -> vector<1x2xf32>
    %cst_689 = arith.constant 3.750000e-01 : f32
    %803 = vector.broadcast %cst_689 : f32 to vector<1x2xf32>
    %804 = arith.mulf %802, %803 : vector<1x2xf32>
    %c0_690 = arith.constant 0 : index
    %c0_691 = arith.constant 0 : index
    %805 = vector.load %arg7[%c0_690, %c0_691] : memref<16x32xf32, #tpu.memory_space<vmem>>, vector<2x4xf32>
    %cst_692 = arith.constant dense<0.000000e+00> : vector<1x4xf32>
    %806 = tpu.matmul %804, %805, %cst_692 {dimension_numbers = #tpu.dot_dimension_numbers<[1], [0], [0], [1], [0, 0, 1, 1], [], []>} : vector<1x2xf32>, vector<2x4xf32>, vector<1x4xf32> -> vector<1x4xf32>
    %807 = vector.shape_cast %806 : vector<1x4xf32> to vector<1x4xf32>
    %808 = vector.broadcast %807 : vector<1x4xf32> to vector<2x4xf32>
    %cst_693 = arith.constant 0.000000e+00 : f32
    %809 = vector.broadcast %cst_693 : f32 to vector<4x6xf32>
    %c0_694 = arith.constant 0 : index
    %c0_695 = arith.constant 0 : index
    %810 = vector.load %arg9[%c0_694, %c0_695] : memref<18x34xf32, #tpu.memory_space<vmem>>, vector<4x6xf32>
    tpu.vector_store %arg9[%c0_694, %c0_695], %809 {strides = array<i32>} : memref<18x34xf32, #tpu.memory_space<vmem>>, vector<4x6xf32>,
    %c1_696 = arith.constant 1 : index
    %c1_697 = arith.constant 1 : index
    %811 = vector.load %arg9[%c1_696, %c1_697] : memref<18x34xf32, #tpu.memory_space<vmem>>, vector<2x4xf32>
    tpu.vector_store %arg9[%c1_696, %c1_697], %808 {strides = array<i32>} : memref<18x34xf32, #tpu.memory_space<vmem>>, vector<2x4xf32>,
    %c0_698 = arith.constant 0 : index
    %c0_699 = arith.constant 0 : index
    %812 = vector.load %arg9[%c0_698, %c0_699] : memref<18x34xf32, #tpu.memory_space<vmem>>, vector<2x4xf32>
    %cst_700 = arith.constant 1.250000e-01 : f32
    %813 = vector.broadcast %cst_700 : f32 to vector<2x4xf32>
    %814 = arith.mulf %812, %813 : vector<2x4xf32>
    %c0_701 = arith.constant 0 : index
    %c1_702 = arith.constant 1 : index
    %815 = vector.load %arg9[%c0_701, %c1_702] : memref<18x34xf32, #tpu.memory_space<vmem>>, vector<2x4xf32>
    %cst_703 = arith.constant 1.250000e-01 : f32
    %816 = vector.broadcast %cst_703 : f32 to vector<2x4xf32>
    %817 = arith.mulf %815, %816 : vector<2x4xf32>
    %818 = arith.addf %814, %817 : vector<2x4xf32>
    %c0_704 = arith.constant 0 : index
    %c2_705 = arith.constant 2 : index
    %819 = vector.load %arg9[%c0_704, %c2_705] : memref<18x34xf32, #tpu.memory_space<vmem>>, vector<2x4xf32>
    %cst_706 = arith.constant 1.250000e-01 : f32
    %820 = vector.broadcast %cst_706 : f32 to vector<2x4xf32>
    %821 = arith.mulf %819, %820 : vector<2x4xf32>
    %822 = arith.addf %818, %821 : vector<2x4xf32>
    %c1_707 = arith.constant 1 : index
    %c0_708 = arith.constant 0 : index
    %823 = vector.load %arg9[%c1_707, %c0_708] : memref<18x34xf32, #tpu.memory_space<vmem>>, vector<2x4xf32>
    %cst_709 = arith.constant 1.250000e-01 : f32
    %824 = vector.broadcast %cst_709 : f32 to vector<2x4xf32>
    %825 = arith.mulf %823, %824 : vector<2x4xf32>
    %826 = arith.addf %822, %825 : vector<2x4xf32>
    %c1_710 = arith.constant 1 : index
    %c1_711 = arith.constant 1 : index
    %827 = vector.load %arg9[%c1_710, %c1_711] : memref<18x34xf32, #tpu.memory_space<vmem>>, vector<2x4xf32>
    %cst_712 = arith.constant -1.000000e+00 : f32
    %828 = vector.broadcast %cst_712 : f32 to vector<2x4xf32>
    %829 = arith.mulf %827, %828 : vector<2x4xf32>
    %830 = arith.addf %826, %829 : vector<2x4xf32>
    %c1_713 = arith.constant 1 : index
    %c2_714 = arith.constant 2 : index
    %831 = vector.load %arg9[%c1_713, %c2_714] : memref<18x34xf32, #tpu.memory_space<vmem>>, vector<2x4xf32>
    %cst_715 = arith.constant 1.250000e-01 : f32
    %832 = vector.broadcast %cst_715 : f32 to vector<2x4xf32>
    %833 = arith.mulf %831, %832 : vector<2x4xf32>
    %834 = arith.addf %830, %833 : vector<2x4xf32>
    %c2_716 = arith.constant 2 : index
    %c0_717 = arith.constant 0 : index
    %835 = vector.load %arg9[%c2_716, %c0_717] : memref<18x34xf32, #tpu.memory_space<vmem>>, vector<2x4xf32>
    %cst_718 = arith.constant 1.250000e-01 : f32
    %836 = vector.broadcast %cst_718 : f32 to vector<2x4xf32>
    %837 = arith.mulf %835, %836 : vector<2x4xf32>
    %838 = arith.addf %834, %837 : vector<2x4xf32>
    %c2_719 = arith.constant 2 : index
    %c1_720 = arith.constant 1 : index
    %839 = vector.load %arg9[%c2_719, %c1_720] : memref<18x34xf32, #tpu.memory_space<vmem>>, vector<2x4xf32>
    %cst_721 = arith.constant 1.250000e-01 : f32
    %840 = vector.broadcast %cst_721 : f32 to vector<2x4xf32>
    %841 = arith.mulf %839, %840 : vector<2x4xf32>
    %842 = arith.addf %838, %841 : vector<2x4xf32>
    %c2_722 = arith.constant 2 : index
    %c2_723 = arith.constant 2 : index
    %843 = vector.load %arg9[%c2_722, %c2_723] : memref<18x34xf32, #tpu.memory_space<vmem>>, vector<2x4xf32>
    %cst_724 = arith.constant 1.250000e-01 : f32
    %844 = vector.broadcast %cst_724 : f32 to vector<2x4xf32>
    %845 = arith.mulf %843, %844 : vector<2x4xf32>
    %846 = arith.addf %842, %845 : vector<2x4xf32>
    %847 = arith.addf %808, %846 : vector<2x4xf32>
    %cst_725 = arith.constant 3.750000e-01 : f32
    %848 = vector.broadcast %cst_725 : f32 to vector<2x4xf32>
    %849 = arith.mulf %798, %848 : vector<2x4xf32>
    %850 = arith.addf %847, %849 : vector<2x4xf32>
    %c0_726 = arith.constant 0 : index
    %c0_727 = arith.constant 0 : index
    %851 = vector.load %arg7[%c0_726, %c0_727] : memref<16x32xf32, #tpu.memory_space<vmem>>, vector<4x8xf32>
    %cst_728 = arith.constant dense<0.000000e+00> : vector<2x8xf32>
    %852 = tpu.matmul %850, %851, %cst_728 {dimension_numbers = #tpu.dot_dimension_numbers<[1], [0], [0], [1], [0, 0, 1, 1], [], []>} : vector<2x4xf32>, vector<4x8xf32>, vector<2x8xf32> -> vector<2x8xf32>
    %c0_729 = arith.constant 0 : index
    %c0_730 = arith.constant 0 : index
    %853 = vector.load %arg6[%c0_729, %c0_730] : memref<16x8xf32, #tpu.memory_space<vmem>>, vector<4x2xf32>
    %cst_731 = arith.constant dense<0.000000e+00> : vector<4x8xf32>
    %854 = tpu.matmul %853, %852, %cst_731 {dimension_numbers = #tpu.dot_dimension_numbers<[1], [0], [0], [1], [0, 0, 1, 1], [], []>} : vector<4x2xf32>, vector<2x8xf32>, vector<4x8xf32> -> vector<4x8xf32>
    %cst_732 = arith.constant 0.000000e+00 : f32
    %855 = vector.broadcast %cst_732 : f32 to vector<6x10xf32>
    %c0_733 = arith.constant 0 : index
    %c0_734 = arith.constant 0 : index
    %856 = vector.load %arg9[%c0_733, %c0_734] : memref<18x34xf32, #tpu.memory_space<vmem>>, vector<6x10xf32>
    tpu.vector_store %arg9[%c0_733, %c0_734], %855 {strides = array<i32>} : memref<18x34xf32, #tpu.memory_space<vmem>>, vector<6x10xf32>,
    %c1_735 = arith.constant 1 : index
    %c1_736 = arith.constant 1 : index
    %857 = vector.load %arg9[%c1_735, %c1_736] : memref<18x34xf32, #tpu.memory_space<vmem>>, vector<4x8xf32>
    tpu.vector_store %arg9[%c1_735, %c1_736], %854 {strides = array<i32>} : memref<18x34xf32, #tpu.memory_space<vmem>>, vector<4x8xf32>,
    %c0_737 = arith.constant 0 : index
    %c0_738 = arith.constant 0 : index
    %858 = vector.load %arg9[%c0_737, %c0_738] : memref<18x34xf32, #tpu.memory_space<vmem>>, vector<4x8xf32>
    %cst_739 = arith.constant 1.250000e-01 : f32
    %859 = vector.broadcast %cst_739 : f32 to vector<4x8xf32>
    %860 = arith.mulf %858, %859 : vector<4x8xf32>
    %c0_740 = arith.constant 0 : index
    %c1_741 = arith.constant 1 : index
    %861 = vector.load %arg9[%c0_740, %c1_741] : memref<18x34xf32, #tpu.memory_space<vmem>>, vector<4x8xf32>
    %cst_742 = arith.constant 1.250000e-01 : f32
    %862 = vector.broadcast %cst_742 : f32 to vector<4x8xf32>
    %863 = arith.mulf %861, %862 : vector<4x8xf32>
    %864 = arith.addf %860, %863 : vector<4x8xf32>
    %c0_743 = arith.constant 0 : index
    %c2_744 = arith.constant 2 : index
    %865 = vector.load %arg9[%c0_743, %c2_744] : memref<18x34xf32, #tpu.memory_space<vmem>>, vector<4x8xf32>
    %cst_745 = arith.constant 1.250000e-01 : f32
    %866 = vector.broadcast %cst_745 : f32 to vector<4x8xf32>
    %867 = arith.mulf %865, %866 : vector<4x8xf32>
    %868 = arith.addf %864, %867 : vector<4x8xf32>
    %c1_746 = arith.constant 1 : index
    %c0_747 = arith.constant 0 : index
    %869 = vector.load %arg9[%c1_746, %c0_747] : memref<18x34xf32, #tpu.memory_space<vmem>>, vector<4x8xf32>
    %cst_748 = arith.constant 1.250000e-01 : f32
    %870 = vector.broadcast %cst_748 : f32 to vector<4x8xf32>
    %871 = arith.mulf %869, %870 : vector<4x8xf32>
    %872 = arith.addf %868, %871 : vector<4x8xf32>
    %c1_749 = arith.constant 1 : index
    %c1_750 = arith.constant 1 : index
    %873 = vector.load %arg9[%c1_749, %c1_750] : memref<18x34xf32, #tpu.memory_space<vmem>>, vector<4x8xf32>
    %cst_751 = arith.constant -1.000000e+00 : f32
    %874 = vector.broadcast %cst_751 : f32 to vector<4x8xf32>
    %875 = arith.mulf %873, %874 : vector<4x8xf32>
    %876 = arith.addf %872, %875 : vector<4x8xf32>
    %c1_752 = arith.constant 1 : index
    %c2_753 = arith.constant 2 : index
    %877 = vector.load %arg9[%c1_752, %c2_753] : memref<18x34xf32, #tpu.memory_space<vmem>>, vector<4x8xf32>
    %cst_754 = arith.constant 1.250000e-01 : f32
    %878 = vector.broadcast %cst_754 : f32 to vector<4x8xf32>
    %879 = arith.mulf %877, %878 : vector<4x8xf32>
    %880 = arith.addf %876, %879 : vector<4x8xf32>
    %c2_755 = arith.constant 2 : index
    %c0_756 = arith.constant 0 : index
    %881 = vector.load %arg9[%c2_755, %c0_756] : memref<18x34xf32, #tpu.memory_space<vmem>>, vector<4x8xf32>
    %cst_757 = arith.constant 1.250000e-01 : f32
    %882 = vector.broadcast %cst_757 : f32 to vector<4x8xf32>
    %883 = arith.mulf %881, %882 : vector<4x8xf32>
    %884 = arith.addf %880, %883 : vector<4x8xf32>
    %c2_758 = arith.constant 2 : index
    %c1_759 = arith.constant 1 : index
    %885 = vector.load %arg9[%c2_758, %c1_759] : memref<18x34xf32, #tpu.memory_space<vmem>>, vector<4x8xf32>
    %cst_760 = arith.constant 1.250000e-01 : f32
    %886 = vector.broadcast %cst_760 : f32 to vector<4x8xf32>
    %887 = arith.mulf %885, %886 : vector<4x8xf32>
    %888 = arith.addf %884, %887 : vector<4x8xf32>
    %c2_761 = arith.constant 2 : index
    %c2_762 = arith.constant 2 : index
    %889 = vector.load %arg9[%c2_761, %c2_762] : memref<18x34xf32, #tpu.memory_space<vmem>>, vector<4x8xf32>
    %cst_763 = arith.constant 1.250000e-01 : f32
    %890 = vector.broadcast %cst_763 : f32 to vector<4x8xf32>
    %891 = arith.mulf %889, %890 : vector<4x8xf32>
    %892 = arith.addf %888, %891 : vector<4x8xf32>
    %893 = arith.addf %854, %892 : vector<4x8xf32>
    %cst_764 = arith.constant 3.750000e-01 : f32
    %894 = vector.broadcast %cst_764 : f32 to vector<4x8xf32>
    %895 = arith.mulf %794, %894 : vector<4x8xf32>
    %896 = arith.addf %893, %895 : vector<4x8xf32>
    %c0_765 = arith.constant 0 : index
    %c0_766 = arith.constant 0 : index
    %897 = vector.load %arg7[%c0_765, %c0_766] : memref<16x32xf32, #tpu.memory_space<vmem>>, vector<8x16xf32>
    %cst_767 = arith.constant dense<0.000000e+00> : vector<4x16xf32>
    %898 = tpu.matmul %896, %897, %cst_767 {dimension_numbers = #tpu.dot_dimension_numbers<[1], [0], [0], [1], [0, 0, 1, 1], [], []>} : vector<4x8xf32>, vector<8x16xf32>, vector<4x16xf32> -> vector<4x16xf32>
    %c0_768 = arith.constant 0 : index
    %c0_769 = arith.constant 0 : index
    %899 = vector.load %arg6[%c0_768, %c0_769] : memref<16x8xf32, #tpu.memory_space<vmem>>, vector<8x4xf32>
    %cst_770 = arith.constant dense<0.000000e+00> : vector<8x16xf32>
    %900 = tpu.matmul %899, %898, %cst_770 {dimension_numbers = #tpu.dot_dimension_numbers<[1], [0], [0], [1], [0, 0, 1, 1], [], []>} : vector<8x4xf32>, vector<4x16xf32>, vector<8x16xf32> -> vector<8x16xf32>
    %cst_771 = arith.constant 0.000000e+00 : f32
    %901 = vector.broadcast %cst_771 : f32 to vector<10x18xf32>
    %c0_772 = arith.constant 0 : index
    %c0_773 = arith.constant 0 : index
    %902 = vector.load %arg9[%c0_772, %c0_773] : memref<18x34xf32, #tpu.memory_space<vmem>>, vector<10x18xf32>
    tpu.vector_store %arg9[%c0_772, %c0_773], %901 {strides = array<i32>} : memref<18x34xf32, #tpu.memory_space<vmem>>, vector<10x18xf32>,
    %c1_774 = arith.constant 1 : index
    %c1_775 = arith.constant 1 : index
    %903 = vector.load %arg9[%c1_774, %c1_775] : memref<18x34xf32, #tpu.memory_space<vmem>>, vector<8x16xf32>
    tpu.vector_store %arg9[%c1_774, %c1_775], %900 {strides = array<i32>} : memref<18x34xf32, #tpu.memory_space<vmem>>, vector<8x16xf32>,
    %c0_776 = arith.constant 0 : index
    %c0_777 = arith.constant 0 : index
    %904 = vector.load %arg9[%c0_776, %c0_777] : memref<18x34xf32, #tpu.memory_space<vmem>>, vector<8x16xf32>
    %cst_778 = arith.constant 1.250000e-01 : f32
    %905 = vector.broadcast %cst_778 : f32 to vector<8x16xf32>
    %906 = arith.mulf %904, %905 : vector<8x16xf32>
    %c0_779 = arith.constant 0 : index
    %c1_780 = arith.constant 1 : index
    %907 = vector.load %arg9[%c0_779, %c1_780] : memref<18x34xf32, #tpu.memory_space<vmem>>, vector<8x16xf32>
    %cst_781 = arith.constant 1.250000e-01 : f32
    %908 = vector.broadcast %cst_781 : f32 to vector<8x16xf32>
    %909 = arith.mulf %907, %908 : vector<8x16xf32>
    %910 = arith.addf %906, %909 : vector<8x16xf32>
    %c0_782 = arith.constant 0 : index
    %c2_783 = arith.constant 2 : index
    %911 = vector.load %arg9[%c0_782, %c2_783] : memref<18x34xf32, #tpu.memory_space<vmem>>, vector<8x16xf32>
    %cst_784 = arith.constant 1.250000e-01 : f32
    %912 = vector.broadcast %cst_784 : f32 to vector<8x16xf32>
    %913 = arith.mulf %911, %912 : vector<8x16xf32>
    %914 = arith.addf %910, %913 : vector<8x16xf32>
    %c1_785 = arith.constant 1 : index
    %c0_786 = arith.constant 0 : index
    %915 = vector.load %arg9[%c1_785, %c0_786] : memref<18x34xf32, #tpu.memory_space<vmem>>, vector<8x16xf32>
    %cst_787 = arith.constant 1.250000e-01 : f32
    %916 = vector.broadcast %cst_787 : f32 to vector<8x16xf32>
    %917 = arith.mulf %915, %916 : vector<8x16xf32>
    %918 = arith.addf %914, %917 : vector<8x16xf32>
    %c1_788 = arith.constant 1 : index
    %c1_789 = arith.constant 1 : index
    %919 = vector.load %arg9[%c1_788, %c1_789] : memref<18x34xf32, #tpu.memory_space<vmem>>, vector<8x16xf32>
    %cst_790 = arith.constant -1.000000e+00 : f32
    %920 = vector.broadcast %cst_790 : f32 to vector<8x16xf32>
    %921 = arith.mulf %919, %920 : vector<8x16xf32>
    %922 = arith.addf %918, %921 : vector<8x16xf32>
    %c1_791 = arith.constant 1 : index
    %c2_792 = arith.constant 2 : index
    %923 = vector.load %arg9[%c1_791, %c2_792] : memref<18x34xf32, #tpu.memory_space<vmem>>, vector<8x16xf32>
    %cst_793 = arith.constant 1.250000e-01 : f32
    %924 = vector.broadcast %cst_793 : f32 to vector<8x16xf32>
    %925 = arith.mulf %923, %924 : vector<8x16xf32>
    %926 = arith.addf %922, %925 : vector<8x16xf32>
    %c2_794 = arith.constant 2 : index
    %c0_795 = arith.constant 0 : index
    %927 = vector.load %arg9[%c2_794, %c0_795] : memref<18x34xf32, #tpu.memory_space<vmem>>, vector<8x16xf32>
    %cst_796 = arith.constant 1.250000e-01 : f32
    %928 = vector.broadcast %cst_796 : f32 to vector<8x16xf32>
    %929 = arith.mulf %927, %928 : vector<8x16xf32>
    %930 = arith.addf %926, %929 : vector<8x16xf32>
    %c2_797 = arith.constant 2 : index
    %c1_798 = arith.constant 1 : index
    %931 = vector.load %arg9[%c2_797, %c1_798] : memref<18x34xf32, #tpu.memory_space<vmem>>, vector<8x16xf32>
    %cst_799 = arith.constant 1.250000e-01 : f32
    %932 = vector.broadcast %cst_799 : f32 to vector<8x16xf32>
    %933 = arith.mulf %931, %932 : vector<8x16xf32>
    %934 = arith.addf %930, %933 : vector<8x16xf32>
    %c2_800 = arith.constant 2 : index
    %c2_801 = arith.constant 2 : index
    %935 = vector.load %arg9[%c2_800, %c2_801] : memref<18x34xf32, #tpu.memory_space<vmem>>, vector<8x16xf32>
    %cst_802 = arith.constant 1.250000e-01 : f32
    %936 = vector.broadcast %cst_802 : f32 to vector<8x16xf32>
    %937 = arith.mulf %935, %936 : vector<8x16xf32>
    %938 = arith.addf %934, %937 : vector<8x16xf32>
    %939 = arith.addf %900, %938 : vector<8x16xf32>
    %cst_803 = arith.constant 3.750000e-01 : f32
    %940 = vector.broadcast %cst_803 : f32 to vector<8x16xf32>
    %941 = arith.mulf %790, %940 : vector<8x16xf32>
    %942 = arith.addf %939, %941 : vector<8x16xf32>
    %c0_804 = arith.constant 0 : index
    %c0_805 = arith.constant 0 : index
    %943 = vector.load %arg7[%c0_804, %c0_805] : memref<16x32xf32, #tpu.memory_space<vmem>>, vector<16x32xf32>
    %cst_806 = arith.constant dense<0.000000e+00> : vector<8x32xf32>
    %944 = tpu.matmul %942, %943, %cst_806 {dimension_numbers = #tpu.dot_dimension_numbers<[1], [0], [0], [1], [0, 0, 1, 1], [], []>} : vector<8x16xf32>, vector<16x32xf32>, vector<8x32xf32> -> vector<8x32xf32>
    %c0_807 = arith.constant 0 : index
    %c0_808 = arith.constant 0 : index
    %945 = vector.load %arg6[%c0_807, %c0_808] : memref<16x8xf32, #tpu.memory_space<vmem>>, vector<16x8xf32>
    %cst_809 = arith.constant dense<0.000000e+00> : vector<16x32xf32>
    %946 = tpu.matmul %945, %944, %cst_809 {dimension_numbers = #tpu.dot_dimension_numbers<[1], [0], [0], [1], [0, 0, 1, 1], [], []>} : vector<16x8xf32>, vector<8x32xf32>, vector<16x32xf32> -> vector<16x32xf32>
    %947 = arith.subf %741, %946 : vector<16x32xf32>
    %c1_810 = arith.constant 1 : index
    %c1_811 = arith.constant 1 : index
    %948 = vector.load %arg9[%c1_810, %c1_811] : memref<18x34xf32, #tpu.memory_space<vmem>>, vector<16x32xf32>
    tpu.vector_store %arg9[%c1_810, %c1_811], %947 {strides = array<i32>} : memref<18x34xf32, #tpu.memory_space<vmem>>, vector<16x32xf32>,
    %c1_812 = arith.constant 1 : index
    %c1_813 = arith.constant 1 : index
    %949 = vector.load %arg9[%c1_812, %c1_813] : memref<18x34xf32, #tpu.memory_space<vmem>>, vector<16x1xf32>
    %c1_814 = arith.constant 1 : index
    %c0_815 = arith.constant 0 : index
    %950 = vector.load %arg9[%c1_814, %c0_815] : memref<18x34xf32, #tpu.memory_space<vmem>>, vector<16x1xf32>
    tpu.vector_store %arg9[%c1_814, %c0_815], %949 {strides = array<i32>} : memref<18x34xf32, #tpu.memory_space<vmem>>, vector<16x1xf32>,
    %c1_816 = arith.constant 1 : index
    %c32_817 = arith.constant 32 : index
    %951 = vector.load %arg9[%c1_816, %c32_817] : memref<18x34xf32, #tpu.memory_space<vmem>>, vector<16x1xf32>
    %c1_818 = arith.constant 1 : index
    %c33_819 = arith.constant 33 : index
    %952 = vector.load %arg9[%c1_818, %c33_819] : memref<18x34xf32, #tpu.memory_space<vmem>>, vector<16x1xf32>
    tpu.vector_store %arg9[%c1_818, %c33_819], %951 {strides = array<i32>} : memref<18x34xf32, #tpu.memory_space<vmem>>, vector<16x1xf32>,
    %c1_820 = arith.constant 1 : index
    %c0_821 = arith.constant 0 : index
    %953 = vector.load %arg9[%c1_820, %c0_821] : memref<18x34xf32, #tpu.memory_space<vmem>>, vector<1x34xf32>
    %c0_822 = arith.constant 0 : index
    %c0_823 = arith.constant 0 : index
    %954 = vector.load %arg9[%c0_822, %c0_823] : memref<18x34xf32, #tpu.memory_space<vmem>>, vector<1x34xf32>
    tpu.vector_store %arg9[%c0_822, %c0_823], %953 {strides = array<i32>} : memref<18x34xf32, #tpu.memory_space<vmem>>, vector<1x34xf32>,
    %c16_824 = arith.constant 16 : index
    %c0_825 = arith.constant 0 : index
    %955 = vector.load %arg9[%c16_824, %c0_825] : memref<18x34xf32, #tpu.memory_space<vmem>>, vector<1x34xf32>
    %c17_826 = arith.constant 17 : index
    %c0_827 = arith.constant 0 : index
    %956 = vector.load %arg9[%c17_826, %c0_827] : memref<18x34xf32, #tpu.memory_space<vmem>>, vector<1x34xf32>
    tpu.vector_store %arg9[%c17_826, %c0_827], %955 {strides = array<i32>} : memref<18x34xf32, #tpu.memory_space<vmem>>, vector<1x34xf32>,
    %c0_828 = arith.constant 0 : index
    %c0_829 = arith.constant 0 : index
    %957 = vector.load %arg9[%c0_828, %c0_829] : memref<18x34xf32, #tpu.memory_space<vmem>>, vector<16x32xf32>
    %cst_830 = arith.constant 1.250000e-01 : f32
    %958 = vector.broadcast %cst_830 : f32 to vector<16x32xf32>
    %959 = arith.mulf %957, %958 : vector<16x32xf32>
    %c0_831 = arith.constant 0 : index
    %c1_832 = arith.constant 1 : index
    %960 = vector.load %arg9[%c0_831, %c1_832] : memref<18x34xf32, #tpu.memory_space<vmem>>, vector<16x32xf32>
    %cst_833 = arith.constant 1.250000e-01 : f32
    %961 = vector.broadcast %cst_833 : f32 to vector<16x32xf32>
    %962 = arith.mulf %960, %961 : vector<16x32xf32>
    %963 = arith.addf %959, %962 : vector<16x32xf32>
    %c0_834 = arith.constant 0 : index
    %c2_835 = arith.constant 2 : index
    %964 = vector.load %arg9[%c0_834, %c2_835] : memref<18x34xf32, #tpu.memory_space<vmem>>, vector<16x32xf32>
    %cst_836 = arith.constant 1.250000e-01 : f32
    %965 = vector.broadcast %cst_836 : f32 to vector<16x32xf32>
    %966 = arith.mulf %964, %965 : vector<16x32xf32>
    %967 = arith.addf %963, %966 : vector<16x32xf32>
    %c1_837 = arith.constant 1 : index
    %c0_838 = arith.constant 0 : index
    %968 = vector.load %arg9[%c1_837, %c0_838] : memref<18x34xf32, #tpu.memory_space<vmem>>, vector<16x32xf32>
    %cst_839 = arith.constant 1.250000e-01 : f32
    %969 = vector.broadcast %cst_839 : f32 to vector<16x32xf32>
    %970 = arith.mulf %968, %969 : vector<16x32xf32>
    %971 = arith.addf %967, %970 : vector<16x32xf32>
    %c1_840 = arith.constant 1 : index
    %c1_841 = arith.constant 1 : index
    %972 = vector.load %arg9[%c1_840, %c1_841] : memref<18x34xf32, #tpu.memory_space<vmem>>, vector<16x32xf32>
    %cst_842 = arith.constant -1.000000e+00 : f32
    %973 = vector.broadcast %cst_842 : f32 to vector<16x32xf32>
    %974 = arith.mulf %972, %973 : vector<16x32xf32>
    %975 = arith.addf %971, %974 : vector<16x32xf32>
    %c1_843 = arith.constant 1 : index
    %c2_844 = arith.constant 2 : index
    %976 = vector.load %arg9[%c1_843, %c2_844] : memref<18x34xf32, #tpu.memory_space<vmem>>, vector<16x32xf32>
    %cst_845 = arith.constant 1.250000e-01 : f32
    %977 = vector.broadcast %cst_845 : f32 to vector<16x32xf32>
    %978 = arith.mulf %976, %977 : vector<16x32xf32>
    %979 = arith.addf %975, %978 : vector<16x32xf32>
    %c2_846 = arith.constant 2 : index
    %c0_847 = arith.constant 0 : index
    %980 = vector.load %arg9[%c2_846, %c0_847] : memref<18x34xf32, #tpu.memory_space<vmem>>, vector<16x32xf32>
    %cst_848 = arith.constant 1.250000e-01 : f32
    %981 = vector.broadcast %cst_848 : f32 to vector<16x32xf32>
    %982 = arith.mulf %980, %981 : vector<16x32xf32>
    %983 = arith.addf %979, %982 : vector<16x32xf32>
    %c2_849 = arith.constant 2 : index
    %c1_850 = arith.constant 1 : index
    %984 = vector.load %arg9[%c2_849, %c1_850] : memref<18x34xf32, #tpu.memory_space<vmem>>, vector<16x32xf32>
    %cst_851 = arith.constant 1.250000e-01 : f32
    %985 = vector.broadcast %cst_851 : f32 to vector<16x32xf32>
    %986 = arith.mulf %984, %985 : vector<16x32xf32>
    %987 = arith.addf %983, %986 : vector<16x32xf32>
    %c2_852 = arith.constant 2 : index
    %c2_853 = arith.constant 2 : index
    %988 = vector.load %arg9[%c2_852, %c2_853] : memref<18x34xf32, #tpu.memory_space<vmem>>, vector<16x32xf32>
    %cst_854 = arith.constant 1.250000e-01 : f32
    %989 = vector.broadcast %cst_854 : f32 to vector<16x32xf32>
    %990 = arith.mulf %988, %989 : vector<16x32xf32>
    %991 = arith.addf %987, %990 : vector<16x32xf32>
    %992 = arith.addf %947, %991 : vector<16x32xf32>
    %cst_855 = arith.constant 3.750000e-01 : f32
    %993 = vector.broadcast %cst_855 : f32 to vector<16x32xf32>
    %994 = arith.mulf %487, %993 : vector<16x32xf32>
    %995 = arith.addf %992, %994 : vector<16x32xf32>
    %c1_856 = arith.constant 1 : index
    %c1_857 = arith.constant 1 : index
    %996 = vector.load %arg9[%c1_856, %c1_857] : memref<18x34xf32, #tpu.memory_space<vmem>>, vector<16x32xf32>
    tpu.vector_store %arg9[%c1_856, %c1_857], %995 {strides = array<i32>} : memref<18x34xf32, #tpu.memory_space<vmem>>, vector<16x32xf32>,
    %c1_858 = arith.constant 1 : index
    %c1_859 = arith.constant 1 : index
    %997 = vector.load %arg9[%c1_858, %c1_859] : memref<18x34xf32, #tpu.memory_space<vmem>>, vector<16x1xf32>
    %c1_860 = arith.constant 1 : index
    %c0_861 = arith.constant 0 : index
    %998 = vector.load %arg9[%c1_860, %c0_861] : memref<18x34xf32, #tpu.memory_space<vmem>>, vector<16x1xf32>
    tpu.vector_store %arg9[%c1_860, %c0_861], %997 {strides = array<i32>} : memref<18x34xf32, #tpu.memory_space<vmem>>, vector<16x1xf32>,
    %c1_862 = arith.constant 1 : index
    %c32_863 = arith.constant 32 : index
    %999 = vector.load %arg9[%c1_862, %c32_863] : memref<18x34xf32, #tpu.memory_space<vmem>>, vector<16x1xf32>
    %c1_864 = arith.constant 1 : index
    %c33_865 = arith.constant 33 : index
    %1000 = vector.load %arg9[%c1_864, %c33_865] : memref<18x34xf32, #tpu.memory_space<vmem>>, vector<16x1xf32>
    tpu.vector_store %arg9[%c1_864, %c33_865], %999 {strides = array<i32>} : memref<18x34xf32, #tpu.memory_space<vmem>>, vector<16x1xf32>,
    %c1_866 = arith.constant 1 : index
    %c0_867 = arith.constant 0 : index
    %1001 = vector.load %arg9[%c1_866, %c0_867] : memref<18x34xf32, #tpu.memory_space<vmem>>, vector<1x34xf32>
    %c0_868 = arith.constant 0 : index
    %c0_869 = arith.constant 0 : index
    %1002 = vector.load %arg9[%c0_868, %c0_869] : memref<18x34xf32, #tpu.memory_space<vmem>>, vector<1x34xf32>
    tpu.vector_store %arg9[%c0_868, %c0_869], %1001 {strides = array<i32>} : memref<18x34xf32, #tpu.memory_space<vmem>>, vector<1x34xf32>,
    %c16_870 = arith.constant 16 : index
    %c0_871 = arith.constant 0 : index
    %1003 = vector.load %arg9[%c16_870, %c0_871] : memref<18x34xf32, #tpu.memory_space<vmem>>, vector<1x34xf32>
    %c17_872 = arith.constant 17 : index
    %c0_873 = arith.constant 0 : index
    %1004 = vector.load %arg9[%c17_872, %c0_873] : memref<18x34xf32, #tpu.memory_space<vmem>>, vector<1x34xf32>
    tpu.vector_store %arg9[%c17_872, %c0_873], %1003 {strides = array<i32>} : memref<18x34xf32, #tpu.memory_space<vmem>>, vector<1x34xf32>,
    %c0_874 = arith.constant 0 : index
    %c0_875 = arith.constant 0 : index
    %1005 = vector.load %arg9[%c0_874, %c0_875] : memref<18x34xf32, #tpu.memory_space<vmem>>, vector<16x32xf32>
    %cst_876 = arith.constant -0.333333343 : f32
    %1006 = vector.broadcast %cst_876 : f32 to vector<16x32xf32>
    %1007 = arith.mulf %1005, %1006 : vector<16x32xf32>
    %c0_877 = arith.constant 0 : index
    %c1_878 = arith.constant 1 : index
    %1008 = vector.load %arg9[%c0_877, %c1_878] : memref<18x34xf32, #tpu.memory_space<vmem>>, vector<16x32xf32>
    %cst_879 = arith.constant -0.333333343 : f32
    %1009 = vector.broadcast %cst_879 : f32 to vector<16x32xf32>
    %1010 = arith.mulf %1008, %1009 : vector<16x32xf32>
    %1011 = arith.addf %1007, %1010 : vector<16x32xf32>
    %c0_880 = arith.constant 0 : index
    %c2_881 = arith.constant 2 : index
    %1012 = vector.load %arg9[%c0_880, %c2_881] : memref<18x34xf32, #tpu.memory_space<vmem>>, vector<16x32xf32>
    %cst_882 = arith.constant -0.333333343 : f32
    %1013 = vector.broadcast %cst_882 : f32 to vector<16x32xf32>
    %1014 = arith.mulf %1012, %1013 : vector<16x32xf32>
    %1015 = arith.addf %1011, %1014 : vector<16x32xf32>
    %c1_883 = arith.constant 1 : index
    %c0_884 = arith.constant 0 : index
    %1016 = vector.load %arg9[%c1_883, %c0_884] : memref<18x34xf32, #tpu.memory_space<vmem>>, vector<16x32xf32>
    %cst_885 = arith.constant -0.333333343 : f32
    %1017 = vector.broadcast %cst_885 : f32 to vector<16x32xf32>
    %1018 = arith.mulf %1016, %1017 : vector<16x32xf32>
    %1019 = arith.addf %1015, %1018 : vector<16x32xf32>
    %c1_886 = arith.constant 1 : index
    %c1_887 = arith.constant 1 : index
    %1020 = vector.load %arg9[%c1_886, %c1_887] : memref<18x34xf32, #tpu.memory_space<vmem>>, vector<16x32xf32>
    %cst_888 = arith.constant 2.66666675 : f32
    %1021 = vector.broadcast %cst_888 : f32 to vector<16x32xf32>
    %1022 = arith.mulf %1020, %1021 : vector<16x32xf32>
    %1023 = arith.addf %1019, %1022 : vector<16x32xf32>
    %c1_889 = arith.constant 1 : index
    %c2_890 = arith.constant 2 : index
    %1024 = vector.load %arg9[%c1_889, %c2_890] : memref<18x34xf32, #tpu.memory_space<vmem>>, vector<16x32xf32>
    %cst_891 = arith.constant -0.333333343 : f32
    %1025 = vector.broadcast %cst_891 : f32 to vector<16x32xf32>
    %1026 = arith.mulf %1024, %1025 : vector<16x32xf32>
    %1027 = arith.addf %1023, %1026 : vector<16x32xf32>
    %c2_892 = arith.constant 2 : index
    %c0_893 = arith.constant 0 : index
    %1028 = vector.load %arg9[%c2_892, %c0_893] : memref<18x34xf32, #tpu.memory_space<vmem>>, vector<16x32xf32>
    %cst_894 = arith.constant -0.333333343 : f32
    %1029 = vector.broadcast %cst_894 : f32 to vector<16x32xf32>
    %1030 = arith.mulf %1028, %1029 : vector<16x32xf32>
    %1031 = arith.addf %1027, %1030 : vector<16x32xf32>
    %c2_895 = arith.constant 2 : index
    %c1_896 = arith.constant 1 : index
    %1032 = vector.load %arg9[%c2_895, %c1_896] : memref<18x34xf32, #tpu.memory_space<vmem>>, vector<16x32xf32>
    %cst_897 = arith.constant -0.333333343 : f32
    %1033 = vector.broadcast %cst_897 : f32 to vector<16x32xf32>
    %1034 = arith.mulf %1032, %1033 : vector<16x32xf32>
    %1035 = arith.addf %1031, %1034 : vector<16x32xf32>
    %c2_898 = arith.constant 2 : index
    %c2_899 = arith.constant 2 : index
    %1036 = vector.load %arg9[%c2_898, %c2_899] : memref<18x34xf32, #tpu.memory_space<vmem>>, vector<16x32xf32>
    %cst_900 = arith.constant -0.333333343 : f32
    %1037 = vector.broadcast %cst_900 : f32 to vector<16x32xf32>
    %1038 = arith.mulf %1036, %1037 : vector<16x32xf32>
    %1039 = arith.addf %1035, %1038 : vector<16x32xf32>
    %1040 = arith.subf %1039, %487 : vector<16x32xf32>
    %c0_901 = arith.constant 0 : index
    %c0_902 = arith.constant 0 : index
    %1041 = vector.load %arg4[%c0_901, %c0_902] : memref<8x16xf32, #tpu.memory_space<vmem>>, vector<8x16xf32>
    %cst_903 = arith.constant dense<0.000000e+00> : vector<8x32xf32>
    %1042 = tpu.matmul %1041, %1040, %cst_903 {dimension_numbers = #tpu.dot_dimension_numbers<[1], [0], [0], [1], [0, 0, 1, 1], [], []>} : vector<8x16xf32>, vector<16x32xf32>, vector<8x32xf32> -> vector<8x32xf32>
    %c0_904 = arith.constant 0 : index
    %c0_905 = arith.constant 0 : index
    %1043 = vector.load %arg5[%c0_904, %c0_905] : memref<32x16xf32, #tpu.memory_space<vmem>>, vector<32x16xf32>
    %cst_906 = arith.constant dense<0.000000e+00> : vector<8x16xf32>
    %1044 = tpu.matmul %1042, %1043, %cst_906 {dimension_numbers = #tpu.dot_dimension_numbers<[1], [0], [0], [1], [0, 0, 1, 1], [], []>} : vector<8x32xf32>, vector<32x16xf32>, vector<8x16xf32> -> vector<8x16xf32>
    %c0_907 = arith.constant 0 : index
    %c0_908 = arith.constant 0 : index
    %1045 = vector.load %arg4[%c0_907, %c0_908] : memref<8x16xf32, #tpu.memory_space<vmem>>, vector<4x8xf32>
    %cst_909 = arith.constant dense<0.000000e+00> : vector<4x16xf32>
    %1046 = tpu.matmul %1045, %1044, %cst_909 {dimension_numbers = #tpu.dot_dimension_numbers<[1], [0], [0], [1], [0, 0, 1, 1], [], []>} : vector<4x8xf32>, vector<8x16xf32>, vector<4x16xf32> -> vector<4x16xf32>
    %c0_910 = arith.constant 0 : index
    %c0_911 = arith.constant 0 : index
    %1047 = vector.load %arg5[%c0_910, %c0_911] : memref<32x16xf32, #tpu.memory_space<vmem>>, vector<16x8xf32>
    %cst_912 = arith.constant dense<0.000000e+00> : vector<4x8xf32>
    %1048 = tpu.matmul %1046, %1047, %cst_912 {dimension_numbers = #tpu.dot_dimension_numbers<[1], [0], [0], [1], [0, 0, 1, 1], [], []>} : vector<4x16xf32>, vector<16x8xf32>, vector<4x8xf32> -> vector<4x8xf32>
    %c0_913 = arith.constant 0 : index
    %c0_914 = arith.constant 0 : index
    %1049 = vector.load %arg4[%c0_913, %c0_914] : memref<8x16xf32, #tpu.memory_space<vmem>>, vector<2x4xf32>
    %cst_915 = arith.constant dense<0.000000e+00> : vector<2x8xf32>
    %1050 = tpu.matmul %1049, %1048, %cst_915 {dimension_numbers = #tpu.dot_dimension_numbers<[1], [0], [0], [1], [0, 0, 1, 1], [], []>} : vector<2x4xf32>, vector<4x8xf32>, vector<2x8xf32> -> vector<2x8xf32>
    %c0_916 = arith.constant 0 : index
    %c0_917 = arith.constant 0 : index
    %1051 = vector.load %arg5[%c0_916, %c0_917] : memref<32x16xf32, #tpu.memory_space<vmem>>, vector<8x4xf32>
    %cst_918 = arith.constant dense<0.000000e+00> : vector<2x4xf32>
    %1052 = tpu.matmul %1050, %1051, %cst_918 {dimension_numbers = #tpu.dot_dimension_numbers<[1], [0], [0], [1], [0, 0, 1, 1], [], []>} : vector<2x8xf32>, vector<8x4xf32>, vector<2x4xf32> -> vector<2x4xf32>
    %c0_919 = arith.constant 0 : index
    %c0_920 = arith.constant 0 : index
    %1053 = vector.load %arg4[%c0_919, %c0_920] : memref<8x16xf32, #tpu.memory_space<vmem>>, vector<1x2xf32>
    %cst_921 = arith.constant dense<0.000000e+00> : vector<1x4xf32>
    %1054 = tpu.matmul %1053, %1052, %cst_921 {dimension_numbers = #tpu.dot_dimension_numbers<[1], [0], [0], [1], [0, 0, 1, 1], [], []>} : vector<1x2xf32>, vector<2x4xf32>, vector<1x4xf32> -> vector<1x4xf32>
    %c0_922 = arith.constant 0 : index
    %c0_923 = arith.constant 0 : index
    %1055 = vector.load %arg5[%c0_922, %c0_923] : memref<32x16xf32, #tpu.memory_space<vmem>>, vector<4x2xf32>
    %cst_924 = arith.constant dense<0.000000e+00> : vector<1x2xf32>
    %1056 = tpu.matmul %1054, %1055, %cst_924 {dimension_numbers = #tpu.dot_dimension_numbers<[1], [0], [0], [1], [0, 0, 1, 1], [], []>} : vector<1x4xf32>, vector<4x2xf32>, vector<1x2xf32> -> vector<1x2xf32>
    %cst_925 = arith.constant 3.750000e-01 : f32
    %1057 = vector.broadcast %cst_925 : f32 to vector<1x2xf32>
    %1058 = arith.mulf %1056, %1057 : vector<1x2xf32>
    %c0_926 = arith.constant 0 : index
    %c0_927 = arith.constant 0 : index
    %1059 = vector.load %arg7[%c0_926, %c0_927] : memref<16x32xf32, #tpu.memory_space<vmem>>, vector<2x4xf32>
    %cst_928 = arith.constant dense<0.000000e+00> : vector<1x4xf32>
    %1060 = tpu.matmul %1058, %1059, %cst_928 {dimension_numbers = #tpu.dot_dimension_numbers<[1], [0], [0], [1], [0, 0, 1, 1], [], []>} : vector<1x2xf32>, vector<2x4xf32>, vector<1x4xf32> -> vector<1x4xf32>
    %1061 = vector.shape_cast %1060 : vector<1x4xf32> to vector<1x4xf32>
    %1062 = vector.broadcast %1061 : vector<1x4xf32> to vector<2x4xf32>
    %cst_929 = arith.constant 0.000000e+00 : f32
    %1063 = vector.broadcast %cst_929 : f32 to vector<4x6xf32>
    %c0_930 = arith.constant 0 : index
    %c0_931 = arith.constant 0 : index
    %1064 = vector.load %arg9[%c0_930, %c0_931] : memref<18x34xf32, #tpu.memory_space<vmem>>, vector<4x6xf32>
    tpu.vector_store %arg9[%c0_930, %c0_931], %1063 {strides = array<i32>} : memref<18x34xf32, #tpu.memory_space<vmem>>, vector<4x6xf32>,
    %c1_932 = arith.constant 1 : index
    %c1_933 = arith.constant 1 : index
    %1065 = vector.load %arg9[%c1_932, %c1_933] : memref<18x34xf32, #tpu.memory_space<vmem>>, vector<2x4xf32>
    tpu.vector_store %arg9[%c1_932, %c1_933], %1062 {strides = array<i32>} : memref<18x34xf32, #tpu.memory_space<vmem>>, vector<2x4xf32>,
    %c0_934 = arith.constant 0 : index
    %c0_935 = arith.constant 0 : index
    %1066 = vector.load %arg9[%c0_934, %c0_935] : memref<18x34xf32, #tpu.memory_space<vmem>>, vector<2x4xf32>
    %cst_936 = arith.constant 1.250000e-01 : f32
    %1067 = vector.broadcast %cst_936 : f32 to vector<2x4xf32>
    %1068 = arith.mulf %1066, %1067 : vector<2x4xf32>
    %c0_937 = arith.constant 0 : index
    %c1_938 = arith.constant 1 : index
    %1069 = vector.load %arg9[%c0_937, %c1_938] : memref<18x34xf32, #tpu.memory_space<vmem>>, vector<2x4xf32>
    %cst_939 = arith.constant 1.250000e-01 : f32
    %1070 = vector.broadcast %cst_939 : f32 to vector<2x4xf32>
    %1071 = arith.mulf %1069, %1070 : vector<2x4xf32>
    %1072 = arith.addf %1068, %1071 : vector<2x4xf32>
    %c0_940 = arith.constant 0 : index
    %c2_941 = arith.constant 2 : index
    %1073 = vector.load %arg9[%c0_940, %c2_941] : memref<18x34xf32, #tpu.memory_space<vmem>>, vector<2x4xf32>
    %cst_942 = arith.constant 1.250000e-01 : f32
    %1074 = vector.broadcast %cst_942 : f32 to vector<2x4xf32>
    %1075 = arith.mulf %1073, %1074 : vector<2x4xf32>
    %1076 = arith.addf %1072, %1075 : vector<2x4xf32>
    %c1_943 = arith.constant 1 : index
    %c0_944 = arith.constant 0 : index
    %1077 = vector.load %arg9[%c1_943, %c0_944] : memref<18x34xf32, #tpu.memory_space<vmem>>, vector<2x4xf32>
    %cst_945 = arith.constant 1.250000e-01 : f32
    %1078 = vector.broadcast %cst_945 : f32 to vector<2x4xf32>
    %1079 = arith.mulf %1077, %1078 : vector<2x4xf32>
    %1080 = arith.addf %1076, %1079 : vector<2x4xf32>
    %c1_946 = arith.constant 1 : index
    %c1_947 = arith.constant 1 : index
    %1081 = vector.load %arg9[%c1_946, %c1_947] : memref<18x34xf32, #tpu.memory_space<vmem>>, vector<2x4xf32>
    %cst_948 = arith.constant -1.000000e+00 : f32
    %1082 = vector.broadcast %cst_948 : f32 to vector<2x4xf32>
    %1083 = arith.mulf %1081, %1082 : vector<2x4xf32>
    %1084 = arith.addf %1080, %1083 : vector<2x4xf32>
    %c1_949 = arith.constant 1 : index
    %c2_950 = arith.constant 2 : index
    %1085 = vector.load %arg9[%c1_949, %c2_950] : memref<18x34xf32, #tpu.memory_space<vmem>>, vector<2x4xf32>
    %cst_951 = arith.constant 1.250000e-01 : f32
    %1086 = vector.broadcast %cst_951 : f32 to vector<2x4xf32>
    %1087 = arith.mulf %1085, %1086 : vector<2x4xf32>
    %1088 = arith.addf %1084, %1087 : vector<2x4xf32>
    %c2_952 = arith.constant 2 : index
    %c0_953 = arith.constant 0 : index
    %1089 = vector.load %arg9[%c2_952, %c0_953] : memref<18x34xf32, #tpu.memory_space<vmem>>, vector<2x4xf32>
    %cst_954 = arith.constant 1.250000e-01 : f32
    %1090 = vector.broadcast %cst_954 : f32 to vector<2x4xf32>
    %1091 = arith.mulf %1089, %1090 : vector<2x4xf32>
    %1092 = arith.addf %1088, %1091 : vector<2x4xf32>
    %c2_955 = arith.constant 2 : index
    %c1_956 = arith.constant 1 : index
    %1093 = vector.load %arg9[%c2_955, %c1_956] : memref<18x34xf32, #tpu.memory_space<vmem>>, vector<2x4xf32>
    %cst_957 = arith.constant 1.250000e-01 : f32
    %1094 = vector.broadcast %cst_957 : f32 to vector<2x4xf32>
    %1095 = arith.mulf %1093, %1094 : vector<2x4xf32>
    %1096 = arith.addf %1092, %1095 : vector<2x4xf32>
    %c2_958 = arith.constant 2 : index
    %c2_959 = arith.constant 2 : index
    %1097 = vector.load %arg9[%c2_958, %c2_959] : memref<18x34xf32, #tpu.memory_space<vmem>>, vector<2x4xf32>
    %cst_960 = arith.constant 1.250000e-01 : f32
    %1098 = vector.broadcast %cst_960 : f32 to vector<2x4xf32>
    %1099 = arith.mulf %1097, %1098 : vector<2x4xf32>
    %1100 = arith.addf %1096, %1099 : vector<2x4xf32>
    %1101 = arith.addf %1062, %1100 : vector<2x4xf32>
    %cst_961 = arith.constant 3.750000e-01 : f32
    %1102 = vector.broadcast %cst_961 : f32 to vector<2x4xf32>
    %1103 = arith.mulf %1052, %1102 : vector<2x4xf32>
    %1104 = arith.addf %1101, %1103 : vector<2x4xf32>
    %c0_962 = arith.constant 0 : index
    %c0_963 = arith.constant 0 : index
    %1105 = vector.load %arg7[%c0_962, %c0_963] : memref<16x32xf32, #tpu.memory_space<vmem>>, vector<4x8xf32>
    %cst_964 = arith.constant dense<0.000000e+00> : vector<2x8xf32>
    %1106 = tpu.matmul %1104, %1105, %cst_964 {dimension_numbers = #tpu.dot_dimension_numbers<[1], [0], [0], [1], [0, 0, 1, 1], [], []>} : vector<2x4xf32>, vector<4x8xf32>, vector<2x8xf32> -> vector<2x8xf32>
    %c0_965 = arith.constant 0 : index
    %c0_966 = arith.constant 0 : index
    %1107 = vector.load %arg6[%c0_965, %c0_966] : memref<16x8xf32, #tpu.memory_space<vmem>>, vector<4x2xf32>
    %cst_967 = arith.constant dense<0.000000e+00> : vector<4x8xf32>
    %1108 = tpu.matmul %1107, %1106, %cst_967 {dimension_numbers = #tpu.dot_dimension_numbers<[1], [0], [0], [1], [0, 0, 1, 1], [], []>} : vector<4x2xf32>, vector<2x8xf32>, vector<4x8xf32> -> vector<4x8xf32>
    %cst_968 = arith.constant 0.000000e+00 : f32
    %1109 = vector.broadcast %cst_968 : f32 to vector<6x10xf32>
    %c0_969 = arith.constant 0 : index
    %c0_970 = arith.constant 0 : index
    %1110 = vector.load %arg9[%c0_969, %c0_970] : memref<18x34xf32, #tpu.memory_space<vmem>>, vector<6x10xf32>
    tpu.vector_store %arg9[%c0_969, %c0_970], %1109 {strides = array<i32>} : memref<18x34xf32, #tpu.memory_space<vmem>>, vector<6x10xf32>,
    %c1_971 = arith.constant 1 : index
    %c1_972 = arith.constant 1 : index
    %1111 = vector.load %arg9[%c1_971, %c1_972] : memref<18x34xf32, #tpu.memory_space<vmem>>, vector<4x8xf32>
    tpu.vector_store %arg9[%c1_971, %c1_972], %1108 {strides = array<i32>} : memref<18x34xf32, #tpu.memory_space<vmem>>, vector<4x8xf32>,
    %c0_973 = arith.constant 0 : index
    %c0_974 = arith.constant 0 : index
    %1112 = vector.load %arg9[%c0_973, %c0_974] : memref<18x34xf32, #tpu.memory_space<vmem>>, vector<4x8xf32>
    %cst_975 = arith.constant 1.250000e-01 : f32
    %1113 = vector.broadcast %cst_975 : f32 to vector<4x8xf32>
    %1114 = arith.mulf %1112, %1113 : vector<4x8xf32>
    %c0_976 = arith.constant 0 : index
    %c1_977 = arith.constant 1 : index
    %1115 = vector.load %arg9[%c0_976, %c1_977] : memref<18x34xf32, #tpu.memory_space<vmem>>, vector<4x8xf32>
    %cst_978 = arith.constant 1.250000e-01 : f32
    %1116 = vector.broadcast %cst_978 : f32 to vector<4x8xf32>
    %1117 = arith.mulf %1115, %1116 : vector<4x8xf32>
    %1118 = arith.addf %1114, %1117 : vector<4x8xf32>
    %c0_979 = arith.constant 0 : index
    %c2_980 = arith.constant 2 : index
    %1119 = vector.load %arg9[%c0_979, %c2_980] : memref<18x34xf32, #tpu.memory_space<vmem>>, vector<4x8xf32>
    %cst_981 = arith.constant 1.250000e-01 : f32
    %1120 = vector.broadcast %cst_981 : f32 to vector<4x8xf32>
    %1121 = arith.mulf %1119, %1120 : vector<4x8xf32>
    %1122 = arith.addf %1118, %1121 : vector<4x8xf32>
    %c1_982 = arith.constant 1 : index
    %c0_983 = arith.constant 0 : index
    %1123 = vector.load %arg9[%c1_982, %c0_983] : memref<18x34xf32, #tpu.memory_space<vmem>>, vector<4x8xf32>
    %cst_984 = arith.constant 1.250000e-01 : f32
    %1124 = vector.broadcast %cst_984 : f32 to vector<4x8xf32>
    %1125 = arith.mulf %1123, %1124 : vector<4x8xf32>
    %1126 = arith.addf %1122, %1125 : vector<4x8xf32>
    %c1_985 = arith.constant 1 : index
    %c1_986 = arith.constant 1 : index
    %1127 = vector.load %arg9[%c1_985, %c1_986] : memref<18x34xf32, #tpu.memory_space<vmem>>, vector<4x8xf32>
    %cst_987 = arith.constant -1.000000e+00 : f32
    %1128 = vector.broadcast %cst_987 : f32 to vector<4x8xf32>
    %1129 = arith.mulf %1127, %1128 : vector<4x8xf32>
    %1130 = arith.addf %1126, %1129 : vector<4x8xf32>
    %c1_988 = arith.constant 1 : index
    %c2_989 = arith.constant 2 : index
    %1131 = vector.load %arg9[%c1_988, %c2_989] : memref<18x34xf32, #tpu.memory_space<vmem>>, vector<4x8xf32>
    %cst_990 = arith.constant 1.250000e-01 : f32
    %1132 = vector.broadcast %cst_990 : f32 to vector<4x8xf32>
    %1133 = arith.mulf %1131, %1132 : vector<4x8xf32>
    %1134 = arith.addf %1130, %1133 : vector<4x8xf32>
    %c2_991 = arith.constant 2 : index
    %c0_992 = arith.constant 0 : index
    %1135 = vector.load %arg9[%c2_991, %c0_992] : memref<18x34xf32, #tpu.memory_space<vmem>>, vector<4x8xf32>
    %cst_993 = arith.constant 1.250000e-01 : f32
    %1136 = vector.broadcast %cst_993 : f32 to vector<4x8xf32>
    %1137 = arith.mulf %1135, %1136 : vector<4x8xf32>
    %1138 = arith.addf %1134, %1137 : vector<4x8xf32>
    %c2_994 = arith.constant 2 : index
    %c1_995 = arith.constant 1 : index
    %1139 = vector.load %arg9[%c2_994, %c1_995] : memref<18x34xf32, #tpu.memory_space<vmem>>, vector<4x8xf32>
    %cst_996 = arith.constant 1.250000e-01 : f32
    %1140 = vector.broadcast %cst_996 : f32 to vector<4x8xf32>
    %1141 = arith.mulf %1139, %1140 : vector<4x8xf32>
    %1142 = arith.addf %1138, %1141 : vector<4x8xf32>
    %c2_997 = arith.constant 2 : index
    %c2_998 = arith.constant 2 : index
    %1143 = vector.load %arg9[%c2_997, %c2_998] : memref<18x34xf32, #tpu.memory_space<vmem>>, vector<4x8xf32>
    %cst_999 = arith.constant 1.250000e-01 : f32
    %1144 = vector.broadcast %cst_999 : f32 to vector<4x8xf32>
    %1145 = arith.mulf %1143, %1144 : vector<4x8xf32>
    %1146 = arith.addf %1142, %1145 : vector<4x8xf32>
    %1147 = arith.addf %1108, %1146 : vector<4x8xf32>
    %cst_1000 = arith.constant 3.750000e-01 : f32
    %1148 = vector.broadcast %cst_1000 : f32 to vector<4x8xf32>
    %1149 = arith.mulf %1048, %1148 : vector<4x8xf32>
    %1150 = arith.addf %1147, %1149 : vector<4x8xf32>
    %c0_1001 = arith.constant 0 : index
    %c0_1002 = arith.constant 0 : index
    %1151 = vector.load %arg7[%c0_1001, %c0_1002] : memref<16x32xf32, #tpu.memory_space<vmem>>, vector<8x16xf32>
    %cst_1003 = arith.constant dense<0.000000e+00> : vector<4x16xf32>
    %1152 = tpu.matmul %1150, %1151, %cst_1003 {dimension_numbers = #tpu.dot_dimension_numbers<[1], [0], [0], [1], [0, 0, 1, 1], [], []>} : vector<4x8xf32>, vector<8x16xf32>, vector<4x16xf32> -> vector<4x16xf32>
    %c0_1004 = arith.constant 0 : index
    %c0_1005 = arith.constant 0 : index
    %1153 = vector.load %arg6[%c0_1004, %c0_1005] : memref<16x8xf32, #tpu.memory_space<vmem>>, vector<8x4xf32>
    %cst_1006 = arith.constant dense<0.000000e+00> : vector<8x16xf32>
    %1154 = tpu.matmul %1153, %1152, %cst_1006 {dimension_numbers = #tpu.dot_dimension_numbers<[1], [0], [0], [1], [0, 0, 1, 1], [], []>} : vector<8x4xf32>, vector<4x16xf32>, vector<8x16xf32> -> vector<8x16xf32>
    %cst_1007 = arith.constant 0.000000e+00 : f32
    %1155 = vector.broadcast %cst_1007 : f32 to vector<10x18xf32>
    %c0_1008 = arith.constant 0 : index
    %c0_1009 = arith.constant 0 : index
    %1156 = vector.load %arg9[%c0_1008, %c0_1009] : memref<18x34xf32, #tpu.memory_space<vmem>>, vector<10x18xf32>
    tpu.vector_store %arg9[%c0_1008, %c0_1009], %1155 {strides = array<i32>} : memref<18x34xf32, #tpu.memory_space<vmem>>, vector<10x18xf32>,
    %c1_1010 = arith.constant 1 : index
    %c1_1011 = arith.constant 1 : index
    %1157 = vector.load %arg9[%c1_1010, %c1_1011] : memref<18x34xf32, #tpu.memory_space<vmem>>, vector<8x16xf32>
    tpu.vector_store %arg9[%c1_1010, %c1_1011], %1154 {strides = array<i32>} : memref<18x34xf32, #tpu.memory_space<vmem>>, vector<8x16xf32>,
    %c0_1012 = arith.constant 0 : index
    %c0_1013 = arith.constant 0 : index
    %1158 = vector.load %arg9[%c0_1012, %c0_1013] : memref<18x34xf32, #tpu.memory_space<vmem>>, vector<8x16xf32>
    %cst_1014 = arith.constant 1.250000e-01 : f32
    %1159 = vector.broadcast %cst_1014 : f32 to vector<8x16xf32>
    %1160 = arith.mulf %1158, %1159 : vector<8x16xf32>
    %c0_1015 = arith.constant 0 : index
    %c1_1016 = arith.constant 1 : index
    %1161 = vector.load %arg9[%c0_1015, %c1_1016] : memref<18x34xf32, #tpu.memory_space<vmem>>, vector<8x16xf32>
    %cst_1017 = arith.constant 1.250000e-01 : f32
    %1162 = vector.broadcast %cst_1017 : f32 to vector<8x16xf32>
    %1163 = arith.mulf %1161, %1162 : vector<8x16xf32>
    %1164 = arith.addf %1160, %1163 : vector<8x16xf32>
    %c0_1018 = arith.constant 0 : index
    %c2_1019 = arith.constant 2 : index
    %1165 = vector.load %arg9[%c0_1018, %c2_1019] : memref<18x34xf32, #tpu.memory_space<vmem>>, vector<8x16xf32>
    %cst_1020 = arith.constant 1.250000e-01 : f32
    %1166 = vector.broadcast %cst_1020 : f32 to vector<8x16xf32>
    %1167 = arith.mulf %1165, %1166 : vector<8x16xf32>
    %1168 = arith.addf %1164, %1167 : vector<8x16xf32>
    %c1_1021 = arith.constant 1 : index
    %c0_1022 = arith.constant 0 : index
    %1169 = vector.load %arg9[%c1_1021, %c0_1022] : memref<18x34xf32, #tpu.memory_space<vmem>>, vector<8x16xf32>
    %cst_1023 = arith.constant 1.250000e-01 : f32
    %1170 = vector.broadcast %cst_1023 : f32 to vector<8x16xf32>
    %1171 = arith.mulf %1169, %1170 : vector<8x16xf32>
    %1172 = arith.addf %1168, %1171 : vector<8x16xf32>
    %c1_1024 = arith.constant 1 : index
    %c1_1025 = arith.constant 1 : index
    %1173 = vector.load %arg9[%c1_1024, %c1_1025] : memref<18x34xf32, #tpu.memory_space<vmem>>, vector<8x16xf32>
    %cst_1026 = arith.constant -1.000000e+00 : f32
    %1174 = vector.broadcast %cst_1026 : f32 to vector<8x16xf32>
    %1175 = arith.mulf %1173, %1174 : vector<8x16xf32>
    %1176 = arith.addf %1172, %1175 : vector<8x16xf32>
    %c1_1027 = arith.constant 1 : index
    %c2_1028 = arith.constant 2 : index
    %1177 = vector.load %arg9[%c1_1027, %c2_1028] : memref<18x34xf32, #tpu.memory_space<vmem>>, vector<8x16xf32>
    %cst_1029 = arith.constant 1.250000e-01 : f32
    %1178 = vector.broadcast %cst_1029 : f32 to vector<8x16xf32>
    %1179 = arith.mulf %1177, %1178 : vector<8x16xf32>
    %1180 = arith.addf %1176, %1179 : vector<8x16xf32>
    %c2_1030 = arith.constant 2 : index
    %c0_1031 = arith.constant 0 : index
    %1181 = vector.load %arg9[%c2_1030, %c0_1031] : memref<18x34xf32, #tpu.memory_space<vmem>>, vector<8x16xf32>
    %cst_1032 = arith.constant 1.250000e-01 : f32
    %1182 = vector.broadcast %cst_1032 : f32 to vector<8x16xf32>
    %1183 = arith.mulf %1181, %1182 : vector<8x16xf32>
    %1184 = arith.addf %1180, %1183 : vector<8x16xf32>
    %c2_1033 = arith.constant 2 : index
    %c1_1034 = arith.constant 1 : index
    %1185 = vector.load %arg9[%c2_1033, %c1_1034] : memref<18x34xf32, #tpu.memory_space<vmem>>, vector<8x16xf32>
    %cst_1035 = arith.constant 1.250000e-01 : f32
    %1186 = vector.broadcast %cst_1035 : f32 to vector<8x16xf32>
    %1187 = arith.mulf %1185, %1186 : vector<8x16xf32>
    %1188 = arith.addf %1184, %1187 : vector<8x16xf32>
    %c2_1036 = arith.constant 2 : index
    %c2_1037 = arith.constant 2 : index
    %1189 = vector.load %arg9[%c2_1036, %c2_1037] : memref<18x34xf32, #tpu.memory_space<vmem>>, vector<8x16xf32>
    %cst_1038 = arith.constant 1.250000e-01 : f32
    %1190 = vector.broadcast %cst_1038 : f32 to vector<8x16xf32>
    %1191 = arith.mulf %1189, %1190 : vector<8x16xf32>
    %1192 = arith.addf %1188, %1191 : vector<8x16xf32>
    %1193 = arith.addf %1154, %1192 : vector<8x16xf32>
    %cst_1039 = arith.constant 3.750000e-01 : f32
    %1194 = vector.broadcast %cst_1039 : f32 to vector<8x16xf32>
    %1195 = arith.mulf %1044, %1194 : vector<8x16xf32>
    %1196 = arith.addf %1193, %1195 : vector<8x16xf32>
    %c0_1040 = arith.constant 0 : index
    %c0_1041 = arith.constant 0 : index
    %1197 = vector.load %arg7[%c0_1040, %c0_1041] : memref<16x32xf32, #tpu.memory_space<vmem>>, vector<16x32xf32>
    %cst_1042 = arith.constant dense<0.000000e+00> : vector<8x32xf32>
    %1198 = tpu.matmul %1196, %1197, %cst_1042 {dimension_numbers = #tpu.dot_dimension_numbers<[1], [0], [0], [1], [0, 0, 1, 1], [], []>} : vector<8x16xf32>, vector<16x32xf32>, vector<8x32xf32> -> vector<8x32xf32>
    %c0_1043 = arith.constant 0 : index
    %c0_1044 = arith.constant 0 : index
    %1199 = vector.load %arg6[%c0_1043, %c0_1044] : memref<16x8xf32, #tpu.memory_space<vmem>>, vector<16x8xf32>
    %cst_1045 = arith.constant dense<0.000000e+00> : vector<16x32xf32>
    %1200 = tpu.matmul %1199, %1198, %cst_1045 {dimension_numbers = #tpu.dot_dimension_numbers<[1], [0], [0], [1], [0, 0, 1, 1], [], []>} : vector<16x8xf32>, vector<8x32xf32>, vector<16x32xf32> -> vector<16x32xf32>
    %1201 = arith.subf %995, %1200 : vector<16x32xf32>
    %c1_1046 = arith.constant 1 : index
    %c1_1047 = arith.constant 1 : index
    %1202 = vector.load %arg9[%c1_1046, %c1_1047] : memref<18x34xf32, #tpu.memory_space<vmem>>, vector<16x32xf32>
    tpu.vector_store %arg9[%c1_1046, %c1_1047], %1201 {strides = array<i32>} : memref<18x34xf32, #tpu.memory_space<vmem>>, vector<16x32xf32>,
    %c1_1048 = arith.constant 1 : index
    %c1_1049 = arith.constant 1 : index
    %1203 = vector.load %arg9[%c1_1048, %c1_1049] : memref<18x34xf32, #tpu.memory_space<vmem>>, vector<16x1xf32>
    %c1_1050 = arith.constant 1 : index
    %c0_1051 = arith.constant 0 : index
    %1204 = vector.load %arg9[%c1_1050, %c0_1051] : memref<18x34xf32, #tpu.memory_space<vmem>>, vector<16x1xf32>
    tpu.vector_store %arg9[%c1_1050, %c0_1051], %1203 {strides = array<i32>} : memref<18x34xf32, #tpu.memory_space<vmem>>, vector<16x1xf32>,
    %c1_1052 = arith.constant 1 : index
    %c32_1053 = arith.constant 32 : index
    %1205 = vector.load %arg9[%c1_1052, %c32_1053] : memref<18x34xf32, #tpu.memory_space<vmem>>, vector<16x1xf32>
    %c1_1054 = arith.constant 1 : index
    %c33_1055 = arith.constant 33 : index
    %1206 = vector.load %arg9[%c1_1054, %c33_1055] : memref<18x34xf32, #tpu.memory_space<vmem>>, vector<16x1xf32>
    tpu.vector_store %arg9[%c1_1054, %c33_1055], %1205 {strides = array<i32>} : memref<18x34xf32, #tpu.memory_space<vmem>>, vector<16x1xf32>,
    %c1_1056 = arith.constant 1 : index
    %c0_1057 = arith.constant 0 : index
    %1207 = vector.load %arg9[%c1_1056, %c0_1057] : memref<18x34xf32, #tpu.memory_space<vmem>>, vector<1x34xf32>
    %c0_1058 = arith.constant 0 : index
    %c0_1059 = arith.constant 0 : index
    %1208 = vector.load %arg9[%c0_1058, %c0_1059] : memref<18x34xf32, #tpu.memory_space<vmem>>, vector<1x34xf32>
    tpu.vector_store %arg9[%c0_1058, %c0_1059], %1207 {strides = array<i32>} : memref<18x34xf32, #tpu.memory_space<vmem>>, vector<1x34xf32>,
    %c16_1060 = arith.constant 16 : index
    %c0_1061 = arith.constant 0 : index
    %1209 = vector.load %arg9[%c16_1060, %c0_1061] : memref<18x34xf32, #tpu.memory_space<vmem>>, vector<1x34xf32>
    %c17_1062 = arith.constant 17 : index
    %c0_1063 = arith.constant 0 : index
    %1210 = vector.load %arg9[%c17_1062, %c0_1063] : memref<18x34xf32, #tpu.memory_space<vmem>>, vector<1x34xf32>
    tpu.vector_store %arg9[%c17_1062, %c0_1063], %1209 {strides = array<i32>} : memref<18x34xf32, #tpu.memory_space<vmem>>, vector<1x34xf32>,
    %c0_1064 = arith.constant 0 : index
    %c0_1065 = arith.constant 0 : index
    %1211 = vector.load %arg9[%c0_1064, %c0_1065] : memref<18x34xf32, #tpu.memory_space<vmem>>, vector<16x32xf32>
    %cst_1066 = arith.constant 1.250000e-01 : f32
    %1212 = vector.broadcast %cst_1066 : f32 to vector<16x32xf32>
    %1213 = arith.mulf %1211, %1212 : vector<16x32xf32>
    %c0_1067 = arith.constant 0 : index
    %c1_1068 = arith.constant 1 : index
    %1214 = vector.load %arg9[%c0_1067, %c1_1068] : memref<18x34xf32, #tpu.memory_space<vmem>>, vector<16x32xf32>
    %cst_1069 = arith.constant 1.250000e-01 : f32
    %1215 = vector.broadcast %cst_1069 : f32 to vector<16x32xf32>
    %1216 = arith.mulf %1214, %1215 : vector<16x32xf32>
    %1217 = arith.addf %1213, %1216 : vector<16x32xf32>
    %c0_1070 = arith.constant 0 : index
    %c2_1071 = arith.constant 2 : index
    %1218 = vector.load %arg9[%c0_1070, %c2_1071] : memref<18x34xf32, #tpu.memory_space<vmem>>, vector<16x32xf32>
    %cst_1072 = arith.constant 1.250000e-01 : f32
    %1219 = vector.broadcast %cst_1072 : f32 to vector<16x32xf32>
    %1220 = arith.mulf %1218, %1219 : vector<16x32xf32>
    %1221 = arith.addf %1217, %1220 : vector<16x32xf32>
    %c1_1073 = arith.constant 1 : index
    %c0_1074 = arith.constant 0 : index
    %1222 = vector.load %arg9[%c1_1073, %c0_1074] : memref<18x34xf32, #tpu.memory_space<vmem>>, vector<16x32xf32>
    %cst_1075 = arith.constant 1.250000e-01 : f32
    %1223 = vector.broadcast %cst_1075 : f32 to vector<16x32xf32>
    %1224 = arith.mulf %1222, %1223 : vector<16x32xf32>
    %1225 = arith.addf %1221, %1224 : vector<16x32xf32>
    %c1_1076 = arith.constant 1 : index
    %c1_1077 = arith.constant 1 : index
    %1226 = vector.load %arg9[%c1_1076, %c1_1077] : memref<18x34xf32, #tpu.memory_space<vmem>>, vector<16x32xf32>
    %cst_1078 = arith.constant -1.000000e+00 : f32
    %1227 = vector.broadcast %cst_1078 : f32 to vector<16x32xf32>
    %1228 = arith.mulf %1226, %1227 : vector<16x32xf32>
    %1229 = arith.addf %1225, %1228 : vector<16x32xf32>
    %c1_1079 = arith.constant 1 : index
    %c2_1080 = arith.constant 2 : index
    %1230 = vector.load %arg9[%c1_1079, %c2_1080] : memref<18x34xf32, #tpu.memory_space<vmem>>, vector<16x32xf32>
    %cst_1081 = arith.constant 1.250000e-01 : f32
    %1231 = vector.broadcast %cst_1081 : f32 to vector<16x32xf32>
    %1232 = arith.mulf %1230, %1231 : vector<16x32xf32>
    %1233 = arith.addf %1229, %1232 : vector<16x32xf32>
    %c2_1082 = arith.constant 2 : index
    %c0_1083 = arith.constant 0 : index
    %1234 = vector.load %arg9[%c2_1082, %c0_1083] : memref<18x34xf32, #tpu.memory_space<vmem>>, vector<16x32xf32>
    %cst_1084 = arith.constant 1.250000e-01 : f32
    %1235 = vector.broadcast %cst_1084 : f32 to vector<16x32xf32>
    %1236 = arith.mulf %1234, %1235 : vector<16x32xf32>
    %1237 = arith.addf %1233, %1236 : vector<16x32xf32>
    %c2_1085 = arith.constant 2 : index
    %c1_1086 = arith.constant 1 : index
    %1238 = vector.load %arg9[%c2_1085, %c1_1086] : memref<18x34xf32, #tpu.memory_space<vmem>>, vector<16x32xf32>
    %cst_1087 = arith.constant 1.250000e-01 : f32
    %1239 = vector.broadcast %cst_1087 : f32 to vector<16x32xf32>
    %1240 = arith.mulf %1238, %1239 : vector<16x32xf32>
    %1241 = arith.addf %1237, %1240 : vector<16x32xf32>
    %c2_1088 = arith.constant 2 : index
    %c2_1089 = arith.constant 2 : index
    %1242 = vector.load %arg9[%c2_1088, %c2_1089] : memref<18x34xf32, #tpu.memory_space<vmem>>, vector<16x32xf32>
    %cst_1090 = arith.constant 1.250000e-01 : f32
    %1243 = vector.broadcast %cst_1090 : f32 to vector<16x32xf32>
    %1244 = arith.mulf %1242, %1243 : vector<16x32xf32>
    %1245 = arith.addf %1241, %1244 : vector<16x32xf32>
    %1246 = arith.addf %1201, %1245 : vector<16x32xf32>
    %cst_1091 = arith.constant 3.750000e-01 : f32
    %1247 = vector.broadcast %cst_1091 : f32 to vector<16x32xf32>
    %1248 = arith.mulf %487, %1247 : vector<16x32xf32>
    %1249 = arith.addf %1246, %1248 : vector<16x32xf32>
    %c1_1092 = arith.constant 1 : index
    %c1_1093 = arith.constant 1 : index
    %1250 = vector.load %arg9[%c1_1092, %c1_1093] : memref<18x34xf32, #tpu.memory_space<vmem>>, vector<16x32xf32>
    tpu.vector_store %arg9[%c1_1092, %c1_1093], %1249 {strides = array<i32>} : memref<18x34xf32, #tpu.memory_space<vmem>>, vector<16x32xf32>,
    %c1_1094 = arith.constant 1 : index
    %c1_1095 = arith.constant 1 : index
    %1251 = vector.load %arg9[%c1_1094, %c1_1095] : memref<18x34xf32, #tpu.memory_space<vmem>>, vector<16x1xf32>
    %c1_1096 = arith.constant 1 : index
    %c0_1097 = arith.constant 0 : index
    %1252 = vector.load %arg9[%c1_1096, %c0_1097] : memref<18x34xf32, #tpu.memory_space<vmem>>, vector<16x1xf32>
    tpu.vector_store %arg9[%c1_1096, %c0_1097], %1251 {strides = array<i32>} : memref<18x34xf32, #tpu.memory_space<vmem>>, vector<16x1xf32>,
    %c1_1098 = arith.constant 1 : index
    %c32_1099 = arith.constant 32 : index
    %1253 = vector.load %arg9[%c1_1098, %c32_1099] : memref<18x34xf32, #tpu.memory_space<vmem>>, vector<16x1xf32>
    %c1_1100 = arith.constant 1 : index
    %c33_1101 = arith.constant 33 : index
    %1254 = vector.load %arg9[%c1_1100, %c33_1101] : memref<18x34xf32, #tpu.memory_space<vmem>>, vector<16x1xf32>
    tpu.vector_store %arg9[%c1_1100, %c33_1101], %1253 {strides = array<i32>} : memref<18x34xf32, #tpu.memory_space<vmem>>, vector<16x1xf32>,
    %c1_1102 = arith.constant 1 : index
    %c0_1103 = arith.constant 0 : index
    %1255 = vector.load %arg9[%c1_1102, %c0_1103] : memref<18x34xf32, #tpu.memory_space<vmem>>, vector<1x34xf32>
    %c0_1104 = arith.constant 0 : index
    %c0_1105 = arith.constant 0 : index
    %1256 = vector.load %arg9[%c0_1104, %c0_1105] : memref<18x34xf32, #tpu.memory_space<vmem>>, vector<1x34xf32>
    tpu.vector_store %arg9[%c0_1104, %c0_1105], %1255 {strides = array<i32>} : memref<18x34xf32, #tpu.memory_space<vmem>>, vector<1x34xf32>,
    %c16_1106 = arith.constant 16 : index
    %c0_1107 = arith.constant 0 : index
    %1257 = vector.load %arg9[%c16_1106, %c0_1107] : memref<18x34xf32, #tpu.memory_space<vmem>>, vector<1x34xf32>
    %c17_1108 = arith.constant 17 : index
    %c0_1109 = arith.constant 0 : index
    %1258 = vector.load %arg9[%c17_1108, %c0_1109] : memref<18x34xf32, #tpu.memory_space<vmem>>, vector<1x34xf32>
    tpu.vector_store %arg9[%c17_1108, %c0_1109], %1257 {strides = array<i32>} : memref<18x34xf32, #tpu.memory_space<vmem>>, vector<1x34xf32>,
    %c0_1110 = arith.constant 0 : index
    %c0_1111 = arith.constant 0 : index
    %1259 = vector.load %arg9[%c0_1110, %c0_1111] : memref<18x34xf32, #tpu.memory_space<vmem>>, vector<16x32xf32>
    %cst_1112 = arith.constant -0.333333343 : f32
    %1260 = vector.broadcast %cst_1112 : f32 to vector<16x32xf32>
    %1261 = arith.mulf %1259, %1260 : vector<16x32xf32>
    %c0_1113 = arith.constant 0 : index
    %c1_1114 = arith.constant 1 : index
    %1262 = vector.load %arg9[%c0_1113, %c1_1114] : memref<18x34xf32, #tpu.memory_space<vmem>>, vector<16x32xf32>
    %cst_1115 = arith.constant -0.333333343 : f32
    %1263 = vector.broadcast %cst_1115 : f32 to vector<16x32xf32>
    %1264 = arith.mulf %1262, %1263 : vector<16x32xf32>
    %1265 = arith.addf %1261, %1264 : vector<16x32xf32>
    %c0_1116 = arith.constant 0 : index
    %c2_1117 = arith.constant 2 : index
    %1266 = vector.load %arg9[%c0_1116, %c2_1117] : memref<18x34xf32, #tpu.memory_space<vmem>>, vector<16x32xf32>
    %cst_1118 = arith.constant -0.333333343 : f32
    %1267 = vector.broadcast %cst_1118 : f32 to vector<16x32xf32>
    %1268 = arith.mulf %1266, %1267 : vector<16x32xf32>
    %1269 = arith.addf %1265, %1268 : vector<16x32xf32>
    %c1_1119 = arith.constant 1 : index
    %c0_1120 = arith.constant 0 : index
    %1270 = vector.load %arg9[%c1_1119, %c0_1120] : memref<18x34xf32, #tpu.memory_space<vmem>>, vector<16x32xf32>
    %cst_1121 = arith.constant -0.333333343 : f32
    %1271 = vector.broadcast %cst_1121 : f32 to vector<16x32xf32>
    %1272 = arith.mulf %1270, %1271 : vector<16x32xf32>
    %1273 = arith.addf %1269, %1272 : vector<16x32xf32>
    %c1_1122 = arith.constant 1 : index
    %c1_1123 = arith.constant 1 : index
    %1274 = vector.load %arg9[%c1_1122, %c1_1123] : memref<18x34xf32, #tpu.memory_space<vmem>>, vector<16x32xf32>
    %cst_1124 = arith.constant 2.66666675 : f32
    %1275 = vector.broadcast %cst_1124 : f32 to vector<16x32xf32>
    %1276 = arith.mulf %1274, %1275 : vector<16x32xf32>
    %1277 = arith.addf %1273, %1276 : vector<16x32xf32>
    %c1_1125 = arith.constant 1 : index
    %c2_1126 = arith.constant 2 : index
    %1278 = vector.load %arg9[%c1_1125, %c2_1126] : memref<18x34xf32, #tpu.memory_space<vmem>>, vector<16x32xf32>
    %cst_1127 = arith.constant -0.333333343 : f32
    %1279 = vector.broadcast %cst_1127 : f32 to vector<16x32xf32>
    %1280 = arith.mulf %1278, %1279 : vector<16x32xf32>
    %1281 = arith.addf %1277, %1280 : vector<16x32xf32>
    %c2_1128 = arith.constant 2 : index
    %c0_1129 = arith.constant 0 : index
    %1282 = vector.load %arg9[%c2_1128, %c0_1129] : memref<18x34xf32, #tpu.memory_space<vmem>>, vector<16x32xf32>
    %cst_1130 = arith.constant -0.333333343 : f32
    %1283 = vector.broadcast %cst_1130 : f32 to vector<16x32xf32>
    %1284 = arith.mulf %1282, %1283 : vector<16x32xf32>
    %1285 = arith.addf %1281, %1284 : vector<16x32xf32>
    %c2_1131 = arith.constant 2 : index
    %c1_1132 = arith.constant 1 : index
    %1286 = vector.load %arg9[%c2_1131, %c1_1132] : memref<18x34xf32, #tpu.memory_space<vmem>>, vector<16x32xf32>
    %cst_1133 = arith.constant -0.333333343 : f32
    %1287 = vector.broadcast %cst_1133 : f32 to vector<16x32xf32>
    %1288 = arith.mulf %1286, %1287 : vector<16x32xf32>
    %1289 = arith.addf %1285, %1288 : vector<16x32xf32>
    %c2_1134 = arith.constant 2 : index
    %c2_1135 = arith.constant 2 : index
    %1290 = vector.load %arg9[%c2_1134, %c2_1135] : memref<18x34xf32, #tpu.memory_space<vmem>>, vector<16x32xf32>
    %cst_1136 = arith.constant -0.333333343 : f32
    %1291 = vector.broadcast %cst_1136 : f32 to vector<16x32xf32>
    %1292 = arith.mulf %1290, %1291 : vector<16x32xf32>
    %1293 = arith.addf %1289, %1292 : vector<16x32xf32>
    %1294 = arith.subf %1293, %487 : vector<16x32xf32>
    %c0_1137 = arith.constant 0 : index
    %c0_1138 = arith.constant 0 : index
    %1295 = vector.load %arg4[%c0_1137, %c0_1138] : memref<8x16xf32, #tpu.memory_space<vmem>>, vector<8x16xf32>
    %cst_1139 = arith.constant dense<0.000000e+00> : vector<8x32xf32>
    %1296 = tpu.matmul %1295, %1294, %cst_1139 {dimension_numbers = #tpu.dot_dimension_numbers<[1], [0], [0], [1], [0, 0, 1, 1], [], []>} : vector<8x16xf32>, vector<16x32xf32>, vector<8x32xf32> -> vector<8x32xf32>
    %c0_1140 = arith.constant 0 : index
    %c0_1141 = arith.constant 0 : index
    %1297 = vector.load %arg5[%c0_1140, %c0_1141] : memref<32x16xf32, #tpu.memory_space<vmem>>, vector<32x16xf32>
    %cst_1142 = arith.constant dense<0.000000e+00> : vector<8x16xf32>
    %1298 = tpu.matmul %1296, %1297, %cst_1142 {dimension_numbers = #tpu.dot_dimension_numbers<[1], [0], [0], [1], [0, 0, 1, 1], [], []>} : vector<8x32xf32>, vector<32x16xf32>, vector<8x16xf32> -> vector<8x16xf32>
    %c0_1143 = arith.constant 0 : index
    %c0_1144 = arith.constant 0 : index
    %1299 = vector.load %arg4[%c0_1143, %c0_1144] : memref<8x16xf32, #tpu.memory_space<vmem>>, vector<4x8xf32>
    %cst_1145 = arith.constant dense<0.000000e+00> : vector<4x16xf32>
    %1300 = tpu.matmul %1299, %1298, %cst_1145 {dimension_numbers = #tpu.dot_dimension_numbers<[1], [0], [0], [1], [0, 0, 1, 1], [], []>} : vector<4x8xf32>, vector<8x16xf32>, vector<4x16xf32> -> vector<4x16xf32>
    %c0_1146 = arith.constant 0 : index
    %c0_1147 = arith.constant 0 : index
    %1301 = vector.load %arg5[%c0_1146, %c0_1147] : memref<32x16xf32, #tpu.memory_space<vmem>>, vector<16x8xf32>
    %cst_1148 = arith.constant dense<0.000000e+00> : vector<4x8xf32>
    %1302 = tpu.matmul %1300, %1301, %cst_1148 {dimension_numbers = #tpu.dot_dimension_numbers<[1], [0], [0], [1], [0, 0, 1, 1], [], []>} : vector<4x16xf32>, vector<16x8xf32>, vector<4x8xf32> -> vector<4x8xf32>
    %c0_1149 = arith.constant 0 : index
    %c0_1150 = arith.constant 0 : index
    %1303 = vector.load %arg4[%c0_1149, %c0_1150] : memref<8x16xf32, #tpu.memory_space<vmem>>, vector<2x4xf32>
    %cst_1151 = arith.constant dense<0.000000e+00> : vector<2x8xf32>
    %1304 = tpu.matmul %1303, %1302, %cst_1151 {dimension_numbers = #tpu.dot_dimension_numbers<[1], [0], [0], [1], [0, 0, 1, 1], [], []>} : vector<2x4xf32>, vector<4x8xf32>, vector<2x8xf32> -> vector<2x8xf32>
    %c0_1152 = arith.constant 0 : index
    %c0_1153 = arith.constant 0 : index
    %1305 = vector.load %arg5[%c0_1152, %c0_1153] : memref<32x16xf32, #tpu.memory_space<vmem>>, vector<8x4xf32>
    %cst_1154 = arith.constant dense<0.000000e+00> : vector<2x4xf32>
    %1306 = tpu.matmul %1304, %1305, %cst_1154 {dimension_numbers = #tpu.dot_dimension_numbers<[1], [0], [0], [1], [0, 0, 1, 1], [], []>} : vector<2x8xf32>, vector<8x4xf32>, vector<2x4xf32> -> vector<2x4xf32>
    %c0_1155 = arith.constant 0 : index
    %c0_1156 = arith.constant 0 : index
    %1307 = vector.load %arg4[%c0_1155, %c0_1156] : memref<8x16xf32, #tpu.memory_space<vmem>>, vector<1x2xf32>
    %cst_1157 = arith.constant dense<0.000000e+00> : vector<1x4xf32>
    %1308 = tpu.matmul %1307, %1306, %cst_1157 {dimension_numbers = #tpu.dot_dimension_numbers<[1], [0], [0], [1], [0, 0, 1, 1], [], []>} : vector<1x2xf32>, vector<2x4xf32>, vector<1x4xf32> -> vector<1x4xf32>
    %c0_1158 = arith.constant 0 : index
    %c0_1159 = arith.constant 0 : index
    %1309 = vector.load %arg5[%c0_1158, %c0_1159] : memref<32x16xf32, #tpu.memory_space<vmem>>, vector<4x2xf32>
    %cst_1160 = arith.constant dense<0.000000e+00> : vector<1x2xf32>
    %1310 = tpu.matmul %1308, %1309, %cst_1160 {dimension_numbers = #tpu.dot_dimension_numbers<[1], [0], [0], [1], [0, 0, 1, 1], [], []>} : vector<1x4xf32>, vector<4x2xf32>, vector<1x2xf32> -> vector<1x2xf32>
    %cst_1161 = arith.constant 3.750000e-01 : f32
    %1311 = vector.broadcast %cst_1161 : f32 to vector<1x2xf32>
    %1312 = arith.mulf %1310, %1311 : vector<1x2xf32>
    %c0_1162 = arith.constant 0 : index
    %c0_1163 = arith.constant 0 : index
    %1313 = vector.load %arg7[%c0_1162, %c0_1163] : memref<16x32xf32, #tpu.memory_space<vmem>>, vector<2x4xf32>
    %cst_1164 = arith.constant dense<0.000000e+00> : vector<1x4xf32>
    %1314 = tpu.matmul %1312, %1313, %cst_1164 {dimension_numbers = #tpu.dot_dimension_numbers<[1], [0], [0], [1], [0, 0, 1, 1], [], []>} : vector<1x2xf32>, vector<2x4xf32>, vector<1x4xf32> -> vector<1x4xf32>
    %1315 = vector.shape_cast %1314 : vector<1x4xf32> to vector<1x4xf32>
    %1316 = vector.broadcast %1315 : vector<1x4xf32> to vector<2x4xf32>
    %cst_1165 = arith.constant 0.000000e+00 : f32
    %1317 = vector.broadcast %cst_1165 : f32 to vector<4x6xf32>
    %c0_1166 = arith.constant 0 : index
    %c0_1167 = arith.constant 0 : index
    %1318 = vector.load %arg9[%c0_1166, %c0_1167] : memref<18x34xf32, #tpu.memory_space<vmem>>, vector<4x6xf32>
    tpu.vector_store %arg9[%c0_1166, %c0_1167], %1317 {strides = array<i32>} : memref<18x34xf32, #tpu.memory_space<vmem>>, vector<4x6xf32>,
    %c1_1168 = arith.constant 1 : index
    %c1_1169 = arith.constant 1 : index
    %1319 = vector.load %arg9[%c1_1168, %c1_1169] : memref<18x34xf32, #tpu.memory_space<vmem>>, vector<2x4xf32>
    tpu.vector_store %arg9[%c1_1168, %c1_1169], %1316 {strides = array<i32>} : memref<18x34xf32, #tpu.memory_space<vmem>>, vector<2x4xf32>,
    %c0_1170 = arith.constant 0 : index
    %c0_1171 = arith.constant 0 : index
    %1320 = vector.load %arg9[%c0_1170, %c0_1171] : memref<18x34xf32, #tpu.memory_space<vmem>>, vector<2x4xf32>
    %cst_1172 = arith.constant 1.250000e-01 : f32
    %1321 = vector.broadcast %cst_1172 : f32 to vector<2x4xf32>
    %1322 = arith.mulf %1320, %1321 : vector<2x4xf32>
    %c0_1173 = arith.constant 0 : index
    %c1_1174 = arith.constant 1 : index
    %1323 = vector.load %arg9[%c0_1173, %c1_1174] : memref<18x34xf32, #tpu.memory_space<vmem>>, vector<2x4xf32>
    %cst_1175 = arith.constant 1.250000e-01 : f32
    %1324 = vector.broadcast %cst_1175 : f32 to vector<2x4xf32>
    %1325 = arith.mulf %1323, %1324 : vector<2x4xf32>
    %1326 = arith.addf %1322, %1325 : vector<2x4xf32>
    %c0_1176 = arith.constant 0 : index
    %c2_1177 = arith.constant 2 : index
    %1327 = vector.load %arg9[%c0_1176, %c2_1177] : memref<18x34xf32, #tpu.memory_space<vmem>>, vector<2x4xf32>
    %cst_1178 = arith.constant 1.250000e-01 : f32
    %1328 = vector.broadcast %cst_1178 : f32 to vector<2x4xf32>
    %1329 = arith.mulf %1327, %1328 : vector<2x4xf32>
    %1330 = arith.addf %1326, %1329 : vector<2x4xf32>
    %c1_1179 = arith.constant 1 : index
    %c0_1180 = arith.constant 0 : index
    %1331 = vector.load %arg9[%c1_1179, %c0_1180] : memref<18x34xf32, #tpu.memory_space<vmem>>, vector<2x4xf32>
    %cst_1181 = arith.constant 1.250000e-01 : f32
    %1332 = vector.broadcast %cst_1181 : f32 to vector<2x4xf32>
    %1333 = arith.mulf %1331, %1332 : vector<2x4xf32>
    %1334 = arith.addf %1330, %1333 : vector<2x4xf32>
    %c1_1182 = arith.constant 1 : index
    %c1_1183 = arith.constant 1 : index
    %1335 = vector.load %arg9[%c1_1182, %c1_1183] : memref<18x34xf32, #tpu.memory_space<vmem>>, vector<2x4xf32>
    %cst_1184 = arith.constant -1.000000e+00 : f32
    %1336 = vector.broadcast %cst_1184 : f32 to vector<2x4xf32>
    %1337 = arith.mulf %1335, %1336 : vector<2x4xf32>
    %1338 = arith.addf %1334, %1337 : vector<2x4xf32>
    %c1_1185 = arith.constant 1 : index
    %c2_1186 = arith.constant 2 : index
    %1339 = vector.load %arg9[%c1_1185, %c2_1186] : memref<18x34xf32, #tpu.memory_space<vmem>>, vector<2x4xf32>
    %cst_1187 = arith.constant 1.250000e-01 : f32
    %1340 = vector.broadcast %cst_1187 : f32 to vector<2x4xf32>
    %1341 = arith.mulf %1339, %1340 : vector<2x4xf32>
    %1342 = arith.addf %1338, %1341 : vector<2x4xf32>
    %c2_1188 = arith.constant 2 : index
    %c0_1189 = arith.constant 0 : index
    %1343 = vector.load %arg9[%c2_1188, %c0_1189] : memref<18x34xf32, #tpu.memory_space<vmem>>, vector<2x4xf32>
    %cst_1190 = arith.constant 1.250000e-01 : f32
    %1344 = vector.broadcast %cst_1190 : f32 to vector<2x4xf32>
    %1345 = arith.mulf %1343, %1344 : vector<2x4xf32>
    %1346 = arith.addf %1342, %1345 : vector<2x4xf32>
    %c2_1191 = arith.constant 2 : index
    %c1_1192 = arith.constant 1 : index
    %1347 = vector.load %arg9[%c2_1191, %c1_1192] : memref<18x34xf32, #tpu.memory_space<vmem>>, vector<2x4xf32>
    %cst_1193 = arith.constant 1.250000e-01 : f32
    %1348 = vector.broadcast %cst_1193 : f32 to vector<2x4xf32>
    %1349 = arith.mulf %1347, %1348 : vector<2x4xf32>
    %1350 = arith.addf %1346, %1349 : vector<2x4xf32>
    %c2_1194 = arith.constant 2 : index
    %c2_1195 = arith.constant 2 : index
    %1351 = vector.load %arg9[%c2_1194, %c2_1195] : memref<18x34xf32, #tpu.memory_space<vmem>>, vector<2x4xf32>
    %cst_1196 = arith.constant 1.250000e-01 : f32
    %1352 = vector.broadcast %cst_1196 : f32 to vector<2x4xf32>
    %1353 = arith.mulf %1351, %1352 : vector<2x4xf32>
    %1354 = arith.addf %1350, %1353 : vector<2x4xf32>
    %1355 = arith.addf %1316, %1354 : vector<2x4xf32>
    %cst_1197 = arith.constant 3.750000e-01 : f32
    %1356 = vector.broadcast %cst_1197 : f32 to vector<2x4xf32>
    %1357 = arith.mulf %1306, %1356 : vector<2x4xf32>
    %1358 = arith.addf %1355, %1357 : vector<2x4xf32>
    %c0_1198 = arith.constant 0 : index
    %c0_1199 = arith.constant 0 : index
    %1359 = vector.load %arg7[%c0_1198, %c0_1199] : memref<16x32xf32, #tpu.memory_space<vmem>>, vector<4x8xf32>
    %cst_1200 = arith.constant dense<0.000000e+00> : vector<2x8xf32>
    %1360 = tpu.matmul %1358, %1359, %cst_1200 {dimension_numbers = #tpu.dot_dimension_numbers<[1], [0], [0], [1], [0, 0, 1, 1], [], []>} : vector<2x4xf32>, vector<4x8xf32>, vector<2x8xf32> -> vector<2x8xf32>
    %c0_1201 = arith.constant 0 : index
    %c0_1202 = arith.constant 0 : index
    %1361 = vector.load %arg6[%c0_1201, %c0_1202] : memref<16x8xf32, #tpu.memory_space<vmem>>, vector<4x2xf32>
    %cst_1203 = arith.constant dense<0.000000e+00> : vector<4x8xf32>
    %1362 = tpu.matmul %1361, %1360, %cst_1203 {dimension_numbers = #tpu.dot_dimension_numbers<[1], [0], [0], [1], [0, 0, 1, 1], [], []>} : vector<4x2xf32>, vector<2x8xf32>, vector<4x8xf32> -> vector<4x8xf32>
    %cst_1204 = arith.constant 0.000000e+00 : f32
    %1363 = vector.broadcast %cst_1204 : f32 to vector<6x10xf32>
    %c0_1205 = arith.constant 0 : index
    %c0_1206 = arith.constant 0 : index
    %1364 = vector.load %arg9[%c0_1205, %c0_1206] : memref<18x34xf32, #tpu.memory_space<vmem>>, vector<6x10xf32>
    tpu.vector_store %arg9[%c0_1205, %c0_1206], %1363 {strides = array<i32>} : memref<18x34xf32, #tpu.memory_space<vmem>>, vector<6x10xf32>,
    %c1_1207 = arith.constant 1 : index
    %c1_1208 = arith.constant 1 : index
    %1365 = vector.load %arg9[%c1_1207, %c1_1208] : memref<18x34xf32, #tpu.memory_space<vmem>>, vector<4x8xf32>
    tpu.vector_store %arg9[%c1_1207, %c1_1208], %1362 {strides = array<i32>} : memref<18x34xf32, #tpu.memory_space<vmem>>, vector<4x8xf32>,
    %c0_1209 = arith.constant 0 : index
    %c0_1210 = arith.constant 0 : index
    %1366 = vector.load %arg9[%c0_1209, %c0_1210] : memref<18x34xf32, #tpu.memory_space<vmem>>, vector<4x8xf32>
    %cst_1211 = arith.constant 1.250000e-01 : f32
    %1367 = vector.broadcast %cst_1211 : f32 to vector<4x8xf32>
    %1368 = arith.mulf %1366, %1367 : vector<4x8xf32>
    %c0_1212 = arith.constant 0 : index
    %c1_1213 = arith.constant 1 : index
    %1369 = vector.load %arg9[%c0_1212, %c1_1213] : memref<18x34xf32, #tpu.memory_space<vmem>>, vector<4x8xf32>
    %cst_1214 = arith.constant 1.250000e-01 : f32
    %1370 = vector.broadcast %cst_1214 : f32 to vector<4x8xf32>
    %1371 = arith.mulf %1369, %1370 : vector<4x8xf32>
    %1372 = arith.addf %1368, %1371 : vector<4x8xf32>
    %c0_1215 = arith.constant 0 : index
    %c2_1216 = arith.constant 2 : index
    %1373 = vector.load %arg9[%c0_1215, %c2_1216] : memref<18x34xf32, #tpu.memory_space<vmem>>, vector<4x8xf32>
    %cst_1217 = arith.constant 1.250000e-01 : f32
    %1374 = vector.broadcast %cst_1217 : f32 to vector<4x8xf32>
    %1375 = arith.mulf %1373, %1374 : vector<4x8xf32>
    %1376 = arith.addf %1372, %1375 : vector<4x8xf32>
    %c1_1218 = arith.constant 1 : index
    %c0_1219 = arith.constant 0 : index
    %1377 = vector.load %arg9[%c1_1218, %c0_1219] : memref<18x34xf32, #tpu.memory_space<vmem>>, vector<4x8xf32>
    %cst_1220 = arith.constant 1.250000e-01 : f32
    %1378 = vector.broadcast %cst_1220 : f32 to vector<4x8xf32>
    %1379 = arith.mulf %1377, %1378 : vector<4x8xf32>
    %1380 = arith.addf %1376, %1379 : vector<4x8xf32>
    %c1_1221 = arith.constant 1 : index
    %c1_1222 = arith.constant 1 : index
    %1381 = vector.load %arg9[%c1_1221, %c1_1222] : memref<18x34xf32, #tpu.memory_space<vmem>>, vector<4x8xf32>
    %cst_1223 = arith.constant -1.000000e+00 : f32
    %1382 = vector.broadcast %cst_1223 : f32 to vector<4x8xf32>
    %1383 = arith.mulf %1381, %1382 : vector<4x8xf32>
    %1384 = arith.addf %1380, %1383 : vector<4x8xf32>
    %c1_1224 = arith.constant 1 : index
    %c2_1225 = arith.constant 2 : index
    %1385 = vector.load %arg9[%c1_1224, %c2_1225] : memref<18x34xf32, #tpu.memory_space<vmem>>, vector<4x8xf32>
    %cst_1226 = arith.constant 1.250000e-01 : f32
    %1386 = vector.broadcast %cst_1226 : f32 to vector<4x8xf32>
    %1387 = arith.mulf %1385, %1386 : vector<4x8xf32>
    %1388 = arith.addf %1384, %1387 : vector<4x8xf32>
    %c2_1227 = arith.constant 2 : index
    %c0_1228 = arith.constant 0 : index
    %1389 = vector.load %arg9[%c2_1227, %c0_1228] : memref<18x34xf32, #tpu.memory_space<vmem>>, vector<4x8xf32>
    %cst_1229 = arith.constant 1.250000e-01 : f32
    %1390 = vector.broadcast %cst_1229 : f32 to vector<4x8xf32>
    %1391 = arith.mulf %1389, %1390 : vector<4x8xf32>
    %1392 = arith.addf %1388, %1391 : vector<4x8xf32>
    %c2_1230 = arith.constant 2 : index
    %c1_1231 = arith.constant 1 : index
    %1393 = vector.load %arg9[%c2_1230, %c1_1231] : memref<18x34xf32, #tpu.memory_space<vmem>>, vector<4x8xf32>
    %cst_1232 = arith.constant 1.250000e-01 : f32
    %1394 = vector.broadcast %cst_1232 : f32 to vector<4x8xf32>
    %1395 = arith.mulf %1393, %1394 : vector<4x8xf32>
    %1396 = arith.addf %1392, %1395 : vector<4x8xf32>
    %c2_1233 = arith.constant 2 : index
    %c2_1234 = arith.constant 2 : index
    %1397 = vector.load %arg9[%c2_1233, %c2_1234] : memref<18x34xf32, #tpu.memory_space<vmem>>, vector<4x8xf32>
    %cst_1235 = arith.constant 1.250000e-01 : f32
    %1398 = vector.broadcast %cst_1235 : f32 to vector<4x8xf32>
    %1399 = arith.mulf %1397, %1398 : vector<4x8xf32>
    %1400 = arith.addf %1396, %1399 : vector<4x8xf32>
    %1401 = arith.addf %1362, %1400 : vector<4x8xf32>
    %cst_1236 = arith.constant 3.750000e-01 : f32
    %1402 = vector.broadcast %cst_1236 : f32 to vector<4x8xf32>
    %1403 = arith.mulf %1302, %1402 : vector<4x8xf32>
    %1404 = arith.addf %1401, %1403 : vector<4x8xf32>
    %c0_1237 = arith.constant 0 : index
    %c0_1238 = arith.constant 0 : index
    %1405 = vector.load %arg7[%c0_1237, %c0_1238] : memref<16x32xf32, #tpu.memory_space<vmem>>, vector<8x16xf32>
    %cst_1239 = arith.constant dense<0.000000e+00> : vector<4x16xf32>
    %1406 = tpu.matmul %1404, %1405, %cst_1239 {dimension_numbers = #tpu.dot_dimension_numbers<[1], [0], [0], [1], [0, 0, 1, 1], [], []>} : vector<4x8xf32>, vector<8x16xf32>, vector<4x16xf32> -> vector<4x16xf32>
    %c0_1240 = arith.constant 0 : index
    %c0_1241 = arith.constant 0 : index
    %1407 = vector.load %arg6[%c0_1240, %c0_1241] : memref<16x8xf32, #tpu.memory_space<vmem>>, vector<8x4xf32>
    %cst_1242 = arith.constant dense<0.000000e+00> : vector<8x16xf32>
    %1408 = tpu.matmul %1407, %1406, %cst_1242 {dimension_numbers = #tpu.dot_dimension_numbers<[1], [0], [0], [1], [0, 0, 1, 1], [], []>} : vector<8x4xf32>, vector<4x16xf32>, vector<8x16xf32> -> vector<8x16xf32>
    %cst_1243 = arith.constant 0.000000e+00 : f32
    %1409 = vector.broadcast %cst_1243 : f32 to vector<10x18xf32>
    %c0_1244 = arith.constant 0 : index
    %c0_1245 = arith.constant 0 : index
    %1410 = vector.load %arg9[%c0_1244, %c0_1245] : memref<18x34xf32, #tpu.memory_space<vmem>>, vector<10x18xf32>
    tpu.vector_store %arg9[%c0_1244, %c0_1245], %1409 {strides = array<i32>} : memref<18x34xf32, #tpu.memory_space<vmem>>, vector<10x18xf32>,
    %c1_1246 = arith.constant 1 : index
    %c1_1247 = arith.constant 1 : index
    %1411 = vector.load %arg9[%c1_1246, %c1_1247] : memref<18x34xf32, #tpu.memory_space<vmem>>, vector<8x16xf32>
    tpu.vector_store %arg9[%c1_1246, %c1_1247], %1408 {strides = array<i32>} : memref<18x34xf32, #tpu.memory_space<vmem>>, vector<8x16xf32>,
    %c0_1248 = arith.constant 0 : index
    %c0_1249 = arith.constant 0 : index
    %1412 = vector.load %arg9[%c0_1248, %c0_1249] : memref<18x34xf32, #tpu.memory_space<vmem>>, vector<8x16xf32>
    %cst_1250 = arith.constant 1.250000e-01 : f32
    %1413 = vector.broadcast %cst_1250 : f32 to vector<8x16xf32>
    %1414 = arith.mulf %1412, %1413 : vector<8x16xf32>
    %c0_1251 = arith.constant 0 : index
    %c1_1252 = arith.constant 1 : index
    %1415 = vector.load %arg9[%c0_1251, %c1_1252] : memref<18x34xf32, #tpu.memory_space<vmem>>, vector<8x16xf32>
    %cst_1253 = arith.constant 1.250000e-01 : f32
    %1416 = vector.broadcast %cst_1253 : f32 to vector<8x16xf32>
    %1417 = arith.mulf %1415, %1416 : vector<8x16xf32>
    %1418 = arith.addf %1414, %1417 : vector<8x16xf32>
    %c0_1254 = arith.constant 0 : index
    %c2_1255 = arith.constant 2 : index
    %1419 = vector.load %arg9[%c0_1254, %c2_1255] : memref<18x34xf32, #tpu.memory_space<vmem>>, vector<8x16xf32>
    %cst_1256 = arith.constant 1.250000e-01 : f32
    %1420 = vector.broadcast %cst_1256 : f32 to vector<8x16xf32>
    %1421 = arith.mulf %1419, %1420 : vector<8x16xf32>
    %1422 = arith.addf %1418, %1421 : vector<8x16xf32>
    %c1_1257 = arith.constant 1 : index
    %c0_1258 = arith.constant 0 : index
    %1423 = vector.load %arg9[%c1_1257, %c0_1258] : memref<18x34xf32, #tpu.memory_space<vmem>>, vector<8x16xf32>
    %cst_1259 = arith.constant 1.250000e-01 : f32
    %1424 = vector.broadcast %cst_1259 : f32 to vector<8x16xf32>
    %1425 = arith.mulf %1423, %1424 : vector<8x16xf32>
    %1426 = arith.addf %1422, %1425 : vector<8x16xf32>
    %c1_1260 = arith.constant 1 : index
    %c1_1261 = arith.constant 1 : index
    %1427 = vector.load %arg9[%c1_1260, %c1_1261] : memref<18x34xf32, #tpu.memory_space<vmem>>, vector<8x16xf32>
    %cst_1262 = arith.constant -1.000000e+00 : f32
    %1428 = vector.broadcast %cst_1262 : f32 to vector<8x16xf32>
    %1429 = arith.mulf %1427, %1428 : vector<8x16xf32>
    %1430 = arith.addf %1426, %1429 : vector<8x16xf32>
    %c1_1263 = arith.constant 1 : index
    %c2_1264 = arith.constant 2 : index
    %1431 = vector.load %arg9[%c1_1263, %c2_1264] : memref<18x34xf32, #tpu.memory_space<vmem>>, vector<8x16xf32>
    %cst_1265 = arith.constant 1.250000e-01 : f32
    %1432 = vector.broadcast %cst_1265 : f32 to vector<8x16xf32>
    %1433 = arith.mulf %1431, %1432 : vector<8x16xf32>
    %1434 = arith.addf %1430, %1433 : vector<8x16xf32>
    %c2_1266 = arith.constant 2 : index
    %c0_1267 = arith.constant 0 : index
    %1435 = vector.load %arg9[%c2_1266, %c0_1267] : memref<18x34xf32, #tpu.memory_space<vmem>>, vector<8x16xf32>
    %cst_1268 = arith.constant 1.250000e-01 : f32
    %1436 = vector.broadcast %cst_1268 : f32 to vector<8x16xf32>
    %1437 = arith.mulf %1435, %1436 : vector<8x16xf32>
    %1438 = arith.addf %1434, %1437 : vector<8x16xf32>
    %c2_1269 = arith.constant 2 : index
    %c1_1270 = arith.constant 1 : index
    %1439 = vector.load %arg9[%c2_1269, %c1_1270] : memref<18x34xf32, #tpu.memory_space<vmem>>, vector<8x16xf32>
    %cst_1271 = arith.constant 1.250000e-01 : f32
    %1440 = vector.broadcast %cst_1271 : f32 to vector<8x16xf32>
    %1441 = arith.mulf %1439, %1440 : vector<8x16xf32>
    %1442 = arith.addf %1438, %1441 : vector<8x16xf32>
    %c2_1272 = arith.constant 2 : index
    %c2_1273 = arith.constant 2 : index
    %1443 = vector.load %arg9[%c2_1272, %c2_1273] : memref<18x34xf32, #tpu.memory_space<vmem>>, vector<8x16xf32>
    %cst_1274 = arith.constant 1.250000e-01 : f32
    %1444 = vector.broadcast %cst_1274 : f32 to vector<8x16xf32>
    %1445 = arith.mulf %1443, %1444 : vector<8x16xf32>
    %1446 = arith.addf %1442, %1445 : vector<8x16xf32>
    %1447 = arith.addf %1408, %1446 : vector<8x16xf32>
    %cst_1275 = arith.constant 3.750000e-01 : f32
    %1448 = vector.broadcast %cst_1275 : f32 to vector<8x16xf32>
    %1449 = arith.mulf %1298, %1448 : vector<8x16xf32>
    %1450 = arith.addf %1447, %1449 : vector<8x16xf32>
    %c0_1276 = arith.constant 0 : index
    %c0_1277 = arith.constant 0 : index
    %1451 = vector.load %arg7[%c0_1276, %c0_1277] : memref<16x32xf32, #tpu.memory_space<vmem>>, vector<16x32xf32>
    %cst_1278 = arith.constant dense<0.000000e+00> : vector<8x32xf32>
    %1452 = tpu.matmul %1450, %1451, %cst_1278 {dimension_numbers = #tpu.dot_dimension_numbers<[1], [0], [0], [1], [0, 0, 1, 1], [], []>} : vector<8x16xf32>, vector<16x32xf32>, vector<8x32xf32> -> vector<8x32xf32>
    %c0_1279 = arith.constant 0 : index
    %c0_1280 = arith.constant 0 : index
    %1453 = vector.load %arg6[%c0_1279, %c0_1280] : memref<16x8xf32, #tpu.memory_space<vmem>>, vector<16x8xf32>
    %cst_1281 = arith.constant dense<0.000000e+00> : vector<16x32xf32>
    %1454 = tpu.matmul %1453, %1452, %cst_1281 {dimension_numbers = #tpu.dot_dimension_numbers<[1], [0], [0], [1], [0, 0, 1, 1], [], []>} : vector<16x8xf32>, vector<8x32xf32>, vector<16x32xf32> -> vector<16x32xf32>
    %1455 = arith.subf %1249, %1454 : vector<16x32xf32>
    %c1_1282 = arith.constant 1 : index
    %c1_1283 = arith.constant 1 : index
    %1456 = vector.load %arg9[%c1_1282, %c1_1283] : memref<18x34xf32, #tpu.memory_space<vmem>>, vector<16x32xf32>
    tpu.vector_store %arg9[%c1_1282, %c1_1283], %1455 {strides = array<i32>} : memref<18x34xf32, #tpu.memory_space<vmem>>, vector<16x32xf32>,
    %c1_1284 = arith.constant 1 : index
    %c1_1285 = arith.constant 1 : index
    %1457 = vector.load %arg9[%c1_1284, %c1_1285] : memref<18x34xf32, #tpu.memory_space<vmem>>, vector<16x1xf32>
    %c1_1286 = arith.constant 1 : index
    %c0_1287 = arith.constant 0 : index
    %1458 = vector.load %arg9[%c1_1286, %c0_1287] : memref<18x34xf32, #tpu.memory_space<vmem>>, vector<16x1xf32>
    tpu.vector_store %arg9[%c1_1286, %c0_1287], %1457 {strides = array<i32>} : memref<18x34xf32, #tpu.memory_space<vmem>>, vector<16x1xf32>,
    %c1_1288 = arith.constant 1 : index
    %c32_1289 = arith.constant 32 : index
    %1459 = vector.load %arg9[%c1_1288, %c32_1289] : memref<18x34xf32, #tpu.memory_space<vmem>>, vector<16x1xf32>
    %c1_1290 = arith.constant 1 : index
    %c33_1291 = arith.constant 33 : index
    %1460 = vector.load %arg9[%c1_1290, %c33_1291] : memref<18x34xf32, #tpu.memory_space<vmem>>, vector<16x1xf32>
    tpu.vector_store %arg9[%c1_1290, %c33_1291], %1459 {strides = array<i32>} : memref<18x34xf32, #tpu.memory_space<vmem>>, vector<16x1xf32>,
    %c1_1292 = arith.constant 1 : index
    %c0_1293 = arith.constant 0 : index
    %1461 = vector.load %arg9[%c1_1292, %c0_1293] : memref<18x34xf32, #tpu.memory_space<vmem>>, vector<1x34xf32>
    %c0_1294 = arith.constant 0 : index
    %c0_1295 = arith.constant 0 : index
    %1462 = vector.load %arg9[%c0_1294, %c0_1295] : memref<18x34xf32, #tpu.memory_space<vmem>>, vector<1x34xf32>
    tpu.vector_store %arg9[%c0_1294, %c0_1295], %1461 {strides = array<i32>} : memref<18x34xf32, #tpu.memory_space<vmem>>, vector<1x34xf32>,
    %c16_1296 = arith.constant 16 : index
    %c0_1297 = arith.constant 0 : index
    %1463 = vector.load %arg9[%c16_1296, %c0_1297] : memref<18x34xf32, #tpu.memory_space<vmem>>, vector<1x34xf32>
    %c17_1298 = arith.constant 17 : index
    %c0_1299 = arith.constant 0 : index
    %1464 = vector.load %arg9[%c17_1298, %c0_1299] : memref<18x34xf32, #tpu.memory_space<vmem>>, vector<1x34xf32>
    tpu.vector_store %arg9[%c17_1298, %c0_1299], %1463 {strides = array<i32>} : memref<18x34xf32, #tpu.memory_space<vmem>>, vector<1x34xf32>,
    %c0_1300 = arith.constant 0 : index
    %c0_1301 = arith.constant 0 : index
    %1465 = vector.load %arg9[%c0_1300, %c0_1301] : memref<18x34xf32, #tpu.memory_space<vmem>>, vector<16x32xf32>
    %cst_1302 = arith.constant 1.250000e-01 : f32
    %1466 = vector.broadcast %cst_1302 : f32 to vector<16x32xf32>
    %1467 = arith.mulf %1465, %1466 : vector<16x32xf32>
    %c0_1303 = arith.constant 0 : index
    %c1_1304 = arith.constant 1 : index
    %1468 = vector.load %arg9[%c0_1303, %c1_1304] : memref<18x34xf32, #tpu.memory_space<vmem>>, vector<16x32xf32>
    %cst_1305 = arith.constant 1.250000e-01 : f32
    %1469 = vector.broadcast %cst_1305 : f32 to vector<16x32xf32>
    %1470 = arith.mulf %1468, %1469 : vector<16x32xf32>
    %1471 = arith.addf %1467, %1470 : vector<16x32xf32>
    %c0_1306 = arith.constant 0 : index
    %c2_1307 = arith.constant 2 : index
    %1472 = vector.load %arg9[%c0_1306, %c2_1307] : memref<18x34xf32, #tpu.memory_space<vmem>>, vector<16x32xf32>
    %cst_1308 = arith.constant 1.250000e-01 : f32
    %1473 = vector.broadcast %cst_1308 : f32 to vector<16x32xf32>
    %1474 = arith.mulf %1472, %1473 : vector<16x32xf32>
    %1475 = arith.addf %1471, %1474 : vector<16x32xf32>
    %c1_1309 = arith.constant 1 : index
    %c0_1310 = arith.constant 0 : index
    %1476 = vector.load %arg9[%c1_1309, %c0_1310] : memref<18x34xf32, #tpu.memory_space<vmem>>, vector<16x32xf32>
    %cst_1311 = arith.constant 1.250000e-01 : f32
    %1477 = vector.broadcast %cst_1311 : f32 to vector<16x32xf32>
    %1478 = arith.mulf %1476, %1477 : vector<16x32xf32>
    %1479 = arith.addf %1475, %1478 : vector<16x32xf32>
    %c1_1312 = arith.constant 1 : index
    %c1_1313 = arith.constant 1 : index
    %1480 = vector.load %arg9[%c1_1312, %c1_1313] : memref<18x34xf32, #tpu.memory_space<vmem>>, vector<16x32xf32>
    %cst_1314 = arith.constant -1.000000e+00 : f32
    %1481 = vector.broadcast %cst_1314 : f32 to vector<16x32xf32>
    %1482 = arith.mulf %1480, %1481 : vector<16x32xf32>
    %1483 = arith.addf %1479, %1482 : vector<16x32xf32>
    %c1_1315 = arith.constant 1 : index
    %c2_1316 = arith.constant 2 : index
    %1484 = vector.load %arg9[%c1_1315, %c2_1316] : memref<18x34xf32, #tpu.memory_space<vmem>>, vector<16x32xf32>
    %cst_1317 = arith.constant 1.250000e-01 : f32
    %1485 = vector.broadcast %cst_1317 : f32 to vector<16x32xf32>
    %1486 = arith.mulf %1484, %1485 : vector<16x32xf32>
    %1487 = arith.addf %1483, %1486 : vector<16x32xf32>
    %c2_1318 = arith.constant 2 : index
    %c0_1319 = arith.constant 0 : index
    %1488 = vector.load %arg9[%c2_1318, %c0_1319] : memref<18x34xf32, #tpu.memory_space<vmem>>, vector<16x32xf32>
    %cst_1320 = arith.constant 1.250000e-01 : f32
    %1489 = vector.broadcast %cst_1320 : f32 to vector<16x32xf32>
    %1490 = arith.mulf %1488, %1489 : vector<16x32xf32>
    %1491 = arith.addf %1487, %1490 : vector<16x32xf32>
    %c2_1321 = arith.constant 2 : index
    %c1_1322 = arith.constant 1 : index
    %1492 = vector.load %arg9[%c2_1321, %c1_1322] : memref<18x34xf32, #tpu.memory_space<vmem>>, vector<16x32xf32>
    %cst_1323 = arith.constant 1.250000e-01 : f32
    %1493 = vector.broadcast %cst_1323 : f32 to vector<16x32xf32>
    %1494 = arith.mulf %1492, %1493 : vector<16x32xf32>
    %1495 = arith.addf %1491, %1494 : vector<16x32xf32>
    %c2_1324 = arith.constant 2 : index
    %c2_1325 = arith.constant 2 : index
    %1496 = vector.load %arg9[%c2_1324, %c2_1325] : memref<18x34xf32, #tpu.memory_space<vmem>>, vector<16x32xf32>
    %cst_1326 = arith.constant 1.250000e-01 : f32
    %1497 = vector.broadcast %cst_1326 : f32 to vector<16x32xf32>
    %1498 = arith.mulf %1496, %1497 : vector<16x32xf32>
    %1499 = arith.addf %1495, %1498 : vector<16x32xf32>
    %1500 = arith.addf %1455, %1499 : vector<16x32xf32>
    %cst_1327 = arith.constant 3.750000e-01 : f32
    %1501 = vector.broadcast %cst_1327 : f32 to vector<16x32xf32>
    %1502 = arith.mulf %487, %1501 : vector<16x32xf32>
    %1503 = arith.addf %1500, %1502 : vector<16x32xf32>
    %c1_1328 = arith.constant 1 : index
    %c1_1329 = arith.constant 1 : index
    %1504 = vector.load %arg9[%c1_1328, %c1_1329] : memref<18x34xf32, #tpu.memory_space<vmem>>, vector<16x32xf32>
    tpu.vector_store %arg9[%c1_1328, %c1_1329], %1503 {strides = array<i32>} : memref<18x34xf32, #tpu.memory_space<vmem>>, vector<16x32xf32>,
    %c1_1330 = arith.constant 1 : index
    %c1_1331 = arith.constant 1 : index
    %1505 = vector.load %arg9[%c1_1330, %c1_1331] : memref<18x34xf32, #tpu.memory_space<vmem>>, vector<16x1xf32>
    %c1_1332 = arith.constant 1 : index
    %c0_1333 = arith.constant 0 : index
    %1506 = vector.load %arg9[%c1_1332, %c0_1333] : memref<18x34xf32, #tpu.memory_space<vmem>>, vector<16x1xf32>
    tpu.vector_store %arg9[%c1_1332, %c0_1333], %1505 {strides = array<i32>} : memref<18x34xf32, #tpu.memory_space<vmem>>, vector<16x1xf32>,
    %c1_1334 = arith.constant 1 : index
    %c32_1335 = arith.constant 32 : index
    %1507 = vector.load %arg9[%c1_1334, %c32_1335] : memref<18x34xf32, #tpu.memory_space<vmem>>, vector<16x1xf32>
    %c1_1336 = arith.constant 1 : index
    %c33_1337 = arith.constant 33 : index
    %1508 = vector.load %arg9[%c1_1336, %c33_1337] : memref<18x34xf32, #tpu.memory_space<vmem>>, vector<16x1xf32>
    tpu.vector_store %arg9[%c1_1336, %c33_1337], %1507 {strides = array<i32>} : memref<18x34xf32, #tpu.memory_space<vmem>>, vector<16x1xf32>,
    %c1_1338 = arith.constant 1 : index
    %c0_1339 = arith.constant 0 : index
    %1509 = vector.load %arg9[%c1_1338, %c0_1339] : memref<18x34xf32, #tpu.memory_space<vmem>>, vector<1x34xf32>
    %c0_1340 = arith.constant 0 : index
    %c0_1341 = arith.constant 0 : index
    %1510 = vector.load %arg9[%c0_1340, %c0_1341] : memref<18x34xf32, #tpu.memory_space<vmem>>, vector<1x34xf32>
    tpu.vector_store %arg9[%c0_1340, %c0_1341], %1509 {strides = array<i32>} : memref<18x34xf32, #tpu.memory_space<vmem>>, vector<1x34xf32>,
    %c16_1342 = arith.constant 16 : index
    %c0_1343 = arith.constant 0 : index
    %1511 = vector.load %arg9[%c16_1342, %c0_1343] : memref<18x34xf32, #tpu.memory_space<vmem>>, vector<1x34xf32>
    %c17_1344 = arith.constant 17 : index
    %c0_1345 = arith.constant 0 : index
    %1512 = vector.load %arg9[%c17_1344, %c0_1345] : memref<18x34xf32, #tpu.memory_space<vmem>>, vector<1x34xf32>
    tpu.vector_store %arg9[%c17_1344, %c0_1345], %1511 {strides = array<i32>} : memref<18x34xf32, #tpu.memory_space<vmem>>, vector<1x34xf32>,
    %c0_1346 = arith.constant 0 : index
    %c0_1347 = arith.constant 0 : index
    %1513 = vector.load %arg9[%c0_1346, %c0_1347] : memref<18x34xf32, #tpu.memory_space<vmem>>, vector<16x32xf32>
    %cst_1348 = arith.constant -0.333333343 : f32
    %1514 = vector.broadcast %cst_1348 : f32 to vector<16x32xf32>
    %1515 = arith.mulf %1513, %1514 : vector<16x32xf32>
    %c0_1349 = arith.constant 0 : index
    %c1_1350 = arith.constant 1 : index
    %1516 = vector.load %arg9[%c0_1349, %c1_1350] : memref<18x34xf32, #tpu.memory_space<vmem>>, vector<16x32xf32>
    %cst_1351 = arith.constant -0.333333343 : f32
    %1517 = vector.broadcast %cst_1351 : f32 to vector<16x32xf32>
    %1518 = arith.mulf %1516, %1517 : vector<16x32xf32>
    %1519 = arith.addf %1515, %1518 : vector<16x32xf32>
    %c0_1352 = arith.constant 0 : index
    %c2_1353 = arith.constant 2 : index
    %1520 = vector.load %arg9[%c0_1352, %c2_1353] : memref<18x34xf32, #tpu.memory_space<vmem>>, vector<16x32xf32>
    %cst_1354 = arith.constant -0.333333343 : f32
    %1521 = vector.broadcast %cst_1354 : f32 to vector<16x32xf32>
    %1522 = arith.mulf %1520, %1521 : vector<16x32xf32>
    %1523 = arith.addf %1519, %1522 : vector<16x32xf32>
    %c1_1355 = arith.constant 1 : index
    %c0_1356 = arith.constant 0 : index
    %1524 = vector.load %arg9[%c1_1355, %c0_1356] : memref<18x34xf32, #tpu.memory_space<vmem>>, vector<16x32xf32>
    %cst_1357 = arith.constant -0.333333343 : f32
    %1525 = vector.broadcast %cst_1357 : f32 to vector<16x32xf32>
    %1526 = arith.mulf %1524, %1525 : vector<16x32xf32>
    %1527 = arith.addf %1523, %1526 : vector<16x32xf32>
    %c1_1358 = arith.constant 1 : index
    %c1_1359 = arith.constant 1 : index
    %1528 = vector.load %arg9[%c1_1358, %c1_1359] : memref<18x34xf32, #tpu.memory_space<vmem>>, vector<16x32xf32>
    %cst_1360 = arith.constant 2.66666675 : f32
    %1529 = vector.broadcast %cst_1360 : f32 to vector<16x32xf32>
    %1530 = arith.mulf %1528, %1529 : vector<16x32xf32>
    %1531 = arith.addf %1527, %1530 : vector<16x32xf32>
    %c1_1361 = arith.constant 1 : index
    %c2_1362 = arith.constant 2 : index
    %1532 = vector.load %arg9[%c1_1361, %c2_1362] : memref<18x34xf32, #tpu.memory_space<vmem>>, vector<16x32xf32>
    %cst_1363 = arith.constant -0.333333343 : f32
    %1533 = vector.broadcast %cst_1363 : f32 to vector<16x32xf32>
    %1534 = arith.mulf %1532, %1533 : vector<16x32xf32>
    %1535 = arith.addf %1531, %1534 : vector<16x32xf32>
    %c2_1364 = arith.constant 2 : index
    %c0_1365 = arith.constant 0 : index
    %1536 = vector.load %arg9[%c2_1364, %c0_1365] : memref<18x34xf32, #tpu.memory_space<vmem>>, vector<16x32xf32>
    %cst_1366 = arith.constant -0.333333343 : f32
    %1537 = vector.broadcast %cst_1366 : f32 to vector<16x32xf32>
    %1538 = arith.mulf %1536, %1537 : vector<16x32xf32>
    %1539 = arith.addf %1535, %1538 : vector<16x32xf32>
    %c2_1367 = arith.constant 2 : index
    %c1_1368 = arith.constant 1 : index
    %1540 = vector.load %arg9[%c2_1367, %c1_1368] : memref<18x34xf32, #tpu.memory_space<vmem>>, vector<16x32xf32>
    %cst_1369 = arith.constant -0.333333343 : f32
    %1541 = vector.broadcast %cst_1369 : f32 to vector<16x32xf32>
    %1542 = arith.mulf %1540, %1541 : vector<16x32xf32>
    %1543 = arith.addf %1539, %1542 : vector<16x32xf32>
    %c2_1370 = arith.constant 2 : index
    %c2_1371 = arith.constant 2 : index
    %1544 = vector.load %arg9[%c2_1370, %c2_1371] : memref<18x34xf32, #tpu.memory_space<vmem>>, vector<16x32xf32>
    %cst_1372 = arith.constant -0.333333343 : f32
    %1545 = vector.broadcast %cst_1372 : f32 to vector<16x32xf32>
    %1546 = arith.mulf %1544, %1545 : vector<16x32xf32>
    %1547 = arith.addf %1543, %1546 : vector<16x32xf32>
    %1548 = arith.subf %1547, %487 : vector<16x32xf32>
    %c0_1373 = arith.constant 0 : index
    %c0_1374 = arith.constant 0 : index
    %1549 = vector.load %arg4[%c0_1373, %c0_1374] : memref<8x16xf32, #tpu.memory_space<vmem>>, vector<8x16xf32>
    %cst_1375 = arith.constant dense<0.000000e+00> : vector<8x32xf32>
    %1550 = tpu.matmul %1549, %1548, %cst_1375 {dimension_numbers = #tpu.dot_dimension_numbers<[1], [0], [0], [1], [0, 0, 1, 1], [], []>} : vector<8x16xf32>, vector<16x32xf32>, vector<8x32xf32> -> vector<8x32xf32>
    %c0_1376 = arith.constant 0 : index
    %c0_1377 = arith.constant 0 : index
    %1551 = vector.load %arg5[%c0_1376, %c0_1377] : memref<32x16xf32, #tpu.memory_space<vmem>>, vector<32x16xf32>
    %cst_1378 = arith.constant dense<0.000000e+00> : vector<8x16xf32>
    %1552 = tpu.matmul %1550, %1551, %cst_1378 {dimension_numbers = #tpu.dot_dimension_numbers<[1], [0], [0], [1], [0, 0, 1, 1], [], []>} : vector<8x32xf32>, vector<32x16xf32>, vector<8x16xf32> -> vector<8x16xf32>
    %c0_1379 = arith.constant 0 : index
    %c0_1380 = arith.constant 0 : index
    %1553 = vector.load %arg4[%c0_1379, %c0_1380] : memref<8x16xf32, #tpu.memory_space<vmem>>, vector<4x8xf32>
    %cst_1381 = arith.constant dense<0.000000e+00> : vector<4x16xf32>
    %1554 = tpu.matmul %1553, %1552, %cst_1381 {dimension_numbers = #tpu.dot_dimension_numbers<[1], [0], [0], [1], [0, 0, 1, 1], [], []>} : vector<4x8xf32>, vector<8x16xf32>, vector<4x16xf32> -> vector<4x16xf32>
    %c0_1382 = arith.constant 0 : index
    %c0_1383 = arith.constant 0 : index
    %1555 = vector.load %arg5[%c0_1382, %c0_1383] : memref<32x16xf32, #tpu.memory_space<vmem>>, vector<16x8xf32>
    %cst_1384 = arith.constant dense<0.000000e+00> : vector<4x8xf32>
    %1556 = tpu.matmul %1554, %1555, %cst_1384 {dimension_numbers = #tpu.dot_dimension_numbers<[1], [0], [0], [1], [0, 0, 1, 1], [], []>} : vector<4x16xf32>, vector<16x8xf32>, vector<4x8xf32> -> vector<4x8xf32>
    %c0_1385 = arith.constant 0 : index
    %c0_1386 = arith.constant 0 : index
    %1557 = vector.load %arg4[%c0_1385, %c0_1386] : memref<8x16xf32, #tpu.memory_space<vmem>>, vector<2x4xf32>
    %cst_1387 = arith.constant dense<0.000000e+00> : vector<2x8xf32>
    %1558 = tpu.matmul %1557, %1556, %cst_1387 {dimension_numbers = #tpu.dot_dimension_numbers<[1], [0], [0], [1], [0, 0, 1, 1], [], []>} : vector<2x4xf32>, vector<4x8xf32>, vector<2x8xf32> -> vector<2x8xf32>
    %c0_1388 = arith.constant 0 : index
    %c0_1389 = arith.constant 0 : index
    %1559 = vector.load %arg5[%c0_1388, %c0_1389] : memref<32x16xf32, #tpu.memory_space<vmem>>, vector<8x4xf32>
    %cst_1390 = arith.constant dense<0.000000e+00> : vector<2x4xf32>
    %1560 = tpu.matmul %1558, %1559, %cst_1390 {dimension_numbers = #tpu.dot_dimension_numbers<[1], [0], [0], [1], [0, 0, 1, 1], [], []>} : vector<2x8xf32>, vector<8x4xf32>, vector<2x4xf32> -> vector<2x4xf32>
    %c0_1391 = arith.constant 0 : index
    %c0_1392 = arith.constant 0 : index
    %1561 = vector.load %arg4[%c0_1391, %c0_1392] : memref<8x16xf32, #tpu.memory_space<vmem>>, vector<1x2xf32>
    %cst_1393 = arith.constant dense<0.000000e+00> : vector<1x4xf32>
    %1562 = tpu.matmul %1561, %1560, %cst_1393 {dimension_numbers = #tpu.dot_dimension_numbers<[1], [0], [0], [1], [0, 0, 1, 1], [], []>} : vector<1x2xf32>, vector<2x4xf32>, vector<1x4xf32> -> vector<1x4xf32>
    %c0_1394 = arith.constant 0 : index
    %c0_1395 = arith.constant 0 : index
    %1563 = vector.load %arg5[%c0_1394, %c0_1395] : memref<32x16xf32, #tpu.memory_space<vmem>>, vector<4x2xf32>
    %cst_1396 = arith.constant dense<0.000000e+00> : vector<1x2xf32>
    %1564 = tpu.matmul %1562, %1563, %cst_1396 {dimension_numbers = #tpu.dot_dimension_numbers<[1], [0], [0], [1], [0, 0, 1, 1], [], []>} : vector<1x4xf32>, vector<4x2xf32>, vector<1x2xf32> -> vector<1x2xf32>
    %cst_1397 = arith.constant 3.750000e-01 : f32
    %1565 = vector.broadcast %cst_1397 : f32 to vector<1x2xf32>
    %1566 = arith.mulf %1564, %1565 : vector<1x2xf32>
    %c0_1398 = arith.constant 0 : index
    %c0_1399 = arith.constant 0 : index
    %1567 = vector.load %arg7[%c0_1398, %c0_1399] : memref<16x32xf32, #tpu.memory_space<vmem>>, vector<2x4xf32>
    %cst_1400 = arith.constant dense<0.000000e+00> : vector<1x4xf32>
    %1568 = tpu.matmul %1566, %1567, %cst_1400 {dimension_numbers = #tpu.dot_dimension_numbers<[1], [0], [0], [1], [0, 0, 1, 1], [], []>} : vector<1x2xf32>, vector<2x4xf32>, vector<1x4xf32> -> vector<1x4xf32>
    %1569 = vector.shape_cast %1568 : vector<1x4xf32> to vector<1x4xf32>
    %1570 = vector.broadcast %1569 : vector<1x4xf32> to vector<2x4xf32>
    %cst_1401 = arith.constant 0.000000e+00 : f32
    %1571 = vector.broadcast %cst_1401 : f32 to vector<4x6xf32>
    %c0_1402 = arith.constant 0 : index
    %c0_1403 = arith.constant 0 : index
    %1572 = vector.load %arg9[%c0_1402, %c0_1403] : memref<18x34xf32, #tpu.memory_space<vmem>>, vector<4x6xf32>
    tpu.vector_store %arg9[%c0_1402, %c0_1403], %1571 {strides = array<i32>} : memref<18x34xf32, #tpu.memory_space<vmem>>, vector<4x6xf32>,
    %c1_1404 = arith.constant 1 : index
    %c1_1405 = arith.constant 1 : index
    %1573 = vector.load %arg9[%c1_1404, %c1_1405] : memref<18x34xf32, #tpu.memory_space<vmem>>, vector<2x4xf32>
    tpu.vector_store %arg9[%c1_1404, %c1_1405], %1570 {strides = array<i32>} : memref<18x34xf32, #tpu.memory_space<vmem>>, vector<2x4xf32>,
    %c0_1406 = arith.constant 0 : index
    %c0_1407 = arith.constant 0 : index
    %1574 = vector.load %arg9[%c0_1406, %c0_1407] : memref<18x34xf32, #tpu.memory_space<vmem>>, vector<2x4xf32>
    %cst_1408 = arith.constant 1.250000e-01 : f32
    %1575 = vector.broadcast %cst_1408 : f32 to vector<2x4xf32>
    %1576 = arith.mulf %1574, %1575 : vector<2x4xf32>
    %c0_1409 = arith.constant 0 : index
    %c1_1410 = arith.constant 1 : index
    %1577 = vector.load %arg9[%c0_1409, %c1_1410] : memref<18x34xf32, #tpu.memory_space<vmem>>, vector<2x4xf32>
    %cst_1411 = arith.constant 1.250000e-01 : f32
    %1578 = vector.broadcast %cst_1411 : f32 to vector<2x4xf32>
    %1579 = arith.mulf %1577, %1578 : vector<2x4xf32>
    %1580 = arith.addf %1576, %1579 : vector<2x4xf32>
    %c0_1412 = arith.constant 0 : index
    %c2_1413 = arith.constant 2 : index
    %1581 = vector.load %arg9[%c0_1412, %c2_1413] : memref<18x34xf32, #tpu.memory_space<vmem>>, vector<2x4xf32>
    %cst_1414 = arith.constant 1.250000e-01 : f32
    %1582 = vector.broadcast %cst_1414 : f32 to vector<2x4xf32>
    %1583 = arith.mulf %1581, %1582 : vector<2x4xf32>
    %1584 = arith.addf %1580, %1583 : vector<2x4xf32>
    %c1_1415 = arith.constant 1 : index
    %c0_1416 = arith.constant 0 : index
    %1585 = vector.load %arg9[%c1_1415, %c0_1416] : memref<18x34xf32, #tpu.memory_space<vmem>>, vector<2x4xf32>
    %cst_1417 = arith.constant 1.250000e-01 : f32
    %1586 = vector.broadcast %cst_1417 : f32 to vector<2x4xf32>
    %1587 = arith.mulf %1585, %1586 : vector<2x4xf32>
    %1588 = arith.addf %1584, %1587 : vector<2x4xf32>
    %c1_1418 = arith.constant 1 : index
    %c1_1419 = arith.constant 1 : index
    %1589 = vector.load %arg9[%c1_1418, %c1_1419] : memref<18x34xf32, #tpu.memory_space<vmem>>, vector<2x4xf32>
    %cst_1420 = arith.constant -1.000000e+00 : f32
    %1590 = vector.broadcast %cst_1420 : f32 to vector<2x4xf32>
    %1591 = arith.mulf %1589, %1590 : vector<2x4xf32>
    %1592 = arith.addf %1588, %1591 : vector<2x4xf32>
    %c1_1421 = arith.constant 1 : index
    %c2_1422 = arith.constant 2 : index
    %1593 = vector.load %arg9[%c1_1421, %c2_1422] : memref<18x34xf32, #tpu.memory_space<vmem>>, vector<2x4xf32>
    %cst_1423 = arith.constant 1.250000e-01 : f32
    %1594 = vector.broadcast %cst_1423 : f32 to vector<2x4xf32>
    %1595 = arith.mulf %1593, %1594 : vector<2x4xf32>
    %1596 = arith.addf %1592, %1595 : vector<2x4xf32>
    %c2_1424 = arith.constant 2 : index
    %c0_1425 = arith.constant 0 : index
    %1597 = vector.load %arg9[%c2_1424, %c0_1425] : memref<18x34xf32, #tpu.memory_space<vmem>>, vector<2x4xf32>
    %cst_1426 = arith.constant 1.250000e-01 : f32
    %1598 = vector.broadcast %cst_1426 : f32 to vector<2x4xf32>
    %1599 = arith.mulf %1597, %1598 : vector<2x4xf32>
    %1600 = arith.addf %1596, %1599 : vector<2x4xf32>
    %c2_1427 = arith.constant 2 : index
    %c1_1428 = arith.constant 1 : index
    %1601 = vector.load %arg9[%c2_1427, %c1_1428] : memref<18x34xf32, #tpu.memory_space<vmem>>, vector<2x4xf32>
    %cst_1429 = arith.constant 1.250000e-01 : f32
    %1602 = vector.broadcast %cst_1429 : f32 to vector<2x4xf32>
    %1603 = arith.mulf %1601, %1602 : vector<2x4xf32>
    %1604 = arith.addf %1600, %1603 : vector<2x4xf32>
    %c2_1430 = arith.constant 2 : index
    %c2_1431 = arith.constant 2 : index
    %1605 = vector.load %arg9[%c2_1430, %c2_1431] : memref<18x34xf32, #tpu.memory_space<vmem>>, vector<2x4xf32>
    %cst_1432 = arith.constant 1.250000e-01 : f32
    %1606 = vector.broadcast %cst_1432 : f32 to vector<2x4xf32>
    %1607 = arith.mulf %1605, %1606 : vector<2x4xf32>
    %1608 = arith.addf %1604, %1607 : vector<2x4xf32>
    %1609 = arith.addf %1570, %1608 : vector<2x4xf32>
    %cst_1433 = arith.constant 3.750000e-01 : f32
    %1610 = vector.broadcast %cst_1433 : f32 to vector<2x4xf32>
    %1611 = arith.mulf %1560, %1610 : vector<2x4xf32>
    %1612 = arith.addf %1609, %1611 : vector<2x4xf32>
    %c0_1434 = arith.constant 0 : index
    %c0_1435 = arith.constant 0 : index
    %1613 = vector.load %arg7[%c0_1434, %c0_1435] : memref<16x32xf32, #tpu.memory_space<vmem>>, vector<4x8xf32>
    %cst_1436 = arith.constant dense<0.000000e+00> : vector<2x8xf32>
    %1614 = tpu.matmul %1612, %1613, %cst_1436 {dimension_numbers = #tpu.dot_dimension_numbers<[1], [0], [0], [1], [0, 0, 1, 1], [], []>} : vector<2x4xf32>, vector<4x8xf32>, vector<2x8xf32> -> vector<2x8xf32>
    %c0_1437 = arith.constant 0 : index
    %c0_1438 = arith.constant 0 : index
    %1615 = vector.load %arg6[%c0_1437, %c0_1438] : memref<16x8xf32, #tpu.memory_space<vmem>>, vector<4x2xf32>
    %cst_1439 = arith.constant dense<0.000000e+00> : vector<4x8xf32>
    %1616 = tpu.matmul %1615, %1614, %cst_1439 {dimension_numbers = #tpu.dot_dimension_numbers<[1], [0], [0], [1], [0, 0, 1, 1], [], []>} : vector<4x2xf32>, vector<2x8xf32>, vector<4x8xf32> -> vector<4x8xf32>
    %cst_1440 = arith.constant 0.000000e+00 : f32
    %1617 = vector.broadcast %cst_1440 : f32 to vector<6x10xf32>
    %c0_1441 = arith.constant 0 : index
    %c0_1442 = arith.constant 0 : index
    %1618 = vector.load %arg9[%c0_1441, %c0_1442] : memref<18x34xf32, #tpu.memory_space<vmem>>, vector<6x10xf32>
    tpu.vector_store %arg9[%c0_1441, %c0_1442], %1617 {strides = array<i32>} : memref<18x34xf32, #tpu.memory_space<vmem>>, vector<6x10xf32>,
    %c1_1443 = arith.constant 1 : index
    %c1_1444 = arith.constant 1 : index
    %1619 = vector.load %arg9[%c1_1443, %c1_1444] : memref<18x34xf32, #tpu.memory_space<vmem>>, vector<4x8xf32>
    tpu.vector_store %arg9[%c1_1443, %c1_1444], %1616 {strides = array<i32>} : memref<18x34xf32, #tpu.memory_space<vmem>>, vector<4x8xf32>,
    %c0_1445 = arith.constant 0 : index
    %c0_1446 = arith.constant 0 : index
    %1620 = vector.load %arg9[%c0_1445, %c0_1446] : memref<18x34xf32, #tpu.memory_space<vmem>>, vector<4x8xf32>
    %cst_1447 = arith.constant 1.250000e-01 : f32
    %1621 = vector.broadcast %cst_1447 : f32 to vector<4x8xf32>
    %1622 = arith.mulf %1620, %1621 : vector<4x8xf32>
    %c0_1448 = arith.constant 0 : index
    %c1_1449 = arith.constant 1 : index
    %1623 = vector.load %arg9[%c0_1448, %c1_1449] : memref<18x34xf32, #tpu.memory_space<vmem>>, vector<4x8xf32>
    %cst_1450 = arith.constant 1.250000e-01 : f32
    %1624 = vector.broadcast %cst_1450 : f32 to vector<4x8xf32>
    %1625 = arith.mulf %1623, %1624 : vector<4x8xf32>
    %1626 = arith.addf %1622, %1625 : vector<4x8xf32>
    %c0_1451 = arith.constant 0 : index
    %c2_1452 = arith.constant 2 : index
    %1627 = vector.load %arg9[%c0_1451, %c2_1452] : memref<18x34xf32, #tpu.memory_space<vmem>>, vector<4x8xf32>
    %cst_1453 = arith.constant 1.250000e-01 : f32
    %1628 = vector.broadcast %cst_1453 : f32 to vector<4x8xf32>
    %1629 = arith.mulf %1627, %1628 : vector<4x8xf32>
    %1630 = arith.addf %1626, %1629 : vector<4x8xf32>
    %c1_1454 = arith.constant 1 : index
    %c0_1455 = arith.constant 0 : index
    %1631 = vector.load %arg9[%c1_1454, %c0_1455] : memref<18x34xf32, #tpu.memory_space<vmem>>, vector<4x8xf32>
    %cst_1456 = arith.constant 1.250000e-01 : f32
    %1632 = vector.broadcast %cst_1456 : f32 to vector<4x8xf32>
    %1633 = arith.mulf %1631, %1632 : vector<4x8xf32>
    %1634 = arith.addf %1630, %1633 : vector<4x8xf32>
    %c1_1457 = arith.constant 1 : index
    %c1_1458 = arith.constant 1 : index
    %1635 = vector.load %arg9[%c1_1457, %c1_1458] : memref<18x34xf32, #tpu.memory_space<vmem>>, vector<4x8xf32>
    %cst_1459 = arith.constant -1.000000e+00 : f32
    %1636 = vector.broadcast %cst_1459 : f32 to vector<4x8xf32>
    %1637 = arith.mulf %1635, %1636 : vector<4x8xf32>
    %1638 = arith.addf %1634, %1637 : vector<4x8xf32>
    %c1_1460 = arith.constant 1 : index
    %c2_1461 = arith.constant 2 : index
    %1639 = vector.load %arg9[%c1_1460, %c2_1461] : memref<18x34xf32, #tpu.memory_space<vmem>>, vector<4x8xf32>
    %cst_1462 = arith.constant 1.250000e-01 : f32
    %1640 = vector.broadcast %cst_1462 : f32 to vector<4x8xf32>
    %1641 = arith.mulf %1639, %1640 : vector<4x8xf32>
    %1642 = arith.addf %1638, %1641 : vector<4x8xf32>
    %c2_1463 = arith.constant 2 : index
    %c0_1464 = arith.constant 0 : index
    %1643 = vector.load %arg9[%c2_1463, %c0_1464] : memref<18x34xf32, #tpu.memory_space<vmem>>, vector<4x8xf32>
    %cst_1465 = arith.constant 1.250000e-01 : f32
    %1644 = vector.broadcast %cst_1465 : f32 to vector<4x8xf32>
    %1645 = arith.mulf %1643, %1644 : vector<4x8xf32>
    %1646 = arith.addf %1642, %1645 : vector<4x8xf32>
    %c2_1466 = arith.constant 2 : index
    %c1_1467 = arith.constant 1 : index
    %1647 = vector.load %arg9[%c2_1466, %c1_1467] : memref<18x34xf32, #tpu.memory_space<vmem>>, vector<4x8xf32>
    %cst_1468 = arith.constant 1.250000e-01 : f32
    %1648 = vector.broadcast %cst_1468 : f32 to vector<4x8xf32>
    %1649 = arith.mulf %1647, %1648 : vector<4x8xf32>
    %1650 = arith.addf %1646, %1649 : vector<4x8xf32>
    %c2_1469 = arith.constant 2 : index
    %c2_1470 = arith.constant 2 : index
    %1651 = vector.load %arg9[%c2_1469, %c2_1470] : memref<18x34xf32, #tpu.memory_space<vmem>>, vector<4x8xf32>
    %cst_1471 = arith.constant 1.250000e-01 : f32
    %1652 = vector.broadcast %cst_1471 : f32 to vector<4x8xf32>
    %1653 = arith.mulf %1651, %1652 : vector<4x8xf32>
    %1654 = arith.addf %1650, %1653 : vector<4x8xf32>
    %1655 = arith.addf %1616, %1654 : vector<4x8xf32>
    %cst_1472 = arith.constant 3.750000e-01 : f32
    %1656 = vector.broadcast %cst_1472 : f32 to vector<4x8xf32>
    %1657 = arith.mulf %1556, %1656 : vector<4x8xf32>
    %1658 = arith.addf %1655, %1657 : vector<4x8xf32>
    %c0_1473 = arith.constant 0 : index
    %c0_1474 = arith.constant 0 : index
    %1659 = vector.load %arg7[%c0_1473, %c0_1474] : memref<16x32xf32, #tpu.memory_space<vmem>>, vector<8x16xf32>
    %cst_1475 = arith.constant dense<0.000000e+00> : vector<4x16xf32>
    %1660 = tpu.matmul %1658, %1659, %cst_1475 {dimension_numbers = #tpu.dot_dimension_numbers<[1], [0], [0], [1], [0, 0, 1, 1], [], []>} : vector<4x8xf32>, vector<8x16xf32>, vector<4x16xf32> -> vector<4x16xf32>
    %c0_1476 = arith.constant 0 : index
    %c0_1477 = arith.constant 0 : index
    %1661 = vector.load %arg6[%c0_1476, %c0_1477] : memref<16x8xf32, #tpu.memory_space<vmem>>, vector<8x4xf32>
    %cst_1478 = arith.constant dense<0.000000e+00> : vector<8x16xf32>
    %1662 = tpu.matmul %1661, %1660, %cst_1478 {dimension_numbers = #tpu.dot_dimension_numbers<[1], [0], [0], [1], [0, 0, 1, 1], [], []>} : vector<8x4xf32>, vector<4x16xf32>, vector<8x16xf32> -> vector<8x16xf32>
    %cst_1479 = arith.constant 0.000000e+00 : f32
    %1663 = vector.broadcast %cst_1479 : f32 to vector<10x18xf32>
    %c0_1480 = arith.constant 0 : index
    %c0_1481 = arith.constant 0 : index
    %1664 = vector.load %arg9[%c0_1480, %c0_1481] : memref<18x34xf32, #tpu.memory_space<vmem>>, vector<10x18xf32>
    tpu.vector_store %arg9[%c0_1480, %c0_1481], %1663 {strides = array<i32>} : memref<18x34xf32, #tpu.memory_space<vmem>>, vector<10x18xf32>,
    %c1_1482 = arith.constant 1 : index
    %c1_1483 = arith.constant 1 : index
    %1665 = vector.load %arg9[%c1_1482, %c1_1483] : memref<18x34xf32, #tpu.memory_space<vmem>>, vector<8x16xf32>
    tpu.vector_store %arg9[%c1_1482, %c1_1483], %1662 {strides = array<i32>} : memref<18x34xf32, #tpu.memory_space<vmem>>, vector<8x16xf32>,
    %c0_1484 = arith.constant 0 : index
    %c0_1485 = arith.constant 0 : index
    %1666 = vector.load %arg9[%c0_1484, %c0_1485] : memref<18x34xf32, #tpu.memory_space<vmem>>, vector<8x16xf32>
    %cst_1486 = arith.constant 1.250000e-01 : f32
    %1667 = vector.broadcast %cst_1486 : f32 to vector<8x16xf32>
    %1668 = arith.mulf %1666, %1667 : vector<8x16xf32>
    %c0_1487 = arith.constant 0 : index
    %c1_1488 = arith.constant 1 : index
    %1669 = vector.load %arg9[%c0_1487, %c1_1488] : memref<18x34xf32, #tpu.memory_space<vmem>>, vector<8x16xf32>
    %cst_1489 = arith.constant 1.250000e-01 : f32
    %1670 = vector.broadcast %cst_1489 : f32 to vector<8x16xf32>
    %1671 = arith.mulf %1669, %1670 : vector<8x16xf32>
    %1672 = arith.addf %1668, %1671 : vector<8x16xf32>
    %c0_1490 = arith.constant 0 : index
    %c2_1491 = arith.constant 2 : index
    %1673 = vector.load %arg9[%c0_1490, %c2_1491] : memref<18x34xf32, #tpu.memory_space<vmem>>, vector<8x16xf32>
    %cst_1492 = arith.constant 1.250000e-01 : f32
    %1674 = vector.broadcast %cst_1492 : f32 to vector<8x16xf32>
    %1675 = arith.mulf %1673, %1674 : vector<8x16xf32>
    %1676 = arith.addf %1672, %1675 : vector<8x16xf32>
    %c1_1493 = arith.constant 1 : index
    %c0_1494 = arith.constant 0 : index
    %1677 = vector.load %arg9[%c1_1493, %c0_1494] : memref<18x34xf32, #tpu.memory_space<vmem>>, vector<8x16xf32>
    %cst_1495 = arith.constant 1.250000e-01 : f32
    %1678 = vector.broadcast %cst_1495 : f32 to vector<8x16xf32>
    %1679 = arith.mulf %1677, %1678 : vector<8x16xf32>
    %1680 = arith.addf %1676, %1679 : vector<8x16xf32>
    %c1_1496 = arith.constant 1 : index
    %c1_1497 = arith.constant 1 : index
    %1681 = vector.load %arg9[%c1_1496, %c1_1497] : memref<18x34xf32, #tpu.memory_space<vmem>>, vector<8x16xf32>
    %cst_1498 = arith.constant -1.000000e+00 : f32
    %1682 = vector.broadcast %cst_1498 : f32 to vector<8x16xf32>
    %1683 = arith.mulf %1681, %1682 : vector<8x16xf32>
    %1684 = arith.addf %1680, %1683 : vector<8x16xf32>
    %c1_1499 = arith.constant 1 : index
    %c2_1500 = arith.constant 2 : index
    %1685 = vector.load %arg9[%c1_1499, %c2_1500] : memref<18x34xf32, #tpu.memory_space<vmem>>, vector<8x16xf32>
    %cst_1501 = arith.constant 1.250000e-01 : f32
    %1686 = vector.broadcast %cst_1501 : f32 to vector<8x16xf32>
    %1687 = arith.mulf %1685, %1686 : vector<8x16xf32>
    %1688 = arith.addf %1684, %1687 : vector<8x16xf32>
    %c2_1502 = arith.constant 2 : index
    %c0_1503 = arith.constant 0 : index
    %1689 = vector.load %arg9[%c2_1502, %c0_1503] : memref<18x34xf32, #tpu.memory_space<vmem>>, vector<8x16xf32>
    %cst_1504 = arith.constant 1.250000e-01 : f32
    %1690 = vector.broadcast %cst_1504 : f32 to vector<8x16xf32>
    %1691 = arith.mulf %1689, %1690 : vector<8x16xf32>
    %1692 = arith.addf %1688, %1691 : vector<8x16xf32>
    %c2_1505 = arith.constant 2 : index
    %c1_1506 = arith.constant 1 : index
    %1693 = vector.load %arg9[%c2_1505, %c1_1506] : memref<18x34xf32, #tpu.memory_space<vmem>>, vector<8x16xf32>
    %cst_1507 = arith.constant 1.250000e-01 : f32
    %1694 = vector.broadcast %cst_1507 : f32 to vector<8x16xf32>
    %1695 = arith.mulf %1693, %1694 : vector<8x16xf32>
    %1696 = arith.addf %1692, %1695 : vector<8x16xf32>
    %c2_1508 = arith.constant 2 : index
    %c2_1509 = arith.constant 2 : index
    %1697 = vector.load %arg9[%c2_1508, %c2_1509] : memref<18x34xf32, #tpu.memory_space<vmem>>, vector<8x16xf32>
    %cst_1510 = arith.constant 1.250000e-01 : f32
    %1698 = vector.broadcast %cst_1510 : f32 to vector<8x16xf32>
    %1699 = arith.mulf %1697, %1698 : vector<8x16xf32>
    %1700 = arith.addf %1696, %1699 : vector<8x16xf32>
    %1701 = arith.addf %1662, %1700 : vector<8x16xf32>
    %cst_1511 = arith.constant 3.750000e-01 : f32
    %1702 = vector.broadcast %cst_1511 : f32 to vector<8x16xf32>
    %1703 = arith.mulf %1552, %1702 : vector<8x16xf32>
    %1704 = arith.addf %1701, %1703 : vector<8x16xf32>
    %c0_1512 = arith.constant 0 : index
    %c0_1513 = arith.constant 0 : index
    %1705 = vector.load %arg7[%c0_1512, %c0_1513] : memref<16x32xf32, #tpu.memory_space<vmem>>, vector<16x32xf32>
    %cst_1514 = arith.constant dense<0.000000e+00> : vector<8x32xf32>
    %1706 = tpu.matmul %1704, %1705, %cst_1514 {dimension_numbers = #tpu.dot_dimension_numbers<[1], [0], [0], [1], [0, 0, 1, 1], [], []>} : vector<8x16xf32>, vector<16x32xf32>, vector<8x32xf32> -> vector<8x32xf32>
    %c0_1515 = arith.constant 0 : index
    %c0_1516 = arith.constant 0 : index
    %1707 = vector.load %arg6[%c0_1515, %c0_1516] : memref<16x8xf32, #tpu.memory_space<vmem>>, vector<16x8xf32>
    %cst_1517 = arith.constant dense<0.000000e+00> : vector<16x32xf32>
    %1708 = tpu.matmul %1707, %1706, %cst_1517 {dimension_numbers = #tpu.dot_dimension_numbers<[1], [0], [0], [1], [0, 0, 1, 1], [], []>} : vector<16x8xf32>, vector<8x32xf32>, vector<16x32xf32> -> vector<16x32xf32>
    %1709 = arith.subf %1503, %1708 : vector<16x32xf32>
    %c1_1518 = arith.constant 1 : index
    %c1_1519 = arith.constant 1 : index
    %1710 = vector.load %arg9[%c1_1518, %c1_1519] : memref<18x34xf32, #tpu.memory_space<vmem>>, vector<16x32xf32>
    tpu.vector_store %arg9[%c1_1518, %c1_1519], %1709 {strides = array<i32>} : memref<18x34xf32, #tpu.memory_space<vmem>>, vector<16x32xf32>,
    %c1_1520 = arith.constant 1 : index
    %c1_1521 = arith.constant 1 : index
    %1711 = vector.load %arg9[%c1_1520, %c1_1521] : memref<18x34xf32, #tpu.memory_space<vmem>>, vector<16x1xf32>
    %c1_1522 = arith.constant 1 : index
    %c0_1523 = arith.constant 0 : index
    %1712 = vector.load %arg9[%c1_1522, %c0_1523] : memref<18x34xf32, #tpu.memory_space<vmem>>, vector<16x1xf32>
    tpu.vector_store %arg9[%c1_1522, %c0_1523], %1711 {strides = array<i32>} : memref<18x34xf32, #tpu.memory_space<vmem>>, vector<16x1xf32>,
    %c1_1524 = arith.constant 1 : index
    %c32_1525 = arith.constant 32 : index
    %1713 = vector.load %arg9[%c1_1524, %c32_1525] : memref<18x34xf32, #tpu.memory_space<vmem>>, vector<16x1xf32>
    %c1_1526 = arith.constant 1 : index
    %c33_1527 = arith.constant 33 : index
    %1714 = vector.load %arg9[%c1_1526, %c33_1527] : memref<18x34xf32, #tpu.memory_space<vmem>>, vector<16x1xf32>
    tpu.vector_store %arg9[%c1_1526, %c33_1527], %1713 {strides = array<i32>} : memref<18x34xf32, #tpu.memory_space<vmem>>, vector<16x1xf32>,
    %c1_1528 = arith.constant 1 : index
    %c0_1529 = arith.constant 0 : index
    %1715 = vector.load %arg9[%c1_1528, %c0_1529] : memref<18x34xf32, #tpu.memory_space<vmem>>, vector<1x34xf32>
    %c0_1530 = arith.constant 0 : index
    %c0_1531 = arith.constant 0 : index
    %1716 = vector.load %arg9[%c0_1530, %c0_1531] : memref<18x34xf32, #tpu.memory_space<vmem>>, vector<1x34xf32>
    tpu.vector_store %arg9[%c0_1530, %c0_1531], %1715 {strides = array<i32>} : memref<18x34xf32, #tpu.memory_space<vmem>>, vector<1x34xf32>,
    %c16_1532 = arith.constant 16 : index
    %c0_1533 = arith.constant 0 : index
    %1717 = vector.load %arg9[%c16_1532, %c0_1533] : memref<18x34xf32, #tpu.memory_space<vmem>>, vector<1x34xf32>
    %c17_1534 = arith.constant 17 : index
    %c0_1535 = arith.constant 0 : index
    %1718 = vector.load %arg9[%c17_1534, %c0_1535] : memref<18x34xf32, #tpu.memory_space<vmem>>, vector<1x34xf32>
    tpu.vector_store %arg9[%c17_1534, %c0_1535], %1717 {strides = array<i32>} : memref<18x34xf32, #tpu.memory_space<vmem>>, vector<1x34xf32>,
    %c0_1536 = arith.constant 0 : index
    %c0_1537 = arith.constant 0 : index
    %1719 = vector.load %arg9[%c0_1536, %c0_1537] : memref<18x34xf32, #tpu.memory_space<vmem>>, vector<16x32xf32>
    %cst_1538 = arith.constant 1.250000e-01 : f32
    %1720 = vector.broadcast %cst_1538 : f32 to vector<16x32xf32>
    %1721 = arith.mulf %1719, %1720 : vector<16x32xf32>
    %c0_1539 = arith.constant 0 : index
    %c1_1540 = arith.constant 1 : index
    %1722 = vector.load %arg9[%c0_1539, %c1_1540] : memref<18x34xf32, #tpu.memory_space<vmem>>, vector<16x32xf32>
    %cst_1541 = arith.constant 1.250000e-01 : f32
    %1723 = vector.broadcast %cst_1541 : f32 to vector<16x32xf32>
    %1724 = arith.mulf %1722, %1723 : vector<16x32xf32>
    %1725 = arith.addf %1721, %1724 : vector<16x32xf32>
    %c0_1542 = arith.constant 0 : index
    %c2_1543 = arith.constant 2 : index
    %1726 = vector.load %arg9[%c0_1542, %c2_1543] : memref<18x34xf32, #tpu.memory_space<vmem>>, vector<16x32xf32>
    %cst_1544 = arith.constant 1.250000e-01 : f32
    %1727 = vector.broadcast %cst_1544 : f32 to vector<16x32xf32>
    %1728 = arith.mulf %1726, %1727 : vector<16x32xf32>
    %1729 = arith.addf %1725, %1728 : vector<16x32xf32>
    %c1_1545 = arith.constant 1 : index
    %c0_1546 = arith.constant 0 : index
    %1730 = vector.load %arg9[%c1_1545, %c0_1546] : memref<18x34xf32, #tpu.memory_space<vmem>>, vector<16x32xf32>
    %cst_1547 = arith.constant 1.250000e-01 : f32
    %1731 = vector.broadcast %cst_1547 : f32 to vector<16x32xf32>
    %1732 = arith.mulf %1730, %1731 : vector<16x32xf32>
    %1733 = arith.addf %1729, %1732 : vector<16x32xf32>
    %c1_1548 = arith.constant 1 : index
    %c1_1549 = arith.constant 1 : index
    %1734 = vector.load %arg9[%c1_1548, %c1_1549] : memref<18x34xf32, #tpu.memory_space<vmem>>, vector<16x32xf32>
    %cst_1550 = arith.constant -1.000000e+00 : f32
    %1735 = vector.broadcast %cst_1550 : f32 to vector<16x32xf32>
    %1736 = arith.mulf %1734, %1735 : vector<16x32xf32>
    %1737 = arith.addf %1733, %1736 : vector<16x32xf32>
    %c1_1551 = arith.constant 1 : index
    %c2_1552 = arith.constant 2 : index
    %1738 = vector.load %arg9[%c1_1551, %c2_1552] : memref<18x34xf32, #tpu.memory_space<vmem>>, vector<16x32xf32>
    %cst_1553 = arith.constant 1.250000e-01 : f32
    %1739 = vector.broadcast %cst_1553 : f32 to vector<16x32xf32>
    %1740 = arith.mulf %1738, %1739 : vector<16x32xf32>
    %1741 = arith.addf %1737, %1740 : vector<16x32xf32>
    %c2_1554 = arith.constant 2 : index
    %c0_1555 = arith.constant 0 : index
    %1742 = vector.load %arg9[%c2_1554, %c0_1555] : memref<18x34xf32, #tpu.memory_space<vmem>>, vector<16x32xf32>
    %cst_1556 = arith.constant 1.250000e-01 : f32
    %1743 = vector.broadcast %cst_1556 : f32 to vector<16x32xf32>
    %1744 = arith.mulf %1742, %1743 : vector<16x32xf32>
    %1745 = arith.addf %1741, %1744 : vector<16x32xf32>
    %c2_1557 = arith.constant 2 : index
    %c1_1558 = arith.constant 1 : index
    %1746 = vector.load %arg9[%c2_1557, %c1_1558] : memref<18x34xf32, #tpu.memory_space<vmem>>, vector<16x32xf32>
    %cst_1559 = arith.constant 1.250000e-01 : f32
    %1747 = vector.broadcast %cst_1559 : f32 to vector<16x32xf32>
    %1748 = arith.mulf %1746, %1747 : vector<16x32xf32>
    %1749 = arith.addf %1745, %1748 : vector<16x32xf32>
    %c2_1560 = arith.constant 2 : index
    %c2_1561 = arith.constant 2 : index
    %1750 = vector.load %arg9[%c2_1560, %c2_1561] : memref<18x34xf32, #tpu.memory_space<vmem>>, vector<16x32xf32>
    %cst_1562 = arith.constant 1.250000e-01 : f32
    %1751 = vector.broadcast %cst_1562 : f32 to vector<16x32xf32>
    %1752 = arith.mulf %1750, %1751 : vector<16x32xf32>
    %1753 = arith.addf %1749, %1752 : vector<16x32xf32>
    %1754 = arith.addf %1709, %1753 : vector<16x32xf32>
    %cst_1563 = arith.constant 3.750000e-01 : f32
    %1755 = vector.broadcast %cst_1563 : f32 to vector<16x32xf32>
    %1756 = arith.mulf %487, %1755 : vector<16x32xf32>
    %1757 = arith.addf %1754, %1756 : vector<16x32xf32>
    %c1_1564 = arith.constant 1 : index
    %c1_1565 = arith.constant 1 : index
    %1758 = vector.load %arg9[%c1_1564, %c1_1565] : memref<18x34xf32, #tpu.memory_space<vmem>>, vector<16x32xf32>
    tpu.vector_store %arg9[%c1_1564, %c1_1565], %1757 {strides = array<i32>} : memref<18x34xf32, #tpu.memory_space<vmem>>, vector<16x32xf32>,
    %c1_1566 = arith.constant 1 : index
    %c1_1567 = arith.constant 1 : index
    %1759 = vector.load %arg9[%c1_1566, %c1_1567] : memref<18x34xf32, #tpu.memory_space<vmem>>, vector<16x1xf32>
    %c1_1568 = arith.constant 1 : index
    %c0_1569 = arith.constant 0 : index
    %1760 = vector.load %arg9[%c1_1568, %c0_1569] : memref<18x34xf32, #tpu.memory_space<vmem>>, vector<16x1xf32>
    tpu.vector_store %arg9[%c1_1568, %c0_1569], %1759 {strides = array<i32>} : memref<18x34xf32, #tpu.memory_space<vmem>>, vector<16x1xf32>,
    %c1_1570 = arith.constant 1 : index
    %c32_1571 = arith.constant 32 : index
    %1761 = vector.load %arg9[%c1_1570, %c32_1571] : memref<18x34xf32, #tpu.memory_space<vmem>>, vector<16x1xf32>
    %c1_1572 = arith.constant 1 : index
    %c33_1573 = arith.constant 33 : index
    %1762 = vector.load %arg9[%c1_1572, %c33_1573] : memref<18x34xf32, #tpu.memory_space<vmem>>, vector<16x1xf32>
    tpu.vector_store %arg9[%c1_1572, %c33_1573], %1761 {strides = array<i32>} : memref<18x34xf32, #tpu.memory_space<vmem>>, vector<16x1xf32>,
    %c1_1574 = arith.constant 1 : index
    %c0_1575 = arith.constant 0 : index
    %1763 = vector.load %arg9[%c1_1574, %c0_1575] : memref<18x34xf32, #tpu.memory_space<vmem>>, vector<1x34xf32>
    %c0_1576 = arith.constant 0 : index
    %c0_1577 = arith.constant 0 : index
    %1764 = vector.load %arg9[%c0_1576, %c0_1577] : memref<18x34xf32, #tpu.memory_space<vmem>>, vector<1x34xf32>
    tpu.vector_store %arg9[%c0_1576, %c0_1577], %1763 {strides = array<i32>} : memref<18x34xf32, #tpu.memory_space<vmem>>, vector<1x34xf32>,
    %c16_1578 = arith.constant 16 : index
    %c0_1579 = arith.constant 0 : index
    %1765 = vector.load %arg9[%c16_1578, %c0_1579] : memref<18x34xf32, #tpu.memory_space<vmem>>, vector<1x34xf32>
    %c17_1580 = arith.constant 17 : index
    %c0_1581 = arith.constant 0 : index
    %1766 = vector.load %arg9[%c17_1580, %c0_1581] : memref<18x34xf32, #tpu.memory_space<vmem>>, vector<1x34xf32>
    tpu.vector_store %arg9[%c17_1580, %c0_1581], %1765 {strides = array<i32>} : memref<18x34xf32, #tpu.memory_space<vmem>>, vector<1x34xf32>,
    %c0_1582 = arith.constant 0 : index
    %c0_1583 = arith.constant 0 : index
    %1767 = vector.load %arg9[%c0_1582, %c0_1583] : memref<18x34xf32, #tpu.memory_space<vmem>>, vector<16x32xf32>
    %cst_1584 = arith.constant 0.00416666688 : f32
    %1768 = vector.broadcast %cst_1584 : f32 to vector<16x32xf32>
    %1769 = arith.mulf %1767, %1768 : vector<16x32xf32>
    %c0_1585 = arith.constant 0 : index
    %c2_1586 = arith.constant 2 : index
    %1770 = vector.load %arg9[%c0_1585, %c2_1586] : memref<18x34xf32, #tpu.memory_space<vmem>>, vector<16x32xf32>
    %cst_1587 = arith.constant -0.00416666688 : f32
    %1771 = vector.broadcast %cst_1587 : f32 to vector<16x32xf32>
    %1772 = arith.mulf %1770, %1771 : vector<16x32xf32>
    %1773 = arith.addf %1769, %1772 : vector<16x32xf32>
    %c1_1588 = arith.constant 1 : index
    %c0_1589 = arith.constant 0 : index
    %1774 = vector.load %arg9[%c1_1588, %c0_1589] : memref<18x34xf32, #tpu.memory_space<vmem>>, vector<16x32xf32>
    %cst_1590 = arith.constant 0.0166666675 : f32
    %1775 = vector.broadcast %cst_1590 : f32 to vector<16x32xf32>
    %1776 = arith.mulf %1774, %1775 : vector<16x32xf32>
    %1777 = arith.addf %1773, %1776 : vector<16x32xf32>
    %c1_1591 = arith.constant 1 : index
    %c2_1592 = arith.constant 2 : index
    %1778 = vector.load %arg9[%c1_1591, %c2_1592] : memref<18x34xf32, #tpu.memory_space<vmem>>, vector<16x32xf32>
    %cst_1593 = arith.constant -0.0166666675 : f32
    %1779 = vector.broadcast %cst_1593 : f32 to vector<16x32xf32>
    %1780 = arith.mulf %1778, %1779 : vector<16x32xf32>
    %1781 = arith.addf %1777, %1780 : vector<16x32xf32>
    %c2_1594 = arith.constant 2 : index
    %c0_1595 = arith.constant 0 : index
    %1782 = vector.load %arg9[%c2_1594, %c0_1595] : memref<18x34xf32, #tpu.memory_space<vmem>>, vector<16x32xf32>
    %cst_1596 = arith.constant 0.00416666688 : f32
    %1783 = vector.broadcast %cst_1596 : f32 to vector<16x32xf32>
    %1784 = arith.mulf %1782, %1783 : vector<16x32xf32>
    %1785 = arith.addf %1781, %1784 : vector<16x32xf32>
    %c2_1597 = arith.constant 2 : index
    %c2_1598 = arith.constant 2 : index
    %1786 = vector.load %arg9[%c2_1597, %c2_1598] : memref<18x34xf32, #tpu.memory_space<vmem>>, vector<16x32xf32>
    %cst_1599 = arith.constant -0.00416666688 : f32
    %1787 = vector.broadcast %cst_1599 : f32 to vector<16x32xf32>
    %1788 = arith.mulf %1786, %1787 : vector<16x32xf32>
    %1789 = arith.addf %1785, %1788 : vector<16x32xf32>
    %cst_1600 = arith.constant -0.00416666688 : f32
    %1790 = vector.broadcast %cst_1600 : f32 to vector<16x32xf32>
    %1791 = arith.mulf %1767, %1790 : vector<16x32xf32>
    %c0_1601 = arith.constant 0 : index
    %c1_1602 = arith.constant 1 : index
    %1792 = vector.load %arg9[%c0_1601, %c1_1602] : memref<18x34xf32, #tpu.memory_space<vmem>>, vector<16x32xf32>
    %cst_1603 = arith.constant -0.0166666675 : f32
    %1793 = vector.broadcast %cst_1603 : f32 to vector<16x32xf32>
    %1794 = arith.mulf %1792, %1793 : vector<16x32xf32>
    %1795 = arith.addf %1791, %1794 : vector<16x32xf32>
    %cst_1604 = arith.constant -0.00416666688 : f32
    %1796 = vector.broadcast %cst_1604 : f32 to vector<16x32xf32>
    %1797 = arith.mulf %1770, %1796 : vector<16x32xf32>
    %1798 = arith.addf %1795, %1797 : vector<16x32xf32>
    %cst_1605 = arith.constant 0.00416666688 : f32
    %1799 = vector.broadcast %cst_1605 : f32 to vector<16x32xf32>
    %1800 = arith.mulf %1782, %1799 : vector<16x32xf32>
    %1801 = arith.addf %1798, %1800 : vector<16x32xf32>
    %c2_1606 = arith.constant 2 : index
    %c1_1607 = arith.constant 1 : index
    %1802 = vector.load %arg9[%c2_1606, %c1_1607] : memref<18x34xf32, #tpu.memory_space<vmem>>, vector<16x32xf32>
    %cst_1608 = arith.constant 0.0166666675 : f32
    %1803 = vector.broadcast %cst_1608 : f32 to vector<16x32xf32>
    %1804 = arith.mulf %1802, %1803 : vector<16x32xf32>
    %1805 = arith.addf %1801, %1804 : vector<16x32xf32>
    %cst_1609 = arith.constant 0.00416666688 : f32
    %1806 = vector.broadcast %cst_1609 : f32 to vector<16x32xf32>
    %1807 = arith.mulf %1786, %1806 : vector<16x32xf32>
    %1808 = arith.addf %1805, %1807 : vector<16x32xf32>
    %1809 = arith.subf %407, %1789 : vector<16x32xf32>
    %1810 = arith.mulf %1809, %3 : vector<16x32xf32>
    %1811 = arith.subf %414, %1808 : vector<16x32xf32>
    %1812 = arith.mulf %1811, %3 : vector<16x32xf32>
    %c0_1610 = arith.constant 0 : index
    %c0_1611 = arith.constant 0 : index
    %1813 = vector.load %arg8[%c0_1610, %c0_1611] : memref<16x128xf32, #tpu.memory_space<vmem>>, vector<16x32xf32>
    tpu.vector_store %arg8[%c0_1610, %c0_1611], %1810 {strides = array<i32>} : memref<16x128xf32, #tpu.memory_space<vmem>>, vector<16x32xf32>,
    %c0_1612 = arith.constant 0 : index
    %c32_1613 = arith.constant 32 : index
    %1814 = vector.load %arg8[%c0_1612, %c32_1613] : memref<16x128xf32, #tpu.memory_space<vmem>>, vector<16x32xf32>
    tpu.vector_store %arg8[%c0_1612, %c32_1613], %1812 {strides = array<i32>} : memref<16x128xf32, #tpu.memory_space<vmem>>, vector<16x32xf32>,
    %c0_1614 = arith.constant 0 : index
    %c64 = arith.constant 64 : index
    %1815 = vector.load %arg8[%c0_1614, %c64] : memref<16x128xf32, #tpu.memory_space<vmem>>, vector<16x32xf32>
    tpu.vector_store %arg8[%c0_1614, %c64], %1757 {strides = array<i32>} : memref<16x128xf32, #tpu.memory_space<vmem>>, vector<16x32xf32>,
    %c0_1615 = arith.constant 0 : index
    %c96 = arith.constant 96 : index
    %1816 = vector.load %arg8[%c0_1615, %c96] : memref<16x128xf32, #tpu.memory_space<vmem>>, vector<16x32xf32>
    tpu.vector_store %arg8[%c0_1615, %c96], %1757 {strides = array<i32>} : memref<16x128xf32, #tpu.memory_space<vmem>>, vector<16x32xf32>,
    return
  }
}

</mosaic_0001>

<bundles_post_ra>
// kernel: flow_past_block_step.1
= control target key start
LH: loop header
LB: loop body
LE: loop exit
PB: predicated region body
PF: predicated region fallthrough
CT: control target
= control target key end

     0   :  { %13 = vsyncpa [#allocation4], 0  ;;  %s7357_s0 = inlined_call_operand.hbm [shape: f32[16,32], index: 0, kind: input, shape index: {}]   ;;  %s7358_s1 = inlined_call_operand.hbm [shape: f32[16,32], index: 1, kind: input, shape index: {}]   ;;  %s7359_s2 = inlined_call_operand.hbm [shape: f32[16,32], index: 2, kind: input, shape index: {}]   ;;  %s7360_s3 = inlined_call_operand.hbm [shape: f32[16,32], index: 3, kind: input, shape index: {}]   ;;  %s7361_s4 = inlined_call_operand.hbm [shape: f32[8,16], index: 4, kind: input, shape index: {}]   ;;  %s7362_s5 = inlined_call_operand.hbm [shape: f32[32,16], index: 5, kind: input, shape index: {}]   ;;  %s7363_s6 = inlined_call_operand.hbm [shape: f32[16,8], index: 6, kind: input, shape index: {}]   ;;  %s7364_s7 = inlined_call_operand.hbm [shape: f32[16,32], index: 7, kind: input, shape index: {}]   ;;  %s7365_s8 = inlined_call_operand.vmem [shape: f32[16,128], index: 8, kind: output, shape index: {}]  }
   0x1   :  { %14 = vsyncpa [#allocation6], 0 }
   0x2   :  { %15 = vsyncpa [#allocation9], 0 }
   0x3   :  { %16 = vsyncpa [#allocation12], 0 }
   0x4   :  { %17 = vsyncpa [#allocation15], 0  ;;  %s35_s29 = sshll.u32 %s7358_s1, 4  ;;  %s5702_s30 = smov [#allocation5]   ;;  %s36_s29 = int_to_ptr.hbm [resolvable:$true] %s35_s29 }
   0x5   :  { %s37_s9 = sshll.u32 %s5702_s30, 4  ;;  %s61_s12 = sshll.u32 %s7360_s3, 4  ;;  %s38_s9 = int_to_ptr.vmem [resolvable:$true] %s37_s9  ;;  %s62_s12 = int_to_ptr.hbm [resolvable:$true] %s61_s12 }
   0x6   :  { %s5703_s13 = smov 128   ;;  %s5704_s14 = smov 8  }
   0x7   :  { %43 = dma.hbm_to_vmem [thread:$0]  %s36_s29, 256, %s38_s9, [#allocation6], %s5703_s13, %s5703_s13, %s5704_s14  }
   0x8   :  { %s5705_s15 = smov [#allocation8]   ;;  %s85_s1 = sshll.u32 %s7362_s5, 4  ;;  %s86_s1 = int_to_ptr.hbm [resolvable:$true] %s85_s1 }
   0x9   :  { %s63_s16 = sshll.u32 %s5705_s15, 4  ;;  %s22_s20 = sshll.u32 %s7357_s0, 4  ;;  %s64_s16 = int_to_ptr.vmem [resolvable:$true] %s63_s16  ;;  %s23_s20 = int_to_ptr.hbm [resolvable:$true] %s22_s20 }
   0xa   :  { %69 = dma.hbm_to_vmem [thread:$0]  %s62_s12, 256, %s64_s16, [#allocation9], %s5703_s13, %s5703_s13, %s5704_s14  }
   0xb   :  { %s5706_s21 = smov [#allocation11]   ;;  %s5707_s23 = smov [#allocation3]  }
   0xc   :  { %s87_s22 = sshll.u32 %s5706_s21, 4  ;;  %s24_s5 = sshll.u32 %s5707_s23, 4  ;;  %s88_s22 = int_to_ptr.vmem [resolvable:$true] %s87_s22  ;;  %s25_s5 = int_to_ptr.vmem [resolvable:$true] %s24_s5 }
   0xd   :  { %93 = dma.hbm_to_vmem [thread:$0]  %s86_s1, 512, %s88_s22, [#allocation12], %s5703_s13, %s5703_s13, %s5704_s14  }
   0xe   :  { %s48_s26 = sshll.u32 %s7359_s2, 4  ;;  %s75_s28 = sshll.u32 %s7361_s4, 4  ;;  %s49_s26 = int_to_ptr.hbm [resolvable:$true] %s48_s26  ;;  %s76_s28 = int_to_ptr.hbm [resolvable:$true] %s75_s28 }
   0xf   :  { %30 = dma.hbm_to_vmem [thread:$0]  %s23_s20, 256, %s25_s5, [#allocation4], %s5703_s13, %s5703_s13, %s5704_s14  }
  0x10   :  { %s5708_s29 = smov [#allocation7]   ;;  %s5709_s9 = smov [#allocation10]  }
  0x11   :  { %s50_s30 = sshll.u32 %s5708_s29, 4  ;;  %s77_s2 = sshll.u32 %s5709_s9, 4  ;;  %s51_s30 = int_to_ptr.vmem [resolvable:$true] %s50_s30  ;;  %s78_s2 = int_to_ptr.vmem [resolvable:$true] %s77_s2 }
  0x12   :  { %56 = dma.hbm_to_vmem [thread:$0]  %s49_s26, 256, %s51_s30, [#allocation6], %s5703_s13, %s5703_s13, %s5704_s14  }
  0x13   :  { %s98_s12 = sshll.u32 %s7363_s6, 4  ;;  %s111_s4 = sshll.u32 %s7364_s7, 4  ;;  %s99_s12 = int_to_ptr.hbm [resolvable:$true] %s98_s12  ;;  %s112_s4 = int_to_ptr.hbm [resolvable:$true] %s111_s4 }
  0x14   :  { %80 = dma.hbm_to_vmem [thread:$0]  %s76_s28, 128, %s78_s2, [#allocation9]  }
  0x15   :  { %s5710_s17 = smov [#allocation13]   ;;  %s5711_s1 = smov [#allocation14]  }
  0x16   :  { %s100_s18 = sshll.u32 %s5710_s17, 4  ;;  %s113_s3 = sshll.u32 %s5711_s1, 4  ;;  %s101_s18 = int_to_ptr.vmem [resolvable:$true] %s100_s18  ;;  %s114_s3 = int_to_ptr.vmem [resolvable:$true] %s113_s3 }
  0x17   :  { %106 = dma.hbm_to_vmem [thread:$0]  %s99_s12, 256, %s101_s18, [#allocation12], %s5703_s13, %s5703_s13, %s5704_s14  }
  0x18   :  { %119 = dma.hbm_to_vmem [thread:$0]  %s112_s4, 256, %s114_s3, [#allocation15], %s5703_s13, %s5703_s13, %s5704_s14  }
  0x19   :  { %5692 = dma.done.wait [#allocation4], 256  }
  0x1a   :  { %5693 = vsyncadd [#allocation4], 4294967040 }
  0x1b   :  { %5694 = dma.done.wait [#allocation6], 512  }
  0x1c   :  { %5695 = vsyncadd [#allocation6], 4294966784 }
  0x1d   :  { %5696 = dma.done.wait [#allocation9], 384  }
  0x1e   :  { %5697 = vsyncadd [#allocation9], 4294966912 }
  0x1f   :  { %5698 = dma.done.wait [#allocation12], 768  }
  0x20   :  { %5699 = vsyncadd [#allocation12], 4294966528 }
  0x21   :  { %5700 = dma.done.wait [#allocation15], 256  }
  0x22   :  { %5701 = vsyncadd [#allocation15], 4294967040  ;;  %v156_v0 = vld [vmem:[#allocation7] sm:$0xff]  ;;  %s5712_s6 = smov 1   ;;  %v157_v1 = vld [vmem:[#allocation7 + $0x8] sm:$0xff]  ;;  %vm168_vm0 = vcmask 269320  }
  0x23   :  { %162 = vrot.lane.b32.xlu0 %v156_v0, %s5712_s6  ;;  %s5713_s7 = smov 127   ;;  %v5822_v6 = vld [vmem:[#allocation3] sm:$0xff]  ;;  %v5826_v7 = vld [vmem:[#allocation3 + $0x8] sm:$0xff]  ;;  %vm181_vm1 = vcmask 7168   ;;  %vm194_vm2 = vcmask 277768   ;;  %vm198_vm3 = vcmask 270336  }
  0x24   :  { %v5854_v26 = vld [vmem:[#allocation5] sm:$0xff]  ;;  %s5714_s13 = smov 126   ;;  %v5862_v30 = vld [vmem:[#allocation5 + $0x8] sm:$0xff]  ;;  %v5715_v37 = vmov 1.0   ;;  %vm332_vm4 = vcmask 1024   ;;  %vm1692_vm5 = vcmask 44032  }
  0x25   :  { %vm1895_vm6 = vcmask 140288   ;;  %vm1452_vm7 = vcmask 130048   ;;  %vm7370_vm8 = vcmask 261120   ;;  %vm1505_vm9 = vcmask 64512   ;;  %s5717_s14 = smov 64   ;;  %s5718_s19 = smov 96  }
  0x26   :  { %vm1559_vm10 = vcmask 1043456   ;;  %vm1555_vm11 = vcmask 31744   ;;  %vm1612_vm12 = vcmask 1041408   ;;  %vm1608_vm13 = vcmask 15360   ;;  %s5719_s20 = smov 32  }
  0x27   :  { %vm1698_vm14 = vcmask 33800   ;;  %vm7369_vm15 = vcmask 78848  }
  0x2b   :  { %164 = vrot.lane.b32.xlu0 %v157_v1, %s5712_s6 }
  0x33   :  { %294 = vrot.lane.b32.xlu0 %v5822_v6, %s5712_s6 }
  0x95   :  { %v5812_v2 = vpop.permute.xlu0 %162 }
  0x96   :  { %169 = vst.msk [vmem:[#allocation2 + $0x1] sm:$0xff] %vm168_vm0, %v5812_v2 }
  0x9d   :  { %v5816_v3 = vpop.permute.xlu0 %164  ;;  %v171_v4 = vld [vmem:[#allocation2 + $0x1] sm:$0xff] }
  0x9e   :  { %170 = vst.msk [vmem:[#allocation2 + $0x9] sm:$0xff] %vm168_vm0, %v5816_v3  ;;  %175 = vrot.lane.b32.xlu1 %v171_v4, %s5713_s7 }
  0xa5   :  { %v172_v5 = vld [vmem:[#allocation2 + $0x9] sm:$0xff]  ;;  %v295_v16 = vpop.permute.xlu0 %294 }
  0xa6   :  { %177 = vrot.lane.b32.xlu1 %v172_v5, %s5713_s7 }
  0xae   :  { %296 = vrot.lane.b32.xlu1 %v5826_v7, %s5712_s6 }
 0x110   :  { %v176_v8 = vpop.permute.xlu1 %175 }
 0x111   :  { %182 = vst.msk [vmem:[#allocation2 + $0x1] sm:$0xff] %vm181_vm1, %v176_v8 }
 0x118   :  { %v178_v9 = vpop.permute.xlu1 %177  ;;  %v184_v10 = vld [vmem:[#allocation2 + $0x1] sm:$0xff] }
 0x119   :  { %183 = vst.msk [vmem:[#allocation2 + $0x9] sm:$0xff] %vm181_vm1, %v178_v9  ;;  %188 = vrot.lane.b32.xlu2 %v184_v10, %s5712_s6 }
 0x120   :  { %v185_v11 = vld [vmem:[#allocation2 + $0x9] sm:$0xff]  ;;  %v297_v21 = vpop.permute.xlu1 %296 }
 0x121   :  { %190 = vrot.lane.b32.xlu2 %v185_v11, %s5712_s6 }
 0x173   :  { %v189_v12 = vpop.permute.xlu2 %188 }
 0x174   :  { %195 = vst.msk [vmem:[#allocation2 + $0x1] sm:$0xff] %vm194_vm2, %v189_v12 }
 0x17b   :  { %v197_v13 = vld [vmem:[#allocation2 + $0x1] sm:$0x1]  ;;  %v191_v14 = vpop.permute.xlu2 %190 }
 0x17c   :  { %199 = vst.msk [vmem:[#allocation2] sm:$0x1] %vm198_vm3, %v197_v13  ;;  %v5841_v19 = vld [vmem:[#allocation2 + $0x1] sm:$0xff] }
 0x17d   :  { %196 = vst.msk [vmem:[#allocation2 + $0x9] sm:$0xff] %vm194_vm2, %v191_v14  ;;  %v224_v27 = vmul.f32 -0.016666668, %v5841_v19 }
 0x183   :  { %v5837_v15 = vld [vmem:[#allocation2] sm:$0xff] }
 0x184   :  { %v200_v17 = vld [vmem:[#allocation2 + $0x10] sm:$0x1]  ;;  %v5839_v18 = vld [vmem:[#allocation2 + $0x8] sm:$0xff]  ;;  %v5867_v31 = vmul.f32 -0.004166667, %v5837_v15 }
 0x185   :  { %201 = vst.msk [vmem:[#allocation2 + $0x11] sm:$0x1] %vm198_vm3, %v200_v17  ;;  %v5844_v20 = vld [vmem:[#allocation2 + $0x2] sm:$0xff]  ;;  %v5952_v5 = vmul.f32 -0.004166667, %v5839_v18 }
 0x186   :  { %300 = vst.msk [vmem:[#allocation2 + $0x1] sm:$0xff] %vm168_vm0, %v295_v16  ;;  %v5847_v22 = vld [vmem:[#allocation2 + $0x9] sm:$0xff]  ;;  %v242_v9 = vmul.f32 -0.004166667, %v5844_v20 }
 0x187   :  { %v225_v12 = vmul.f32 -0.016666668, %v5847_v22 }
 0x18c   :  { %v5849_v23 = vld [vmem:[#allocation2 + $0xa] sm:$0xff] }
 0x18d   :  { %301 = vst.msk [vmem:[#allocation2 + $0x9] sm:$0xff] %vm168_vm0, %v297_v21  ;;  %v302_v24 = vld [vmem:[#allocation2 + $0x1] sm:$0xff]  ;;  %v243_v11 = vmul.f32 -0.004166667, %v5849_v23 }
 0x18e   :  { %306 = vrot.lane.b32.xlu2 %v302_v24, %s5713_s7 }
 0x194   :  { %v303_v25 = vld [vmem:[#allocation2 + $0x9] sm:$0xff] }
 0x195   :  { %308 = vrot.lane.b32.xlu0 %v303_v25, %s5713_s7 }
 0x19d   :  { %494 = vrot.lane.b32.xlu0 %v5854_v26, %s5712_s6 }
 0x1a5   :  { %228 = vrot.lane.b32.xlu0 %v224_v27, %s5714_s13 }
 0x1e8   :  { %v307_v28 = vpop.permute.xlu2 %306 }
 0x1e9   :  { %312 = vst.msk [vmem:[#allocation2 + $0x1] sm:$0xff] %vm181_vm1, %v307_v28 }
 0x1f0   :  { %v314_v29 = vld [vmem:[#allocation2 + $0x1] sm:$0xff] }
 0x1f1   :  { %318 = vrot.lane.b32.xlu1 %v314_v29, %s5712_s6 }
 0x1f9   :  { %496 = vrot.lane.b32.xlu1 %v5862_v30, %s5712_s6 }
 0x201   :  { %210 = vrot.lane.b32.xlu1 %v5867_v31, %s5714_s13 }
 0x207   :  { %v309_v32 = vpop.permute.xlu0 %308 }
 0x208   :  { %313 = vst.msk [vmem:[#allocation2 + $0x9] sm:$0xff] %vm181_vm1, %v309_v32 }
 0x20f   :  { %v315_v33 = vld [vmem:[#allocation2 + $0x9] sm:$0xff]  ;;  %v495_v42 = vpop.permute.xlu0 %494 }
 0x210   :  { %320 = vrot.lane.b32.xlu2 %v315_v33, %s5712_s6 }
 0x217   :  { %v5973_v17 = vpop.permute.xlu0 %228 }
 0x263   :  { %v319_v34 = vpop.permute.xlu1 %318 }
 0x264   :  { %324 = vst.msk [vmem:[#allocation2 + $0x1] sm:$0xff] %vm194_vm2, %v319_v34 }
 0x26a   :  { %v321_v35 = vpop.permute.xlu2 %320 }
 0x26b   :  { %v326_v36 = vld [vmem:[#allocation2 + $0x1] sm:$0x1]  ;;  %325 = vst.msk [vmem:[#allocation2 + $0x9] sm:$0xff] %vm194_vm2, %v321_v35  ;;  %v497_v47 = vpop.permute.xlu1 %496 }
 0x26c   :  { %327 = vst.msk [vmem:[#allocation2] sm:$0x1] %vm198_vm3, %v326_v36 }
 0x26d   :  { %330 = vst.msk [vmem:[#allocation2] sm:$0xff] %vm181_vm1, %v5715_v37 }
 0x26e   :  { %331 = vst.msk [vmem:[#allocation2 + $0x8] sm:$0xff] %vm181_vm1, %v5715_v37 }
 0x272   :  { %v328_v38 = vld [vmem:[#allocation2 + $0x10] sm:$0x1] }
 0x273   :  { %329 = vst.msk [vmem:[#allocation2 + $0x11] sm:$0x1] %vm198_vm3, %v328_v38  ;;  %v5975_v21 = vpop.permute.xlu1 %210 }
 0x274   :  { %333 = vst.msk [vmem:[#allocation2 + $0x10] sm:$0x3] %vm332_vm4, %v5715_v37  ;;  %v5883_v39 = vld [vmem:[#allocation2] sm:$0xff] }
 0x275   :  { %v5886_v40 = vmul.f32 0.00016666666, %v5883_v39  ;;  %v5888_v41 = vld [vmem:[#allocation2 + $0x8] sm:$0xff]  ;;  %v5903_v49 = vmul.f32 -0.004166667, %v5883_v39 }
 0x276   :  { %v368_v43 = vld [vmem:[#allocation2 + $0x2] sm:$0xff]  ;;  %v5891_v44 = vmul.f32 0.00016666666, %v5888_v41  ;;  %v387_v45 = vmul.f32 -0.016666668, %v5888_v41 }
 0x277   :  { %v5894_v46 = vld [vmem:[#allocation2 + $0x1] sm:$0xff]  ;;  %428 = vrot.lane.b32.xlu2 %v5886_v40, %s5713_s7  ;;  %v386_v52 = vmul.f32 -0.016666668, %v5883_v39  ;;  %v5917_v53 = vmul.f32 -0.004166667, %v5888_v41 }
 0x278   :  { %500 = vst.msk [vmem:[#allocation2 + $0x1] sm:$0xff] %vm168_vm0, %v495_v42  ;;  %430 = vrot.lane.b32.xlu1 %v5891_v44, %s5713_s7  ;;  %392 = vrot.lane.b32.xlu0 %v387_v45, %s5713_s7  ;;  %v448_v51 = vmul.f32 -0.0013333333, %v5894_v46  ;;  %v444_v54 = vmul.f32 0.00016666666, %v5894_v46 }
 0x279   :  { %v356_v55 = vmul.f32 -0.016666668, %v5894_v46  ;;  %v402_v56 = vmul.f32 0.016666668, %v368_v43  ;;  %v374_v57 = vmul.f32 -0.004166667, %v368_v43 }
 0x27a   :  { %v5928_v58 = vmul.f32 0.00016666666, %v368_v43  ;;  %v5939_v61 = vmul.f32 0.004166667, %v368_v43  ;;  %v336_v45 = vmul.f32 0.004166667, %v5883_v39 }
 0x27b   :  { %v369_v48 = vld [vmem:[#allocation2 + $0xa] sm:$0xff] }
 0x27c   :  { %v5905_v50 = vld [vmem:[#allocation2 + $0x9] sm:$0xff]  ;;  %v375_v0 = vmul.f32 -0.004166667, %v369_v48  ;;  %v5949_v4 = vmul.f32 0.00016666666, %v369_v48 }
 0x27d   :  { %501 = vst.msk [vmem:[#allocation2 + $0x9] sm:$0xff] %vm168_vm0, %v497_v47  ;;  %v5931_v59 = vmul.f32 0.00016666666, %v5905_v50  ;;  %v449_v60 = vmul.f32 -0.0013333333, %v5905_v50 }
 0x27e   :  { %v357_v63 = vmul.f32 -0.016666668, %v5905_v50  ;;  %v403_v8 = vmul.f32 0.016666668, %v369_v48  ;;  %v5965_v10 = vmul.f32 0.004166667, %v369_v48 }
 0x27f   :  { %342 = vrot.lane.b32.xlu2 %v5903_v49, %s5714_s13  ;;  %v502_v62 = vld [vmem:[#allocation2 + $0x1] sm:$0xff] }
 0x280   :  { %438 = vrot.lane.b32.xlu1 %v5891_v44, %s5714_s13  ;;  %436 = vrot.lane.b32.xlu0 %v5886_v40, %s5714_s13 }
 0x284   :  { %v503_v1 = vld [vmem:[#allocation2 + $0x9] sm:$0xff] }
 0x287   :  { %452 = vrot.lane.b32.xlu2 %v448_v51, %s5713_s7 }
 0x288   :  { %390 = vrot.lane.b32.xlu0 %v386_v52, %s5713_s7  ;;  %344 = vrot.lane.b32.xlu1 %v5917_v53, %s5714_s13  ;;  %v352_v52 = vmul.f32 0.016666668, %v5894_v46 }
 0x28f   :  { %462 = vrot.lane.b32.xlu2 %v444_v54, %s5714_s13 }
 0x290   :  { %360 = vrot.lane.b32.xlu0 %v356_v55, %s5714_s13  ;;  %406 = vrot.lane.b32.xlu1 %v402_v56, %s5713_s7 }
 0x297   :  { %378 = vrot.lane.b32.xlu2 %v374_v57, %s5714_s13 }
 0x298   :  { %476 = vrot.lane.b32.xlu0 %v5928_v58, %s5713_s7  ;;  %464 = vrot.lane.b32.xlu1 %v5931_v59, %s5714_s13 }
 0x29f   :  { %454 = vrot.lane.b32.xlu2 %v449_v60, %s5713_s7 }
 0x2a0   :  { %416 = vrot.lane.b32.xlu0 %v5939_v61, %s5714_s13  ;;  %506 = vrot.lane.b32.xlu1 %v502_v62, %s5713_s7 }
 0x2a7   :  { %362 = vrot.lane.b32.xlu2 %v357_v63, %s5714_s13 }
 0x2a8   :  { %508 = vrot.lane.b32.xlu0 %v503_v1, %s5713_s7  ;;  %380 = vrot.lane.b32.xlu1 %v375_v0, %s5714_s13 }
 0x2af   :  { %484 = vrot.lane.b32.xlu2 %v5928_v58, %s5714_s13 }
 0x2b0   :  { %478 = vrot.lane.b32.xlu0 %v5949_v4, %s5713_s7  ;;  %212 = vrot.lane.b32.xlu1 %v5952_v5, %s5714_s13 }
 0x2b7   :  { %408 = vrot.lane.b32.xlu2 %v403_v8, %s5713_s7 }
 0x2b8   :  { %486 = vrot.lane.b32.xlu0 %v5949_v4, %s5714_s13  ;;  %246 = vrot.lane.b32.xlu1 %v242_v9, %s5714_s13 }
 0x2bf   :  { %418 = vrot.lane.b32.xlu2 %v5965_v10, %s5714_s13 }
 0x2c0   :  { %248 = vrot.lane.b32.xlu0 %v243_v11, %s5714_s13  ;;  %v337_v11 = vmul.f32 0.004166667, %v5888_v41 }
 0x2c7   :  { %230 = vrot.lane.b32.xlu2 %v225_v12, %s5714_s13 }
 0x2d1   :  { %v429_v13 = vpop.permute.xlu2 %428 }
 0x2d2   :  { %v434_v36 = vadd.f32 %v429_v13, %v5886_v40 }
 0x2d9   :  { %v343_v14 = vpop.permute.xlu2 %342 }
 0x2da   :  { %v348_v48 = vadd.f32 %v343_v14, %v336_v45 }
 0x2dc   :  { %v354_v62 = vadd.f32 %v352_v52, %v348_v48 }
 0x2e1   :  { %v453_v16 = vpop.permute.xlu2 %452 }
 0x2e9   :  { %v463_v24 = vpop.permute.xlu2 %462 }
 0x2ea   :  { %v431_v25 = vpop.permute.xlu1 %430  ;;  %v393_v27 = vpop.permute.xlu0 %392 }
 0x2f1   :  { %v379_v28 = vpop.permute.xlu2 %378 }
 0x2f2   :  { %v439_v29 = vpop.permute.xlu1 %438  ;;  %v437_v32 = vpop.permute.xlu0 %436 }
 0x2f3   :  { %v442_v47 = vadd.f32 %v437_v32, %v434_v36 }
 0x2f5   :  { %v446_v51 = vadd.f32 %v444_v54, %v442_v47  ;;  %v353_v47 = vmul.f32 0.016666668, %v5905_v50 }
 0x2f7   :  { %v458_v57 = vadd.f32 %v453_v16, %v446_v51  ;;  %v254_v51 = vmul.f32 -0.016666668, %v5837_v15 }
 0x2f9   :  { %v455_v33 = vpop.permute.xlu2 %454  ;;  %v468_v40 = vadd.f32 %v463_v24, %v458_v57  ;;  %v204_v24 = vmul.f32 0.004166667, %v5837_v15 }
 0x2fa   :  { %v345_v34 = vpop.permute.xlu1 %344  ;;  %v391_v35 = vpop.permute.xlu0 %390 }
 0x2fb   :  { %v396_v60 = vadd.f32 %v391_v35, %v5903_v49  ;;  %v472_v46 = vadd.f32 %v5928_v58, %v468_v40  ;;  %v435_v49 = vadd.f32 %v431_v25, %v5891_v44  ;;  %v349_v45 = vadd.f32 %v345_v34, %v337_v11 }
 0x2fc   :  { %v216_v41 = vadd.f32 %v5975_v21, %v204_v24  ;;  %v397_v44 = vadd.f32 %v393_v27, %v5917_v53  ;;  %v6009_v40 = vmul.f32 0.004166667, %v5844_v20 }
 0x2fd   :  { %v398_v0 = vadd.f32 %v396_v60, %v343_v14 }
 0x2fe   :  { %v399_v52 = vadd.f32 %v397_v44, %v345_v34 }
 0x2ff   :  { %v400_v39 = vadd.f32 %v398_v0, %v5939_v61 }
 0x301   :  { %v363_v43 = vpop.permute.xlu2 %362 }
 0x302   :  { %v407_v38 = vpop.permute.xlu1 %406  ;;  %v361_v42 = vpop.permute.xlu0 %360 }
 0x303   :  { %v366_v1 = vadd.f32 %v361_v42, %v354_v62  ;;  %v412_v13 = vadd.f32 %v407_v38, %v400_v39  ;;  %v443_v42 = vadd.f32 %v439_v29, %v435_v49  ;;  %v355_v29 = vadd.f32 %v353_v47, %v349_v45 }
 0x304   :  { %v6025_v47 = vmul.f32 0.004166667, %v5849_v23 }
 0x305   :  { %v372_v54 = vadd.f32 %v5939_v61, %v366_v1  ;;  %v447_v38 = vadd.f32 %v5931_v59, %v443_v42  ;;  %v367_v57 = vadd.f32 %v363_v43, %v355_v29  ;;  %v401_v59 = vadd.f32 %v399_v52, %v5965_v10 }
 0x306   :  { %v221_v43 = vmul.f32 0.016666668, %v5847_v22 }
 0x307   :  { %v384_v16 = vadd.f32 %v379_v28, %v372_v54  ;;  %v220_v28 = vmul.f32 0.016666668, %v5841_v19  ;;  %v205_v19 = vmul.f32 0.004166667, %v5839_v18  ;;  %v373_v15 = vadd.f32 %v5965_v10, %v367_v57 }
 0x309   :  { %v485_v63 = vpop.permute.xlu2 %484  ;;  %v693_v58 = vmul.f32 %v384_v16, %v5822_v6  ;;  %v222_v50 = vadd.f32 %v220_v28, %v216_v41  ;;  %v6033_v28 = vld [vmem:[#allocation8 + $0x8] sm:$0xff] }
 0x30a   :  { %v465_v55 = vpop.permute.xlu1 %464  ;;  %v477_v56 = vpop.permute.xlu0 %476 }
 0x30b   :  { %v482_v14 = vadd.f32 %v477_v56, %v472_v46  ;;  %v459_v56 = vadd.f32 %v455_v33, %v447_v38  ;;  %v234_v34 = vadd.f32 %v5973_v17, %v222_v50 }
 0x30d   :  { %v490_v25 = vadd.f32 %v485_v63, %v482_v14  ;;  %v469_v63 = vadd.f32 %v465_v55, %v459_v56  ;;  %v240_v49 = vadd.f32 %v6009_v40, %v234_v34 }
 0x30f   :  { %v695_v60 = vsub.f32 %v490_v25, %v693_v58  ;;  %v473_v39 = vadd.f32 %v5949_v4, %v469_v63 }
 0x311   :  { %v409_v12 = vpop.permute.xlu2 %408 }
 0x312   :  { %v507_v8 = vpop.permute.xlu1 %506  ;;  %v417_v9 = vpop.permute.xlu0 %416  ;;  %v413_v55 = vadd.f32 %v409_v12, %v401_v59  ;;  %v6017_v12 = vld [vmem:[#allocation8] sm:$0xff] }
 0x313   :  { %512 = vst.msk [vmem:[#allocation2 + $0x1] sm:$0xff] %vm181_vm1, %v507_v8  ;;  %v422_v61 = vadd.f32 %v417_v9, %v412_v13 }
 0x315   :  { %v697_v48 = vmul.f32 %v422_v61, %v5854_v26 }
 0x317   :  { %v699_v1 = vsub.f32 %v695_v60, %v697_v48 }
 0x319   :  { %v419_v62 = vpop.permute.xlu2 %418  ;;  %v701_v8 = vmul.f32 0.5, %v699_v1 }
 0x31a   :  { %v381_v32 = vpop.permute.xlu1 %380  ;;  %v509_v35 = vpop.permute.xlu0 %508  ;;  %v514_v36 = vld [vmem:[#allocation2 + $0x1] sm:$0xff]  ;;  %v423_v54 = vadd.f32 %v419_v62, %v413_v55 }
 0x31b   :  { %513 = vst.msk [vmem:[#allocation2 + $0x9] sm:$0xff] %vm181_vm1, %v509_v35  ;;  %518 = vrot.lane.b32.xlu1 %v514_v36, %s5712_s6  ;;  %v385_v9 = vadd.f32 %v381_v32, %v373_v15  ;;  %v703_v22 = vadd.f32 %v701_v8, %v5822_v6 }
 0x31c   :  { %v698_v32 = vmul.f32 %v423_v54, %v5862_v30 }
 0x31d   :  { %v694_v16 = vmul.f32 %v385_v9, %v5826_v7 }
 0x321   :  { %v231_v24 = vpop.permute.xlu2 %230 }
 0x322   :  { %v5998_v0 = vpop.permute.xlu1 %212  ;;  %v479_v53 = vpop.permute.xlu0 %478  ;;  %v515_v27 = vld [vmem:[#allocation2 + $0x9] sm:$0xff] }
 0x323   :  { %258 = vrot.lane.b32.xlu1 %v254_v51, %s5713_s7  ;;  %520 = vrot.lane.b32.xlu2 %v515_v27, %s5712_s6  ;;  %v217_v33 = vadd.f32 %v5998_v0, %v205_v19  ;;  %v483_v11 = vadd.f32 %v479_v53, %v473_v39  ;;  %v7366_v51 = vmov 0.0  }
 0x325   :  { %v223_v46 = vadd.f32 %v221_v43, %v217_v33 }
 0x327   :  { %v235_v36 = vadd.f32 %v231_v24, %v223_v46 }
 0x329   :  { %v241_v41 = vadd.f32 %v6025_v47, %v235_v36  ;;  %v255_v36 = vmul.f32 -0.016666668, %v5839_v18  ;;  %v271_v18 = vmul.f32 0.016666668, %v5849_v23 }
 0x32a   :  { %v247_v10 = vpop.permute.xlu1 %246  ;;  %v487_v13 = vpop.permute.xlu0 %486 }
 0x32b   :  { %v6014_v17 = vadd.f32 %v247_v10, %v240_v49  ;;  %v491_v14 = vadd.f32 %v487_v13, %v483_v11 }
 0x32d   :  { %v705_v4 = vsub.f32 %v703_v22, %v6014_v17  ;;  %v696_v35 = vsub.f32 %v491_v14, %v694_v16 }
 0x32f   :  { %v700_v42 = vsub.f32 %v696_v35, %v698_v32  ;;  %v6022_v45 = vmul.f32 %v705_v4, %v6017_v12  ;;  %v270_v4 = vmul.f32 0.016666668, %v5844_v20 }
 0x331   :  { %v702_v61 = vmul.f32 0.5, %v700_v42  ;;  %727 = vrot.lane.b32.xlu0 %v6022_v45, %s5712_s6 }
 0x332   :  { %v249_v44 = vpop.permute.xlu0 %248 }
 0x333   :  { %v704_v58 = vadd.f32 %v702_v61, %v5826_v7  ;;  %v6031_v25 = vadd.f32 %v249_v44, %v241_v41 }
 0x335   :  { %v706_v38 = vsub.f32 %v704_v58, %v6031_v25 }
 0x337   :  { %v6037_v29 = vmul.f32 %v706_v38, %v6033_v28 }
 0x339   :  { %729 = vrot.lane.b32.xlu1 %v6037_v29, %s5712_s6 }
 0x37d   :  { %v521_v48 = vpop.permute.xlu2 %520 }
 0x37e   :  { %525 = vst.msk [vmem:[#allocation2 + $0x9] sm:$0xff] %vm194_vm2, %v521_v48 }
 0x385   :  { %v528_v50 = vld [vmem:[#allocation2 + $0x10] sm:$0x1] }
 0x386   :  { %529 = vst.msk [vmem:[#allocation2 + $0x11] sm:$0x1] %vm198_vm3, %v528_v50 }
 0x387   :  { %532 = vst.msk [vmem:[#allocation2 + $0x10] sm:$0x3] %vm332_vm4, %v7366_v51 }
 0x388   :  { %534 = vst.msk [vmem:[#allocation2 + $0x11] sm:$0x1] %vm198_vm3, %v7366_v51 }
 0x38d   :  { %v519_v52 = vpop.permute.xlu1 %518 }
 0x38e   :  { %524 = vst.msk [vmem:[#allocation2 + $0x1] sm:$0xff] %vm194_vm2, %v519_v52 }
 0x38f   :  { %531 = vst.msk [vmem:[#allocation2 + $0x8] sm:$0xff] %vm181_vm1, %v7366_v51 }
 0x395   :  { %v526_v56 = vld [vmem:[#allocation2 + $0x1] sm:$0x1]  ;;  %v6074_v59 = vpop.permute.xlu1 %258 }
 0x396   :  { %527 = vst.msk [vmem:[#allocation2] sm:$0x1] %vm198_vm3, %v526_v56  ;;  %v6051_v57 = vld [vmem:[#allocation2 + $0x8] sm:$0xff] }
 0x397   :  { %530 = vst.msk [vmem:[#allocation2] sm:$0xff] %vm181_vm1, %v7366_v51  ;;  %v588_v60 = vmul.f32 -0.016666668, %v6051_v57  ;;  %v6057_v62 = vmul.f32 0.00016666666, %v6051_v57  ;;  %v6089_v55 = vld [vmem:[#allocation2 + $0x9] sm:$0xff] }
 0x398   :  { %533 = vst.msk [vmem:[#allocation2] sm:$0x1] %vm198_vm3, %v7366_v51  ;;  %v6083_v43 = vmul.f32 -0.004166667, %v6051_v57  ;;  %v570_v8 = vld [vmem:[#allocation2 + $0xa] sm:$0xff] }
 0x399   :  { %593 = vrot.lane.b32.xlu0 %v588_v60, %s5713_s7  ;;  %631 = vrot.lane.b32.xlu1 %v6057_v62, %s5713_s7  ;;  %v650_v49 = vmul.f32 -0.0013333333, %v6089_v55  ;;  %v6103_v10 = vmul.f32 0.00016666666, %v6089_v55  ;;  %v558_v16 = vmul.f32 -0.016666668, %v6089_v55 }
 0x39a   :  { %v576_v14 = vmul.f32 -0.004166667, %v570_v8  ;;  %v604_v24 = vmul.f32 0.016666668, %v570_v8  ;;  %v6128_v42 = vmul.f32 0.00016666666, %v570_v8 }
 0x39b   :  { %v6134_v20 = vmul.f32 0.004166667, %v570_v8 }
 0x39e   :  { %v6064_v53 = vld [vmem:[#allocation2 + $0x1] sm:$0xff] }
 0x39f   :  { %v649_v27 = vmul.f32 -0.0013333333, %v6064_v53  ;;  %v557_v63 = vmul.f32 -0.016666668, %v6064_v53  ;;  %v569_v1 = vld [vmem:[#allocation2 + $0x2] sm:$0xff] }
 0x3a0   :  { %v6070_v19 = vld [vmem:[#allocation2] sm:$0xff]  ;;  %v6078_v33 = vmul.f32 0.00016666666, %v6064_v53  ;;  %v6080_v34 = vmul.f32 0.00016666666, %v569_v1 }
 0x3a1   :  { %653 = vrot.lane.b32.xlu2 %v649_v27, %s5713_s7  ;;  %561 = vrot.lane.b32.xlu0 %v557_v63, %s5714_s13  ;;  %v575_v39 = vmul.f32 -0.004166667, %v569_v1  ;;  %v6094_v54 = vmul.f32 0.004166667, %v569_v1  ;;  %v603_v46 = vmul.f32 0.016666668, %v569_v1 }
 0x3a2   :  { %639 = vrot.lane.b32.xlu1 %v6057_v62, %s5714_s13  ;;  %v625_v11 = vmul.f32 0.00016666666, %v6070_v19  ;;  %v587_v13 = vmul.f32 -0.016666668, %v6070_v19  ;;  %v539_v35 = vmul.f32 -0.004166667, %v6070_v19 }
 0x3a3   :  { %v728_v15 = vpop.permute.xlu0 %727 }
 0x3a4   :  { %733 = vst.msk [vmem:[#allocation2 + $0x1] sm:$0xff] %vm168_vm0, %v728_v15 }
 0x3a9   :  { %663 = vrot.lane.b32.xlu2 %v6078_v33, %s5714_s13  ;;  %677 = vrot.lane.b32.xlu0 %v6080_v34, %s5713_s7 }
 0x3aa   :  { %545 = vrot.lane.b32.xlu1 %v6083_v43, %s5714_s13 }
 0x3ab   :  { %v730_v9 = vpop.permute.xlu1 %729  ;;  %v735_v22 = vld [vmem:[#allocation2 + $0x1] sm:$0xff] }
 0x3ac   :  { %734 = vst.msk [vmem:[#allocation2 + $0x9] sm:$0xff] %vm168_vm0, %v730_v9 }
 0x3b1   :  { %579 = vrot.lane.b32.xlu2 %v575_v39, %s5714_s13  ;;  %617 = vrot.lane.b32.xlu0 %v6094_v54, %s5714_s13 }
 0x3b2   :  { %607 = vrot.lane.b32.xlu1 %v603_v46, %s5713_s7 }
 0x3b3   :  { %v736_v32 = vld [vmem:[#allocation2 + $0x9] sm:$0xff] }
 0x3b9   :  { %637 = vrot.lane.b32.xlu0 %v625_v11, %s5714_s13  ;;  %655 = vrot.lane.b32.xlu2 %v650_v49, %s5713_s7 }
 0x3ba   :  { %665 = vrot.lane.b32.xlu1 %v6103_v10, %s5714_s13 }
 0x3c1   :  { %591 = vrot.lane.b32.xlu0 %v587_v13, %s5713_s7  ;;  %563 = vrot.lane.b32.xlu2 %v558_v16, %s5714_s13  ;;  %v537_v13 = vmul.f32 0.004166667, %v6070_v19 }
 0x3c2   :  { %739 = vrot.lane.b32.xlu1 %v735_v22, %s5713_s7  ;;  %v553_v22 = vmul.f32 0.016666668, %v6064_v53 }
 0x3c9   :  { %685 = vrot.lane.b32.xlu2 %v6080_v34, %s5714_s13  ;;  %581 = vrot.lane.b32.xlu0 %v576_v14, %s5714_s13 }
 0x3ca   :  { %609 = vrot.lane.b32.xlu1 %v604_v24, %s5713_s7 }
 0x3d1   :  { %629 = vrot.lane.b32.xlu2 %v625_v11, %s5713_s7  ;;  %741 = vrot.lane.b32.xlu0 %v736_v32, %s5713_s7 }
 0x3d2   :  { %274 = vrot.lane.b32.xlu1 %v270_v4, %s5713_s7 }
 0x3d9   :  { %543 = vrot.lane.b32.xlu2 %v539_v35, %s5714_s13  ;;  %260 = vrot.lane.b32.xlu0 %v255_v36, %s5713_s7 }
 0x3da   :  { %284 = vrot.lane.b32.xlu1 %v6009_v40, %s5714_s13 }
 0x3e1   :  { %679 = vrot.lane.b32.xlu2 %v6128_v42, %s5713_s7  ;;  %687 = vrot.lane.b32.xlu0 %v6128_v42, %s5714_s13 }
 0x3e9   :  { %619 = vrot.lane.b32.xlu2 %v6134_v20, %s5714_s13  ;;  %286 = vrot.lane.b32.xlu0 %v6025_v47, %s5714_s13 }
 0x3f1   :  { %276 = vrot.lane.b32.xlu2 %v271_v18, %s5713_s7 }
 0x3fb   :  { %v654_v61 = vpop.permute.xlu2 %653 }
 0x403   :  { %v664_v41 = vpop.permute.xlu2 %663 }
 0x40b   :  { %v580_v44 = vpop.permute.xlu2 %579  ;;  %v632_v58 = vpop.permute.xlu1 %631 }
 0x40c   :  { %v594_v38 = vpop.permute.xlu0 %593 }
 0x413   :  { %v656_v48 = vpop.permute.xlu2 %655 }
 0x414   :  { %v640_v50 = vpop.permute.xlu1 %639  ;;  %v562_v52 = vpop.permute.xlu0 %561 }
 0x41b   :  { %v564_v56 = vpop.permute.xlu2 %563 }
 0x41c   :  { %v546_v60 = vpop.permute.xlu1 %545  ;;  %v678_v27 = vpop.permute.xlu0 %677 }
 0x423   :  { %v686_v63 = vpop.permute.xlu2 %685 }
 0x424   :  { %v608_v1 = vpop.permute.xlu1 %607  ;;  %v618_v15 = vpop.permute.xlu0 %617 }
 0x42b   :  { %v630_v8 = vpop.permute.xlu2 %629 }
 0x42c   :  { %v635_v9 = vadd.f32 %v630_v8, %v625_v11  ;;  %v666_v39 = vpop.permute.xlu1 %665  ;;  %v638_v23 = vpop.permute.xlu0 %637 }
 0x42e   :  { %v643_v46 = vadd.f32 %v638_v23, %v635_v9 }
 0x430   :  { %v647_v49 = vadd.f32 %v6078_v33, %v643_v46 }
 0x432   :  { %v659_v16 = vadd.f32 %v654_v61, %v647_v49 }
 0x433   :  { %v544_v14 = vpop.permute.xlu2 %543 }
 0x434   :  { %v669_v24 = vadd.f32 %v664_v41, %v659_v16  ;;  %v549_v32 = vadd.f32 %v544_v14, %v537_v13  ;;  %v740_v4 = vpop.permute.xlu1 %739  ;;  %v592_v36 = vpop.permute.xlu0 %591 }
 0x435   :  { %745 = vst.msk [vmem:[#allocation2 + $0x1] sm:$0xff] %vm181_vm1, %v740_v4  ;;  %v597_v18 = vadd.f32 %v592_v36, %v539_v35  ;;  %v538_v35 = vmul.f32 0.004166667, %v6051_v57 }
 0x436   :  { %v555_v51 = vadd.f32 %v553_v22, %v549_v32  ;;  %v673_v11 = vadd.f32 %v6080_v34, %v669_v24 }
 0x437   :  { %v599_v8 = vadd.f32 %v597_v18, %v544_v14 }
 0x438   :  { %v567_v9 = vadd.f32 %v562_v52, %v555_v51  ;;  %v683_v61 = vadd.f32 %v678_v27, %v673_v11  ;;  %v264_v51 = vadd.f32 %v6074_v59, %v5867_v31  ;;  %v636_v52 = vadd.f32 %v632_v58, %v6057_v62 }
 0x439   :  { %v601_v33 = vadd.f32 %v599_v8, %v6094_v54  ;;  %v598_v62 = vadd.f32 %v594_v38, %v6083_v43 }
 0x43a   :  { %v573_v19 = vadd.f32 %v6094_v54, %v567_v9  ;;  %v691_v34 = vadd.f32 %v686_v63, %v683_v61  ;;  %v644_v27 = vadd.f32 %v640_v50, %v636_v52 }
 0x43b   :  { %v613_v23 = vadd.f32 %v608_v1, %v601_v33  ;;  %v550_v1 = vadd.f32 %v546_v60, %v538_v35  ;;  %v680_v63 = vpop.permute.xlu2 %679 }
 0x43c   :  { %v585_v53 = vadd.f32 %v580_v44, %v573_v19  ;;  %v610_v46 = vpop.permute.xlu1 %609  ;;  %v582_v41 = vpop.permute.xlu0 %581  ;;  %v747_v49 = vld [vmem:[#allocation2 + $0x1] sm:$0xff]  ;;  %v554_v44 = vmul.f32 0.016666668, %v6089_v55  ;;  %v600_v55 = vadd.f32 %v598_v62, %v546_v60 }
 0x43d   :  { %751 = vrot.lane.b32.xlu1 %v747_v49, %s5712_s6  ;;  %v623_v16 = vadd.f32 %v618_v15, %v613_v23  ;;  %v648_v15 = vadd.f32 %v6103_v10, %v644_v27 }
 0x43e   :  { %v709_v13 = vmul.f32 %v585_v53, %v5822_v6  ;;  %v266_v6 = vadd.f32 %v264_v51, %v5975_v21  ;;  %v556_v31 = vadd.f32 %v554_v44, %v550_v1  ;;  %v602_v10 = vadd.f32 %v600_v55, %v6134_v20 }
 0x43f   :  { %v713_v22 = vmul.f32 %v623_v16, %v5854_v26  ;;  %v660_v50 = vadd.f32 %v656_v48, %v648_v15 }
 0x440   :  { %v711_v54 = vsub.f32 %v691_v34, %v709_v13  ;;  %v268_v59 = vadd.f32 %v266_v6, %v6009_v40  ;;  %v568_v32 = vadd.f32 %v564_v56, %v556_v31  ;;  %v614_v60 = vadd.f32 %v610_v46, %v602_v10 }
 0x441   :  { %v670_v21 = vadd.f32 %v666_v39, %v660_v50 }
 0x442   :  { %v715_v57 = vsub.f32 %v711_v54, %v713_v22  ;;  %v574_v43 = vadd.f32 %v6134_v20, %v568_v32 }
 0x443   :  { %v620_v48 = vpop.permute.xlu2 %619  ;;  %v674_v56 = vadd.f32 %v6128_v42, %v670_v21 }
 0x444   :  { %v275_v14 = vpop.permute.xlu1 %274  ;;  %v742_v24 = vpop.permute.xlu0 %741  ;;  %v717_v58 = vmul.f32 0.5, %v715_v57  ;;  %v586_v33 = vadd.f32 %v582_v41, %v574_v43 }
 0x445   :  { %746 = vst.msk [vmem:[#allocation2 + $0x9] sm:$0xff] %vm181_vm1, %v742_v24  ;;  %v280_v4 = vadd.f32 %v275_v14, %v268_v59  ;;  %v684_v19 = vadd.f32 %v680_v63, %v674_v56 }
 0x446   :  { %v719_v9 = vadd.f32 %v717_v58, %v5854_v26  ;;  %v624_v26 = vadd.f32 %v620_v48, %v614_v60  ;;  %v710_v23 = vmul.f32 %v586_v33, %v5826_v7 }
 0x44b   :  { %v277_v41 = vpop.permute.xlu2 %276 }
 0x44c   :  { %v285_v36 = vpop.permute.xlu1 %284  ;;  %v261_v18 = vpop.permute.xlu0 %260  ;;  %v748_v11 = vld [vmem:[#allocation2 + $0x9] sm:$0xff] }
 0x44d   :  { %v6162_v8 = vadd.f32 %v285_v36, %v280_v4  ;;  %753 = vrot.lane.b32.xlu2 %v748_v11, %s5712_s6  ;;  %v265_v38 = vadd.f32 %v261_v18, %v5952_v5  ;;  %v714_v5 = vmul.f32 %v624_v26, %v5862_v30 }
 0x44f   :  { %v721_v40 = vsub.f32 %v719_v9, %v6162_v8  ;;  %v267_v61 = vadd.f32 %v265_v38, %v5998_v0 }
 0x451   :  { %v6172_v39 = vmul.f32 %v721_v40, %v6017_v12  ;;  %v269_v42 = vadd.f32 %v267_v61, %v6025_v47 }
 0x453   :  { %926 = vrot.lane.b32.xlu0 %v6172_v39, %s5712_s6  ;;  %v281_v35 = vadd.f32 %v277_v41, %v269_v42 }
 0x454   :  { %v688_v20 = vpop.permute.xlu0 %687 }
 0x455   :  { %v692_v53 = vadd.f32 %v688_v20, %v684_v19 }
 0x457   :  { %v712_v49 = vsub.f32 %v692_v53, %v710_v23 }
 0x459   :  { %v716_v46 = vsub.f32 %v712_v49, %v714_v5 }
 0x45b   :  { %v718_v13 = vmul.f32 0.5, %v716_v46 }
 0x45c   :  { %v287_v16 = vpop.permute.xlu0 %286 }
 0x45d   :  { %v720_v34 = vadd.f32 %v718_v13, %v5862_v30  ;;  %v6181_v0 = vadd.f32 %v287_v16, %v281_v35 }
 0x45f   :  { %v722_v51 = vsub.f32 %v720_v34, %v6181_v0 }
 0x461   :  { %v6185_v52 = vmul.f32 %v722_v51, %v6033_v28 }
 0x463   :  { %928 = vrot.lane.b32.xlu1 %v6185_v52, %s5712_s6 }
 0x4a7   :  { %v754_v7 = vpop.permute.xlu2 %753 }
 0x4a8   :  { %758 = vst.msk [vmem:[#allocation2 + $0x9] sm:$0xff] %vm194_vm2, %v754_v7 }
 0x4af   :  { %v761_v47 = vld [vmem:[#allocation2 + $0x10] sm:$0x1]  ;;  %v752_v54 = vpop.permute.xlu1 %751 }
 0x4b0   :  { %762 = vst.msk [vmem:[#allocation2 + $0x11] sm:$0x1] %vm198_vm3, %v761_v47 }
 0x4b1   :  { %757 = vst.msk [vmem:[#allocation2 + $0x1] sm:$0xff] %vm194_vm2, %v752_v54 }
 0x4b2   :  { %764 = vst.msk [vmem:[#allocation2 + $0x8] sm:$0xff] %vm181_vm1, %v5715_v37 }
 0x4b3   :  { %765 = vst.msk [vmem:[#allocation2 + $0x10] sm:$0x3] %vm332_vm4, %v5715_v37 }
 0x4b8   :  { %v759_v30 = vld [vmem:[#allocation2 + $0x1] sm:$0x1] }
 0x4b9   :  { %760 = vst.msk [vmem:[#allocation2] sm:$0x1] %vm198_vm3, %v759_v30  ;;  %v6197_v27 = vld [vmem:[#allocation2 + $0x8] sm:$0xff] }
 0x4ba   :  { %763 = vst.msk [vmem:[#allocation2] sm:$0xff] %vm181_vm1, %v5715_v37  ;;  %v6202_v44 = vmul.f32 0.00016666666, %v6197_v27  ;;  %v819_v1 = vmul.f32 -0.016666668, %v6197_v27  ;;  %v6236_v50 = vld [vmem:[#allocation2 + $0x9] sm:$0xff] }
 0x4bb   :  { %v6213_v14 = vmul.f32 -0.004166667, %v6197_v27  ;;  %v801_v32 = vld [vmem:[#allocation2 + $0xa] sm:$0xff]  ;;  %v881_v18 = vmul.f32 -0.0013333333, %v6236_v50 }
 0x4bc   :  { %862 = vrot.lane.b32.xlu0 %v6202_v44, %s5713_s7  ;;  %824 = vrot.lane.b32.xlu2 %v819_v1, %s5713_s7  ;;  %v6248_v21 = vmul.f32 0.00016666666, %v6236_v50  ;;  %v789_v10 = vmul.f32 -0.016666668, %v6236_v50  ;;  %v807_v38 = vmul.f32 -0.004166667, %v801_v32 }
 0x4bd   :  { %870 = vrot.lane.b32.xlu1 %v6202_v44, %s5714_s13  ;;  %v6259_v48 = vmul.f32 0.00016666666, %v801_v32  ;;  %v835_v56 = vmul.f32 0.016666668, %v801_v32  ;;  %v6265_v60 = vmul.f32 0.004166667, %v801_v32 }
 0x4c1   :  { %v6210_v22 = vld [vmem:[#allocation2] sm:$0xff] }
 0x4c2   :  { %v818_v24 = vmul.f32 -0.016666668, %v6210_v22  ;;  %v856_v6 = vmul.f32 0.00016666666, %v6210_v22  ;;  %v800_v57 = vld [vmem:[#allocation2 + $0x2] sm:$0xff] }
 0x4c3   :  { %v6217_v63 = vld [vmem:[#allocation2 + $0x1] sm:$0xff]  ;;  %v6226_v62 = vmul.f32 -0.004166667, %v6210_v22  ;;  %v6232_v59 = vmul.f32 0.00016666666, %v800_v57 }
 0x4c4   :  { %822 = vrot.lane.b32.xlu0 %v818_v24, %s5713_s7  ;;  %860 = vrot.lane.b32.xlu2 %v856_v6, %s5713_s7  ;;  %v788_v31 = vmul.f32 -0.016666668, %v6217_v63  ;;  %v876_v58 = vmul.f32 0.00016666666, %v6217_v63  ;;  %v880_v55 = vmul.f32 -0.0013333333, %v6217_v63 }
 0x4c5   :  { %776 = vrot.lane.b32.xlu1 %v6213_v14, %s5714_s13  ;;  %v927_v15 = vpop.permute.xlu0 %926  ;;  %v834_v36 = vmul.f32 0.016666668, %v800_v57  ;;  %v806_v11 = vmul.f32 -0.004166667, %v800_v57  ;;  %v802_v43 = vmul.f32 0.004166667, %v800_v57 }
 0x4c6   :  { %932 = vst.msk [vmem:[#allocation2 + $0x1] sm:$0xff] %vm168_vm0, %v927_v15  ;;  %v768_v47 = vmul.f32 0.004166667, %v6210_v22  ;;  %v784_v1 = vmul.f32 0.016666668, %v6217_v63 }
 0x4cc   :  { %792 = vrot.lane.b32.xlu0 %v788_v31, %s5714_s13  ;;  %774 = vrot.lane.b32.xlu2 %v6226_v62, %s5714_s13 }
 0x4cd   :  { %868 = vrot.lane.b32.xlu1 %v856_v6, %s5714_s13  ;;  %v934_v9 = vld [vmem:[#allocation2 + $0x1] sm:$0xff] }
 0x4d4   :  { %908 = vrot.lane.b32.xlu0 %v6232_v59, %s5713_s7  ;;  %894 = vrot.lane.b32.xlu2 %v876_v58, %s5714_s13 }
 0x4d5   :  { %884 = vrot.lane.b32.xlu1 %v880_v55, %s5713_s7  ;;  %v929_v4 = vpop.permute.xlu1 %928 }
 0x4d6   :  { %933 = vst.msk [vmem:[#allocation2 + $0x9] sm:$0xff] %vm168_vm0, %v929_v4 }
 0x4dc   :  { %838 = vrot.lane.b32.xlu0 %v834_v36, %s5713_s7  ;;  %886 = vrot.lane.b32.xlu2 %v881_v18, %s5713_s7 }
 0x4dd   :  { %810 = vrot.lane.b32.xlu1 %v806_v11, %s5714_s13  ;;  %v935_v40 = vld [vmem:[#allocation2 + $0x9] sm:$0xff] }
 0x4e4   :  { %916 = vrot.lane.b32.xlu2 %v6232_v59, %s5714_s13  ;;  %938 = vrot.lane.b32.xlu0 %v934_v9, %s5713_s7 }
 0x4e5   :  { %896 = vrot.lane.b32.xlu1 %v6248_v21, %s5714_s13 }
 0x4ec   :  { %940 = vrot.lane.b32.xlu2 %v935_v40, %s5713_s7  ;;  %794 = vrot.lane.b32.xlu0 %v789_v10, %s5714_s13  ;;  %v769_v10 = vmul.f32 0.004166667, %v6197_v27 }
 0x4ed   :  { %848 = vrot.lane.b32.xlu1 %v802_v43, %s5714_s13 }
 0x4f4   :  { %812 = vrot.lane.b32.xlu0 %v807_v38, %s5714_s13  ;;  %910 = vrot.lane.b32.xlu2 %v6259_v48, %s5713_s7 }
 0x4f5   :  { %840 = vrot.lane.b32.xlu1 %v835_v56, %s5713_s7 }
 0x4fc   :  { %850 = vrot.lane.b32.xlu0 %v6265_v60, %s5714_s13  ;;  %918 = vrot.lane.b32.xlu2 %v6259_v48, %s5714_s13 }
 0x516   :  { %v825_v33 = vpop.permute.xlu2 %824 }
 0x51e   :  { %v861_v19 = vpop.permute.xlu2 %860 }
 0x51f   :  { %v866_v42 = vadd.f32 %v861_v19, %v856_v6 }
 0x526   :  { %v775_v26 = vpop.permute.xlu2 %774 }
 0x527   :  { %v780_v30 = vadd.f32 %v775_v26, %v768_v47 }
 0x529   :  { %v786_v31 = vadd.f32 %v784_v1, %v780_v30 }
 0x52e   :  { %v895_v61 = vpop.permute.xlu2 %894  ;;  %v863_v20 = vpop.permute.xlu0 %862 }
 0x52f   :  { %v871_v23 = vpop.permute.xlu1 %870 }
 0x536   :  { %v887_v53 = vpop.permute.xlu2 %886  ;;  %v823_v5 = vpop.permute.xlu0 %822 }
 0x537   :  { %v777_v49 = vpop.permute.xlu1 %776  ;;  %v828_v32 = vadd.f32 %v823_v5, %v6226_v62  ;;  %v785_v62 = vmul.f32 0.016666668, %v6236_v50 }
 0x539   :  { %v830_v63 = vadd.f32 %v828_v32, %v775_v26 }
 0x53e   :  { %v917_v46 = vpop.permute.xlu2 %916  ;;  %v793_v41 = vpop.permute.xlu0 %792 }
 0x53f   :  { %v869_v13 = vpop.permute.xlu1 %868  ;;  %v798_v4 = vadd.f32 %v793_v41, %v786_v31 }
 0x540   :  { %v874_v35 = vadd.f32 %v869_v13, %v866_v42 }
 0x541   :  { %v804_v9 = vadd.f32 %v802_v43, %v798_v4 }
 0x542   :  { %v878_v34 = vadd.f32 %v876_v58, %v874_v35  ;;  %v867_v58 = vadd.f32 %v863_v20, %v6202_v44  ;;  %v781_v44 = vadd.f32 %v777_v49, %v769_v10 }
 0x544   :  { %v875_v18 = vadd.f32 %v871_v23, %v867_v58 }
 0x546   :  { %v941_v16 = vpop.permute.xlu2 %940  ;;  %v909_v51 = vpop.permute.xlu0 %908  ;;  %v879_v56 = vadd.f32 %v6248_v21, %v875_v18 }
 0x547   :  { %945 = vst.msk [vmem:[#allocation2 + $0x9] sm:$0xff] %vm181_vm1, %v941_v16  ;;  %v885_v7 = vpop.permute.xlu1 %884 }
 0x548   :  { %v890_v54 = vadd.f32 %v885_v7, %v878_v34  ;;  %v891_v19 = vadd.f32 %v887_v53, %v879_v56  ;;  %v829_v53 = vadd.f32 %v825_v33, %v6213_v14 }
 0x54a   :  { %v900_v24 = vadd.f32 %v895_v61, %v890_v54  ;;  %v5492_v61 = vld [vmem:[#allocation3] sm:$0xff]  ;;  %v831_v47 = vadd.f32 %v829_v53, %v777_v49  ;;  %v5493_v49 = vld [vmem:[#allocation3 + $0x8] sm:$0xff] }
 0x54c   :  { %v904_v55 = vadd.f32 %v6232_v59, %v900_v24  ;;  %v832_v59 = vadd.f32 %v830_v63, %v802_v43 }
 0x54e   :  { %v839_v57 = vpop.permute.xlu0 %838  ;;  %v947_v15 = vld [vmem:[#allocation2 + $0x9] sm:$0xff]  ;;  %v914_v36 = vadd.f32 %v909_v51, %v904_v55  ;;  %v911_v42 = vpop.permute.xlu2 %910 }
 0x54f   :  { %v811_v6 = vpop.permute.xlu1 %810  ;;  %952 = vrot.lane.b32.xlu2 %v947_v15, %s5712_s6  ;;  %v844_v5 = vadd.f32 %v839_v57, %v832_v59 }
 0x550   :  { %v922_v40 = vadd.f32 %v917_v46, %v914_v36  ;;  %v816_v38 = vadd.f32 %v811_v6, %v804_v9  ;;  %v787_v46 = vadd.f32 %v785_v62, %v781_v44 }
 0x552   :  { %v1125_v20 = vadd.f32 %v5492_v61, %v922_v40  ;;  %v1127_v23 = vmul.f32 %v816_v38, %v6022_v45 }
 0x554   :  { %v1129_v21 = vsub.f32 %v1125_v20, %v1127_v23 }
 0x556   :  { %v939_v22 = vpop.permute.xlu0 %938  ;;  %v919_v1 = vpop.permute.xlu2 %918 }
 0x557   :  { %v897_v11 = vpop.permute.xlu1 %896  ;;  %944 = vst.msk [vmem:[#allocation2 + $0x1] sm:$0xff] %vm181_vm1, %v939_v22 }
 0x558   :  { %v901_v13 = vadd.f32 %v897_v11, %v891_v19  ;;  %v7371_v11 = vmov 0.0  }
 0x55a   :  { %v905_v50 = vadd.f32 %v6259_v48, %v901_v13  ;;  %v833_v48 = vadd.f32 %v831_v47, %v6265_v60 }
 0x55c   :  { %v915_v54 = vadd.f32 %v911_v42, %v905_v50 }
 0x55e   :  { %v795_v41 = vpop.permute.xlu0 %794  ;;  %v946_v26 = vld [vmem:[#allocation2 + $0x1] sm:$0xff]  ;;  %v923_v14 = vadd.f32 %v919_v1, %v915_v54 }
 0x55f   :  { %v849_v35 = vpop.permute.xlu1 %848  ;;  %950 = vrot.lane.b32.xlu1 %v946_v26, %s5712_s6  ;;  %v799_v16 = vadd.f32 %v795_v41, %v787_v46 }
 0x560   :  { %v854_v27 = vadd.f32 %v849_v35, %v844_v5  ;;  %v1126_v31 = vadd.f32 %v5493_v49, %v923_v14 }
 0x561   :  { %v805_v30 = vadd.f32 %v6265_v60, %v799_v16 }
 0x562   :  { %v1131_v43 = vmul.f32 %v854_v27, %v6172_v39 }
 0x564   :  { %v1133_v34 = vsub.f32 %v1129_v21, %v1131_v43 }
 0x566   :  { %v813_v51 = vpop.permute.xlu0 %812  ;;  %v1135_v7 = vsub.f32 %v1133_v34, %v6014_v17 }
 0x567   :  { %v817_v57 = vadd.f32 %v813_v51, %v805_v30  ;;  %v841_v15 = vpop.permute.xlu1 %840 }
 0x568   :  { %v6290_v24 = vmul.f32 %v1135_v7, %v6017_v12  ;;  %v845_v33 = vadd.f32 %v841_v15, %v833_v48 }
 0x569   :  { %v1128_v6 = vmul.f32 %v817_v57, %v6037_v29 }
 0x56a   :  { %1155 = vrot.lane.b32.xlu0 %v6290_v24, %s5712_s6 }
 0x56b   :  { %v1130_v58 = vsub.f32 %v1126_v31, %v1128_v6 }
 0x56e   :  { %v851_v17 = vpop.permute.xlu0 %850 }
 0x56f   :  { %v855_v55 = vadd.f32 %v851_v17, %v845_v33 }
 0x571   :  { %v1132_v32 = vmul.f32 %v855_v55, %v6185_v52 }
 0x573   :  { %v1134_v4 = vsub.f32 %v1130_v58, %v1132_v32 }
 0x575   :  { %v1136_v36 = vsub.f32 %v1134_v4, %v6031_v25 }
 0x577   :  { %v6299_v22 = vmul.f32 %v1136_v36, %v6033_v28 }
 0x579   :  { %1157 = vrot.lane.b32.xlu1 %v6299_v22, %s5712_s6 }
 0x5a9   :  { %v953_v60 = vpop.permute.xlu2 %952 }
 0x5aa   :  { %957 = vst.msk [vmem:[#allocation2 + $0x9] sm:$0xff] %vm194_vm2, %v953_v60 }
 0x5b1   :  { %v960_v18 = vld [vmem:[#allocation2 + $0x10] sm:$0x1] }
 0x5b2   :  { %961 = vst.msk [vmem:[#allocation2 + $0x11] sm:$0x1] %vm198_vm3, %v960_v18 }
 0x5b3   :  { %964 = vst.msk [vmem:[#allocation2 + $0x10] sm:$0x3] %vm332_vm4, %v7371_v11 }
 0x5b4   :  { %966 = vst.msk [vmem:[#allocation2 + $0x11] sm:$0x1] %vm198_vm3, %v7371_v11 }
 0x5d1   :  { %v951_v63 = vpop.permute.xlu1 %950 }
 0x5d2   :  { %956 = vst.msk [vmem:[#allocation2 + $0x1] sm:$0xff] %vm194_vm2, %v951_v63 }
 0x5d3   :  { %963 = vst.msk [vmem:[#allocation2 + $0x8] sm:$0xff] %vm181_vm1, %v7371_v11 }
 0x5d9   :  { %v958_v25 = vld [vmem:[#allocation2 + $0x1] sm:$0x1] }
 0x5da   :  { %959 = vst.msk [vmem:[#allocation2] sm:$0x1] %vm198_vm3, %v958_v25  ;;  %v6313_v9 = vld [vmem:[#allocation2 + $0x8] sm:$0xff] }
 0x5db   :  { %962 = vst.msk [vmem:[#allocation2] sm:$0xff] %vm181_vm1, %v7371_v11  ;;  %v6318_v10 = vmul.f32 0.00016666666, %v6313_v9  ;;  %v1020_v40 = vmul.f32 -0.016666668, %v6313_v9  ;;  %v6343_v20 = vld [vmem:[#allocation2 + $0x9] sm:$0xff] }
 0x5dc   :  { %965 = vst.msk [vmem:[#allocation2] sm:$0x1] %vm198_vm3, %v7371_v11  ;;  %v6331_v59 = vmul.f32 -0.004166667, %v6313_v9  ;;  %v1156_v62 = vpop.permute.xlu0 %1155  ;;  %v1002_v23 = vld [vmem:[#allocation2 + $0xa] sm:$0xff] }
 0x5dd   :  { %1063 = vrot.lane.b32.xlu0 %v6318_v10, %s5713_s7  ;;  %1025 = vrot.lane.b32.xlu2 %v1020_v40, %s5713_s7  ;;  %v1082_v5 = vmul.f32 -0.0013333333, %v6343_v20  ;;  %v1078_v43 = vmul.f32 0.00016666666, %v6343_v20  ;;  %v990_v50 = vmul.f32 -0.016666668, %v6343_v20 }
 0x5de   :  { %1071 = vrot.lane.b32.xlu1 %v6318_v10, %s5714_s13  ;;  %v1008_v51 = vmul.f32 -0.004166667, %v1002_v23  ;;  %v6369_v7 = vmul.f32 0.00016666666, %v1002_v23  ;;  %v1036_v47 = vmul.f32 0.016666668, %v1002_v23 }
 0x5df   :  { %v6375_v54 = vmul.f32 0.004166667, %v1002_v23 }
 0x5e2   :  { %v6328_v38 = vld [vmem:[#allocation2 + $0x1] sm:$0xff] }
 0x5e3   :  { %v1001_v56 = vld [vmem:[#allocation2 + $0x2] sm:$0xff]  ;;  %v6334_v19 = vmul.f32 0.00016666666, %v6328_v38  ;;  %v989_v44 = vmul.f32 -0.016666668, %v6328_v38 }
 0x5e4   :  { %v967_v61 = vld [vmem:[#allocation2] sm:$0xff]  ;;  %v6346_v42 = vmul.f32 0.00016666666, %v1001_v56  ;;  %v1081_v41 = vmul.f32 -0.0013333333, %v6328_v38 }
 0x5e5   :  { %1095 = vrot.lane.b32.xlu2 %v6334_v19, %s5714_s13  ;;  %993 = vrot.lane.b32.xlu0 %v989_v44, %s5714_s13  ;;  %1161 = vst.msk [vmem:[#allocation2 + $0x1] sm:$0xff] %vm168_vm0, %v1156_v62  ;;  %v1035_v13 = vmul.f32 0.016666668, %v1001_v56  ;;  %v1057_v35 = vmul.f32 0.00016666666, %v967_v61 }
 0x5e6   :  { %977 = vrot.lane.b32.xlu1 %v6331_v59, %s5714_s13  ;;  %v1007_v27 = vmul.f32 -0.004166667, %v1001_v56  ;;  %v1019_v46 = vmul.f32 -0.016666668, %v967_v61  ;;  %v971_v21 = vmul.f32 -0.004166667, %v967_v61 }
 0x5e7   :  { %v1003_v16 = vmul.f32 0.004166667, %v1001_v56  ;;  %v969_v36 = vmul.f32 0.004166667, %v967_v61  ;;  %v985_v60 = vmul.f32 0.016666668, %v6328_v38 }
 0x5eb   :  { %v1158_v26 = vpop.permute.xlu1 %1157 }
 0x5ec   :  { %1162 = vst.msk [vmem:[#allocation2 + $0x9] sm:$0xff] %vm168_vm0, %v1158_v26  ;;  %v1163_v53 = vld [vmem:[#allocation2 + $0x1] sm:$0xff] }
 0x5ed   :  { %1087 = vrot.lane.b32.xlu2 %v1082_v5, %s5713_s7  ;;  %1109 = vrot.lane.b32.xlu0 %v6346_v42, %s5713_s7 }
 0x5ee   :  { %1085 = vrot.lane.b32.xlu1 %v1081_v41, %s5713_s7 }
 0x5f3   :  { %v1164_v34 = vld [vmem:[#allocation2 + $0x9] sm:$0xff] }
 0x5f5   :  { %1039 = vrot.lane.b32.xlu0 %v1035_v13, %s5713_s7  ;;  %1061 = vrot.lane.b32.xlu2 %v1057_v35, %s5713_s7 }
 0x5f6   :  { %1011 = vrot.lane.b32.xlu1 %v1007_v27, %s5714_s13 }
 0x5fd   :  { %1117 = vrot.lane.b32.xlu2 %v6346_v42, %s5714_s13  ;;  %1023 = vrot.lane.b32.xlu0 %v1019_v46, %s5713_s7 }
 0x5fe   :  { %1069 = vrot.lane.b32.xlu1 %v1057_v35, %s5714_s13 }
 0x605   :  { %975 = vrot.lane.b32.xlu2 %v971_v21, %s5714_s13  ;;  %1167 = vrot.lane.b32.xlu0 %v1163_v53, %s5713_s7 }
 0x606   :  { %1097 = vrot.lane.b32.xlu1 %v1078_v43, %s5714_s13 }
 0x60d   :  { %1169 = vrot.lane.b32.xlu2 %v1164_v34, %s5713_s7  ;;  %995 = vrot.lane.b32.xlu0 %v990_v50, %s5714_s13  ;;  %v970_v34 = vmul.f32 0.004166667, %v6313_v9 }
 0x60e   :  { %1049 = vrot.lane.b32.xlu1 %v1003_v16, %s5714_s13 }
 0x615   :  { %1013 = vrot.lane.b32.xlu0 %v1008_v51, %s5714_s13  ;;  %1111 = vrot.lane.b32.xlu2 %v6369_v7, %s5713_s7 }
 0x616   :  { %1041 = vrot.lane.b32.xlu1 %v1036_v47, %s5713_s7 }
 0x61d   :  { %1051 = vrot.lane.b32.xlu0 %v6375_v54, %s5714_s13  ;;  %1119 = vrot.lane.b32.xlu2 %v6369_v7, %s5714_s13 }
 0x637   :  { %v6381_v30 = vpop.permute.xlu2 %1025 }
 0x63f   :  { %v1096_v1 = vpop.permute.xlu2 %1095 }
 0x647   :  { %v1088_v57 = vpop.permute.xlu2 %1087 }
 0x64f   :  { %v1062_v15 = vpop.permute.xlu2 %1061  ;;  %v1064_v14 = vpop.permute.xlu0 %1063 }
 0x650   :  { %v1072_v48 = vpop.permute.xlu1 %1071  ;;  %v1067_v63 = vadd.f32 %v1062_v15, %v1057_v35  ;;  %v1068_v23 = vadd.f32 %v1064_v14, %v6318_v10 }
 0x652   :  { %v1076_v27 = vadd.f32 %v1072_v48, %v1068_v23  ;;  %v986_v48 = vmul.f32 0.016666668, %v6343_v20 }
 0x654   :  { %v1080_v51 = vadd.f32 %v1078_v43, %v1076_v27 }
 0x656   :  { %v1092_v14 = vadd.f32 %v1088_v57, %v1080_v51 }
 0x657   :  { %v1118_v33 = vpop.permute.xlu2 %1117  ;;  %v994_v6 = vpop.permute.xlu0 %993 }
 0x658   :  { %v978_v17 = vpop.permute.xlu1 %977 }
 0x65f   :  { %v976_v49 = vpop.permute.xlu2 %975  ;;  %v1110_v31 = vpop.permute.xlu0 %1109 }
 0x660   :  { %v1086_v55 = vpop.permute.xlu1 %1085  ;;  %v981_v18 = vadd.f32 %v976_v49, %v969_v36 }
 0x662   :  { %v987_v44 = vadd.f32 %v985_v60, %v981_v18 }
 0x664   :  { %v999_v26 = vadd.f32 %v994_v6, %v987_v44 }
 0x666   :  { %v1005_v35 = vadd.f32 %v1003_v16, %v999_v26 }
 0x667   :  { %v1170_v58 = vpop.permute.xlu2 %1169  ;;  %v1040_v32 = vpop.permute.xlu0 %1039 }
 0x668   :  { %1174 = vst.msk [vmem:[#allocation2 + $0x9] sm:$0xff] %vm181_vm1, %v1170_v58  ;;  %v1012_v4 = vpop.permute.xlu1 %1011 }
 0x669   :  { %v1017_v15 = vadd.f32 %v1012_v4, %v1005_v35 }
 0x66b   :  { %v1141_v9 = vmul.f32 %v1017_v15, %v6022_v45 }
 0x66f   :  { %v1024_v25 = vpop.permute.xlu0 %1023  ;;  %v1176_v40 = vld [vmem:[#allocation2 + $0x9] sm:$0xff] }
 0x670   :  { %v1070_v56 = vpop.permute.xlu1 %1069  ;;  %1181 = vrot.lane.b32.xlu2 %v1176_v40, %s5712_s6  ;;  %v1029_v41 = vadd.f32 %v1024_v25, %v971_v21  ;;  %v982_v21 = vadd.f32 %v978_v17, %v970_v34 }
 0x671   :  { %v1075_v62 = vadd.f32 %v1070_v56, %v1067_v63 }
 0x672   :  { %v1031_v46 = vadd.f32 %v1029_v41, %v976_v49  ;;  %v5494_v49 = vld [vmem:[#allocation5] sm:$0xff]  ;;  %v988_v43 = vadd.f32 %v986_v48, %v982_v21 }
 0x673   :  { %v1079_v5 = vadd.f32 %v6334_v19, %v1075_v62 }
 0x674   :  { %v1033_v10 = vadd.f32 %v1031_v46, %v1003_v16 }
 0x675   :  { %v1091_v13 = vadd.f32 %v1086_v55, %v1079_v5 }
 0x676   :  { %v1045_v6 = vadd.f32 %v1040_v32, %v1033_v10  ;;  %v1030_v32 = vadd.f32 %v6381_v30, %v6331_v59 }
 0x677   :  { %v1101_v61 = vadd.f32 %v1096_v1, %v1091_v13  ;;  %v1168_v38 = vpop.permute.xlu0 %1167  ;;  %v1112_v1 = vpop.permute.xlu2 %1111 }
 0x678   :  { %v1098_v53 = vpop.permute.xlu1 %1097  ;;  %1173 = vst.msk [vmem:[#allocation2 + $0x1] sm:$0xff] %vm181_vm1, %v1168_v38  ;;  %v1032_v25 = vadd.f32 %v1030_v32, %v978_v17  ;;  %v5495_v17 = vld [vmem:[#allocation5 + $0x8] sm:$0xff] }
 0x679   :  { %v1105_v50 = vadd.f32 %v6346_v42, %v1101_v61  ;;  %v1102_v60 = vadd.f32 %v1098_v53, %v1092_v14 }
 0x67a   :  { %v1034_v23 = vadd.f32 %v1032_v25, %v6375_v54 }
 0x67b   :  { %v1115_v47 = vadd.f32 %v1110_v31, %v1105_v50  ;;  %v1106_v57 = vadd.f32 %v6369_v7, %v1102_v60 }
 0x67d   :  { %v1123_v19 = vadd.f32 %v1118_v33, %v1115_v47  ;;  %v1116_v40 = vadd.f32 %v1112_v1, %v1106_v57 }
 0x67f   :  { %v1139_v55 = vadd.f32 %v5494_v49, %v1123_v19  ;;  %v996_v58 = vpop.permute.xlu0 %995  ;;  %v1175_v36 = vld [vmem:[#allocation2 + $0x1] sm:$0xff]  ;;  %v1120_v45 = vpop.permute.xlu2 %1119 }
 0x680   :  { %v1050_v18 = vpop.permute.xlu1 %1049  ;;  %1179 = vrot.lane.b32.xlu1 %v1175_v36, %s5712_s6  ;;  %v1000_v20 = vadd.f32 %v996_v58, %v988_v43  ;;  %v1124_v7 = vadd.f32 %v1120_v45, %v1116_v40 }
 0x681   :  { %v1055_v42 = vadd.f32 %v1050_v18, %v1045_v6  ;;  %v1143_v16 = vsub.f32 %v1139_v55, %v1141_v9 }
 0x682   :  { %v1006_v56 = vadd.f32 %v6375_v54, %v1000_v20  ;;  %v1140_v5 = vadd.f32 %v5495_v17, %v1124_v7 }
 0x683   :  { %v1145_v33 = vmul.f32 %v1055_v42, %v6172_v39 }
 0x685   :  { %v1147_v31 = vsub.f32 %v1143_v16, %v1145_v33 }
 0x687   :  { %v1014_v4 = vpop.permute.xlu0 %1013  ;;  %v1149_v63 = vsub.f32 %v1147_v31, %v6162_v8 }
 0x688   :  { %v1018_v62 = vadd.f32 %v1014_v4, %v1006_v56  ;;  %v1042_v39 = vpop.permute.xlu1 %1041 }
 0x689   :  { %v6401_v44 = vmul.f32 %v1149_v63, %v6017_v12  ;;  %v1046_v59 = vadd.f32 %v1042_v39, %v1034_v23 }
 0x68a   :  { %v1142_v30 = vmul.f32 %v1018_v62, %v6037_v29 }
 0x68b   :  { %1248 = vrot.lane.b32.xlu0 %v6401_v44, %s5712_s6 }
 0x68c   :  { %v1144_v26 = vsub.f32 %v1140_v5, %v1142_v30 }
 0x68f   :  { %v1052_v8 = vpop.permute.xlu0 %1051 }
 0x690   :  { %v1056_v41 = vadd.f32 %v1052_v8, %v1046_v59 }
 0x692   :  { %v1146_v13 = vmul.f32 %v1056_v41, %v6185_v52 }
 0x694   :  { %v1148_v12 = vsub.f32 %v1144_v26, %v1146_v13 }
 0x696   :  { %v1150_v27 = vsub.f32 %v1148_v12, %v6181_v0 }
 0x698   :  { %v6410_v61 = vmul.f32 %v1150_v27, %v6033_v28 }
 0x69a   :  { %1250 = vrot.lane.b32.xlu1 %v6410_v61, %s5712_s6 }
 0x6ca   :  { %v1182_v54 = vpop.permute.xlu2 %1181 }
 0x6cb   :  { %1186 = vst.msk [vmem:[#allocation2 + $0x9] sm:$0xff] %vm194_vm2, %v1182_v54 }
 0x6d2   :  { %v1189_v29 = vld [vmem:[#allocation2 + $0x10] sm:$0x1] }
 0x6d3   :  { %1190 = vst.msk [vmem:[#allocation2 + $0x11] sm:$0x1] %vm198_vm3, %v1189_v29 }
 0x6d4   :  { %1193 = vst.msk [vmem:[#allocation2 + $0x10] sm:$0x3] %vm332_vm4, %v5715_v37 }
 0x6f2   :  { %v1180_v46 = vpop.permute.xlu1 %1179 }
 0x6f3   :  { %1185 = vst.msk [vmem:[#allocation2 + $0x1] sm:$0xff] %vm194_vm2, %v1180_v46 }
 0x6f4   :  { %1192 = vst.msk [vmem:[#allocation2 + $0x8] sm:$0xff] %vm181_vm1, %v5715_v37 }
 0x6fa   :  { %v1187_v28 = vld [vmem:[#allocation2 + $0x1] sm:$0x1] }
 0x6fb   :  { %1188 = vst.msk [vmem:[#allocation2] sm:$0x1] %vm198_vm3, %v1187_v28  ;;  %v6424_v0 = vld [vmem:[#allocation2 + $0x8] sm:$0xff] }
 0x6fc   :  { %1191 = vst.msk [vmem:[#allocation2] sm:$0xff] %vm181_vm1, %v5715_v37  ;;  %v6433_v50 = vld [vmem:[#allocation2 + $0x9] sm:$0xff]  ;;  %v1199_v9 = vmul.f32 1.6666666, %v6424_v0 }
 0x6fd   :  { %v1249_v52 = vpop.permute.xlu0 %1248  ;;  %v6435_v34 = vld [vmem:[#allocation2 + $0xa] sm:$0xff]  ;;  %v1217_v56 = vmul.f32 6.6666665, %v6433_v50 }
 0x6fe   :  { %v1235_v4 = vmul.f32 1.6666666, %v6435_v34 }
 0x703   :  { %v6426_v38 = vld [vmem:[#allocation2] sm:$0xff] }
 0x704   :  { %v6428_v53 = vld [vmem:[#allocation2 + $0x1] sm:$0xff] }
 0x705   :  { %v6430_v35 = vld [vmem:[#allocation2 + $0x2] sm:$0xff]  ;;  %v1216_v20 = vmul.f32 6.6666665, %v6428_v53 }
 0x706   :  { %1254 = vst.msk [vmem:[#allocation2 + $0x1] sm:$0xff] %vm168_vm0, %v1249_v52  ;;  %v1234_v40 = vmul.f32 1.6666666, %v6430_v35 }
 0x70c   :  { %v1251_v47 = vpop.permute.xlu1 %1250 }
 0x70d   :  { %v1256_v51 = vld [vmem:[#allocation2 + $0x1] sm:$0xff]  ;;  %1255 = vst.msk [vmem:[#allocation2 + $0x9] sm:$0xff] %vm168_vm0, %v1251_v47 }
 0x70e   :  { %1260 = vrot.lane.b32.xlu2 %v1256_v51, %s5713_s7 }
 0x714   :  { %v1257_v37 = vld [vmem:[#allocation2 + $0x9] sm:$0xff] }
 0x715   :  { %1262 = vrot.lane.b32.xlu0 %v1257_v37, %s5713_s7 }
 0x768   :  { %v1261_v10 = vpop.permute.xlu2 %1260 }
 0x769   :  { %1266 = vst.msk [vmem:[#allocation2 + $0x1] sm:$0xff] %vm181_vm1, %v1261_v10 }
 0x770   :  { %v1268_v15 = vld [vmem:[#allocation2 + $0x1] sm:$0xff] }
 0x771   :  { %1272 = vrot.lane.b32.xlu1 %v1268_v15, %s5712_s6 }
 0x787   :  { %v1263_v19 = vpop.permute.xlu0 %1262 }
 0x788   :  { %1267 = vst.msk [vmem:[#allocation2 + $0x9] sm:$0xff] %vm181_vm1, %v1263_v19 }
 0x78f   :  { %v1269_v21 = vld [vmem:[#allocation2 + $0x9] sm:$0xff] }
 0x790   :  { %1274 = vrot.lane.b32.xlu2 %v1269_v21, %s5712_s6 }
 0x7e3   :  { %v1273_v14 = vpop.permute.xlu1 %1272 }
 0x7e4   :  { %1278 = vst.msk [vmem:[#allocation2 + $0x1] sm:$0xff] %vm194_vm2, %v1273_v14 }
 0x7ea   :  { %v1275_v1 = vpop.permute.xlu2 %1274 }
 0x7eb   :  { %v1280_v48 = vld [vmem:[#allocation2 + $0x1] sm:$0x1]  ;;  %1279 = vst.msk [vmem:[#allocation2 + $0x9] sm:$0xff] %vm194_vm2, %v1275_v1 }
 0x7ec   :  { %1281 = vst.msk [vmem:[#allocation2] sm:$0x1] %vm198_vm3, %v1280_v48 }
 0x7ed   :  { %1284 = vst.msk [vmem:[#allocation2] sm:$0xff] %vm181_vm1, %v7371_v11 }
 0x7ee   :  { %1287 = vst.msk [vmem:[#allocation2] sm:$0x1] %vm198_vm3, %v7371_v11 }
 0x7ef   :  { %1285 = vst.msk [vmem:[#allocation2 + $0x8] sm:$0xff] %vm181_vm1, %v7371_v11 }
 0x7f2   :  { %v1282_v49 = vld [vmem:[#allocation2 + $0x10] sm:$0x1] }
 0x7f3   :  { %1283 = vst.msk [vmem:[#allocation2 + $0x11] sm:$0x1] %vm198_vm3, %v1282_v49 }
 0x7f4   :  { %1286 = vst.msk [vmem:[#allocation2 + $0x10] sm:$0x3] %vm332_vm4, %v7371_v11  ;;  %vm7368_vm4 = vcmask 68616  }
 0x7f5   :  { %v1289_v6 = vld [vmem:[#allocation2] sm:$0xff]  ;;  %1288 = vst.msk [vmem:[#allocation2 + $0x11] sm:$0x1] %vm198_vm3, %v7371_v11 }
 0x7f6   :  { %v1290_v55 = vld [vmem:[#allocation2 + $0x8] sm:$0xff]  ;;  %v6478_v57 = vmul.f32 1.6666666, %v1289_v6  ;;  %v1293_v25 = vmul.f32 6.6666665, %v1289_v6 }
 0x7f7   :  { %v6454_v58 = vld [vmem:[#allocation2 + $0x2] sm:$0xff]  ;;  %v6474_v33 = vmul.f32 1.6666666, %v1290_v55  ;;  %v1294_v32 = vmul.f32 6.6666665, %v1290_v55 }
 0x7f8   :  { %1345 = vst.msk [vmem:[#allocation2 + $0x1] sm:$0xff] %vm168_vm0, %v5812_v2  ;;  %v1198_v2 = vmul.f32 1.6666666, %v6426_v38  ;;  %v1321_v63 = vmul.f32 -6.6666665, %v6454_v58 }
 0x7f9   :  { %v1317_v28 = vmul.f32 -1.6666666, %v6454_v58 }
 0x7fc   :  { %v1316_v60 = vld [vmem:[#allocation2 + $0xa] sm:$0xff] }
 0x7fd   :  { %1346 = vst.msk [vmem:[#allocation2 + $0x9] sm:$0xff] %vm168_vm0, %v5816_v3  ;;  %v1322_v31 = vmul.f32 -6.6666665, %v1316_v60  ;;  %v6496_v62 = vmul.f32 -1.6666666, %v1316_v60 }
 0x7ff   :  { %v1347_v36 = vld [vmem:[#allocation2 + $0x1] sm:$0xff] }
 0x800   :  { %1351 = vrot.lane.b32.xlu0 %v1347_v36, %s5713_s7 }
 0x804   :  { %v1348_v18 = vld [vmem:[#allocation2 + $0x9] sm:$0xff] }
 0x805   :  { %1353 = vrot.lane.b32.xlu1 %v1348_v18, %s5713_s7 }
 0x80d   :  { %1204 = vrot.lane.b32.xlu1 %v1199_v9, %s5714_s13  ;;  %v6535_v9 = vld [vmem:[#allocation11 + $0x18] sm:$0xff] }
 0x80e   :  { %1496 = vmatpush.msra.mxu1 %v6535_v9 }
 0x815   :  { %1202 = vrot.lane.b32.xlu1 %v1198_v2, %s5714_s13  ;;  %v6537_v2 = vld [vmem:[#allocation11 + $0x10] sm:$0xff] }
 0x816   :  { %1497 = vmatpush.msra.mxu1 %v6537_v2 }
 0x81d   :  { %1327 = vrot.lane.b32.xlu1 %v1322_v31, %s5713_s7 }
 0x825   :  { %1325 = vrot.lane.b32.xlu1 %v1321_v63, %s5713_s7 }
 0x82d   :  { %1238 = vrot.lane.b32.xlu1 %v1234_v40, %s5714_s13  ;;  %v1212_v40 = vmul.f32 -6.6666665, %v6428_v53 }
 0x872   :  { %v1352_v42 = vpop.permute.xlu0 %1351 }
 0x873   :  { %1357 = vst.msk [vmem:[#allocation2 + $0x1] sm:$0xff] %vm181_vm1, %v1352_v42  ;;  %v1197_v42 = vmul.f32 -1.6666666, %v6424_v0 }
 0x877   :  { %v1354_v16 = vpop.permute.xlu1 %1353 }
 0x878   :  { %1358 = vst.msk [vmem:[#allocation2 + $0x9] sm:$0xff] %vm181_vm1, %v1354_v16 }
 0x87a   :  { %v1359_v43 = vld [vmem:[#allocation2 + $0x1] sm:$0xff] }
 0x87b   :  { %1363 = vrot.lane.b32.xlu2 %v1359_v43, %s5712_s6  ;;  %v6541_v43 = vld [vmem:[#allocation11 + $0x8] sm:$0xff] }
 0x87c   :  { %1498 = vmatpush.msra.mxu1 %v6541_v43 }
 0x87f   :  { %v1360_v3 = vld [vmem:[#allocation2 + $0x9] sm:$0xff]  ;;  %v1205_v47 = vpop.permute.xlu1 %1204 }
 0x880   :  { %1365 = vrot.lane.b32.xlu0 %v1360_v3, %s5712_s6  ;;  %v1196_v3 = vmul.f32 -1.6666666, %v6426_v38  ;;  %v1209_v31 = vadd.f32 %v1205_v47, %v1197_v42 }
 0x883   :  { %1299 = vrot.lane.b32.xlu2 %v1294_v32, %s5713_s7  ;;  %v1213_v32 = vmul.f32 -6.6666665, %v6433_v50 }
 0x887   :  { %v1203_v15 = vpop.permute.xlu1 %1202 }
 0x888   :  { %1309 = vrot.lane.b32.xlu0 %v6474_v33, %s5714_s13 }
 0x88b   :  { %1297 = vrot.lane.b32.xlu2 %v1293_v25, %s5713_s7  ;;  %v1208_v25 = vadd.f32 %v1203_v15, %v1196_v3 }
 0x88f   :  { %v1328_v14 = vpop.permute.xlu1 %1327 }
 0x890   :  { %1307 = vrot.lane.b32.xlu0 %v6478_v57, %s5714_s13 }
 0x893   :  { %1222 = vrot.lane.b32.xlu2 %v1217_v56, %s5714_s13 }
 0x897   :  { %v1326_v6 = vpop.permute.xlu1 %1325 }
 0x898   :  { %1220 = vrot.lane.b32.xlu0 %v1216_v20, %s5714_s13 }
 0x89b   :  { %1337 = vrot.lane.b32.xlu2 %v6496_v62, %s5714_s13 }
 0x89f   :  { %v1239_v58 = vpop.permute.xlu1 %1238 }
 0x8a0   :  { %1240 = vrot.lane.b32.xlu0 %v1235_v4, %s5714_s13 }
 0x8d5   :  { %v1364_v45 = vpop.permute.xlu2 %1363 }
 0x8d6   :  { %1369 = vst.msk [vmem:[#allocation2 + $0x1] sm:$0xff] %vm194_vm2, %v1364_v45 }
 0x8dd   :  { %v1371_v39 = vld [vmem:[#allocation2 + $0x1] sm:$0x1]  ;;  %v1300_v51 = vpop.permute.xlu2 %1299 }
 0x8de   :  { %1372 = vst.msk [vmem:[#allocation2] sm:$0x1] %vm198_vm3, %v1371_v39  ;;  %v1397_v23 = vld [vmem:[#allocation2 + $0x1] sm:$0xff]  ;;  %v1304_v20 = vadd.f32 %v1300_v51, %v6474_v33 }
 0x8df   :  { %v6513_v27 = vmul.f32 -0.33333334, %v1397_v23  ;;  %v1403_v46 = vmul.f32 2.6666667, %v1397_v23 }
 0x8e5   :  { %v1375_v8 = vld [vmem:[#allocation2] sm:$0xff]  ;;  %v1298_v37 = vpop.permute.xlu2 %1297 }
 0x8e6   :  { %v1377_v13 = vmul.f32 -0.33333334, %v1375_v8  ;;  %v1303_v0 = vadd.f32 %v1298_v37, %v6478_v57 }
 0x8ed   :  { %v1223_v19 = vpop.permute.xlu2 %1222 }
 0x8f2   :  { %v1366_v7 = vpop.permute.xlu0 %1365 }
 0x8f3   :  { %1370 = vst.msk [vmem:[#allocation2 + $0x9] sm:$0xff] %vm194_vm2, %v1366_v7  ;;  %v1215_v7 = vadd.f32 %v1213_v32, %v1209_v31  ;;  %v1554_v32 = vld [vmem:[#allocation10] sm:$0x3] }
 0x8f5   :  { %v1338_v48 = vpop.permute.xlu2 %1337  ;;  %v1227_v50 = vadd.f32 %v1223_v19, %v1215_v7 }
 0x8fa   :  { %v1373_v59 = vld [vmem:[#allocation2 + $0x10] sm:$0x1]  ;;  %v1376_v30 = vld [vmem:[#allocation2 + $0x8] sm:$0xff]  ;;  %v1310_v10 = vpop.permute.xlu0 %1309 }
 0x8fb   :  { %1374 = vst.msk [vmem:[#allocation2 + $0x11] sm:$0x1] %vm198_vm3, %v1373_v59  ;;  %v1425_v17 = vld [vmem:[#allocation2 + $0x2] sm:$0xff]  ;;  %v1378_v5 = vmul.f32 -0.33333334, %v1376_v30  ;;  %v1314_v39 = vadd.f32 %v1310_v10, %v1304_v20  ;;  %v1214_v30 = vadd.f32 %v1212_v40, %v1208_v25 }
 0x8fc   :  { %v1398_v41 = vld [vmem:[#allocation2 + $0x9] sm:$0xff]  ;;  %1693 = vst.msk [vmem:[#allocation2] sm:$0xf] %vm1692_vm5, %v7371_v11  ;;  %v6526_v52 = vmul.f32 -0.33333334, %v1425_v17 }
 0x8fd   :  { %v6503_v26 = vmul.f32 -0.33333334, %v1398_v41  ;;  %1391 = vrot.lane.b32.xlu0 %v1378_v5, %s5714_s13  ;;  %1383 = vrot.lane.b32.xlu1 %v1378_v5, %s5713_s7  ;;  %1896 = vst.msk [vmem:[#allocation2 + $0x8] sm:$0x3] %vm1895_vm6, %v7371_v11  ;;  %v1404_v12 = vmul.f32 2.6666667, %v1398_v41  ;;  %v1320_v8 = vadd.f32 %v6496_v62, %v1314_v39 }
 0x8fe   :  { %v1231_v17 = vmul.f32 -1.6666666, %v6435_v34  ;;  %v1636_v40 = vld [vmem:[#allocation11] sm:$0xf] }
 0x8ff   :  { %1419 = vrot.lane.b32.xlu2 %v6503_v26, %s5714_s13  ;;  %v1332_v51 = vadd.f32 %v1328_v14, %v1320_v8 }
 0x900   :  { %v1233_v47 = vadd.f32 %v1231_v17, %v1227_v50 }
 0x902   :  { %v1426_v54 = vld [vmem:[#allocation2 + $0xa] sm:$0xff]  ;;  %v1308_v21 = vpop.permute.xlu0 %1307 }
 0x903   :  { %v6519_v29 = vmul.f32 -0.33333334, %v1426_v54  ;;  %v1313_v59 = vadd.f32 %v1308_v21, %v1303_v0  ;;  %v1230_v54 = vmul.f32 -1.6666666, %v6430_v35  ;;  %v1342_v21 = vadd.f32 %v1338_v48, %v1332_v51  ;;  %v6563_v48 = vld [vmem:[#allocation10] sm:$0xff] }
 0x904   :  { %v1607_v0 = vld [vmem:[#allocation10] sm:$0x1] }
 0x905   :  { %1389 = vrot.lane.b32.xlu0 %v1377_v13, %s5714_s13  ;;  %1409 = vrot.lane.b32.xlu1 %v1404_v12, %s5713_s7  ;;  %v1319_v12 = vadd.f32 %v1317_v28, %v1313_v59 }
 0x907   :  { %1417 = vrot.lane.b32.xlu2 %v6513_v27, %s5714_s13  ;;  %v1331_v62 = vadd.f32 %v1326_v6, %v1319_v12 }
 0x90a   :  { %v1221_v1 = vpop.permute.xlu0 %1220 }
 0x90b   :  { %v1226_v53 = vadd.f32 %v1221_v1, %v1214_v30 }
 0x90d   :  { %1435 = vrot.lane.b32.xlu0 %v6519_v29, %s5713_s7  ;;  %1407 = vrot.lane.b32.xlu1 %v1403_v46, %s5713_s7  ;;  %v1232_v15 = vadd.f32 %v1230_v54, %v1226_v53 }
 0x90f   :  { %1381 = vrot.lane.b32.xlu2 %v1377_v13, %s5713_s7  ;;  %v1244_v42 = vadd.f32 %v1239_v58, %v1232_v15 }
 0x912   :  { %v1241_v55 = vpop.permute.xlu0 %1240 }
 0x913   :  { %v1245_v19 = vadd.f32 %v1241_v55, %v1233_v47 }
 0x915   :  { %1433 = vrot.lane.b32.xlu0 %v6526_v52, %s5713_s7  ;;  %1443 = vrot.lane.b32.xlu1 %v6519_v29, %s5714_s13  ;;  %v6557_v35 = vadd.f32 %v1342_v21, %v1245_v19 }
 0x917   :  { %1335 = vrot.lane.b32.xlu2 %v1317_v28, %s5714_s13 }
 0x91f   :  { %1441 = vrot.lane.b32.xlu2 %v6526_v52, %s5714_s13 }
 0x959   :  { %v1420_v49 = vpop.permute.xlu2 %1419 }
 0x961   :  { %v1418_v36 = vpop.permute.xlu2 %1417 }
 0x969   :  { %v1382_v4 = vpop.permute.xlu2 %1381 }
 0x96a   :  { %v1387_v23 = vadd.f32 %v1382_v4, %v1377_v13 }
 0x96f   :  { %v1392_v60 = vpop.permute.xlu0 %1391  ;;  %v1384_v18 = vpop.permute.xlu1 %1383 }
 0x970   :  { %v1388_v16 = vadd.f32 %v1384_v18, %v1378_v5 }
 0x971   :  { %v1336_v57 = vpop.permute.xlu2 %1335 }
 0x972   :  { %v1396_v63 = vadd.f32 %v1392_v60, %v1388_v16  ;;  %v1341_v60 = vadd.f32 %v1336_v57, %v1331_v62 }
 0x974   :  { %v1402_v33 = vadd.f32 %v6503_v26, %v1396_v63  ;;  %v6559_v3 = vadd.f32 %v1341_v60, %v1244_v42 }
 0x977   :  { %v1390_v56 = vpop.permute.xlu0 %1389  ;;  %v1410_v45 = vpop.permute.xlu1 %1409 }
 0x978   :  { %v1395_v38 = vadd.f32 %v1390_v56, %v1387_v23  ;;  %v1414_v5 = vadd.f32 %v1410_v45, %v1402_v33  ;;  %v1664_v45 = vld [vmem:[#allocation14] sm:$0x3] }
 0x97a   :  { %v1401_v41 = vadd.f32 %v6513_v27, %v1395_v38  ;;  %v1424_v26 = vadd.f32 %v1420_v49, %v1414_v5  ;;  %v1442_v49 = vpop.permute.xlu2 %1441 }
 0x97c   :  { %v1430_v34 = vadd.f32 %v6519_v29, %v1424_v26 }
 0x97f   :  { %v1436_v46 = vpop.permute.xlu0 %1435  ;;  %v1408_v13 = vpop.permute.xlu1 %1407 }
 0x980   :  { %v1413_v37 = vadd.f32 %v1408_v13, %v1401_v41  ;;  %v1440_v18 = vadd.f32 %v1436_v46, %v1430_v34  ;;  %v1740_v41 = vld [vmem:[#allocation14] sm:$0xf] }
 0x982   :  { %v1423_v10 = vadd.f32 %v1418_v36, %v1413_v37  ;;  %v1504_v36 = vld [vmem:[#allocation10] sm:$0xf] }
 0x984   :  { %v1429_v27 = vadd.f32 %v6526_v52, %v1423_v10  ;;  %v6567_v52 = vld [vmem:[#allocation11] sm:$0xff] }
 0x985   :  { %1499 = vmatpush.msra.mxu1 %v6567_v52 }
 0x987   :  { %v1434_v28 = vpop.permute.xlu0 %1433  ;;  %v1444_v1 = vpop.permute.xlu1 %1443  ;;  %1548 = vmatpush.msrb.mxu1 %v6541_v43 }
 0x988   :  { %v1439_v14 = vadd.f32 %v1434_v28, %v1429_v27  ;;  %v1448_v16 = vadd.f32 %v1444_v1, %v1440_v18  ;;  %v1767_v27 = vld [vmem:[#allocation13] sm:$0xf] }
 0x989   :  { %1549 = vmatpush.msrb.mxu1 %v6567_v52 }
 0x98a   :  { %v1450_v55 = vsub.f32 %v1448_v16, %v6557_v35  ;;  %v1447_v6 = vadd.f32 %v1442_v49, %v1439_v14 }
 0x98c   :  { %1470 = vmatpush.msra.mxu0 %v1450_v55  ;;  %v1449_v29 = vsub.f32 %v1447_v6, %v6559_v3 }
 0x98e   :  { %1471 = vmatpush.msra.mxu0 %v1449_v29 }
 0x98f   :  { %5359 = vmatmul.msk.f32.vlgmr.msra.gmra.mxu0 %vm1452_vm7, %v6563_v48 }
 0x990   :  { %1602 = vmatpush.msrb.mxu0 %v6567_v52 }
 0x992   :  { %5372 = vmatpush.msk.msra.mxu0 %vm1559_vm10, %v1740_v41 }
 0xa0c   :  { %v1473_v58 = vpop.f32.mrf.mxu0 }
 0xa0d   :  { %5360 = vmatmul.msk.f32.vlgmr.msra.gmra.mxu1 %vm7370_vm8, %v1473_v58 }
 0xa0e   :  { %5368 = vmatpush.msk.msra.mxu1 %vm1559_vm10, %v1636_v40 }
 0xa8a   :  { %v6574_v20 = vpop.f32.mrf.mxu1 }
 0xa8b   :  { %1524 = vmatpush.msra.mxu2 %v6574_v20 }
 0xa8c   :  { %5361 = vmatmul.msk.f32.vlgmr.msra.gmra.mxu2 %vm1505_vm9, %v1504_v36  ;;  %v6613_v36 = vld [vmem:[#allocation14] sm:$0xff] }
 0xb0f   :  { %v1526_v31 = vpop.f32.mrf.mxu2 }
 0xb10   :  { %5362 = vmatmul.msk.f32.vlgmr.msrb.gmra.mxu1 %vm1452_vm7, %v1526_v31 }
 0xb11   :  { %1861 = vmatpush.msrb.mxu1 %v6613_v36 }
 0xb8d   :  { %v6579_v4 = vpop.f32.mrf.mxu1 }
 0xb8e   :  { %5363 = vmatpush.msk.msrb.mxu2 %vm1559_vm10, %v6579_v4 }
 0xb8f   :  { %5364 = vmatmul.msk.f32.vlgmr.msrb.gmra.mxu2 %vm1555_vm11, %v1554_v32 }
 0xb90   :  { %5370 = vmatpush.msk.msra.mxu2 %vm1612_vm12, %v1664_v45 }
 0xc12   :  { %v1580_v63 = vpop.f32.mrf.mxu2 }
 0xc13   :  { %5365 = vmatmul.msk.f32.vlgmr.msrb.gmra.mxu0 %vm1505_vm9, %v1580_v63 }
 0xc90   :  { %v1604_v25 = vpop.f32.mrf.mxu0 }
 0xc91   :  { %5366 = vmatpush.msk.msra.mxu3 %vm1612_vm12, %v1604_v25  ;;  %v1738_v34 = vmul.f32 0.375, %v1604_v25 }
 0xc92   :  { %5367 = vmatmul.msk.f32.vlgmr.msra.gmra.mxu3 %vm1608_vm13, %v1607_v0 }
 0xd15   :  { %v1633_v56 = vpop.f32.mrf.mxu3 }
 0xd16   :  { %5369 = vmatmul.msk.f32.vlgmr.msra.gmra.mxu1 %vm1555_vm11, %v1633_v56 }
 0xd93   :  { %v1660_v39 = vpop.f32.mrf.mxu1 }
 0xd94   :  { %v1663_v7 = vmul.f32 0.375, %v1660_v39 }
 0xd96   :  { %5371 = vmatmul.msk.f32.vlgmr.msra.gmra.mxu2 %vm1608_vm13, %v1663_v7 }
 0xe19   :  { %v1688_v23 = vpop.f32.mrf.mxu2 }
 0xe1a   :  { %v1691_v38 = vperm.slane %v1688_v23, 0 }
 0xe1c   :  { %1695 = vrot.lane.b32.xlu0 %v1691_v38, %s5712_s6 }
 0xe8e   :  { %v1696_v33 = vpop.permute.xlu0 %1695 }
 0xe8f   :  { %1699 = vst.msk [vmem:[#allocation2 + $0x1] sm:$0x3] %vm1698_vm14, %v1696_v33 }
 0xe96   :  { %v1711_v59 = vld [vmem:[#allocation2 + $0x1] sm:$0x3] }
 0xe97   :  { %v1725_v30 = vld [vmem:[#allocation2 + $0x2] sm:$0x3]  ;;  %v1700_v50 = vld [vmem:[#allocation2] sm:$0x3]  ;;  %v1714_v8 = vmul.f32 -1.0, %v1711_v59  ;;  %v1712_v57 = vmul.f32 0.125, %v1711_v59 }
 0xe98   :  { %v1701_v17 = vmul.f32 0.125, %v1700_v50  ;;  %1795 = vst.msk [vmem:[#allocation2] sm:$0x3f] %vm7369_vm15, %v7371_v11  ;;  %v1726_v5 = vmul.f32 0.125, %v1725_v30  ;;  %v1840_v30 = vmul.f32 0.375, %v6579_v4  ;;  %vm1901_vm15 = vcmask 138248  }
 0xe99   :  { %1716 = vrot.lane.b32.xlu0 %v1714_v8, %s5713_s7 }
 0xe9a   :  { %1707 = vrot.lane.b32.xlu2 %v1701_v17, %s5714_s13  ;;  %1703 = vrot.lane.b32.xlu1 %v1701_v17, %s5713_s7 }
 0xea1   :  { %1733 = vrot.lane.b32.xlu0 %v1726_v5, %s5714_s13 }
 0xea2   :  { %1729 = vrot.lane.b32.xlu2 %v1726_v5, %s5713_s7  ;;  %1721 = vrot.lane.b32.xlu1 %v1712_v57, %s5714_s13 }
 0xef4   :  { %v1708_v54 = vpop.permute.xlu2 %1707 }
 0xefc   :  { %v1730_v15 = vpop.permute.xlu2 %1729 }
 0xf0b   :  { %v1717_v13 = vpop.permute.xlu0 %1716 }
 0xf0c   :  { %v1704_v53 = vpop.permute.xlu1 %1703 }
 0xf0d   :  { %v1706_v12 = vadd.f32 %v1704_v53, %v1701_v17  ;;  %v6618_v17 = vld [vmem:[#allocation13] sm:$0xff] }
 0xf0f   :  { %v1710_v46 = vadd.f32 %v1708_v54, %v1706_v12 }
 0xf11   :  { %v1713_v51 = vadd.f32 %v1712_v57, %v1710_v46 }
 0xf13   :  { %v1719_v47 = vadd.f32 %v1717_v13, %v1713_v51  ;;  %v1734_v62 = vpop.permute.xlu0 %1733  ;;  %v6637_v13 = vld [vmem:[#allocation14 + $0x8] sm:$0xff] }
 0xf14   :  { %v1722_v26 = vpop.permute.xlu1 %1721  ;;  %1962 = vmatpush.msrb.mxu0 %v6637_v13 }
 0xf15   :  { %v1724_v37 = vadd.f32 %v1722_v26, %v1719_v47 }
 0xf16   :  { %1963 = vmatpush.msrb.mxu0 %v6613_v36 }
 0xf17   :  { %v1727_v10 = vadd.f32 %v1726_v5, %v1724_v37 }
 0xf19   :  { %v1732_v19 = vadd.f32 %v1730_v15, %v1727_v10 }
 0xf1b   :  { %v1736_v21 = vadd.f32 %v1734_v62, %v1732_v19 }
 0xf1d   :  { %v1737_v60 = vadd.f32 %v1736_v21, %v1691_v38 }
 0xf1f   :  { %v1739_v18 = vadd.f32 %v1738_v34, %v1737_v60 }
 0xf21   :  { %5373 = vmatmul.msk.f32.vlgmr.msra.gmra.mxu0 %vm1555_vm11, %v1739_v18 }
 0xf9e   :  { %v1764_v28 = vpop.f32.mrf.mxu0 }
 0xf9f   :  { %5374 = vmatpush.msk.msrb.mxu3 %vm1612_vm12, %v1764_v28 }
 0xfa0   :  { %5375 = vmatmul.msk.f32.vlgmr.msrb.gmra.mxu3 %vm1608_vm13, %v1767_v27 }
0x1023   :  { %v1791_v1 = vpop.f32.mrf.mxu3 }
0x1024   :  { %1797 = vrot.lane.b32.xlu1 %v1791_v1, %s5712_s6 }
0x1096   :  { %v1798_v42 = vpop.permute.xlu1 %1797 }
0x1097   :  { %1801 = vst.msk [vmem:[#allocation2 + $0x1] sm:$0xf] %vm7368_vm4, %v1798_v42  ;;  %vm1893_vm4 = vcmask 146432  }
0x109e   :  { %v1813_v14 = vld [vmem:[#allocation2 + $0x1] sm:$0xf] }
0x109f   :  { %v1802_v16 = vld [vmem:[#allocation2] sm:$0xf]  ;;  %v1816_v49 = vmul.f32 -1.0, %v1813_v14  ;;  %v1814_v58 = vmul.f32 0.125, %v1813_v14 }
0x10a0   :  { %v1803_v55 = vmul.f32 0.125, %v1802_v16  ;;  %v1827_v6 = vld [vmem:[#allocation2 + $0x2] sm:$0xf] }
0x10a1   :  { %1818 = vrot.lane.b32.xlu1 %v1816_v49, %s5713_s7  ;;  %v1828_v29 = vmul.f32 0.125, %v1827_v6  ;;  %1894 = vst.msk [vmem:[#allocation2] sm:$0xff] %vm1893_vm4, %v7371_v11  ;;  %v6645_v49 = vld [vmem:[#allocation13 + $0x8] sm:$0xff]  ;;  %v5496_v6 = vld [vmem:[#allocation7] sm:$0xff] }
0x10a2   :  { %1809 = vrot.lane.b32.xlu0 %v1803_v55, %s5714_s13  ;;  %1805 = vrot.lane.b32.xlu2 %v1803_v55, %s5713_s7 }
0x10a9   :  { %1835 = vrot.lane.b32.xlu1 %v1828_v29, %s5714_s13 }
0x10aa   :  { %1831 = vrot.lane.b32.xlu0 %v1828_v29, %s5713_s7  ;;  %1823 = vrot.lane.b32.xlu2 %v1814_v58, %s5714_s13 }
0x10fc   :  { %v1806_v31 = vpop.permute.xlu2 %1805 }
0x10fd   :  { %v1808_v32 = vadd.f32 %v1806_v31, %v1803_v55 }
0x1104   :  { %v1824_v45 = vpop.permute.xlu2 %1823 }
0x1113   :  { %v1819_v25 = vpop.permute.xlu1 %1818 }
0x1114   :  { %v1810_v63 = vpop.permute.xlu0 %1809 }
0x1115   :  { %v1812_v0 = vadd.f32 %v1810_v63, %v1808_v32 }
0x1117   :  { %v1815_v40 = vadd.f32 %v1814_v58, %v1812_v0  ;;  %v5497_v58 = vld [vmem:[#allocation7 + $0x8] sm:$0xff] }
0x1119   :  { %v1821_v56 = vadd.f32 %v1819_v25, %v1815_v40 }
0x111b   :  { %v1826_v39 = vadd.f32 %v1824_v45, %v1821_v56  ;;  %v1836_v33 = vpop.permute.xlu1 %1835 }
0x111c   :  { %v1832_v23 = vpop.permute.xlu0 %1831 }
0x111d   :  { %v1829_v7 = vadd.f32 %v1828_v29, %v1826_v39 }
0x111f   :  { %v1834_v38 = vadd.f32 %v1832_v23, %v1829_v7 }
0x1121   :  { %v1838_v59 = vadd.f32 %v1836_v33, %v1834_v38 }
0x1123   :  { %v1839_v50 = vadd.f32 %v1838_v59, %v1791_v1  ;;  %v1941_v1 = vmul.f32 0.375, %v6574_v20 }
0x1125   :  { %v1841_v8 = vadd.f32 %v1840_v30, %v1839_v50 }
0x1127   :  { %5376 = vmatmul.msk.f32.vlgmr.msrb.gmra.mxu1 %vm1505_vm9, %v1841_v8 }
0x11a4   :  { %v1863_v5 = vpop.f32.mrf.mxu1 }
0x11a5   :  { %5377 = vmatpush.msk.msrb.mxu2 %vm1559_vm10, %v1863_v5 }
0x11a6   :  { %5378 = vmatmul.msk.f32.vlgmr.msrb.gmra.mxu2 %vm1555_vm11, %v6618_v17 }
0x11a7   :  { %2276 = vmatpush.msra.mxu2 %v6535_v9 }
0x11a9   :  { %2277 = vmatpush.msra.mxu2 %v6537_v2 }
0x11ab   :  { %2278 = vmatpush.msra.mxu2 %v6541_v43 }
0x11ad   :  { %2279 = vmatpush.msra.mxu2 %v6567_v52 }
0x1229   :  { %v1890_v4 = vpop.f32.mrf.mxu2 }
0x122a   :  { %1898 = vrot.lane.b32.xlu2 %v1890_v4, %s5712_s6 }
0x1284   :  { %v1899_v57 = vpop.permute.xlu2 %1898 }
0x1285   :  { %1902 = vst.msk [vmem:[#allocation2 + $0x1] sm:$0xff] %vm1901_vm15, %v1899_v57 }
0x128c   :  { %v1914_v41 = vld [vmem:[#allocation2 + $0x1] sm:$0xff] }
0x128d   :  { %v1903_v53 = vld [vmem:[#allocation2] sm:$0xff]  ;;  %v1917_v9 = vmul.f32 -1.0, %v1914_v41  ;;  %v1915_v46 = vmul.f32 0.125, %v1914_v41 }
0x128e   :  { %v1904_v12 = vmul.f32 0.125, %v1903_v53  ;;  %v1928_v2 = vld [vmem:[#allocation2 + $0x2] sm:$0xff] }
0x128f   :  { %1919 = vrot.lane.b32.xlu2 %v1917_v9, %s5713_s7  ;;  %v1929_v54 = vmul.f32 0.125, %v1928_v2 }
0x1290   :  { %1910 = vrot.lane.b32.xlu1 %v1904_v12, %s5714_s13  ;;  %1906 = vrot.lane.b32.xlu0 %v1904_v12, %s5713_s7 }
0x1297   :  { %1936 = vrot.lane.b32.xlu2 %v1929_v54, %s5714_s13 }
0x1298   :  { %1932 = vrot.lane.b32.xlu1 %v1929_v54, %s5713_s7  ;;  %1924 = vrot.lane.b32.xlu0 %v1915_v46, %s5714_s13 }
0x12e9   :  { %v1920_v10 = vpop.permute.xlu2 %1919 }
0x12f1   :  { %v1937_v27 = vpop.permute.xlu2 %1936 }
0x1302   :  { %v1907_v51 = vpop.permute.xlu0 %1906  ;;  %v1911_v26 = vpop.permute.xlu1 %1910 }
0x1303   :  { %v1909_v47 = vadd.f32 %v1907_v51, %v1904_v12 }
0x1305   :  { %v1913_v37 = vadd.f32 %v1911_v26, %v1909_v47 }
0x1307   :  { %v1916_v15 = vadd.f32 %v1915_v46, %v1913_v37 }
0x1309   :  { %v1922_v19 = vadd.f32 %v1920_v10, %v1916_v15 }
0x130a   :  { %v1925_v62 = vpop.permute.xlu0 %1924  ;;  %v1933_v60 = vpop.permute.xlu1 %1932 }
0x130b   :  { %v1927_v21 = vadd.f32 %v1925_v62, %v1922_v19 }
0x130d   :  { %v1930_v34 = vadd.f32 %v1929_v54, %v1927_v21 }
0x130f   :  { %v1935_v18 = vadd.f32 %v1933_v60, %v1930_v34 }
0x1311   :  { %v1939_v28 = vadd.f32 %v1937_v27, %v1935_v18 }
0x1313   :  { %v1940_v42 = vadd.f32 %v1939_v28, %v1890_v4 }
0x1315   :  { %v1942_v14 = vadd.f32 %v1941_v1, %v1940_v42 }
0x1317   :  { %5379 = vmatmul.msk.f32.vlgmr.msrb.gmra.mxu0 %vm1452_vm7, %v1942_v14 }
0x1394   :  { %v1965_v16 = vpop.f32.mrf.mxu0 }
0x1395   :  { %1991 = vmatpush.msra.mxu3 %v1965_v16 }
0x1396   :  { %5380 = vmatmul.msk.f32.vlgmr.msra.gmra.mxu3 %vm1505_vm9, %v6618_v17 }
0x139e   :  { %5381 = vmatmul.msk.f32.gmra.mxu3 %vm1505_vm9, %v6645_v49 }
0x1419   :  { %v1993_v55 = vpop.f32.mrf.mxu3 }
0x141a   :  { %v6649_v29 = vsub.f32 %v5496_v6, %v1993_v55 }
0x141c   :  { %2003 = vrot.lane.b32.xlu0 %v6649_v29, %s5712_s6 }
0x1421   :  { %v1996_v20 = vpop.f32.mrf.mxu3 }
0x1422   :  { %v6653_v31 = vsub.f32 %v5497_v58, %v1996_v20 }
0x1424   :  { %2005 = vrot.lane.b32.xlu1 %v6653_v31, %s5712_s6 }
0x148e   :  { %v2004_v32 = vpop.permute.xlu0 %2003 }
0x148f   :  { %2009 = vst.msk [vmem:[#allocation2 + $0x1] sm:$0xff] %vm168_vm0, %v2004_v32 }
0x1496   :  { %v2006_v63 = vpop.permute.xlu1 %2005  ;;  %v2011_v0 = vld [vmem:[#allocation2 + $0x1] sm:$0xff] }
0x1497   :  { %2010 = vst.msk [vmem:[#allocation2 + $0x9] sm:$0xff] %vm168_vm0, %v2006_v63  ;;  %2015 = vrot.lane.b32.xlu2 %v2011_v0, %s5713_s7  ;;  %v6682_v63 = vmul.f32 0.375, %v6559_v3 }
0x149e   :  { %v2012_v25 = vld [vmem:[#allocation2 + $0x9] sm:$0xff] }
0x149f   :  { %2017 = vrot.lane.b32.xlu0 %v2012_v25, %s5713_s7 }
0x14f1   :  { %v2016_v40 = vpop.permute.xlu2 %2015 }
0x14f2   :  { %2021 = vst.msk [vmem:[#allocation2 + $0x1] sm:$0xff] %vm181_vm1, %v2016_v40 }
0x14f9   :  { %v2023_v56 = vld [vmem:[#allocation2 + $0x1] sm:$0xff] }
0x14fa   :  { %2027 = vrot.lane.b32.xlu1 %v2023_v56, %s5712_s6 }
0x1511   :  { %v2018_v45 = vpop.permute.xlu0 %2017 }
0x1512   :  { %2022 = vst.msk [vmem:[#allocation2 + $0x9] sm:$0xff] %vm181_vm1, %v2018_v45 }
0x1519   :  { %v2024_v39 = vld [vmem:[#allocation2 + $0x9] sm:$0xff] }
0x151a   :  { %2029 = vrot.lane.b32.xlu2 %v2024_v39, %s5712_s6 }
0x156c   :  { %v2028_v7 = vpop.permute.xlu1 %2027 }
0x156d   :  { %2033 = vst.msk [vmem:[#allocation2 + $0x1] sm:$0xff] %vm194_vm2, %v2028_v7 }
0x1574   :  { %v2030_v23 = vpop.permute.xlu2 %2029  ;;  %v2061_v38 = vld [vmem:[#allocation2 + $0x1] sm:$0xff] }
0x1575   :  { %v2035_v33 = vld [vmem:[#allocation2 + $0x1] sm:$0x1]  ;;  %2034 = vst.msk [vmem:[#allocation2 + $0x9] sm:$0xff] %vm194_vm2, %v2030_v23  ;;  %v2067_v59 = vmul.f32 -1.0, %v2061_v38  ;;  %v2063_v30 = vmul.f32 0.125, %v2061_v38  ;;  %v6692_v38 = vmul.f32 0.375, %v6557_v35 }
0x1576   :  { %2036 = vst.msk [vmem:[#allocation2] sm:$0x1] %vm198_vm3, %v2035_v33 }
0x1577   :  { %2071 = vrot.lane.b32.xlu0 %v2067_v59, %s5713_s7  ;;  %2081 = vrot.lane.b32.xlu2 %v2063_v30, %s5714_s13 }
0x157c   :  { %v2037_v50 = vld [vmem:[#allocation2 + $0x10] sm:$0x1]  ;;  %v2040_v8 = vld [vmem:[#allocation2 + $0x8] sm:$0xff] }
0x157d   :  { %2038 = vst.msk [vmem:[#allocation2 + $0x11] sm:$0x1] %vm198_vm3, %v2037_v50  ;;  %v2042_v5 = vmul.f32 0.125, %v2040_v8  ;;  %v2039_v4 = vld [vmem:[#allocation2] sm:$0xff]  ;;  %v2062_v41 = vld [vmem:[#allocation2 + $0x9] sm:$0xff] }
0x157e   :  { %v2041_v57 = vmul.f32 0.125, %v2039_v4  ;;  %v2064_v53 = vmul.f32 0.125, %v2062_v41  ;;  %v2068_v9 = vmul.f32 -1.0, %v2062_v41  ;;  %v2089_v2 = vld [vmem:[#allocation2 + $0x2] sm:$0xff] }
0x157f   :  { %2047 = vrot.lane.b32.xlu2 %v2042_v5, %s5713_s7  ;;  %v2091_v46 = vmul.f32 0.125, %v2089_v2 }
0x1580   :  { %2053 = vrot.lane.b32.xlu1 %v2041_v57, %s5714_s13  ;;  %2045 = vrot.lane.b32.xlu0 %v2041_v57, %s5713_s7 }
0x1584   :  { %v2090_v12 = vld [vmem:[#allocation2 + $0xa] sm:$0xff] }
0x1585   :  { %v2092_v54 = vmul.f32 0.125, %v2090_v12 }
0x1587   :  { %2083 = vrot.lane.b32.xlu2 %v2064_v53, %s5714_s13 }
0x1588   :  { %2055 = vrot.lane.b32.xlu1 %v2042_v5, %s5714_s13  ;;  %2073 = vrot.lane.b32.xlu0 %v2068_v9, %s5713_s7 }
0x158f   :  { %2107 = vrot.lane.b32.xlu2 %v2092_v54, %s5714_s13 }
0x1590   :  { %2097 = vrot.lane.b32.xlu1 %v2091_v46, %s5713_s7  ;;  %2105 = vrot.lane.b32.xlu0 %v2091_v46, %s5714_s13 }
0x1598   :  { %2099 = vrot.lane.b32.xlu1 %v2092_v54, %s5713_s7 }
0x15d1   :  { %v2082_v47 = vpop.permute.xlu2 %2081 }
0x15d9   :  { %v2048_v19 = vpop.permute.xlu2 %2047 }
0x15da   :  { %v2052_v21 = vadd.f32 %v2048_v19, %v2042_v5 }
0x15e1   :  { %v2084_v16 = vpop.permute.xlu2 %2083 }
0x15e9   :  { %v2072_v51 = vpop.permute.xlu0 %2071  ;;  %v2108_v39 = vpop.permute.xlu2 %2107 }
0x15f2   :  { %v2054_v26 = vpop.permute.xlu1 %2053  ;;  %v2046_v37 = vpop.permute.xlu0 %2045 }
0x15f3   :  { %v2051_v10 = vadd.f32 %v2046_v37, %v2041_v57 }
0x15f5   :  { %v2059_v15 = vadd.f32 %v2054_v26, %v2051_v10 }
0x15f7   :  { %v2065_v62 = vadd.f32 %v2063_v30, %v2059_v15 }
0x15f9   :  { %v2077_v34 = vadd.f32 %v2072_v51, %v2065_v62 }
0x15fa   :  { %v2056_v60 = vpop.permute.xlu1 %2055  ;;  %v2074_v18 = vpop.permute.xlu0 %2073 }
0x15fb   :  { %v2060_v27 = vadd.f32 %v2056_v60, %v2052_v21  ;;  %v2087_v1 = vadd.f32 %v2082_v47, %v2077_v34 }
0x15fd   :  { %v2066_v28 = vadd.f32 %v2064_v53, %v2060_v27  ;;  %v2093_v14 = vadd.f32 %v2091_v46, %v2087_v1 }
0x15ff   :  { %v2078_v42 = vadd.f32 %v2074_v18, %v2066_v28 }
0x1601   :  { %v2088_v58 = vadd.f32 %v2084_v16, %v2078_v42 }
0x1602   :  { %v2098_v55 = vpop.permute.xlu1 %2097  ;;  %v2106_v20 = vpop.permute.xlu0 %2105 }
0x1603   :  { %v2103_v6 = vadd.f32 %v2098_v55, %v2093_v14  ;;  %v2094_v40 = vadd.f32 %v2092_v54, %v2088_v58 }
0x1605   :  { %v2111_v32 = vadd.f32 %v2106_v20, %v2103_v6 }
0x1607   :  { %v2113_v0 = vadd.f32 %v2111_v32, %v6649_v29 }
0x1609   :  { %v6686_v25 = vadd.f32 %v6682_v63, %v2113_v0 }
0x160a   :  { %v2100_v56 = vpop.permute.xlu1 %2099 }
0x160b   :  { %v2104_v45 = vadd.f32 %v2100_v56, %v2094_v40  ;;  %2121 = vrot.lane.b32.xlu0 %v6686_v25, %s5712_s6 }
0x160d   :  { %v2112_v7 = vadd.f32 %v2108_v39, %v2104_v45 }
0x160f   :  { %v2114_v23 = vadd.f32 %v2112_v7, %v6653_v31 }
0x1611   :  { %v6695_v33 = vadd.f32 %v6692_v38, %v2114_v23 }
0x1613   :  { %2123 = vrot.lane.b32.xlu1 %v6695_v33, %s5712_s6 }
0x167d   :  { %v2122_v29 = vpop.permute.xlu0 %2121 }
0x167e   :  { %2127 = vst.msk [vmem:[#allocation2 + $0x1] sm:$0xff] %vm168_vm0, %v2122_v29 }
0x1685   :  { %v2124_v59 = vpop.permute.xlu1 %2123  ;;  %v2129_v30 = vld [vmem:[#allocation2 + $0x1] sm:$0xff] }
0x1686   :  { %2128 = vst.msk [vmem:[#allocation2 + $0x9] sm:$0xff] %vm168_vm0, %v2124_v59  ;;  %2133 = vrot.lane.b32.xlu2 %v2129_v30, %s5713_s7 }
0x168d   :  { %v2130_v50 = vld [vmem:[#allocation2 + $0x9] sm:$0xff] }
0x168e   :  { %2135 = vrot.lane.b32.xlu0 %v2130_v50, %s5713_s7 }
0x16e0   :  { %v2134_v31 = vpop.permute.xlu2 %2133 }
0x16e1   :  { %2139 = vst.msk [vmem:[#allocation2 + $0x1] sm:$0xff] %vm181_vm1, %v2134_v31 }
0x16e8   :  { %v2141_v8 = vld [vmem:[#allocation2 + $0x1] sm:$0xff] }
0x16e9   :  { %2145 = vrot.lane.b32.xlu1 %v2141_v8, %s5712_s6 }
0x1700   :  { %v2136_v5 = vpop.permute.xlu0 %2135 }
0x1701   :  { %2140 = vst.msk [vmem:[#allocation2 + $0x9] sm:$0xff] %vm181_vm1, %v2136_v5 }
0x1708   :  { %v2142_v4 = vld [vmem:[#allocation2 + $0x9] sm:$0xff] }
0x1709   :  { %2147 = vrot.lane.b32.xlu2 %v2142_v4, %s5712_s6 }
0x175b   :  { %v2146_v57 = vpop.permute.xlu1 %2145 }
0x175c   :  { %2151 = vst.msk [vmem:[#allocation2 + $0x1] sm:$0xff] %vm194_vm2, %v2146_v57 }
0x1763   :  { %v2148_v41 = vpop.permute.xlu2 %2147  ;;  %v2153_v53 = vld [vmem:[#allocation2 + $0x1] sm:$0x1] }
0x1764   :  { %2152 = vst.msk [vmem:[#allocation2 + $0x9] sm:$0xff] %vm194_vm2, %v2148_v41  ;;  %v2179_v9 = vld [vmem:[#allocation2 + $0x1] sm:$0xff] }
0x1765   :  { %2154 = vst.msk [vmem:[#allocation2] sm:$0x1] %vm198_vm3, %v2153_v53  ;;  %v2185_v10 = vmul.f32 2.6666667, %v2179_v9  ;;  %v2181_v19 = vmul.f32 -0.33333334, %v2179_v9 }
0x1766   :  { %v2284_v9 = vld [vmem:[#allocation10] sm:$0xf] }
0x176b   :  { %v2180_v12 = vld [vmem:[#allocation2 + $0x9] sm:$0xff] }
0x176c   :  { %v2207_v2 = vld [vmem:[#allocation2 + $0x2] sm:$0xff]  ;;  %v2155_v54 = vld [vmem:[#allocation2 + $0x10] sm:$0x1]  ;;  %v2186_v46 = vmul.f32 2.6666667, %v2180_v12 }
0x176d   :  { %2156 = vst.msk [vmem:[#allocation2 + $0x11] sm:$0x1] %vm198_vm3, %v2155_v54  ;;  %v2158_v51 = vld [vmem:[#allocation2 + $0x8] sm:$0xff]  ;;  %v2157_v47 = vld [vmem:[#allocation2] sm:$0xff]  ;;  %v2182_v62 = vmul.f32 -0.33333334, %v2180_v12 }
0x176e   :  { %v2160_v26 = vmul.f32 -0.33333334, %v2158_v51  ;;  %2467 = vst.msk [vmem:[#allocation2] sm:$0xf] %vm1692_vm5, %v7371_v11  ;;  %2191 = vrot.lane.b32.xlu1 %v2186_v46, %s5713_s7  ;;  %v2159_v37 = vmul.f32 -0.33333334, %v2157_v47 }
0x176f   :  { %2665 = vst.msk [vmem:[#allocation2 + $0x8] sm:$0x3] %vm1895_vm6, %v7371_v11  ;;  %v2209_v34 = vmul.f32 -0.33333334, %v2207_v2  ;;  %v2384_v46 = vld [vmem:[#allocation10] sm:$0x1] }
0x1770   :  { %2173 = vrot.lane.b32.xlu2 %v2160_v26, %s5714_s13  ;;  %2165 = vrot.lane.b32.xlu0 %v2160_v26, %s5713_s7 }
0x1774   :  { %v2208_v15 = vld [vmem:[#allocation2 + $0xa] sm:$0xff] }
0x1775   :  { %v2210_v21 = vmul.f32 -0.33333334, %v2208_v15 }
0x1776   :  { %2163 = vrot.lane.b32.xlu1 %v2159_v37, %s5713_s7 }
0x1778   :  { %2189 = vrot.lane.b32.xlu2 %v2185_v10, %s5713_s7  ;;  %2171 = vrot.lane.b32.xlu0 %v2159_v37, %s5714_s13 }
0x177e   :  { %2199 = vrot.lane.b32.xlu1 %v2181_v19, %s5714_s13 }
0x1780   :  { %2201 = vrot.lane.b32.xlu0 %v2182_v62, %s5714_s13  ;;  %2217 = vrot.lane.b32.xlu2 %v2210_v21, %s5713_s7 }
0x1786   :  { %2225 = vrot.lane.b32.xlu1 %v2210_v21, %s5714_s13 }
0x1788   :  { %2215 = vrot.lane.b32.xlu0 %v2209_v34, %s5713_s7  ;;  %2223 = vrot.lane.b32.xlu2 %v2209_v34, %s5714_s13 }
0x17ca   :  { %v2174_v60 = vpop.permute.xlu2 %2173 }
0x17d2   :  { %v2190_v1 = vpop.permute.xlu2 %2189 }
0x17da   :  { %v2218_v56 = vpop.permute.xlu2 %2217 }
0x17e0   :  { %v2192_v18 = vpop.permute.xlu1 %2191 }
0x17e2   :  { %v2166_v27 = vpop.permute.xlu0 %2165  ;;  %v2224_v5 = vpop.permute.xlu2 %2223 }
0x17e3   :  { %v2170_v28 = vadd.f32 %v2166_v27, %v2160_v26  ;;  %v2439_v26 = vld [vmem:[#allocation14] sm:$0x3] }
0x17e5   :  { %v2178_v42 = vadd.f32 %v2174_v60, %v2170_v28 }
0x17e7   :  { %v2184_v20 = vadd.f32 %v2182_v62, %v2178_v42  ;;  %v2513_v42 = vld [vmem:[#allocation14] sm:$0xf] }
0x17e8   :  { %v2164_v14 = vpop.permute.xlu1 %2163 }
0x17e9   :  { %v2169_v16 = vadd.f32 %v2164_v14, %v2159_v37  ;;  %v2196_v40 = vadd.f32 %v2192_v18, %v2184_v20 }
0x17ea   :  { %v2172_v55 = vpop.permute.xlu0 %2171 }
0x17eb   :  { %v2177_v6 = vadd.f32 %v2172_v55, %v2169_v16 }
0x17ed   :  { %v2183_v58 = vadd.f32 %v2181_v19, %v2177_v6 }
0x17ef   :  { %v2195_v0 = vadd.f32 %v2190_v1, %v2183_v58 }
0x17f0   :  { %v2200_v32 = vpop.permute.xlu1 %2199 }
0x17f1   :  { %v2205_v7 = vadd.f32 %v2200_v32, %v2195_v0 }
0x17f2   :  { %v2202_v45 = vpop.permute.xlu0 %2201 }
0x17f3   :  { %v2206_v39 = vadd.f32 %v2202_v45, %v2196_v40  ;;  %v2211_v59 = vadd.f32 %v2209_v34, %v2205_v7 }
0x17f5   :  { %v2212_v23 = vadd.f32 %v2210_v21, %v2206_v39 }
0x17f7   :  { %v2222_v29 = vadd.f32 %v2218_v56, %v2212_v23 }
0x17f8   :  { %v2226_v30 = vpop.permute.xlu1 %2225 }
0x17f9   :  { %v2230_v31 = vadd.f32 %v2226_v30, %v2222_v29 }
0x17fa   :  { %v2216_v50 = vpop.permute.xlu0 %2215 }
0x17fb   :  { %v2221_v8 = vadd.f32 %v2216_v50, %v2211_v59  ;;  %v2232_v4 = vsub.f32 %v2230_v31, %v6557_v35 }
0x17fd   :  { %v2229_v57 = vadd.f32 %v2224_v5, %v2221_v8  ;;  %2251 = vmatpush.msra.mxu1 %v2232_v4 }
0x17ff   :  { %v2231_v41 = vsub.f32 %v2229_v57, %v6559_v3 }
0x1801   :  { %2252 = vmatpush.msra.mxu1 %v2231_v41 }
0x1802   :  { %5382 = vmatmul.msk.f32.vlgmr.msra.gmra.mxu1 %vm1452_vm7, %v6563_v48  ;;  %v2333_v48 = vld [vmem:[#allocation10] sm:$0x3] }
0x1803   :  { %2327 = vmatpush.msrb.mxu1 %v6541_v43 }
0x1805   :  { %2328 = vmatpush.msrb.mxu1 %v6567_v52 }
0x187f   :  { %v2254_v53 = vpop.f32.mrf.mxu1 }
0x1880   :  { %5383 = vmatmul.msk.f32.vlgmr.msra.gmra.mxu2 %vm7370_vm8, %v2254_v53  ;;  %vm7372_vm8 = vcmask 78848  }
0x1903   :  { %v6734_v12 = vpop.f32.mrf.mxu2 }
0x1904   :  { %2303 = vmatpush.msra.mxu0 %v6734_v12 }
0x1905   :  { %5384 = vmatmul.msk.f32.vlgmr.msra.gmra.mxu0 %vm1505_vm9, %v2284_v9 }
0x1906   :  { %2379 = vmatpush.msrb.mxu0 %v6567_v52  ;;  %v2411_v52 = vld [vmem:[#allocation11] sm:$0xf] }
0x1907   :  { %5391 = vmatpush.msk.msra.mxu1 %vm1559_vm10, %v2411_v52 }
0x1908   :  { %5395 = vmatpush.msk.msra.mxu0 %vm1559_vm10, %v2513_v42 }
0x1982   :  { %v2305_v2 = vpop.f32.mrf.mxu0 }
0x1983   :  { %5385 = vmatmul.msk.f32.vlgmr.msrb.gmra.mxu1 %vm1452_vm7, %v2305_v2 }
0x1984   :  { %2632 = vmatpush.msrb.mxu1 %v6613_v36 }
0x1a00   :  { %v6740_v54 = vpop.f32.mrf.mxu1 }
0x1a01   :  { %5386 = vmatpush.msk.msrb.mxu2 %vm1559_vm10, %v6740_v54 }
0x1a02   :  { %5387 = vmatmul.msk.f32.vlgmr.msrb.gmra.mxu2 %vm1555_vm11, %v2333_v48 }
0x1a03   :  { %5393 = vmatpush.msk.msra.mxu2 %vm1612_vm12, %v2439_v26 }
0x1a85   :  { %v2357_v43 = vpop.f32.mrf.mxu2 }
0x1a86   :  { %5388 = vmatmul.msk.f32.vlgmr.msrb.gmra.mxu0 %vm1505_vm9, %v2357_v43 }
0x1a87   :  { %2730 = vmatpush.msrb.mxu0 %v6637_v13 }
0x1a89   :  { %2731 = vmatpush.msrb.mxu0 %v6613_v36  ;;  %v2540_v36 = vld [vmem:[#allocation13] sm:$0xf] }
0x1b03   :  { %v2381_v51 = vpop.f32.mrf.mxu0 }
0x1b04   :  { %5389 = vmatpush.msk.msrb.mxu3 %vm1612_vm12, %v2381_v51  ;;  %v2511_v29 = vmul.f32 0.375, %v2381_v51 }
0x1b05   :  { %5390 = vmatmul.msk.f32.vlgmr.msrb.gmra.mxu3 %vm1608_vm13, %v2384_v46 }
0x1b88   :  { %v2408_v47 = vpop.f32.mrf.mxu3 }
0x1b89   :  { %5392 = vmatmul.msk.f32.vlgmr.msra.gmra.mxu1 %vm1555_vm11, %v2408_v47 }
0x1c06   :  { %v2435_v37 = vpop.f32.mrf.mxu1 }
0x1c07   :  { %v2438_v10 = vmul.f32 0.375, %v2435_v37 }
0x1c09   :  { %5394 = vmatmul.msk.f32.vlgmr.msra.gmra.mxu2 %vm1608_vm13, %v2438_v10 }
0x1c8c   :  { %v2463_v15 = vpop.f32.mrf.mxu2 }
0x1c8d   :  { %v2466_v19 = vperm.slane %v2463_v15, 0 }
0x1c8f   :  { %2469 = vrot.lane.b32.xlu0 %v2466_v19, %s5712_s6 }
0x1d01   :  { %v2470_v62 = vpop.permute.xlu0 %2469 }
0x1d02   :  { %2472 = vst.msk [vmem:[#allocation2 + $0x1] sm:$0x3] %vm1698_vm14, %v2470_v62 }
0x1d09   :  { %v2484_v21 = vld [vmem:[#allocation2 + $0x1] sm:$0x3] }
0x1d0a   :  { %v2498_v34 = vld [vmem:[#allocation2 + $0x2] sm:$0x3]  ;;  %v2473_v60 = vld [vmem:[#allocation2] sm:$0x3]  ;;  %v2487_v18 = vmul.f32 -1.0, %v2484_v21  ;;  %v2485_v1 = vmul.f32 0.125, %v2484_v21 }
0x1d0b   :  { %v2474_v27 = vmul.f32 0.125, %v2473_v60  ;;  %2567 = vst.msk [vmem:[#allocation2] sm:$0x3f] %vm7372_vm8, %v7371_v11  ;;  %v2499_v28 = vmul.f32 0.125, %v2498_v34  ;;  %vm7373_vm8 = vcmask 68616   ;;  %v2611_v34 = vmul.f32 0.375, %v6740_v54 }
0x1d0c   :  { %2489 = vrot.lane.b32.xlu0 %v2487_v18, %s5713_s7 }
0x1d0d   :  { %2480 = vrot.lane.b32.xlu2 %v2474_v27, %s5714_s13  ;;  %2476 = vrot.lane.b32.xlu1 %v2474_v27, %s5713_s7 }
0x1d14   :  { %2506 = vrot.lane.b32.xlu0 %v2499_v28, %s5714_s13 }
0x1d15   :  { %2502 = vrot.lane.b32.xlu2 %v2499_v28, %s5713_s7  ;;  %2494 = vrot.lane.b32.xlu1 %v2485_v1, %s5714_s13 }
0x1d67   :  { %v2481_v55 = vpop.permute.xlu2 %2480 }
0x1d6f   :  { %v2503_v45 = vpop.permute.xlu2 %2502 }
0x1d7e   :  { %v2490_v20 = vpop.permute.xlu0 %2489 }
0x1d7f   :  { %v2477_v14 = vpop.permute.xlu1 %2476 }
0x1d80   :  { %v2479_v16 = vadd.f32 %v2477_v14, %v2474_v27 }
0x1d82   :  { %v2483_v6 = vadd.f32 %v2481_v55, %v2479_v16 }
0x1d84   :  { %v2486_v58 = vadd.f32 %v2485_v1, %v2483_v6 }
0x1d86   :  { %v2492_v32 = vadd.f32 %v2490_v20, %v2486_v58  ;;  %v2507_v7 = vpop.permute.xlu0 %2506 }
0x1d87   :  { %v2495_v0 = vpop.permute.xlu1 %2494 }
0x1d88   :  { %v2497_v40 = vadd.f32 %v2495_v0, %v2492_v32 }
0x1d8a   :  { %v2500_v56 = vadd.f32 %v2499_v28, %v2497_v40 }
0x1d8c   :  { %v2505_v39 = vadd.f32 %v2503_v45, %v2500_v56 }
0x1d8e   :  { %v2509_v23 = vadd.f32 %v2507_v7, %v2505_v39 }
0x1d90   :  { %v2510_v59 = vadd.f32 %v2509_v23, %v2466_v19 }
0x1d92   :  { %v2512_v30 = vadd.f32 %v2511_v29, %v2510_v59 }
0x1d94   :  { %5396 = vmatmul.msk.f32.vlgmr.msra.gmra.mxu0 %vm1555_vm11, %v2512_v30 }
0x1e11   :  { %v2537_v13 = vpop.f32.mrf.mxu0 }
0x1e12   :  { %5397 = vmatpush.msk.msra.mxu3 %vm1612_vm12, %v2537_v13 }
0x1e13   :  { %5398 = vmatmul.msk.f32.vlgmr.msra.gmra.mxu3 %vm1608_vm13, %v2540_v36 }
0x1e96   :  { %v2564_v50 = vpop.f32.mrf.mxu3 }
0x1e97   :  { %2569 = vrot.lane.b32.xlu1 %v2564_v50, %s5712_s6 }
0x1f09   :  { %v2570_v31 = vpop.permute.xlu1 %2569 }
0x1f0a   :  { %2572 = vst.msk [vmem:[#allocation2 + $0x1] sm:$0xf] %vm7373_vm8, %v2570_v31  ;;  %vm7374_vm8 = vcmask 261120  }
0x1f11   :  { %v2584_v8 = vld [vmem:[#allocation2 + $0x1] sm:$0xf] }
0x1f12   :  { %v2598_v5 = vld [vmem:[#allocation2 + $0x2] sm:$0xf]  ;;  %v2587_v57 = vmul.f32 -1.0, %v2584_v8  ;;  %v2585_v9 = vmul.f32 0.125, %v2584_v8 }
0x1f13   :  { %v2573_v4 = vld [vmem:[#allocation2] sm:$0xf]  ;;  %v2599_v53 = vmul.f32 0.125, %v2598_v5 }
0x1f14   :  { %v2574_v41 = vmul.f32 0.125, %v2573_v4  ;;  %2664 = vst.msk [vmem:[#allocation2] sm:$0xff] %vm1893_vm4, %v7371_v11  ;;  %2589 = vrot.lane.b32.xlu1 %v2587_v57, %s5713_s7 }
0x1f16   :  { %2580 = vrot.lane.b32.xlu0 %v2574_v41, %s5714_s13  ;;  %2576 = vrot.lane.b32.xlu2 %v2574_v41, %s5713_s7 }
0x1f1c   :  { %2606 = vrot.lane.b32.xlu1 %v2599_v53, %s5714_s13 }
0x1f1e   :  { %2602 = vrot.lane.b32.xlu0 %v2599_v53, %s5713_s7  ;;  %2594 = vrot.lane.b32.xlu2 %v2585_v9, %s5714_s13 }
0x1f70   :  { %v2577_v2 = vpop.permute.xlu2 %2576 }
0x1f71   :  { %v2579_v48 = vadd.f32 %v2577_v2, %v2574_v41 }
0x1f78   :  { %v2595_v26 = vpop.permute.xlu2 %2594 }
0x1f86   :  { %v2590_v51 = vpop.permute.xlu1 %2589 }
0x1f88   :  { %v2581_v43 = vpop.permute.xlu0 %2580 }
0x1f89   :  { %v2583_v46 = vadd.f32 %v2581_v43, %v2579_v48 }
0x1f8b   :  { %v2586_v52 = vadd.f32 %v2585_v9, %v2583_v46 }
0x1f8d   :  { %v2592_v47 = vadd.f32 %v2590_v51, %v2586_v52 }
0x1f8e   :  { %v2607_v62 = vpop.permute.xlu1 %2606 }
0x1f8f   :  { %v2597_v37 = vadd.f32 %v2595_v26, %v2592_v47 }
0x1f90   :  { %v2603_v15 = vpop.permute.xlu0 %2602 }
0x1f91   :  { %v2600_v10 = vadd.f32 %v2599_v53, %v2597_v37 }
0x1f93   :  { %v2605_v19 = vadd.f32 %v2603_v15, %v2600_v10 }
0x1f95   :  { %v2609_v21 = vadd.f32 %v2607_v62, %v2605_v19 }
0x1f97   :  { %v2610_v60 = vadd.f32 %v2609_v21, %v2564_v50  ;;  %v2709_v50 = vmul.f32 0.375, %v6734_v12 }
0x1f99   :  { %v2612_v18 = vadd.f32 %v2611_v34, %v2610_v60 }
0x1f9b   :  { %5399 = vmatmul.msk.f32.vlgmr.msrb.gmra.mxu1 %vm1505_vm9, %v2612_v18 }
0x2018   :  { %v2634_v27 = vpop.f32.mrf.mxu1 }
0x2019   :  { %5400 = vmatpush.msk.msrb.mxu2 %vm1559_vm10, %v2634_v27 }
0x201a   :  { %5401 = vmatmul.msk.f32.vlgmr.msrb.gmra.mxu2 %vm1555_vm11, %v6618_v17 }
0x209d   :  { %v2661_v28 = vpop.f32.mrf.mxu2 }
0x209e   :  { %2667 = vrot.lane.b32.xlu2 %v2661_v28, %s5712_s6 }
0x20f8   :  { %v2668_v1 = vpop.permute.xlu2 %2667 }
0x20f9   :  { %2670 = vst.msk [vmem:[#allocation2 + $0x1] sm:$0xff] %vm1901_vm15, %v2668_v1 }
0x2100   :  { %v2682_v42 = vld [vmem:[#allocation2 + $0x1] sm:$0xff] }
0x2101   :  { %v2671_v14 = vld [vmem:[#allocation2] sm:$0xff]  ;;  %v2685_v16 = vmul.f32 -1.0, %v2682_v42  ;;  %v2683_v20 = vmul.f32 0.125, %v2682_v42 }
0x2102   :  { %v2672_v54 = vmul.f32 0.125, %v2671_v14  ;;  %v2696_v55 = vld [vmem:[#allocation2 + $0x2] sm:$0xff] }
0x2103   :  { %2687 = vrot.lane.b32.xlu2 %v2685_v16, %s5713_s7  ;;  %v2697_v6 = vmul.f32 0.125, %v2696_v55 }
0x2104   :  { %2678 = vrot.lane.b32.xlu1 %v2672_v54, %s5714_s13  ;;  %2674 = vrot.lane.b32.xlu0 %v2672_v54, %s5713_s7 }
0x210b   :  { %2704 = vrot.lane.b32.xlu2 %v2697_v6, %s5714_s13 }
0x210c   :  { %2700 = vrot.lane.b32.xlu1 %v2697_v6, %s5713_s7  ;;  %2692 = vrot.lane.b32.xlu0 %v2683_v20, %s5714_s13 }
0x215d   :  { %v2688_v56 = vpop.permute.xlu2 %2687 }
0x2165   :  { %v2705_v36 = vpop.permute.xlu2 %2704 }
0x2176   :  { %v2675_v58 = vpop.permute.xlu0 %2674  ;;  %v2679_v0 = vpop.permute.xlu1 %2678 }
0x2177   :  { %v2677_v32 = vadd.f32 %v2675_v58, %v2672_v54 }
0x2179   :  { %v2681_v40 = vadd.f32 %v2679_v0, %v2677_v32 }
0x217b   :  { %v2684_v45 = vadd.f32 %v2683_v20, %v2681_v40 }
0x217d   :  { %v2690_v39 = vadd.f32 %v2688_v56, %v2684_v45 }
0x217e   :  { %v2693_v7 = vpop.permute.xlu0 %2692  ;;  %v2701_v59 = vpop.permute.xlu1 %2700 }
0x217f   :  { %v2695_v23 = vadd.f32 %v2693_v7, %v2690_v39 }
0x2181   :  { %v2698_v29 = vadd.f32 %v2697_v6, %v2695_v23 }
0x2183   :  { %v2703_v30 = vadd.f32 %v2701_v59, %v2698_v29 }
0x2185   :  { %v2707_v13 = vadd.f32 %v2705_v36, %v2703_v30 }
0x2187   :  { %v2708_v31 = vadd.f32 %v2707_v13, %v2661_v28 }
0x2189   :  { %v2710_v8 = vadd.f32 %v2709_v50, %v2708_v31 }
0x218b   :  { %5402 = vmatmul.msk.f32.vlgmr.msrb.gmra.mxu0 %vm1452_vm7, %v2710_v8 }
0x2208   :  { %v2733_v5 = vpop.f32.mrf.mxu0 }
0x2209   :  { %2759 = vmatpush.msrb.mxu3 %v2733_v5 }
0x220a   :  { %5403 = vmatmul.msk.f32.vlgmr.msrb.gmra.mxu3 %vm1505_vm9, %v6618_v17 }
0x2212   :  { %5404 = vmatmul.msk.f32.gmra.mxu3 %vm1505_vm9, %v6645_v49 }
0x228d   :  { %v2761_v4 = vpop.f32.mrf.mxu3 }
0x228e   :  { %v6799_v57 = vsub.f32 %v6686_v25, %v2761_v4 }
0x2290   :  { %2771 = vrot.lane.b32.xlu0 %v6799_v57, %s5712_s6 }
0x2295   :  { %v2764_v12 = vpop.f32.mrf.mxu3 }
0x2296   :  { %v6804_v41 = vsub.f32 %v6695_v33, %v2764_v12 }
0x2298   :  { %2773 = vrot.lane.b32.xlu1 %v6804_v41, %s5712_s6 }
0x2302   :  { %v2772_v53 = vpop.permute.xlu0 %2771 }
0x2303   :  { %2777 = vst.msk [vmem:[#allocation2 + $0x1] sm:$0xff] %vm168_vm0, %v2772_v53 }
0x230a   :  { %v2774_v17 = vpop.permute.xlu1 %2773  ;;  %v2779_v9 = vld [vmem:[#allocation2 + $0x1] sm:$0xff] }
0x230b   :  { %2778 = vst.msk [vmem:[#allocation2 + $0x9] sm:$0xff] %vm168_vm0, %v2774_v17  ;;  %2783 = vrot.lane.b32.xlu2 %v2779_v9, %s5713_s7 }
0x2312   :  { %v2780_v49 = vld [vmem:[#allocation2 + $0x9] sm:$0xff] }
0x2313   :  { %2785 = vrot.lane.b32.xlu0 %v2780_v49, %s5713_s7 }
0x2365   :  { %v2784_v25 = vpop.permute.xlu2 %2783 }
0x2366   :  { %2789 = vst.msk [vmem:[#allocation2 + $0x1] sm:$0xff] %vm181_vm1, %v2784_v25 }
0x236d   :  { %v2791_v33 = vld [vmem:[#allocation2 + $0x1] sm:$0xff] }
0x236e   :  { %2795 = vrot.lane.b32.xlu1 %v2791_v33, %s5712_s6 }
0x2385   :  { %v2786_v2 = vpop.permute.xlu0 %2785 }
0x2386   :  { %2790 = vst.msk [vmem:[#allocation2 + $0x9] sm:$0xff] %vm181_vm1, %v2786_v2 }
0x238d   :  { %v2792_v48 = vld [vmem:[#allocation2 + $0x9] sm:$0xff] }
0x238e   :  { %2797 = vrot.lane.b32.xlu2 %v2792_v48, %s5712_s6 }
0x23e0   :  { %v2796_v43 = vpop.permute.xlu1 %2795 }
0x23e1   :  { %2801 = vst.msk [vmem:[#allocation2 + $0x1] sm:$0xff] %vm194_vm2, %v2796_v43 }
0x23e8   :  { %v2798_v46 = vpop.permute.xlu2 %2797  ;;  %v2829_v51 = vld [vmem:[#allocation2 + $0x1] sm:$0xff] }
0x23e9   :  { %v2803_v52 = vld [vmem:[#allocation2 + $0x1] sm:$0x1]  ;;  %2802 = vst.msk [vmem:[#allocation2 + $0x9] sm:$0xff] %vm194_vm2, %v2798_v46  ;;  %v2835_v47 = vmul.f32 -1.0, %v2829_v51  ;;  %v2831_v26 = vmul.f32 0.125, %v2829_v51 }
0x23ea   :  { %2804 = vst.msk [vmem:[#allocation2] sm:$0x1] %vm198_vm3, %v2803_v52 }
0x23eb   :  { %2839 = vrot.lane.b32.xlu0 %v2835_v47, %s5713_s7  ;;  %2849 = vrot.lane.b32.xlu2 %v2831_v26, %s5714_s13 }
0x23f0   :  { %v2808_v37 = vld [vmem:[#allocation2 + $0x8] sm:$0xff]  ;;  %v2805_v19 = vld [vmem:[#allocation2 + $0x10] sm:$0x1] }
0x23f1   :  { %v2810_v10 = vmul.f32 0.125, %v2808_v37  ;;  %v2807_v15 = vld [vmem:[#allocation2] sm:$0xff]  ;;  %2806 = vst.msk [vmem:[#allocation2 + $0x11] sm:$0x1] %vm198_vm3, %v2805_v19  ;;  %v2830_v21 = vld [vmem:[#allocation2 + $0x9] sm:$0xff] }
0x23f2   :  { %v2809_v62 = vmul.f32 0.125, %v2807_v15  ;;  %v2832_v34 = vmul.f32 0.125, %v2830_v21  ;;  %v2836_v60 = vmul.f32 -1.0, %v2830_v21  ;;  %v2857_v27 = vld [vmem:[#allocation2 + $0x2] sm:$0xff] }
0x23f3   :  { %2815 = vrot.lane.b32.xlu2 %v2810_v10, %s5713_s7  ;;  %v2859_v1 = vmul.f32 0.125, %v2857_v27 }
0x23f4   :  { %2821 = vrot.lane.b32.xlu1 %v2809_v62, %s5714_s13  ;;  %2813 = vrot.lane.b32.xlu0 %v2809_v62, %s5713_s7 }
0x23f8   :  { %v2858_v18 = vld [vmem:[#allocation2 + $0xa] sm:$0xff] }
0x23f9   :  { %v2860_v28 = vmul.f32 0.125, %v2858_v18 }
0x23fb   :  { %2851 = vrot.lane.b32.xlu2 %v2832_v34, %s5714_s13 }
0x23fc   :  { %2823 = vrot.lane.b32.xlu1 %v2810_v10, %s5714_s13  ;;  %2841 = vrot.lane.b32.xlu0 %v2836_v60, %s5713_s7 }
0x2403   :  { %2875 = vrot.lane.b32.xlu2 %v2860_v28, %s5714_s13 }
0x2404   :  { %2865 = vrot.lane.b32.xlu1 %v2859_v1, %s5713_s7  ;;  %2873 = vrot.lane.b32.xlu0 %v2859_v1, %s5714_s13 }
0x240c   :  { %2867 = vrot.lane.b32.xlu1 %v2860_v28, %s5713_s7 }
0x2445   :  { %v2850_v14 = vpop.permute.xlu2 %2849 }
0x244d   :  { %v2816_v20 = vpop.permute.xlu2 %2815 }
0x244e   :  { %v2820_v32 = vadd.f32 %v2816_v20, %v2810_v10  ;;  %v6872_v20 = vld [vmem:[#allocation11 + $0x18] sm:$0xff] }
0x244f   :  { %3042 = vmatpush.msra.mxu2 %v6872_v20 }
0x2455   :  { %v2852_v59 = vpop.permute.xlu2 %2851 }
0x245d   :  { %v2840_v42 = vpop.permute.xlu0 %2839  ;;  %v2876_v17 = vpop.permute.xlu2 %2875 }
0x2466   :  { %v2822_v16 = vpop.permute.xlu1 %2821  ;;  %v2814_v54 = vpop.permute.xlu0 %2813 }
0x2467   :  { %v2819_v55 = vadd.f32 %v2814_v54, %v2809_v62 }
0x2469   :  { %v2827_v6 = vadd.f32 %v2822_v16, %v2819_v55 }
0x246b   :  { %v2833_v58 = vadd.f32 %v2831_v26, %v2827_v6 }
0x246d   :  { %v2845_v0 = vadd.f32 %v2840_v42, %v2833_v58  ;;  %v6874_v58 = vld [vmem:[#allocation11 + $0x10] sm:$0xff] }
0x246e   :  { %v2824_v40 = vpop.permute.xlu1 %2823  ;;  %v2842_v56 = vpop.permute.xlu0 %2841  ;;  %3043 = vmatpush.msra.mxu2 %v6874_v58 }
0x246f   :  { %v2828_v45 = vadd.f32 %v2824_v40, %v2820_v32  ;;  %v2855_v7 = vadd.f32 %v2850_v14, %v2845_v0  ;;  %v6877_v32 = vld [vmem:[#allocation11 + $0x8] sm:$0xff] }
0x2470   :  { %3044 = vmatpush.msra.mxu2 %v6877_v32 }
0x2471   :  { %v2834_v39 = vadd.f32 %v2832_v34, %v2828_v45  ;;  %v2861_v29 = vadd.f32 %v2859_v1, %v2855_v7 }
0x2473   :  { %v2846_v23 = vadd.f32 %v2842_v56, %v2834_v39 }
0x2475   :  { %v2856_v50 = vadd.f32 %v2852_v59, %v2846_v23 }
0x2476   :  { %v2866_v30 = vpop.permute.xlu1 %2865  ;;  %v2874_v13 = vpop.permute.xlu0 %2873 }
0x2477   :  { %v2871_v36 = vadd.f32 %v2866_v30, %v2861_v29  ;;  %v2862_v4 = vadd.f32 %v2860_v28, %v2856_v50 }
0x2479   :  { %v2879_v31 = vadd.f32 %v2874_v13, %v2871_v36 }
0x247b   :  { %v2881_v8 = vadd.f32 %v2879_v31, %v6799_v57 }
0x247d   :  { %v6834_v5 = vadd.f32 %v2881_v8, %v6682_v63 }
0x247e   :  { %v2868_v12 = vpop.permute.xlu1 %2867 }
0x247f   :  { %v2872_v53 = vadd.f32 %v2868_v12, %v2862_v4  ;;  %2887 = vrot.lane.b32.xlu0 %v6834_v5, %s5712_s6 }
0x2481   :  { %v2880_v9 = vadd.f32 %v2876_v17, %v2872_v53 }
0x2483   :  { %v2882_v49 = vadd.f32 %v2880_v9, %v6804_v41 }
0x2485   :  { %v6840_v25 = vadd.f32 %v2882_v49, %v6692_v38 }
0x2487   :  { %2889 = vrot.lane.b32.xlu1 %v6840_v25, %s5712_s6 }
0x24f1   :  { %v2888_v57 = vpop.permute.xlu0 %2887 }
0x24f2   :  { %2893 = vst.msk [vmem:[#allocation2 + $0x1] sm:$0xff] %vm168_vm0, %v2888_v57 }
0x24f9   :  { %v2890_v33 = vpop.permute.xlu1 %2889  ;;  %v2895_v2 = vld [vmem:[#allocation2 + $0x1] sm:$0xff] }
0x24fa   :  { %2894 = vst.msk [vmem:[#allocation2 + $0x9] sm:$0xff] %vm168_vm0, %v2890_v33  ;;  %2899 = vrot.lane.b32.xlu2 %v2895_v2, %s5713_s7 }
0x2501   :  { %v2896_v48 = vld [vmem:[#allocation2 + $0x9] sm:$0xff] }
0x2502   :  { %2901 = vrot.lane.b32.xlu0 %v2896_v48, %s5713_s7 }
0x2554   :  { %v2900_v43 = vpop.permute.xlu2 %2899 }
0x2555   :  { %2905 = vst.msk [vmem:[#allocation2 + $0x1] sm:$0xff] %vm181_vm1, %v2900_v43 }
0x255c   :  { %v2907_v41 = vld [vmem:[#allocation2 + $0x1] sm:$0xff] }
0x255d   :  { %2911 = vrot.lane.b32.xlu1 %v2907_v41, %s5712_s6 }
0x2574   :  { %v2902_v46 = vpop.permute.xlu0 %2901 }
0x2575   :  { %2906 = vst.msk [vmem:[#allocation2 + $0x9] sm:$0xff] %vm181_vm1, %v2902_v46  ;;  %v6883_v46 = vld [vmem:[#allocation10] sm:$0xff] }
0x257c   :  { %v2908_v51 = vld [vmem:[#allocation2 + $0x9] sm:$0xff] }
0x257d   :  { %2913 = vrot.lane.b32.xlu2 %v2908_v51, %s5712_s6  ;;  %v6888_v51 = vld [vmem:[#allocation11] sm:$0xff] }
0x257e   :  { %3045 = vmatpush.msra.mxu2 %v6888_v51 }
0x25cf   :  { %v2912_v52 = vpop.permute.xlu1 %2911 }
0x25d0   :  { %2917 = vst.msk [vmem:[#allocation2 + $0x1] sm:$0xff] %vm194_vm2, %v2912_v52 }
0x25d7   :  { %v2914_v47 = vpop.permute.xlu2 %2913  ;;  %v2919_v26 = vld [vmem:[#allocation2 + $0x1] sm:$0x1] }
0x25d8   :  { %2918 = vst.msk [vmem:[#allocation2 + $0x9] sm:$0xff] %vm194_vm2, %v2914_v47  ;;  %v2945_v37 = vld [vmem:[#allocation2 + $0x1] sm:$0xff]  ;;  %v3050_v47 = vld [vmem:[#allocation10] sm:$0xf] }
0x25d9   :  { %2920 = vst.msk [vmem:[#allocation2] sm:$0x1] %vm198_vm3, %v2919_v26  ;;  %v2951_v27 = vmul.f32 2.6666667, %v2945_v37  ;;  %v2947_v1 = vmul.f32 -0.33333334, %v2945_v37 }
0x25df   :  { %v2946_v10 = vld [vmem:[#allocation2 + $0x9] sm:$0xff] }
0x25e0   :  { %v2973_v15 = vld [vmem:[#allocation2 + $0x2] sm:$0xff]  ;;  %v2921_v19 = vld [vmem:[#allocation2 + $0x10] sm:$0x1]  ;;  %v2952_v62 = vmul.f32 2.6666667, %v2946_v10 }
0x25e1   :  { %2922 = vst.msk [vmem:[#allocation2 + $0x11] sm:$0x1] %vm198_vm3, %v2921_v19  ;;  %v2924_v21 = vld [vmem:[#allocation2 + $0x8] sm:$0xff]  ;;  %v2923_v34 = vld [vmem:[#allocation2] sm:$0xff]  ;;  %v2948_v42 = vmul.f32 -0.33333334, %v2946_v10 }
0x25e2   :  { %v2926_v60 = vmul.f32 -0.33333334, %v2924_v21  ;;  %3233 = vst.msk [vmem:[#allocation2] sm:$0xf] %vm1692_vm5, %v7371_v11  ;;  %2957 = vrot.lane.b32.xlu1 %v2952_v62, %s5713_s7  ;;  %v2925_v18 = vmul.f32 -0.33333334, %v2923_v34 }
0x25e3   :  { %3431 = vst.msk [vmem:[#allocation2 + $0x8] sm:$0x3] %vm1895_vm6, %v7371_v11  ;;  %v2975_v16 = vmul.f32 -0.33333334, %v2973_v15  ;;  %v3099_v10 = vld [vmem:[#allocation10] sm:$0x3] }
0x25e4   :  { %2939 = vrot.lane.b32.xlu2 %v2926_v60, %s5714_s13  ;;  %2931 = vrot.lane.b32.xlu0 %v2926_v60, %s5713_s7  ;;  %v3150_v62 = vld [vmem:[#allocation10] sm:$0x1]  ;;  %v3177_v34 = vld [vmem:[#allocation11] sm:$0xf] }
0x25e8   :  { %v2974_v28 = vld [vmem:[#allocation2 + $0xa] sm:$0xff] }
0x25e9   :  { %v2976_v14 = vmul.f32 -0.33333334, %v2974_v28 }
0x25ea   :  { %2929 = vrot.lane.b32.xlu1 %v2925_v18, %s5713_s7 }
0x25ec   :  { %2955 = vrot.lane.b32.xlu2 %v2951_v27, %s5713_s7  ;;  %2937 = vrot.lane.b32.xlu0 %v2925_v18, %s5714_s13 }
0x25f2   :  { %2965 = vrot.lane.b32.xlu1 %v2947_v1, %s5714_s13 }
0x25f4   :  { %2967 = vrot.lane.b32.xlu0 %v2948_v42, %s5714_s13  ;;  %2983 = vrot.lane.b32.xlu2 %v2976_v14, %s5713_s7 }
0x25fa   :  { %2991 = vrot.lane.b32.xlu1 %v2976_v14, %s5714_s13 }
0x25fc   :  { %2981 = vrot.lane.b32.xlu0 %v2975_v16, %s5713_s7  ;;  %2989 = vrot.lane.b32.xlu2 %v2975_v16, %s5714_s13 }
0x263e   :  { %v2940_v54 = vpop.permute.xlu2 %2939 }
0x2646   :  { %v2956_v40 = vpop.permute.xlu2 %2955 }
0x264e   :  { %v2984_v50 = vpop.permute.xlu2 %2983 }
0x2654   :  { %v2958_v55 = vpop.permute.xlu1 %2957 }
0x2656   :  { %v2932_v6 = vpop.permute.xlu0 %2931  ;;  %v2990_v2 = vpop.permute.xlu2 %2989 }
0x2657   :  { %v2936_v0 = vadd.f32 %v2932_v6, %v2926_v60 }
0x2659   :  { %v2944_v56 = vadd.f32 %v2940_v54, %v2936_v0 }
0x265b   :  { %v2950_v29 = vadd.f32 %v2948_v42, %v2944_v56 }
0x265c   :  { %v2930_v45 = vpop.permute.xlu1 %2929 }
0x265d   :  { %v2935_v39 = vadd.f32 %v2930_v45, %v2925_v18  ;;  %v2962_v13 = vadd.f32 %v2958_v55, %v2950_v29  ;;  %v3205_v18 = vld [vmem:[#allocation14] sm:$0x3] }
0x265e   :  { %v2938_v7 = vpop.permute.xlu0 %2937  ;;  %v3279_v45 = vld [vmem:[#allocation14] sm:$0xf] }
0x265f   :  { %v2943_v23 = vadd.f32 %v2938_v7, %v2935_v39 }
0x2661   :  { %v2949_v59 = vadd.f32 %v2947_v1, %v2943_v23 }
0x2663   :  { %v2961_v36 = vadd.f32 %v2956_v40, %v2949_v59 }
0x2664   :  { %v2966_v30 = vpop.permute.xlu1 %2965 }
0x2665   :  { %v2971_v4 = vadd.f32 %v2966_v30, %v2961_v36 }
0x2666   :  { %v2968_v31 = vpop.permute.xlu0 %2967 }
0x2667   :  { %v2972_v8 = vadd.f32 %v2968_v31, %v2962_v13  ;;  %v2977_v17 = vadd.f32 %v2975_v16, %v2971_v4 }
0x2669   :  { %v2978_v12 = vadd.f32 %v2976_v14, %v2972_v8 }
0x266b   :  { %v2988_v53 = vadd.f32 %v2984_v50, %v2978_v12 }
0x266c   :  { %v2992_v9 = vpop.permute.xlu1 %2991 }
0x266d   :  { %v2996_v57 = vadd.f32 %v2992_v9, %v2988_v53 }
0x266e   :  { %v2982_v49 = vpop.permute.xlu0 %2981 }
0x266f   :  { %v2987_v33 = vadd.f32 %v2982_v49, %v2977_v17  ;;  %v2998_v48 = vsub.f32 %v2996_v57, %v6557_v35  ;;  %v3306_v57 = vld [vmem:[#allocation13] sm:$0xf] }
0x2671   :  { %v2995_v43 = vadd.f32 %v2990_v2, %v2987_v33  ;;  %3017 = vmatpush.msra.mxu1 %v2998_v48 }
0x2673   :  { %v2997_v41 = vsub.f32 %v2995_v43, %v6559_v3 }
0x2675   :  { %3018 = vmatpush.msra.mxu1 %v2997_v41 }
0x2676   :  { %5405 = vmatmul.msk.f32.vlgmr.msra.gmra.mxu1 %vm1452_vm7, %v6883_v46 }
0x2677   :  { %3093 = vmatpush.msrb.mxu1 %v6877_v32 }
0x2679   :  { %3094 = vmatpush.msrb.mxu1 %v6888_v51 }
0x267b   :  { %5414 = vmatpush.msk.msra.mxu1 %vm1559_vm10, %v3177_v34 }
0x26f3   :  { %v3020_v52 = vpop.f32.mrf.mxu1 }
0x26f4   :  { %5406 = vmatmul.msk.f32.vlgmr.msra.gmra.mxu2 %vm7374_vm8, %v3020_v52  ;;  %vm7375_vm8 = vcmask 78848  }
0x2777   :  { %v6893_v26 = vpop.f32.mrf.mxu2 }
0x2778   :  { %3069 = vmatpush.msra.mxu0 %v6893_v26 }
0x2779   :  { %5407 = vmatmul.msk.f32.vlgmr.msra.gmra.mxu0 %vm1505_vm9, %v3050_v47 }
0x277a   :  { %3145 = vmatpush.msrb.mxu0 %v6888_v51 }
0x277c   :  { %5418 = vmatpush.msk.msra.mxu0 %vm1559_vm10, %v3279_v45 }
0x27f6   :  { %v3071_v37 = vpop.f32.mrf.mxu0 }
0x27f7   :  { %5408 = vmatmul.msk.f32.vlgmr.msrb.gmra.mxu1 %vm1452_vm7, %v3071_v37 }
0x2874   :  { %v6899_v15 = vpop.f32.mrf.mxu1 }
0x2875   :  { %5409 = vmatpush.msk.msrb.mxu2 %vm1559_vm10, %v6899_v15 }
0x2876   :  { %5410 = vmatmul.msk.f32.vlgmr.msrb.gmra.mxu2 %vm1555_vm11, %v3099_v10 }
0x2877   :  { %5416 = vmatpush.msk.msra.mxu2 %vm1612_vm12, %v3205_v18 }
0x28f9   :  { %v3123_v19 = vpop.f32.mrf.mxu2 }
0x28fa   :  { %5411 = vmatmul.msk.f32.vlgmr.msrb.gmra.mxu0 %vm1505_vm9, %v3123_v19 }
0x2977   :  { %v3147_v21 = vpop.f32.mrf.mxu0 }
0x2978   :  { %5412 = vmatpush.msk.msra.mxu3 %vm1612_vm12, %v3147_v21  ;;  %v3277_v17 = vmul.f32 0.375, %v3147_v21 }
0x2979   :  { %5413 = vmatmul.msk.f32.vlgmr.msra.gmra.mxu3 %vm1608_vm13, %v3150_v62  ;;  %v6935_v62 = vld [vmem:[#allocation14] sm:$0xff] }
0x297a   :  { %3398 = vmatpush.msrb.mxu1 %v6935_v62 }
0x29fc   :  { %v3174_v60 = vpop.f32.mrf.mxu3 }
0x29fd   :  { %5415 = vmatmul.msk.f32.vlgmr.msra.gmra.mxu1 %vm1555_vm11, %v3174_v60 }
0x2a7a   :  { %v3201_v27 = vpop.f32.mrf.mxu1 }
0x2a7b   :  { %v3204_v28 = vmul.f32 0.375, %v3201_v27 }
0x2a7d   :  { %5417 = vmatmul.msk.f32.vlgmr.msra.gmra.mxu2 %vm1608_vm13, %v3204_v28 }
0x2b00   :  { %v3229_v1 = vpop.f32.mrf.mxu2 }
0x2b01   :  { %v3232_v42 = vperm.slane %v3229_v1, 0 }
0x2b03   :  { %3235 = vrot.lane.b32.xlu0 %v3232_v42, %s5712_s6 }
0x2b75   :  { %v3236_v14 = vpop.permute.xlu0 %3235 }
0x2b76   :  { %3238 = vst.msk [vmem:[#allocation2 + $0x1] sm:$0x3] %vm1698_vm14, %v3236_v14 }
0x2b7d   :  { %v3250_v16 = vld [vmem:[#allocation2 + $0x1] sm:$0x3] }
0x2b7e   :  { %v3264_v54 = vld [vmem:[#allocation2 + $0x2] sm:$0x3]  ;;  %v3239_v55 = vld [vmem:[#allocation2] sm:$0x3]  ;;  %v3253_v6 = vmul.f32 -1.0, %v3250_v16  ;;  %v3251_v56 = vmul.f32 0.125, %v3250_v16 }
0x2b7f   :  { %v3240_v0 = vmul.f32 0.125, %v3239_v55  ;;  %3333 = vst.msk [vmem:[#allocation2] sm:$0x3f] %vm7375_vm8, %v7371_v11  ;;  %v3265_v40 = vmul.f32 0.125, %v3264_v54  ;;  %vm7376_vm8 = vcmask 68616  }
0x2b80   :  { %3255 = vrot.lane.b32.xlu0 %v3253_v6, %s5713_s7 }
0x2b81   :  { %3246 = vrot.lane.b32.xlu2 %v3240_v0, %s5714_s13  ;;  %3242 = vrot.lane.b32.xlu1 %v3240_v0, %s5713_s7 }
0x2b88   :  { %3272 = vrot.lane.b32.xlu0 %v3265_v40, %s5714_s13 }
0x2b89   :  { %3268 = vrot.lane.b32.xlu2 %v3265_v40, %s5713_s7  ;;  %3260 = vrot.lane.b32.xlu1 %v3251_v56, %s5714_s13 }
0x2bdb   :  { %v3247_v23 = vpop.permute.xlu2 %3246 }
0x2be3   :  { %v3269_v8 = vpop.permute.xlu2 %3268 }
0x2bf2   :  { %v3256_v59 = vpop.permute.xlu0 %3255 }
0x2bf3   :  { %v3243_v39 = vpop.permute.xlu1 %3242 }
0x2bf4   :  { %v3245_v7 = vadd.f32 %v3243_v39, %v3240_v0  ;;  %v6940_v39 = vld [vmem:[#allocation13] sm:$0xff] }
0x2bf6   :  { %v3249_v29 = vadd.f32 %v3247_v23, %v3245_v7 }
0x2bf8   :  { %v3252_v30 = vadd.f32 %v3251_v56, %v3249_v29 }
0x2bfa   :  { %v3258_v36 = vadd.f32 %v3256_v59, %v3252_v30  ;;  %v3273_v12 = vpop.permute.xlu0 %3272 }
0x2bfb   :  { %v3261_v13 = vpop.permute.xlu1 %3260 }
0x2bfc   :  { %v3263_v50 = vadd.f32 %v3261_v13, %v3258_v36 }
0x2bfe   :  { %v3266_v31 = vadd.f32 %v3265_v40, %v3263_v50  ;;  %v3377_v40 = vmul.f32 0.375, %v6899_v15  ;;  %v6957_v50 = vld [vmem:[#allocation14 + $0x8] sm:$0xff] }
0x2bff   :  { %3496 = vmatpush.msrb.mxu0 %v6957_v50 }
0x2c00   :  { %v3271_v4 = vadd.f32 %v3269_v8, %v3266_v31 }
0x2c01   :  { %3497 = vmatpush.msrb.mxu0 %v6935_v62 }
0x2c02   :  { %v3275_v53 = vadd.f32 %v3273_v12, %v3271_v4 }
0x2c04   :  { %v3276_v9 = vadd.f32 %v3275_v53, %v3232_v42 }
0x2c06   :  { %v3278_v49 = vadd.f32 %v3277_v17, %v3276_v9 }
0x2c08   :  { %5419 = vmatmul.msk.f32.vlgmr.msra.gmra.mxu0 %vm1555_vm11, %v3278_v49 }
0x2c85   :  { %v3303_v33 = vpop.f32.mrf.mxu0 }
0x2c86   :  { %5420 = vmatpush.msk.msrb.mxu3 %vm1612_vm12, %v3303_v33 }
0x2c87   :  { %5421 = vmatmul.msk.f32.vlgmr.msrb.gmra.mxu3 %vm1608_vm13, %v3306_v57 }
0x2d0a   :  { %v3330_v2 = vpop.f32.mrf.mxu3 }
0x2d0b   :  { %3335 = vrot.lane.b32.xlu1 %v3330_v2, %s5712_s6 }
0x2d7d   :  { %v3336_v48 = vpop.permute.xlu1 %3335 }
0x2d7e   :  { %3338 = vst.msk [vmem:[#allocation2 + $0x1] sm:$0xf] %vm7376_vm8, %v3336_v48  ;;  %vm7377_vm8 = vcmask 261120  }
0x2d85   :  { %v3350_v43 = vld [vmem:[#allocation2 + $0x1] sm:$0xf] }
0x2d86   :  { %v3364_v41 = vld [vmem:[#allocation2 + $0x2] sm:$0xf]  ;;  %v3353_v47 = vmul.f32 -1.0, %v3350_v43  ;;  %v3351_v19 = vmul.f32 0.125, %v3350_v43 }
0x2d87   :  { %v3339_v52 = vld [vmem:[#allocation2] sm:$0xf]  ;;  %v3365_v10 = vmul.f32 0.125, %v3364_v41 }
0x2d88   :  { %v3340_v37 = vmul.f32 0.125, %v3339_v52  ;;  %3430 = vst.msk [vmem:[#allocation2] sm:$0xff] %vm1893_vm4, %v7371_v11  ;;  %3355 = vrot.lane.b32.xlu1 %v3353_v47, %s5713_s7  ;;  %v3475_v52 = vmul.f32 0.375, %v6893_v26 }
0x2d8a   :  { %3346 = vrot.lane.b32.xlu0 %v3340_v37, %s5714_s13  ;;  %3342 = vrot.lane.b32.xlu2 %v3340_v37, %s5713_s7 }
0x2d90   :  { %3372 = vrot.lane.b32.xlu1 %v3365_v10, %s5714_s13 }
0x2d92   :  { %3368 = vrot.lane.b32.xlu0 %v3365_v10, %s5713_s7  ;;  %3360 = vrot.lane.b32.xlu2 %v3351_v19, %s5714_s13 }
0x2de4   :  { %v3343_v21 = vpop.permute.xlu2 %3342 }
0x2de5   :  { %v3345_v34 = vadd.f32 %v3343_v21, %v3340_v37 }
0x2dec   :  { %v3361_v42 = vpop.permute.xlu2 %3360 }
0x2dfa   :  { %v3356_v27 = vpop.permute.xlu1 %3355 }
0x2dfc   :  { %v3347_v60 = vpop.permute.xlu0 %3346 }
0x2dfd   :  { %v3349_v18 = vadd.f32 %v3347_v60, %v3345_v34 }
0x2dff   :  { %v3352_v28 = vadd.f32 %v3351_v19, %v3349_v18  ;;  %v6965_v19 = vld [vmem:[#allocation13 + $0x8] sm:$0xff] }
0x2e01   :  { %v3358_v1 = vadd.f32 %v3356_v27, %v3352_v28 }
0x2e02   :  { %v3373_v6 = vpop.permute.xlu1 %3372 }
0x2e03   :  { %v3363_v14 = vadd.f32 %v3361_v42, %v3358_v1 }
0x2e04   :  { %v3369_v54 = vpop.permute.xlu0 %3368 }
0x2e05   :  { %v3366_v16 = vadd.f32 %v3365_v10, %v3363_v14 }
0x2e07   :  { %v3371_v55 = vadd.f32 %v3369_v54, %v3366_v16 }
0x2e09   :  { %v3375_v0 = vadd.f32 %v3373_v6, %v3371_v55 }
0x2e0b   :  { %v3376_v56 = vadd.f32 %v3375_v0, %v3330_v2 }
0x2e0d   :  { %v3378_v45 = vadd.f32 %v3377_v40, %v3376_v56 }
0x2e0f   :  { %5422 = vmatmul.msk.f32.vlgmr.msrb.gmra.mxu1 %vm1505_vm9, %v3378_v45 }
0x2e8c   :  { %v3400_v7 = vpop.f32.mrf.mxu1 }
0x2e8d   :  { %5423 = vmatpush.msk.msrb.mxu2 %vm1559_vm10, %v3400_v7 }
0x2e8e   :  { %5424 = vmatmul.msk.f32.vlgmr.msrb.gmra.mxu2 %vm1555_vm11, %v6940_v39 }
0x2e8f   :  { %3808 = vmatpush.msra.mxu2 %v6872_v20 }
0x2e91   :  { %3809 = vmatpush.msra.mxu2 %v6874_v58 }
0x2e93   :  { %3810 = vmatpush.msra.mxu2 %v6877_v32 }
0x2e95   :  { %3811 = vmatpush.msra.mxu2 %v6888_v51 }
0x2f11   :  { %v3427_v15 = vpop.f32.mrf.mxu2 }
0x2f12   :  { %3433 = vrot.lane.b32.xlu2 %v3427_v15, %s5712_s6 }
0x2f6c   :  { %v3434_v23 = vpop.permute.xlu2 %3433 }
0x2f6d   :  { %3436 = vst.msk [vmem:[#allocation2 + $0x1] sm:$0xff] %vm1901_vm15, %v3434_v23 }
0x2f74   :  { %v3448_v29 = vld [vmem:[#allocation2 + $0x1] sm:$0xff] }
0x2f75   :  { %v3437_v59 = vld [vmem:[#allocation2] sm:$0xff]  ;;  %v3451_v30 = vmul.f32 -1.0, %v3448_v29  ;;  %v3449_v13 = vmul.f32 0.125, %v3448_v29 }
0x2f76   :  { %v3438_v36 = vmul.f32 0.125, %v3437_v59  ;;  %v3462_v20 = vld [vmem:[#allocation2 + $0x2] sm:$0xff] }
0x2f77   :  { %3453 = vrot.lane.b32.xlu2 %v3451_v30, %s5713_s7  ;;  %v3463_v58 = vmul.f32 0.125, %v3462_v20 }
0x2f78   :  { %3444 = vrot.lane.b32.xlu1 %v3438_v36, %s5714_s13  ;;  %3440 = vrot.lane.b32.xlu0 %v3438_v36, %s5713_s7 }
0x2f7f   :  { %3470 = vrot.lane.b32.xlu2 %v3463_v58, %s5714_s13 }
0x2f80   :  { %3466 = vrot.lane.b32.xlu1 %v3463_v58, %s5713_s7  ;;  %3458 = vrot.lane.b32.xlu0 %v3449_v13, %s5714_s13 }
0x2fd1   :  { %v3454_v53 = vpop.permute.xlu2 %3453 }
0x2fd9   :  { %v3471_v43 = vpop.permute.xlu2 %3470 }
0x2fea   :  { %v3441_v31 = vpop.permute.xlu0 %3440  ;;  %v3445_v4 = vpop.permute.xlu1 %3444 }
0x2feb   :  { %v3443_v8 = vadd.f32 %v3441_v31, %v3438_v36 }
0x2fed   :  { %v3447_v12 = vadd.f32 %v3445_v4, %v3443_v8 }
0x2fef   :  { %v3450_v17 = vadd.f32 %v3449_v13, %v3447_v12 }
0x2ff1   :  { %v3456_v9 = vadd.f32 %v3454_v53, %v3450_v17 }
0x2ff2   :  { %v3459_v49 = vpop.permute.xlu0 %3458  ;;  %v3467_v2 = vpop.permute.xlu1 %3466 }
0x2ff3   :  { %v3461_v57 = vadd.f32 %v3459_v49, %v3456_v9 }
0x2ff5   :  { %v3464_v33 = vadd.f32 %v3463_v58, %v3461_v57 }
0x2ff7   :  { %v3469_v48 = vadd.f32 %v3467_v2, %v3464_v33 }
0x2ff9   :  { %v3473_v41 = vadd.f32 %v3471_v43, %v3469_v48 }
0x2ffb   :  { %v3474_v47 = vadd.f32 %v3473_v41, %v3427_v15 }
0x2ffd   :  { %v3476_v37 = vadd.f32 %v3475_v52, %v3474_v47 }
0x2fff   :  { %5425 = vmatmul.msk.f32.vlgmr.msrb.gmra.mxu0 %vm1452_vm7, %v3476_v37 }
0x307c   :  { %v3499_v10 = vpop.f32.mrf.mxu0 }
0x307d   :  { %3525 = vmatpush.msra.mxu3 %v3499_v10 }
0x307e   :  { %5426 = vmatmul.msk.f32.vlgmr.msra.gmra.mxu3 %vm1505_vm9, %v6940_v39 }
0x3086   :  { %5427 = vmatmul.msk.f32.gmra.mxu3 %vm1505_vm9, %v6965_v19 }
0x3101   :  { %v3527_v21 = vpop.f32.mrf.mxu3 }
0x3102   :  { %v6970_v34 = vsub.f32 %v6834_v5, %v3527_v21 }
0x3104   :  { %3537 = vrot.lane.b32.xlu0 %v6970_v34, %s5712_s6 }
0x3109   :  { %v3530_v26 = vpop.f32.mrf.mxu3 }
0x310a   :  { %v6975_v60 = vsub.f32 %v6840_v25, %v3530_v26 }
0x310c   :  { %3539 = vrot.lane.b32.xlu1 %v6975_v60, %s5712_s6 }
0x3176   :  { %v3538_v18 = vpop.permute.xlu0 %3537 }
0x3177   :  { %3543 = vst.msk [vmem:[#allocation2 + $0x1] sm:$0xff] %vm168_vm0, %v3538_v18 }
0x317e   :  { %v3540_v27 = vpop.permute.xlu1 %3539  ;;  %v3545_v28 = vld [vmem:[#allocation2 + $0x1] sm:$0xff] }
0x317f   :  { %3544 = vst.msk [vmem:[#allocation2 + $0x9] sm:$0xff] %vm168_vm0, %v3540_v27  ;;  %3549 = vrot.lane.b32.xlu2 %v3545_v28, %s5713_s7 }
0x3186   :  { %v3546_v5 = vld [vmem:[#allocation2 + $0x9] sm:$0xff] }
0x3187   :  { %3551 = vrot.lane.b32.xlu0 %v3546_v5, %s5713_s7 }
0x31d9   :  { %v3550_v1 = vpop.permute.xlu2 %3549 }
0x31da   :  { %3555 = vst.msk [vmem:[#allocation2 + $0x1] sm:$0xff] %vm181_vm1, %v3550_v1 }
0x31e1   :  { %v3557_v25 = vld [vmem:[#allocation2 + $0x1] sm:$0xff] }
0x31e2   :  { %3561 = vrot.lane.b32.xlu1 %v3557_v25, %s5712_s6 }
0x31f9   :  { %v3552_v42 = vpop.permute.xlu0 %3551 }
0x31fa   :  { %3556 = vst.msk [vmem:[#allocation2 + $0x9] sm:$0xff] %vm181_vm1, %v3552_v42 }
0x3201   :  { %v3558_v14 = vld [vmem:[#allocation2 + $0x9] sm:$0xff] }
0x3202   :  { %3563 = vrot.lane.b32.xlu2 %v3558_v14, %s5712_s6 }
0x3254   :  { %v3562_v16 = vpop.permute.xlu1 %3561 }
0x3255   :  { %3567 = vst.msk [vmem:[#allocation2 + $0x1] sm:$0xff] %vm194_vm2, %v3562_v16 }
0x325c   :  { %v3564_v54 = vpop.permute.xlu2 %3563  ;;  %v3595_v55 = vld [vmem:[#allocation2 + $0x1] sm:$0xff] }
0x325d   :  { %v3569_v6 = vld [vmem:[#allocation2 + $0x1] sm:$0x1]  ;;  %3568 = vst.msk [vmem:[#allocation2 + $0x9] sm:$0xff] %vm194_vm2, %v3564_v54  ;;  %v3601_v0 = vmul.f32 -1.0, %v3595_v55  ;;  %v3597_v40 = vmul.f32 0.125, %v3595_v55 }
0x325e   :  { %3570 = vst.msk [vmem:[#allocation2] sm:$0x1] %vm198_vm3, %v3569_v6 }
0x325f   :  { %3605 = vrot.lane.b32.xlu0 %v3601_v0, %s5713_s7  ;;  %3615 = vrot.lane.b32.xlu2 %v3597_v40, %s5714_s13 }
0x3264   :  { %v3574_v56 = vld [vmem:[#allocation2 + $0x8] sm:$0xff]  ;;  %v3571_v15 = vld [vmem:[#allocation2 + $0x10] sm:$0x1] }
0x3265   :  { %v3576_v45 = vmul.f32 0.125, %v3574_v56  ;;  %v3573_v7 = vld [vmem:[#allocation2] sm:$0xff]  ;;  %3572 = vst.msk [vmem:[#allocation2 + $0x11] sm:$0x1] %vm198_vm3, %v3571_v15  ;;  %v3596_v29 = vld [vmem:[#allocation2 + $0x9] sm:$0xff] }
0x3266   :  { %v3575_v23 = vmul.f32 0.125, %v3573_v7  ;;  %v3598_v59 = vmul.f32 0.125, %v3596_v29  ;;  %v3602_v30 = vmul.f32 -1.0, %v3596_v29  ;;  %v3623_v20 = vld [vmem:[#allocation2 + $0x2] sm:$0xff] }
0x3267   :  { %3581 = vrot.lane.b32.xlu2 %v3576_v45, %s5713_s7  ;;  %v3625_v13 = vmul.f32 0.125, %v3623_v20 }
0x3268   :  { %3587 = vrot.lane.b32.xlu1 %v3575_v23, %s5714_s13  ;;  %3579 = vrot.lane.b32.xlu0 %v3575_v23, %s5713_s7 }
0x326c   :  { %v3624_v36 = vld [vmem:[#allocation2 + $0xa] sm:$0xff] }
0x326d   :  { %v3626_v58 = vmul.f32 0.125, %v3624_v36 }
0x326f   :  { %3617 = vrot.lane.b32.xlu2 %v3598_v59, %s5714_s13 }
0x3270   :  { %3589 = vrot.lane.b32.xlu1 %v3576_v45, %s5714_s13  ;;  %3607 = vrot.lane.b32.xlu0 %v3602_v30, %s5713_s7 }
0x3277   :  { %3641 = vrot.lane.b32.xlu2 %v3626_v58, %s5714_s13 }
0x3278   :  { %3631 = vrot.lane.b32.xlu1 %v3625_v13, %s5713_s7  ;;  %3639 = vrot.lane.b32.xlu0 %v3625_v13, %s5714_s13 }
0x3280   :  { %3633 = vrot.lane.b32.xlu1 %v3626_v58, %s5713_s7 }
0x32b9   :  { %v3616_v8 = vpop.permute.xlu2 %3615 }
0x32c1   :  { %v3582_v9 = vpop.permute.xlu2 %3581 }
0x32c2   :  { %v3586_v57 = vadd.f32 %v3582_v9, %v3576_v45 }
0x32c9   :  { %v3618_v10 = vpop.permute.xlu2 %3617 }
0x32d1   :  { %v3606_v31 = vpop.permute.xlu0 %3605  ;;  %v3642_v16 = vpop.permute.xlu2 %3641 }
0x32da   :  { %v3588_v4 = vpop.permute.xlu1 %3587  ;;  %v3580_v12 = vpop.permute.xlu0 %3579 }
0x32db   :  { %v3585_v53 = vadd.f32 %v3580_v12, %v3575_v23 }
0x32dd   :  { %v3593_v17 = vadd.f32 %v3588_v4, %v3585_v53 }
0x32df   :  { %v3599_v49 = vadd.f32 %v3597_v40, %v3593_v17 }
0x32e1   :  { %v3611_v33 = vadd.f32 %v3606_v31, %v3599_v49 }
0x32e2   :  { %v3590_v2 = vpop.permute.xlu1 %3589  ;;  %v3608_v48 = vpop.permute.xlu0 %3607 }
0x32e3   :  { %v3594_v43 = vadd.f32 %v3590_v2, %v3586_v57  ;;  %v3621_v52 = vadd.f32 %v3616_v8, %v3611_v33 }
0x32e5   :  { %v3600_v41 = vadd.f32 %v3598_v59, %v3594_v43  ;;  %v3627_v37 = vadd.f32 %v3625_v13, %v3621_v52 }
0x32e7   :  { %v3612_v47 = vadd.f32 %v3608_v48, %v3600_v41 }
0x32e9   :  { %v3622_v27 = vadd.f32 %v3618_v10, %v3612_v47 }
0x32ea   :  { %v3632_v21 = vpop.permute.xlu1 %3631  ;;  %v3640_v18 = vpop.permute.xlu0 %3639 }
0x32eb   :  { %v3637_v26 = vadd.f32 %v3632_v21, %v3627_v37  ;;  %v3628_v25 = vadd.f32 %v3626_v58, %v3622_v27 }
0x32ed   :  { %v3645_v28 = vadd.f32 %v3640_v18, %v3637_v26 }
0x32ef   :  { %v3647_v5 = vadd.f32 %v3645_v28, %v6970_v34 }
0x32f1   :  { %v7005_v1 = vadd.f32 %v3647_v5, %v6682_v63 }
0x32f2   :  { %v3634_v42 = vpop.permute.xlu1 %3633 }
0x32f3   :  { %v3638_v14 = vadd.f32 %v3634_v42, %v3628_v25  ;;  %3653 = vrot.lane.b32.xlu0 %v7005_v1, %s5712_s6 }
0x32f5   :  { %v3646_v54 = vadd.f32 %v3642_v16, %v3638_v14 }
0x32f7   :  { %v3648_v55 = vadd.f32 %v3646_v54, %v6975_v60 }
0x32f9   :  { %v7011_v6 = vadd.f32 %v3648_v55, %v6692_v38 }
0x32fb   :  { %3655 = vrot.lane.b32.xlu1 %v7011_v6, %s5712_s6 }
0x3365   :  { %v3654_v34 = vpop.permute.xlu0 %3653 }
0x3366   :  { %3659 = vst.msk [vmem:[#allocation2 + $0x1] sm:$0xff] %vm168_vm0, %v3654_v34 }
0x336d   :  { %v3656_v0 = vpop.permute.xlu1 %3655  ;;  %v3661_v40 = vld [vmem:[#allocation2 + $0x1] sm:$0xff] }
0x336e   :  { %3660 = vst.msk [vmem:[#allocation2 + $0x9] sm:$0xff] %vm168_vm0, %v3656_v0  ;;  %3665 = vrot.lane.b32.xlu2 %v3661_v40, %s5713_s7 }
0x3375   :  { %v3662_v56 = vld [vmem:[#allocation2 + $0x9] sm:$0xff] }
0x3376   :  { %3667 = vrot.lane.b32.xlu0 %v3662_v56, %s5713_s7 }
0x33c8   :  { %v3666_v45 = vpop.permute.xlu2 %3665 }
0x33c9   :  { %3671 = vst.msk [vmem:[#allocation2 + $0x1] sm:$0xff] %vm181_vm1, %v3666_v45 }
0x33d0   :  { %v3673_v60 = vld [vmem:[#allocation2 + $0x1] sm:$0xff] }
0x33d1   :  { %3677 = vrot.lane.b32.xlu1 %v3673_v60, %s5712_s6 }
0x33e8   :  { %v3668_v7 = vpop.permute.xlu0 %3667 }
0x33e9   :  { %3672 = vst.msk [vmem:[#allocation2 + $0x9] sm:$0xff] %vm181_vm1, %v3668_v7 }
0x33f0   :  { %v3674_v15 = vld [vmem:[#allocation2 + $0x9] sm:$0xff] }
0x33f1   :  { %3679 = vrot.lane.b32.xlu2 %v3674_v15, %s5712_s6 }
0x3443   :  { %v3678_v23 = vpop.permute.xlu1 %3677 }
0x3444   :  { %3683 = vst.msk [vmem:[#allocation2 + $0x1] sm:$0xff] %vm194_vm2, %v3678_v23 }
0x344b   :  { %v3680_v29 = vpop.permute.xlu2 %3679  ;;  %v3685_v59 = vld [vmem:[#allocation2 + $0x1] sm:$0x1] }
0x344c   :  { %3684 = vst.msk [vmem:[#allocation2 + $0x9] sm:$0xff] %vm194_vm2, %v3680_v29  ;;  %v3711_v20 = vld [vmem:[#allocation2 + $0x1] sm:$0xff] }
0x344d   :  { %3686 = vst.msk [vmem:[#allocation2] sm:$0x1] %vm198_vm3, %v3685_v59  ;;  %v3717_v53 = vmul.f32 2.6666667, %v3711_v20  ;;  %v3713_v9 = vmul.f32 -0.33333334, %v3711_v20 }
0x3453   :  { %v3712_v30 = vld [vmem:[#allocation2 + $0x9] sm:$0xff] }
0x3454   :  { %v3687_v36 = vld [vmem:[#allocation2 + $0x10] sm:$0x1]  ;;  %v3718_v58 = vmul.f32 2.6666667, %v3712_v30  ;;  %v3739_v13 = vld [vmem:[#allocation2 + $0x2] sm:$0xff] }
0x3455   :  { %3688 = vst.msk [vmem:[#allocation2 + $0x11] sm:$0x1] %vm198_vm3, %v3687_v36  ;;  %v3690_v31 = vld [vmem:[#allocation2 + $0x8] sm:$0xff]  ;;  %v3689_v4 = vld [vmem:[#allocation2] sm:$0xff]  ;;  %v3714_v49 = vmul.f32 -0.33333334, %v3712_v30 }
0x3456   :  { %v3692_v8 = vmul.f32 -0.33333334, %v3690_v31  ;;  %4197 = vst.msk [vmem:[#allocation2 + $0x8] sm:$0x3] %vm1895_vm6, %v7371_v11  ;;  %3723 = vrot.lane.b32.xlu1 %v3718_v58, %s5713_s7  ;;  %v3691_v12 = vmul.f32 -0.33333334, %v3689_v4 }
0x3457   :  { %3999 = vst.msk [vmem:[#allocation2] sm:$0xf] %vm1692_vm5, %v7371_v11  ;;  %v3741_v33 = vmul.f32 -0.33333334, %v3739_v13  ;;  %v3816_v30 = vld [vmem:[#allocation10] sm:$0xf] }
0x3458   :  { %3705 = vrot.lane.b32.xlu2 %v3692_v8, %s5714_s13  ;;  %3697 = vrot.lane.b32.xlu0 %v3692_v8, %s5713_s7  ;;  %v3916_v13 = vld [vmem:[#allocation10] sm:$0x1]  ;;  %v3971_v4 = vld [vmem:[#allocation14] sm:$0x3] }
0x345c   :  { %v3740_v17 = vld [vmem:[#allocation2 + $0xa] sm:$0xff] }
0x345d   :  { %v3742_v57 = vmul.f32 -0.33333334, %v3740_v17 }
0x345e   :  { %3695 = vrot.lane.b32.xlu1 %v3691_v12, %s5713_s7 }
0x3460   :  { %3721 = vrot.lane.b32.xlu2 %v3717_v53, %s5713_s7  ;;  %3703 = vrot.lane.b32.xlu0 %v3691_v12, %s5714_s13 }
0x3466   :  { %3731 = vrot.lane.b32.xlu1 %v3713_v9, %s5714_s13 }
0x3468   :  { %3733 = vrot.lane.b32.xlu0 %v3714_v49, %s5714_s13  ;;  %3749 = vrot.lane.b32.xlu2 %v3742_v57, %s5713_s7 }
0x346e   :  { %3757 = vrot.lane.b32.xlu1 %v3742_v57, %s5714_s13 }
0x3470   :  { %3747 = vrot.lane.b32.xlu0 %v3741_v33, %s5713_s7  ;;  %3755 = vrot.lane.b32.xlu2 %v3741_v33, %s5714_s13 }
0x34b2   :  { %v3706_v2 = vpop.permute.xlu2 %3705 }
0x34ba   :  { %v3722_v52 = vpop.permute.xlu2 %3721 }
0x34c2   :  { %v3750_v42 = vpop.permute.xlu2 %3749 }
0x34c8   :  { %v3724_v48 = vpop.permute.xlu1 %3723 }
0x34ca   :  { %v3698_v43 = vpop.permute.xlu0 %3697  ;;  %v3756_v7 = vpop.permute.xlu2 %3755 }
0x34cb   :  { %v3702_v41 = vadd.f32 %v3698_v43, %v3692_v8 }
0x34cd   :  { %v3710_v47 = vadd.f32 %v3706_v2, %v3702_v41 }
0x34cf   :  { %v3716_v18 = vadd.f32 %v3714_v49, %v3710_v47  ;;  %v4045_v47 = vld [vmem:[#allocation14] sm:$0xf] }
0x34d0   :  { %v3696_v37 = vpop.permute.xlu1 %3695 }
0x34d1   :  { %v3701_v10 = vadd.f32 %v3696_v37, %v3691_v12  ;;  %v3728_v25 = vadd.f32 %v3724_v48, %v3716_v18 }
0x34d2   :  { %v3704_v21 = vpop.permute.xlu0 %3703 }
0x34d3   :  { %v3709_v26 = vadd.f32 %v3704_v21, %v3701_v10 }
0x34d5   :  { %v3715_v27 = vadd.f32 %v3713_v9, %v3709_v26 }
0x34d7   :  { %v3727_v5 = vadd.f32 %v3722_v52, %v3715_v27 }
0x34d8   :  { %v3732_v28 = vpop.permute.xlu1 %3731 }
0x34d9   :  { %v3737_v54 = vadd.f32 %v3732_v28, %v3727_v5 }
0x34da   :  { %v3734_v14 = vpop.permute.xlu0 %3733 }
0x34db   :  { %v3738_v16 = vadd.f32 %v3734_v14, %v3728_v25  ;;  %v3743_v0 = vadd.f32 %v3741_v33, %v3737_v54 }
0x34dd   :  { %v3744_v55 = vadd.f32 %v3742_v57, %v3738_v16 }
0x34df   :  { %v3754_v34 = vadd.f32 %v3750_v42, %v3744_v55 }
0x34e0   :  { %v3758_v40 = vpop.permute.xlu1 %3757 }
0x34e1   :  { %v3762_v45 = vadd.f32 %v3758_v40, %v3754_v34 }
0x34e2   :  { %v3748_v56 = vpop.permute.xlu0 %3747 }
0x34e3   :  { %v3753_v60 = vadd.f32 %v3748_v56, %v3743_v0  ;;  %v3764_v15 = vsub.f32 %v3762_v45, %v6557_v35 }
0x34e5   :  { %v3761_v23 = vadd.f32 %v3756_v7, %v3753_v60  ;;  %3783 = vmatpush.msra.mxu1 %v3764_v15 }
0x34e7   :  { %v3763_v29 = vsub.f32 %v3761_v23, %v6559_v3 }
0x34e9   :  { %3784 = vmatpush.msra.mxu1 %v3763_v29 }
0x34ea   :  { %5428 = vmatmul.msk.f32.vlgmr.msra.gmra.mxu1 %vm1452_vm7, %v6883_v46  ;;  %v3865_v46 = vld [vmem:[#allocation10] sm:$0x3] }
0x34eb   :  { %3859 = vmatpush.msrb.mxu1 %v6877_v32 }
0x34ed   :  { %3860 = vmatpush.msrb.mxu1 %v6888_v51 }
0x3567   :  { %v3786_v59 = vpop.f32.mrf.mxu1 }
0x3568   :  { %5429 = vmatmul.msk.f32.vlgmr.msra.gmra.mxu2 %vm7377_vm8, %v3786_v59  ;;  %vm7378_vm8 = vcmask 78848  }
0x35eb   :  { %v7050_v36 = vpop.f32.mrf.mxu2 }
0x35ec   :  { %3835 = vmatpush.msra.mxu0 %v7050_v36 }
0x35ed   :  { %5430 = vmatmul.msk.f32.vlgmr.msra.gmra.mxu0 %vm1505_vm9, %v3816_v30 }
0x35ee   :  { %3911 = vmatpush.msrb.mxu0 %v6888_v51  ;;  %v3943_v51 = vld [vmem:[#allocation11] sm:$0xf] }
0x35ef   :  { %5437 = vmatpush.msk.msra.mxu1 %vm1559_vm10, %v3943_v51 }
0x35f0   :  { %5441 = vmatpush.msk.msra.mxu0 %vm1559_vm10, %v4045_v47 }
0x366a   :  { %v3837_v20 = vpop.f32.mrf.mxu0 }
0x366b   :  { %5431 = vmatmul.msk.f32.vlgmr.msrb.gmra.mxu1 %vm1452_vm7, %v3837_v20 }
0x366c   :  { %4164 = vmatpush.msrb.mxu1 %v6935_v62 }
0x36e8   :  { %v7056_v58 = vpop.f32.mrf.mxu1 }
0x36e9   :  { %5432 = vmatpush.msk.msrb.mxu2 %vm1559_vm10, %v7056_v58 }
0x36ea   :  { %5433 = vmatmul.msk.f32.vlgmr.msrb.gmra.mxu2 %vm1555_vm11, %v3865_v46 }
0x36eb   :  { %5439 = vmatpush.msk.msra.mxu2 %vm1612_vm12, %v3971_v4 }
0x376d   :  { %v3889_v32 = vpop.f32.mrf.mxu2 }
0x376e   :  { %5434 = vmatmul.msk.f32.vlgmr.msrb.gmra.mxu0 %vm1505_vm9, %v3889_v32 }
0x376f   :  { %4262 = vmatpush.msrb.mxu0 %v6957_v50 }
0x3771   :  { %4263 = vmatpush.msrb.mxu0 %v6935_v62  ;;  %v4072_v62 = vld [vmem:[#allocation13] sm:$0xf] }
0x37eb   :  { %v3913_v31 = vpop.f32.mrf.mxu0 }
0x37ec   :  { %5435 = vmatpush.msk.msrb.mxu3 %vm1612_vm12, %v3913_v31  ;;  %v4043_v34 = vmul.f32 0.375, %v3913_v31 }
0x37ed   :  { %5436 = vmatmul.msk.f32.vlgmr.msrb.gmra.mxu3 %vm1608_vm13, %v3916_v13 }
0x3870   :  { %v3940_v8 = vpop.f32.mrf.mxu3 }
0x3871   :  { %5438 = vmatmul.msk.f32.vlgmr.msra.gmra.mxu1 %vm1555_vm11, %v3940_v8 }
0x38ee   :  { %v3967_v12 = vpop.f32.mrf.mxu1 }
0x38ef   :  { %v3970_v53 = vmul.f32 0.375, %v3967_v12 }
0x38f1   :  { %5440 = vmatmul.msk.f32.vlgmr.msra.gmra.mxu2 %vm1608_vm13, %v3970_v53 }
0x3974   :  { %v3995_v17 = vpop.f32.mrf.mxu2 }
0x3975   :  { %v3998_v9 = vperm.slane %v3995_v17, 0 }
0x3977   :  { %4001 = vrot.lane.b32.xlu0 %v3998_v9, %s5712_s6 }
0x39e9   :  { %v4002_v49 = vpop.permute.xlu0 %4001 }
0x39ea   :  { %4004 = vst.msk [vmem:[#allocation2 + $0x1] sm:$0x3] %vm1698_vm14, %v4002_v49 }
0x39f1   :  { %v4016_v57 = vld [vmem:[#allocation2 + $0x1] sm:$0x3] }
0x39f2   :  { %v4030_v33 = vld [vmem:[#allocation2 + $0x2] sm:$0x3]  ;;  %v4005_v2 = vld [vmem:[#allocation2] sm:$0x3]  ;;  %v4019_v48 = vmul.f32 -1.0, %v4016_v57  ;;  %v4017_v52 = vmul.f32 0.125, %v4016_v57 }
0x39f3   :  { %v4006_v43 = vmul.f32 0.125, %v4005_v2  ;;  %4099 = vst.msk [vmem:[#allocation2] sm:$0x3f] %vm7378_vm8, %v7371_v11  ;;  %v4031_v41 = vmul.f32 0.125, %v4030_v33  ;;  %vm7379_vm8 = vcmask 68616   ;;  %v4143_v33 = vmul.f32 0.375, %v7056_v58 }
0x39f4   :  { %4021 = vrot.lane.b32.xlu0 %v4019_v48, %s5713_s7 }
0x39f5   :  { %4012 = vrot.lane.b32.xlu2 %v4006_v43, %s5714_s13  ;;  %4008 = vrot.lane.b32.xlu1 %v4006_v43, %s5713_s7 }
0x39fc   :  { %4038 = vrot.lane.b32.xlu0 %v4031_v41, %s5714_s13 }
0x39fd   :  { %4034 = vrot.lane.b32.xlu2 %v4031_v41, %s5713_s7  ;;  %4026 = vrot.lane.b32.xlu1 %v4017_v52, %s5714_s13 }
0x3a4f   :  { %v4013_v21 = vpop.permute.xlu2 %4012 }
0x3a57   :  { %v4035_v14 = vpop.permute.xlu2 %4034 }
0x3a66   :  { %v4022_v18 = vpop.permute.xlu0 %4021 }
0x3a67   :  { %v4009_v37 = vpop.permute.xlu1 %4008 }
0x3a68   :  { %v4011_v10 = vadd.f32 %v4009_v37, %v4006_v43 }
0x3a6a   :  { %v4015_v26 = vadd.f32 %v4013_v21, %v4011_v10 }
0x3a6c   :  { %v4018_v27 = vadd.f32 %v4017_v52, %v4015_v26 }
0x3a6e   :  { %v4024_v28 = vadd.f32 %v4022_v18, %v4018_v27  ;;  %v4039_v54 = vpop.permute.xlu0 %4038 }
0x3a6f   :  { %v4027_v5 = vpop.permute.xlu1 %4026 }
0x3a70   :  { %v4029_v25 = vadd.f32 %v4027_v5, %v4024_v28 }
0x3a72   :  { %v4032_v42 = vadd.f32 %v4031_v41, %v4029_v25 }
0x3a74   :  { %v4037_v16 = vadd.f32 %v4035_v14, %v4032_v42 }
0x3a76   :  { %v4041_v55 = vadd.f32 %v4039_v54, %v4037_v16 }
0x3a78   :  { %v4042_v0 = vadd.f32 %v4041_v55, %v3998_v9 }
0x3a7a   :  { %v4044_v40 = vadd.f32 %v4043_v34, %v4042_v0 }
0x3a7c   :  { %5442 = vmatmul.msk.f32.vlgmr.msra.gmra.mxu0 %vm1555_vm11, %v4044_v40 }
0x3af9   :  { %v4069_v50 = vpop.f32.mrf.mxu0 }
0x3afa   :  { %5443 = vmatpush.msk.msra.mxu3 %vm1612_vm12, %v4069_v50 }
0x3afb   :  { %5444 = vmatmul.msk.f32.vlgmr.msra.gmra.mxu3 %vm1608_vm13, %v4072_v62 }
0x3b7e   :  { %v4096_v56 = vpop.f32.mrf.mxu3 }
0x3b7f   :  { %4101 = vrot.lane.b32.xlu1 %v4096_v56, %s5712_s6 }
0x3bf1   :  { %v4102_v45 = vpop.permute.xlu1 %4101 }
0x3bf2   :  { %4104 = vst.msk [vmem:[#allocation2 + $0x1] sm:$0xf] %vm7379_vm8, %v4102_v45 }
0x3bf9   :  { %v4116_v60 = vld [vmem:[#allocation2 + $0x1] sm:$0xf] }
0x3bfa   :  { %v4130_v7 = vld [vmem:[#allocation2 + $0x2] sm:$0xf]  ;;  %v4119_v23 = vmul.f32 -1.0, %v4116_v60  ;;  %v4117_v30 = vmul.f32 0.125, %v4116_v60 }
0x3bfb   :  { %v4105_v15 = vld [vmem:[#allocation2] sm:$0xf]  ;;  %v4131_v59 = vmul.f32 0.125, %v4130_v7 }
0x3bfc   :  { %v4106_v29 = vmul.f32 0.125, %v4105_v15  ;;  %4196 = vst.msk [vmem:[#allocation2] sm:$0xff] %vm1893_vm4, %v7371_v11  ;;  %4121 = vrot.lane.b32.xlu1 %v4119_v23, %s5713_s7 }
0x3bfe   :  { %4112 = vrot.lane.b32.xlu0 %v4106_v29, %s5714_s13  ;;  %4108 = vrot.lane.b32.xlu2 %v4106_v29, %s5713_s7 }
0x3c04   :  { %4138 = vrot.lane.b32.xlu1 %v4131_v59, %s5714_s13 }
0x3c06   :  { %4134 = vrot.lane.b32.xlu0 %v4131_v59, %s5713_s7  ;;  %4126 = vrot.lane.b32.xlu2 %v4117_v30, %s5714_s13 }
0x3c58   :  { %v4109_v20 = vpop.permute.xlu2 %4108 }
0x3c59   :  { %v4111_v46 = vadd.f32 %v4109_v20, %v4106_v29 }
0x3c60   :  { %v4127_v4 = vpop.permute.xlu2 %4126 }
0x3c6e   :  { %v4122_v31 = vpop.permute.xlu1 %4121 }
0x3c70   :  { %v4113_v32 = vpop.permute.xlu0 %4112 }
0x3c71   :  { %v4115_v13 = vadd.f32 %v4113_v32, %v4111_v46 }
0x3c73   :  { %v4118_v51 = vadd.f32 %v4117_v30, %v4115_v13 }
0x3c75   :  { %v4124_v8 = vadd.f32 %v4122_v31, %v4118_v51 }
0x3c76   :  { %v4139_v49 = vpop.permute.xlu1 %4138 }
0x3c77   :  { %v4129_v12 = vadd.f32 %v4127_v4, %v4124_v8 }
0x3c78   :  { %v4135_v17 = vpop.permute.xlu0 %4134 }
0x3c79   :  { %v4132_v53 = vadd.f32 %v4131_v59, %v4129_v12 }
0x3c7b   :  { %v4137_v9 = vadd.f32 %v4135_v17, %v4132_v53 }
0x3c7d   :  { %v4141_v57 = vadd.f32 %v4139_v49, %v4137_v9 }
0x3c7f   :  { %v4142_v2 = vadd.f32 %v4141_v57, %v4096_v56  ;;  %v4241_v56 = vmul.f32 0.375, %v7050_v36 }
0x3c81   :  { %v4144_v48 = vadd.f32 %v4143_v33, %v4142_v2 }
0x3c83   :  { %5445 = vmatmul.msk.f32.vlgmr.msrb.gmra.mxu1 %vm1505_vm9, %v4144_v48 }
0x3d00   :  { %v4166_v43 = vpop.f32.mrf.mxu1 }
0x3d01   :  { %5446 = vmatpush.msk.msrb.mxu2 %vm1559_vm10, %v4166_v43 }
0x3d02   :  { %5447 = vmatmul.msk.f32.vlgmr.msrb.gmra.mxu2 %vm1555_vm11, %v6940_v39 }
0x3d85   :  { %v4193_v41 = vpop.f32.mrf.mxu2 }
0x3d86   :  { %4199 = vrot.lane.b32.xlu2 %v4193_v41, %s5712_s6 }
0x3de0   :  { %v4200_v52 = vpop.permute.xlu2 %4199 }
0x3de1   :  { %4202 = vst.msk [vmem:[#allocation2 + $0x1] sm:$0xff] %vm1901_vm15, %v4200_v52 }
0x3de8   :  { %v4214_v47 = vld [vmem:[#allocation2 + $0x1] sm:$0xff] }
0x3de9   :  { %v4203_v37 = vld [vmem:[#allocation2] sm:$0xff]  ;;  %v4217_v10 = vmul.f32 -1.0, %v4214_v47  ;;  %v4215_v18 = vmul.f32 0.125, %v4214_v47 }
0x3dea   :  { %v4204_v58 = vmul.f32 0.125, %v4203_v37  ;;  %v4228_v21 = vld [vmem:[#allocation2 + $0x2] sm:$0xff] }
0x3deb   :  { %4219 = vrot.lane.b32.xlu2 %v4217_v10, %s5713_s7  ;;  %v4229_v26 = vmul.f32 0.125, %v4228_v21 }
0x3dec   :  { %4210 = vrot.lane.b32.xlu1 %v4204_v58, %s5714_s13  ;;  %4206 = vrot.lane.b32.xlu0 %v4204_v58, %s5713_s7 }
0x3df3   :  { %4236 = vrot.lane.b32.xlu2 %v4229_v26, %s5714_s13 }
0x3df4   :  { %4232 = vrot.lane.b32.xlu1 %v4229_v26, %s5713_s7  ;;  %4224 = vrot.lane.b32.xlu0 %v4215_v18, %s5714_s13 }
0x3e45   :  { %v4220_v42 = vpop.permute.xlu2 %4219 }
0x3e4d   :  { %v4237_v62 = vpop.permute.xlu2 %4236 }
0x3e5e   :  { %v4207_v27 = vpop.permute.xlu0 %4206  ;;  %v4211_v5 = vpop.permute.xlu1 %4210 }
0x3e5f   :  { %v4209_v28 = vadd.f32 %v4207_v27, %v4204_v58 }
0x3e61   :  { %v4213_v25 = vadd.f32 %v4211_v5, %v4209_v28 }
0x3e63   :  { %v4216_v14 = vadd.f32 %v4215_v18, %v4213_v25 }
0x3e65   :  { %v4222_v16 = vadd.f32 %v4220_v42, %v4216_v14 }
0x3e66   :  { %v4225_v54 = vpop.permute.xlu0 %4224  ;;  %v4233_v0 = vpop.permute.xlu1 %4232 }
0x3e67   :  { %v4227_v55 = vadd.f32 %v4225_v54, %v4222_v16 }
0x3e69   :  { %v4230_v34 = vadd.f32 %v4229_v26, %v4227_v55 }
0x3e6b   :  { %v4235_v40 = vadd.f32 %v4233_v0, %v4230_v34 }
0x3e6d   :  { %v4239_v50 = vadd.f32 %v4237_v62, %v4235_v40 }
0x3e6f   :  { %v4240_v45 = vadd.f32 %v4239_v50, %v4193_v41 }
0x3e71   :  { %v4242_v60 = vadd.f32 %v4241_v56, %v4240_v45 }
0x3e73   :  { %5448 = vmatmul.msk.f32.vlgmr.msrb.gmra.mxu0 %vm1452_vm7, %v4242_v60 }
0x3ef0   :  { %v4265_v7 = vpop.f32.mrf.mxu0 }
0x3ef1   :  { %4291 = vmatpush.msrb.mxu3 %v4265_v7 }
0x3ef2   :  { %5449 = vmatmul.msk.f32.vlgmr.msrb.gmra.mxu3 %vm1505_vm9, %v6940_v39 }
0x3efa   :  { %5450 = vmatmul.msk.f32.gmra.mxu3 %vm1505_vm9, %v6965_v19 }
0x3f75   :  { %v4293_v15 = vpop.f32.mrf.mxu3 }
0x3f76   :  { %v7115_v23 = vsub.f32 %v7005_v1, %v4293_v15 }
0x3f78   :  { %4303 = vrot.lane.b32.xlu0 %v7115_v23, %s5712_s6 }
0x3f7d   :  { %v4296_v36 = vpop.f32.mrf.mxu3 }
0x3f7e   :  { %v7120_v29 = vsub.f32 %v7011_v6, %v4296_v36 }
0x3f80   :  { %4305 = vrot.lane.b32.xlu1 %v7120_v29, %s5712_s6 }
0x3fea   :  { %v4304_v59 = vpop.permute.xlu0 %4303 }
0x3feb   :  { %4309 = vst.msk [vmem:[#allocation2 + $0x1] sm:$0xff] %vm168_vm0, %v4304_v59 }
0x3ff2   :  { %v4306_v39 = vpop.permute.xlu1 %4305  ;;  %v4311_v30 = vld [vmem:[#allocation2 + $0x1] sm:$0xff] }
0x3ff3   :  { %4310 = vst.msk [vmem:[#allocation2 + $0x9] sm:$0xff] %vm168_vm0, %v4306_v39  ;;  %4315 = vrot.lane.b32.xlu2 %v4311_v30, %s5713_s7 }
0x3ffa   :  { %v4312_v19 = vld [vmem:[#allocation2 + $0x9] sm:$0xff] }
0x3ffb   :  { %4317 = vrot.lane.b32.xlu0 %v4312_v19, %s5713_s7 }
0x404d   :  { %v4316_v1 = vpop.permute.xlu2 %4315 }
0x404e   :  { %4321 = vst.msk [vmem:[#allocation2 + $0x1] sm:$0xff] %vm181_vm1, %v4316_v1 }
0x4055   :  { %v4323_v6 = vld [vmem:[#allocation2 + $0x1] sm:$0xff] }
0x4056   :  { %4327 = vrot.lane.b32.xlu1 %v4323_v6, %s5712_s6 }
0x406d   :  { %v4318_v20 = vpop.permute.xlu0 %4317 }
0x406e   :  { %4322 = vst.msk [vmem:[#allocation2 + $0x9] sm:$0xff] %vm181_vm1, %v4318_v20 }
0x4075   :  { %v4324_v46 = vld [vmem:[#allocation2 + $0x9] sm:$0xff] }
0x4076   :  { %4329 = vrot.lane.b32.xlu2 %v4324_v46, %s5712_s6 }
0x40c8   :  { %v4328_v32 = vpop.permute.xlu1 %4327 }
0x40c9   :  { %4333 = vst.msk [vmem:[#allocation2 + $0x1] sm:$0xff] %vm194_vm2, %v4328_v32 }
0x40d0   :  { %v4330_v13 = vpop.permute.xlu2 %4329  ;;  %v4361_v31 = vld [vmem:[#allocation2 + $0x1] sm:$0xff] }
0x40d1   :  { %v4335_v51 = vld [vmem:[#allocation2 + $0x1] sm:$0x1]  ;;  %4334 = vst.msk [vmem:[#allocation2 + $0x9] sm:$0xff] %vm194_vm2, %v4330_v13  ;;  %v4367_v8 = vmul.f32 -1.0, %v4361_v31  ;;  %v4363_v4 = vmul.f32 0.125, %v4361_v31 }
0x40d2   :  { %4336 = vst.msk [vmem:[#allocation2] sm:$0x1] %vm198_vm3, %v4335_v51 }
0x40d3   :  { %4371 = vrot.lane.b32.xlu0 %v4367_v8, %s5713_s7  ;;  %4381 = vrot.lane.b32.xlu2 %v4363_v4, %s5714_s13 }
0x40d8   :  { %v4340_v12 = vld [vmem:[#allocation2 + $0x8] sm:$0xff]  ;;  %v4337_v9 = vld [vmem:[#allocation2 + $0x10] sm:$0x1] }
0x40d9   :  { %v4342_v53 = vmul.f32 0.125, %v4340_v12  ;;  %v4339_v17 = vld [vmem:[#allocation2] sm:$0xff]  ;;  %4338 = vst.msk [vmem:[#allocation2 + $0x11] sm:$0x1] %vm198_vm3, %v4337_v9  ;;  %v4362_v57 = vld [vmem:[#allocation2 + $0x9] sm:$0xff] }
0x40da   :  { %v4341_v49 = vmul.f32 0.125, %v4339_v17  ;;  %v4364_v33 = vmul.f32 0.125, %v4362_v57  ;;  %v4368_v2 = vmul.f32 -1.0, %v4362_v57  ;;  %v4389_v43 = vld [vmem:[#allocation2 + $0x2] sm:$0xff] }
0x40db   :  { %4347 = vrot.lane.b32.xlu2 %v4342_v53, %s5713_s7  ;;  %v4391_v52 = vmul.f32 0.125, %v4389_v43 }
0x40dc   :  { %4353 = vrot.lane.b32.xlu1 %v4341_v49, %s5714_s13  ;;  %4345 = vrot.lane.b32.xlu0 %v4341_v49, %s5713_s7 }
0x40e0   :  { %v4390_v48 = vld [vmem:[#allocation2 + $0xa] sm:$0xff] }
0x40e1   :  { %v4392_v41 = vmul.f32 0.125, %v4390_v48 }
0x40e3   :  { %4383 = vrot.lane.b32.xlu2 %v4364_v33, %s5714_s13 }
0x40e4   :  { %4355 = vrot.lane.b32.xlu1 %v4342_v53, %s5714_s13  ;;  %4373 = vrot.lane.b32.xlu0 %v4368_v2, %s5713_s7 }
0x40eb   :  { %4407 = vrot.lane.b32.xlu2 %v4392_v41, %s5714_s13 }
0x40ec   :  { %4397 = vrot.lane.b32.xlu1 %v4391_v52, %s5713_s7  ;;  %4405 = vrot.lane.b32.xlu0 %v4391_v52, %s5714_s13 }
0x40f4   :  { %4399 = vrot.lane.b32.xlu1 %v4392_v41, %s5713_s7 }
0x412d   :  { %v4382_v37 = vpop.permute.xlu2 %4381 }
0x4135   :  { %v4348_v18 = vpop.permute.xlu2 %4347 }
0x4136   :  { %v4352_v28 = vadd.f32 %v4348_v18, %v4342_v53  ;;  %v4558_v18 = vld [vmem:[#allocation11 + $0x18] sm:$0xff] }
0x4137   :  { %4574 = vmatpush.msra.mxu2 %v4558_v18 }
0x413d   :  { %v4384_v0 = vpop.permute.xlu2 %4383 }
0x4145   :  { %v4372_v47 = vpop.permute.xlu0 %4371  ;;  %v4408_v39 = vpop.permute.xlu2 %4407 }
0x414e   :  { %v4354_v10 = vpop.permute.xlu1 %4353  ;;  %v4346_v58 = vpop.permute.xlu0 %4345 }
0x414f   :  { %v4351_v21 = vadd.f32 %v4346_v58, %v4341_v49 }
0x4151   :  { %v4359_v26 = vadd.f32 %v4354_v10, %v4351_v21 }
0x4153   :  { %v4365_v27 = vadd.f32 %v4363_v4, %v4359_v26 }
0x4155   :  { %v4377_v5 = vadd.f32 %v4372_v47, %v4365_v27  ;;  %v4557_v27 = vld [vmem:[#allocation11 + $0x10] sm:$0xff] }
0x4156   :  { %v4356_v25 = vpop.permute.xlu1 %4355  ;;  %v4374_v42 = vpop.permute.xlu0 %4373  ;;  %4575 = vmatpush.msra.mxu2 %v4557_v27  ;;  %v4811_v27 = vld [vmem:[#allocation14] sm:$0xf] }
0x4157   :  { %v4360_v14 = vadd.f32 %v4356_v25, %v4352_v28  ;;  %v4387_v54 = vadd.f32 %v4382_v37, %v4377_v5  ;;  %v4556_v28 = vld [vmem:[#allocation11 + $0x8] sm:$0xff] }
0x4158   :  { %4576 = vmatpush.msra.mxu2 %v4556_v28 }
0x4159   :  { %v4366_v16 = vadd.f32 %v4364_v33, %v4360_v14  ;;  %v4393_v34 = vadd.f32 %v4391_v52, %v4387_v54 }
0x415b   :  { %v4378_v55 = vadd.f32 %v4374_v42, %v4366_v16 }
0x415d   :  { %v4388_v56 = vadd.f32 %v4384_v0, %v4378_v55 }
0x415e   :  { %v4398_v40 = vpop.permute.xlu1 %4397  ;;  %v4406_v50 = vpop.permute.xlu0 %4405 }
0x415f   :  { %v4403_v62 = vadd.f32 %v4398_v40, %v4393_v34  ;;  %v4394_v15 = vadd.f32 %v4392_v41, %v4388_v56 }
0x4161   :  { %v4411_v45 = vadd.f32 %v4406_v50, %v4403_v62 }
0x4163   :  { %v4413_v60 = vadd.f32 %v4411_v45, %v7115_v23 }
0x4165   :  { %v7150_v7 = vadd.f32 %v4413_v60, %v6682_v63 }
0x4166   :  { %v4400_v36 = vpop.permute.xlu1 %4399 }
0x4167   :  { %v4404_v59 = vadd.f32 %v4400_v36, %v4394_v15  ;;  %4419 = vrot.lane.b32.xlu0 %v7150_v7, %s5712_s6 }
0x4169   :  { %v4412_v30 = vadd.f32 %v4408_v39, %v4404_v59 }
0x416b   :  { %v4414_v19 = vadd.f32 %v4412_v30, %v7120_v29 }
0x416d   :  { %v7156_v1 = vadd.f32 %v4414_v19, %v6692_v38 }
0x416f   :  { %4421 = vrot.lane.b32.xlu1 %v7156_v1, %s5712_s6 }
0x41d9   :  { %v4420_v23 = vpop.permute.xlu0 %4419 }
0x41da   :  { %4425 = vst.msk [vmem:[#allocation2 + $0x1] sm:$0xff] %vm168_vm0, %v4420_v23 }
0x41e1   :  { %v4422_v6 = vpop.permute.xlu1 %4421  ;;  %v4427_v20 = vld [vmem:[#allocation2 + $0x1] sm:$0xff] }
0x41e2   :  { %4426 = vst.msk [vmem:[#allocation2 + $0x9] sm:$0xff] %vm168_vm0, %v4422_v6  ;;  %4431 = vrot.lane.b32.xlu2 %v4427_v20, %s5713_s7 }
0x41e9   :  { %v4428_v46 = vld [vmem:[#allocation2 + $0x9] sm:$0xff] }
0x41ea   :  { %4433 = vrot.lane.b32.xlu0 %v4428_v46, %s5713_s7 }
0x423c   :  { %v4432_v32 = vpop.permute.xlu2 %4431 }
0x423d   :  { %4437 = vst.msk [vmem:[#allocation2 + $0x1] sm:$0xff] %vm181_vm1, %v4432_v32 }
0x4244   :  { %v4439_v29 = vld [vmem:[#allocation2 + $0x1] sm:$0xff] }
0x4245   :  { %4443 = vrot.lane.b32.xlu1 %v4439_v29, %s5712_s6 }
0x425c   :  { %v4434_v13 = vpop.permute.xlu0 %4433 }
0x425d   :  { %4438 = vst.msk [vmem:[#allocation2 + $0x9] sm:$0xff] %vm181_vm1, %v4434_v13  ;;  %v4531_v13 = vld [vmem:[#allocation10] sm:$0xff] }
0x4264   :  { %v4440_v31 = vld [vmem:[#allocation2 + $0x9] sm:$0xff] }
0x4265   :  { %4445 = vrot.lane.b32.xlu2 %v4440_v31, %s5712_s6  ;;  %v4555_v31 = vld [vmem:[#allocation11] sm:$0xff] }
0x4266   :  { %4577 = vmatpush.msra.mxu2 %v4555_v31 }
0x42b7   :  { %v4444_v51 = vpop.permute.xlu1 %4443 }
0x42b8   :  { %4449 = vst.msk [vmem:[#allocation2 + $0x1] sm:$0xff] %vm194_vm2, %v4444_v51 }
0x42bf   :  { %v4446_v8 = vpop.permute.xlu2 %4445  ;;  %v4451_v4 = vld [vmem:[#allocation2 + $0x1] sm:$0x1] }
0x42c0   :  { %4450 = vst.msk [vmem:[#allocation2 + $0x9] sm:$0xff] %vm194_vm2, %v4446_v8  ;;  %v4477_v57 = vld [vmem:[#allocation2 + $0x1] sm:$0xff]  ;;  %v4582_v8 = vld [vmem:[#allocation10] sm:$0xf] }
0x42c1   :  { %4452 = vst.msk [vmem:[#allocation2] sm:$0x1] %vm198_vm3, %v4451_v4  ;;  %v4483_v43 = vmul.f32 2.6666667, %v4477_v57  ;;  %v4479_v52 = vmul.f32 -0.33333334, %v4477_v57 }
0x42c7   :  { %v4478_v12 = vld [vmem:[#allocation2 + $0x9] sm:$0xff] }
0x42c8   :  { %v4456_v53 = vld [vmem:[#allocation2 + $0x8] sm:$0xff]  ;;  %v4453_v17 = vld [vmem:[#allocation2 + $0x10] sm:$0x1]  ;;  %v4484_v9 = vmul.f32 2.6666667, %v4478_v12  ;;  %v4455_v2 = vld [vmem:[#allocation2] sm:$0xff] }
0x42c9   :  { %v4458_v49 = vmul.f32 -0.33333334, %v4456_v53  ;;  %4454 = vst.msk [vmem:[#allocation2 + $0x11] sm:$0x1] %vm198_vm3, %v4453_v17  ;;  %v4505_v33 = vld [vmem:[#allocation2 + $0x2] sm:$0xff] }
0x42ca   :  { %4489 = vrot.lane.b32.xlu1 %v4484_v9, %s5713_s7  ;;  %4963 = vst.msk [vmem:[#allocation2 + $0x8] sm:$0x3] %vm1895_vm6, %v7371_v11  ;;  %v4457_v48 = vmul.f32 -0.33333334, %v4455_v2  ;;  %v4480_v37 = vmul.f32 -0.33333334, %v4478_v12 }
0x42cb   :  { %4471 = vrot.lane.b32.xlu2 %v4458_v49, %s5714_s13  ;;  %4463 = vrot.lane.b32.xlu0 %v4458_v49, %s5713_s7  ;;  %4765 = vst.msk [vmem:[#allocation2] sm:$0xf] %vm1692_vm5, %v7371_v11  ;;  %v4507_v10 = vmul.f32 -0.33333334, %v4505_v33  ;;  %vm7380_vm5 = vcmask 261120   ;;  %vm7381_vm6 = vcmask 78848  }
0x42cc   :  { %v4682_v17 = vld [vmem:[#allocation10] sm:$0x1]  ;;  %v4737_v33 = vld [vmem:[#allocation14] sm:$0x3] }
0x42d0   :  { %v4506_v41 = vld [vmem:[#allocation2 + $0xa] sm:$0xff] }
0x42d1   :  { %v4508_v47 = vmul.f32 -0.33333334, %v4506_v41 }
0x42d2   :  { %4461 = vrot.lane.b32.xlu1 %v4457_v48, %s5713_s7 }
0x42d3   :  { %4487 = vrot.lane.b32.xlu2 %v4483_v43, %s5713_s7  ;;  %4469 = vrot.lane.b32.xlu0 %v4457_v48, %s5714_s13 }
0x42da   :  { %4497 = vrot.lane.b32.xlu1 %v4479_v52, %s5714_s13 }
0x42db   :  { %4515 = vrot.lane.b32.xlu2 %v4508_v47, %s5713_s7  ;;  %4499 = vrot.lane.b32.xlu0 %v4480_v37, %s5714_s13 }
0x42e2   :  { %4523 = vrot.lane.b32.xlu1 %v4508_v47, %s5714_s13 }
0x42e3   :  { %4521 = vrot.lane.b32.xlu2 %v4507_v10, %s5714_s13  ;;  %4513 = vrot.lane.b32.xlu0 %v4507_v10, %s5713_s7 }
0x4325   :  { %v4472_v58 = vpop.permute.xlu2 %4471 }
0x432d   :  { %v4488_v25 = vpop.permute.xlu2 %4487 }
0x4335   :  { %v4516_v56 = vpop.permute.xlu2 %4515 }
0x433c   :  { %v4490_v21 = vpop.permute.xlu1 %4489 }
0x433d   :  { %v4464_v26 = vpop.permute.xlu0 %4463  ;;  %v4522_v20 = vpop.permute.xlu2 %4521 }
0x433e   :  { %v4468_v5 = vadd.f32 %v4464_v26, %v4458_v49  ;;  %v4709_v49 = vld [vmem:[#allocation11] sm:$0xf] }
0x4340   :  { %v4476_v42 = vadd.f32 %v4472_v58, %v4468_v5 }
0x4342   :  { %v4482_v34 = vadd.f32 %v4480_v37, %v4476_v42 }
0x4344   :  { %v4462_v14 = vpop.permute.xlu1 %4461  ;;  %v4494_v50 = vadd.f32 %v4490_v21, %v4482_v34 }
0x4345   :  { %v4467_v16 = vadd.f32 %v4462_v14, %v4457_v48  ;;  %v4470_v54 = vpop.permute.xlu0 %4469 }
0x4347   :  { %v4475_v55 = vadd.f32 %v4470_v54, %v4467_v16 }
0x4349   :  { %v4481_v0 = vadd.f32 %v4479_v52, %v4475_v55 }
0x434b   :  { %v4493_v62 = vadd.f32 %v4488_v25, %v4481_v0 }
0x434c   :  { %v4498_v40 = vpop.permute.xlu1 %4497 }
0x434d   :  { %v4500_v45 = vpop.permute.xlu0 %4499  ;;  %v4503_v15 = vadd.f32 %v4498_v40, %v4493_v62 }
0x434e   :  { %v4504_v60 = vadd.f32 %v4500_v45, %v4494_v50 }
0x434f   :  { %v4509_v39 = vadd.f32 %v4507_v10, %v4503_v15 }
0x4350   :  { %v4510_v36 = vadd.f32 %v4508_v47, %v4504_v60 }
0x4352   :  { %v4520_v59 = vadd.f32 %v4516_v56, %v4510_v36  ;;  %v4838_v36 = vld [vmem:[#allocation13] sm:$0xf] }
0x4354   :  { %v4524_v30 = vpop.permute.xlu1 %4523 }
0x4355   :  { %v4514_v19 = vpop.permute.xlu0 %4513  ;;  %v4528_v23 = vadd.f32 %v4524_v30, %v4520_v59 }
0x4356   :  { %v4519_v6 = vadd.f32 %v4514_v19, %v4509_v39 }
0x4357   :  { %v4530_v46 = vsub.f32 %v4528_v23, %v6557_v35 }
0x4358   :  { %v4527_v32 = vadd.f32 %v4522_v20, %v4519_v6 }
0x4359   :  { %4549 = vmatpush.msra.mxu1 %v4530_v46 }
0x435a   :  { %v4529_v29 = vsub.f32 %v4527_v32, %v6559_v3  ;;  %v4631_v3 = vld [vmem:[#allocation10] sm:$0x3] }
0x435c   :  { %4550 = vmatpush.msra.mxu1 %v4529_v29 }
0x435d   :  { %5451 = vmatmul.msk.f32.vlgmr.msra.gmra.mxu1 %vm1452_vm7, %v4531_v13  ;;  %v4911_v13 = vld [vmem:[#allocation14] sm:$0xff] }
0x435e   :  { %4625 = vmatpush.msrb.mxu1 %v4556_v28 }
0x4360   :  { %4626 = vmatpush.msrb.mxu1 %v4555_v31 }
0x4362   :  { %5460 = vmatpush.msk.msra.mxu1 %vm1559_vm10, %v4709_v49 }
0x43da   :  { %v4552_v51 = vpop.f32.mrf.mxu1 }
0x43db   :  { %5452 = vmatmul.msk.f32.vlgmr.msra.gmra.mxu2 %vm7380_vm5, %v4552_v51 }
0x445e   :  { %v7192_v4 = vpop.f32.mrf.mxu2 }
0x445f   :  { %4601 = vmatpush.msra.mxu0 %v7192_v4 }
0x4460   :  { %5453 = vmatmul.msk.f32.vlgmr.msra.gmra.mxu0 %vm1505_vm9, %v4582_v8 }
0x4461   :  { %4677 = vmatpush.msrb.mxu0 %v4555_v31 }
0x4463   :  { %5464 = vmatpush.msk.msra.mxu0 %vm1559_vm10, %v4811_v27 }
0x44dd   :  { %v4603_v35 = vpop.f32.mrf.mxu0 }
0x44de   :  { %5454 = vmatmul.msk.f32.vlgmr.msrb.gmra.mxu1 %vm1452_vm7, %v4603_v35 }
0x44df   :  { %4930 = vmatpush.msrb.mxu1 %v4911_v13 }
0x455b   :  { %v7197_v12 = vpop.f32.mrf.mxu1 }
0x455c   :  { %5455 = vmatpush.msk.msrb.mxu2 %vm1559_vm10, %v7197_v12 }
0x455d   :  { %5456 = vmatmul.msk.f32.vlgmr.msrb.gmra.mxu2 %vm1555_vm11, %v4631_v3 }
0x455e   :  { %5462 = vmatpush.msk.msra.mxu2 %vm1612_vm12, %v4737_v33 }
0x45e0   :  { %v4655_v53 = vpop.f32.mrf.mxu2 }
0x45e1   :  { %5457 = vmatmul.msk.f32.vlgmr.msrb.gmra.mxu0 %vm1505_vm9, %v4655_v53 }
0x465e   :  { %v4679_v9 = vpop.f32.mrf.mxu0 }
0x465f   :  { %5458 = vmatpush.msk.msra.mxu3 %vm1612_vm12, %v4679_v9  ;;  %v4809_v45 = vmul.f32 0.375, %v4679_v9 }
0x4660   :  { %5459 = vmatmul.msk.f32.vlgmr.msra.gmra.mxu3 %vm1608_vm13, %v4682_v17 }
0x46e3   :  { %v4706_v57 = vpop.f32.mrf.mxu3 }
0x46e4   :  { %5461 = vmatmul.msk.f32.vlgmr.msra.gmra.mxu1 %vm1555_vm11, %v4706_v57 }
0x4761   :  { %v4733_v2 = vpop.f32.mrf.mxu1 }
0x4762   :  { %v4736_v48 = vmul.f32 0.375, %v4733_v2 }
0x4764   :  { %5463 = vmatmul.msk.f32.vlgmr.msra.gmra.mxu2 %vm1608_vm13, %v4736_v48 }
0x47e7   :  { %v4761_v43 = vpop.f32.mrf.mxu2 }
0x47e8   :  { %v4764_v41 = vperm.slane %v4761_v43, 0  ;;  %v4909_v43 = vmul.f32 0.375, %v7197_v12 }
0x47ea   :  { %4767 = vrot.lane.b32.xlu0 %v4764_v41, %s5712_s6 }
0x485c   :  { %v4768_v52 = vpop.permute.xlu0 %4767 }
0x485d   :  { %4770 = vst.msk [vmem:[#allocation2 + $0x1] sm:$0x3] %vm1698_vm14, %v4768_v52  ;;  %vm7382_vm14 = vmmov %vm7379_vm8 }
0x4864   :  { %v4782_v47 = vld [vmem:[#allocation2 + $0x1] sm:$0x3] }
0x4865   :  { %v4771_v37 = vld [vmem:[#allocation2] sm:$0x3]  ;;  %v4796_v10 = vld [vmem:[#allocation2 + $0x2] sm:$0x3]  ;;  %v4785_v58 = vmul.f32 -1.0, %v4782_v47  ;;  %v4783_v18 = vmul.f32 0.125, %v4782_v47 }
0x4866   :  { %v4772_v21 = vmul.f32 0.125, %v4771_v37  ;;  %4865 = vst.msk [vmem:[#allocation2] sm:$0x3f] %vm7381_vm6, %v7371_v11  ;;  %v4797_v26 = vmul.f32 0.125, %v4796_v10  ;;  %v4935_v47 = vld [vmem:[#allocation13] sm:$0xff] }
0x4867   :  { %4787 = vrot.lane.b32.xlu0 %v4785_v58, %s5713_s7 }
0x4868   :  { %4778 = vrot.lane.b32.xlu2 %v4772_v21, %s5714_s13  ;;  %4774 = vrot.lane.b32.xlu1 %v4772_v21, %s5713_s7 }
0x486f   :  { %4804 = vrot.lane.b32.xlu0 %v4797_v26, %s5714_s13 }
0x4870   :  { %4800 = vrot.lane.b32.xlu2 %v4797_v26, %s5713_s7  ;;  %4792 = vrot.lane.b32.xlu1 %v4783_v18, %s5714_s13 }
0x48c2   :  { %v4779_v25 = vpop.permute.xlu2 %4778 }
0x48ca   :  { %v4801_v40 = vpop.permute.xlu2 %4800 }
0x48d9   :  { %v4788_v14 = vpop.permute.xlu0 %4787 }
0x48da   :  { %v4775_v28 = vpop.permute.xlu1 %4774 }
0x48db   :  { %v4777_v5 = vadd.f32 %v4775_v28, %v4772_v21 }
0x48dd   :  { %v4781_v42 = vadd.f32 %v4779_v25, %v4777_v5  ;;  %v5010_v25 = vld [vmem:[#allocation14 + $0x8] sm:$0xff] }
0x48de   :  { %5028 = vmatpush.msrb.mxu0 %v5010_v25 }
0x48df   :  { %v4784_v16 = vadd.f32 %v4783_v18, %v4781_v42 }
0x48e0   :  { %5029 = vmatpush.msrb.mxu0 %v4911_v13 }
0x48e1   :  { %v4790_v54 = vadd.f32 %v4788_v14, %v4784_v16  ;;  %v4805_v50 = vpop.permute.xlu0 %4804 }
0x48e2   :  { %v4793_v55 = vpop.permute.xlu1 %4792 }
0x48e3   :  { %v4795_v34 = vadd.f32 %v4793_v55, %v4790_v54 }
0x48e5   :  { %v4798_v0 = vadd.f32 %v4797_v26, %v4795_v34 }
0x48e7   :  { %v4803_v62 = vadd.f32 %v4801_v40, %v4798_v0 }
0x48e9   :  { %v4807_v56 = vadd.f32 %v4805_v50, %v4803_v62 }
0x48eb   :  { %v4808_v60 = vadd.f32 %v4807_v56, %v4764_v41 }
0x48ed   :  { %v4810_v15 = vadd.f32 %v4809_v45, %v4808_v60 }
0x48ef   :  { %5465 = vmatmul.msk.f32.vlgmr.msra.gmra.mxu0 %vm1555_vm11, %v4810_v15 }
0x496c   :  { %v4835_v59 = vpop.f32.mrf.mxu0 }
0x496d   :  { %5466 = vmatpush.msk.msrb.mxu3 %vm1612_vm12, %v4835_v59 }
0x496e   :  { %5467 = vmatmul.msk.f32.vlgmr.msrb.gmra.mxu3 %vm1608_vm13, %v4838_v36  ;;  %v5007_v36 = vmul.f32 0.375, %v7192_v4 }
0x49f1   :  { %v4862_v39 = vpop.f32.mrf.mxu3 }
0x49f2   :  { %4867 = vrot.lane.b32.xlu1 %v4862_v39, %s5712_s6 }
0x4a64   :  { %v4868_v30 = vpop.permute.xlu1 %4867 }
0x4a65   :  { %4870 = vst.msk [vmem:[#allocation2 + $0x1] sm:$0xf] %vm7382_vm14, %v4868_v30 }
0x4a6c   :  { %v4882_v19 = vld [vmem:[#allocation2 + $0x1] sm:$0xf] }
0x4a6d   :  { %v4871_v23 = vld [vmem:[#allocation2] sm:$0xf]  ;;  %v4885_v20 = vmul.f32 -1.0, %v4882_v19  ;;  %v4883_v29 = vmul.f32 0.125, %v4882_v19  ;;  %v5035_v19 = vld [vmem:[#allocation13 + $0x8] sm:$0xff] }
0x4a6e   :  { %v4896_v6 = vld [vmem:[#allocation2 + $0x2] sm:$0xf]  ;;  %v4872_v46 = vmul.f32 0.125, %v4871_v23 }
0x4a6f   :  { %4962 = vst.msk [vmem:[#allocation2] sm:$0xff] %vm1893_vm4, %v7371_v11  ;;  %4887 = vrot.lane.b32.xlu1 %v4885_v20, %s5713_s7  ;;  %v4897_v32 = vmul.f32 0.125, %v4896_v6 }
0x4a70   :  { %4878 = vrot.lane.b32.xlu0 %v4872_v46, %s5714_s13  ;;  %4874 = vrot.lane.b32.xlu2 %v4872_v46, %s5713_s7 }
0x4a77   :  { %4904 = vrot.lane.b32.xlu1 %v4897_v32, %s5714_s13 }
0x4a78   :  { %4900 = vrot.lane.b32.xlu0 %v4897_v32, %s5713_s7  ;;  %4892 = vrot.lane.b32.xlu2 %v4883_v29, %s5714_s13 }
0x4aca   :  { %v4875_v31 = vpop.permute.xlu2 %4874 }
0x4acb   :  { %v4877_v51 = vadd.f32 %v4875_v31, %v4872_v46 }
0x4ad2   :  { %v4893_v17 = vpop.permute.xlu2 %4892 }
0x4ae1   :  { %v4888_v35 = vpop.permute.xlu1 %4887 }
0x4ae2   :  { %v4879_v8 = vpop.permute.xlu0 %4878 }
0x4ae3   :  { %v4881_v11 = vadd.f32 %v4879_v8, %v4877_v51 }
0x4ae5   :  { %v4884_v3 = vadd.f32 %v4883_v29, %v4881_v11 }
0x4ae7   :  { %v4890_v53 = vadd.f32 %v4888_v35, %v4884_v3 }
0x4ae9   :  { %v4895_v9 = vadd.f32 %v4893_v17, %v4890_v53  ;;  %v4905_v2 = vpop.permute.xlu1 %4904 }
0x4aea   :  { %v4901_v57 = vpop.permute.xlu0 %4900 }
0x4aeb   :  { %v4898_v49 = vadd.f32 %v4897_v32, %v4895_v9 }
0x4aed   :  { %v4903_v33 = vadd.f32 %v4901_v57, %v4898_v49 }
0x4aef   :  { %v4907_v48 = vadd.f32 %v4905_v2, %v4903_v33 }
0x4af1   :  { %v4908_v41 = vadd.f32 %v4907_v48, %v4862_v39 }
0x4af3   :  { %v4910_v52 = vadd.f32 %v4909_v43, %v4908_v41 }
0x4af5   :  { %5468 = vmatmul.msk.f32.vlgmr.msrb.gmra.mxu1 %vm1505_vm9, %v4910_v52 }
0x4b72   :  { %v4932_v37 = vpop.f32.mrf.mxu1 }
0x4b73   :  { %5469 = vmatpush.msk.msrb.mxu2 %vm1559_vm10, %v4932_v37 }
0x4b74   :  { %5470 = vmatmul.msk.f32.vlgmr.msrb.gmra.mxu2 %vm1555_vm11, %v4935_v47 }
0x4bf7   :  { %v4959_v10 = vpop.f32.mrf.mxu2 }
0x4bf8   :  { %4965 = vrot.lane.b32.xlu2 %v4959_v10, %s5712_s6 }
0x4c52   :  { %v4966_v58 = vpop.permute.xlu2 %4965 }
0x4c53   :  { %4968 = vst.msk [vmem:[#allocation2 + $0x1] sm:$0xff] %vm1901_vm15, %v4966_v58 }
0x4c5a   :  { %v4980_v21 = vld [vmem:[#allocation2 + $0x1] sm:$0xff] }
0x4c5b   :  { %v4969_v26 = vld [vmem:[#allocation2] sm:$0xff]  ;;  %v4983_v18 = vmul.f32 -1.0, %v4980_v21  ;;  %v4981_v5 = vmul.f32 0.125, %v4980_v21 }
0x4c5c   :  { %v4970_v12 = vmul.f32 0.125, %v4969_v26  ;;  %v4994_v27 = vld [vmem:[#allocation2 + $0x2] sm:$0xff] }
0x4c5d   :  { %4985 = vrot.lane.b32.xlu2 %v4983_v18, %s5713_s7  ;;  %v4995_v28 = vmul.f32 0.125, %v4994_v27 }
0x4c5e   :  { %4976 = vrot.lane.b32.xlu1 %v4970_v12, %s5714_s13  ;;  %4972 = vrot.lane.b32.xlu0 %v4970_v12, %s5713_s7 }
0x4c65   :  { %5002 = vrot.lane.b32.xlu2 %v4995_v28, %s5714_s13 }
0x4c66   :  { %4998 = vrot.lane.b32.xlu1 %v4995_v28, %s5713_s7  ;;  %4990 = vrot.lane.b32.xlu0 %v4981_v5, %s5714_s13 }
0x4cb7   :  { %v4986_v55 = vpop.permute.xlu2 %4985 }
0x4cbf   :  { %v5003_v60 = vpop.permute.xlu2 %5002 }
0x4cd0   :  { %v4973_v42 = vpop.permute.xlu0 %4972  ;;  %v4977_v16 = vpop.permute.xlu1 %4976 }
0x4cd1   :  { %v4975_v14 = vadd.f32 %v4973_v42, %v4970_v12 }
0x4cd3   :  { %v4979_v54 = vadd.f32 %v4977_v16, %v4975_v14 }
0x4cd5   :  { %v4982_v34 = vadd.f32 %v4981_v5, %v4979_v54 }
0x4cd7   :  { %v4988_v0 = vadd.f32 %v4986_v55, %v4982_v34 }
0x4cd8   :  { %v4991_v40 = vpop.permute.xlu0 %4990  ;;  %v4999_v56 = vpop.permute.xlu1 %4998 }
0x4cd9   :  { %v4993_v62 = vadd.f32 %v4991_v40, %v4988_v0 }
0x4cdb   :  { %v4996_v50 = vadd.f32 %v4995_v28, %v4993_v62 }
0x4cdd   :  { %v5001_v45 = vadd.f32 %v4999_v56, %v4996_v50 }
0x4cdf   :  { %v5005_v15 = vadd.f32 %v5003_v60, %v5001_v45 }
0x4ce1   :  { %v5006_v59 = vadd.f32 %v5005_v15, %v4959_v10 }
0x4ce3   :  { %v5008_v39 = vadd.f32 %v5007_v36, %v5006_v59 }
0x4ce5   :  { %5471 = vmatmul.msk.f32.vlgmr.msrb.gmra.mxu0 %vm1452_vm7, %v5008_v39  ;;  %vm5347_vm7 = vcmask 1048320  }
0x4d62   :  { %v5031_v30 = vpop.f32.mrf.mxu0 }
0x4d63   :  { %5057 = vmatpush.msra.mxu3 %v5031_v30 }
0x4d64   :  { %5472 = vmatmul.msk.f32.vlgmr.msra.gmra.mxu3 %vm1505_vm9, %v4935_v47 }
0x4d6c   :  { %5473 = vmatmul.msk.f32.gmra.mxu3 %vm1505_vm9, %v5035_v19 }
0x4de7   :  { %v5059_v23 = vpop.f32.mrf.mxu3 }
0x4de8   :  { %v7250_v6 = vsub.f32 %v7150_v7, %v5059_v23 }
0x4dea   :  { %5069 = vrot.lane.b32.xlu0 %v7250_v6, %s5712_s6 }
0x4def   :  { %v5062_v20 = vpop.f32.mrf.mxu3 }
0x4df0   :  { %v7255_v4 = vsub.f32 %v7156_v1, %v5062_v20 }
0x4df2   :  { %5071 = vrot.lane.b32.xlu1 %v7255_v4, %s5712_s6 }
0x4e5c   :  { %v5070_v46 = vpop.permute.xlu0 %5069 }
0x4e5d   :  { %5075 = vst.msk [vmem:[#allocation2 + $0x1] sm:$0xff] %vm168_vm0, %v5070_v46 }
0x4e64   :  { %v5072_v32 = vpop.permute.xlu1 %5071  ;;  %v5077_v29 = vld [vmem:[#allocation2 + $0x1] sm:$0xff] }
0x4e65   :  { %5076 = vst.msk [vmem:[#allocation2 + $0x9] sm:$0xff] %vm168_vm0, %v5072_v32  ;;  %5081 = vrot.lane.b32.xlu2 %v5077_v29, %s5713_s7 }
0x4e6c   :  { %v5078_v7 = vld [vmem:[#allocation2 + $0x9] sm:$0xff] }
0x4e6d   :  { %5083 = vrot.lane.b32.xlu0 %v5078_v7, %s5713_s7 }
0x4ebf   :  { %v5082_v13 = vpop.permute.xlu2 %5081 }
0x4ec0   :  { %5087 = vst.msk [vmem:[#allocation2 + $0x1] sm:$0xff] %vm181_vm1, %v5082_v13 }
0x4ec7   :  { %v5089_v1 = vld [vmem:[#allocation2 + $0x1] sm:$0xff] }
0x4ec8   :  { %5093 = vrot.lane.b32.xlu1 %v5089_v1, %s5712_s6 }
0x4edf   :  { %v5084_v31 = vpop.permute.xlu0 %5083 }
0x4ee0   :  { %5088 = vst.msk [vmem:[#allocation2 + $0x9] sm:$0xff] %vm181_vm1, %v5084_v31 }
0x4ee7   :  { %v5090_v51 = vld [vmem:[#allocation2 + $0x9] sm:$0xff] }
0x4ee8   :  { %5095 = vrot.lane.b32.xlu2 %v5090_v51, %s5712_s6 }
0x4f3a   :  { %v5094_v8 = vpop.permute.xlu1 %5093 }
0x4f3b   :  { %5099 = vst.msk [vmem:[#allocation2 + $0x1] sm:$0xff] %vm194_vm2, %v5094_v8 }
0x4f42   :  { %v5096_v11 = vpop.permute.xlu2 %5095  ;;  %v5127_v35 = vld [vmem:[#allocation2 + $0x1] sm:$0xff] }
0x4f43   :  { %v5101_v3 = vld [vmem:[#allocation2 + $0x1] sm:$0x1]  ;;  %5100 = vst.msk [vmem:[#allocation2 + $0x9] sm:$0xff] %vm194_vm2, %v5096_v11  ;;  %v5133_v53 = vmul.f32 -1.0, %v5127_v35  ;;  %v5129_v17 = vmul.f32 0.125, %v5127_v35 }
0x4f44   :  { %5102 = vst.msk [vmem:[#allocation2] sm:$0x1] %vm198_vm3, %v5101_v3 }
0x4f45   :  { %5137 = vrot.lane.b32.xlu0 %v5133_v53, %s5713_s7  ;;  %5147 = vrot.lane.b32.xlu2 %v5129_v17, %s5714_s13 }
0x4f4a   :  { %v5106_v9 = vld [vmem:[#allocation2 + $0x8] sm:$0xff]  ;;  %v5103_v49 = vld [vmem:[#allocation2 + $0x10] sm:$0x1] }
0x4f4b   :  { %v5108_v57 = vmul.f32 0.125, %v5106_v9  ;;  %v5105_v33 = vld [vmem:[#allocation2] sm:$0xff]  ;;  %5104 = vst.msk [vmem:[#allocation2 + $0x11] sm:$0x1] %vm198_vm3, %v5103_v49  ;;  %v5128_v48 = vld [vmem:[#allocation2 + $0x9] sm:$0xff] }
0x4f4c   :  { %v5107_v2 = vmul.f32 0.125, %v5105_v33  ;;  %v5130_v43 = vmul.f32 0.125, %v5128_v48  ;;  %v5134_v41 = vmul.f32 -1.0, %v5128_v48  ;;  %v5155_v47 = vld [vmem:[#allocation2 + $0x2] sm:$0xff] }
0x4f4d   :  { %5113 = vrot.lane.b32.xlu2 %v5108_v57, %s5713_s7  ;;  %v5157_v10 = vmul.f32 0.125, %v5155_v47 }
0x4f4e   :  { %5119 = vrot.lane.b32.xlu1 %v5107_v2, %s5714_s13  ;;  %5111 = vrot.lane.b32.xlu0 %v5107_v2, %s5713_s7 }
0x4f52   :  { %v5156_v52 = vld [vmem:[#allocation2 + $0xa] sm:$0xff] }
0x4f53   :  { %v5158_v37 = vmul.f32 0.125, %v5156_v52 }
0x4f55   :  { %5149 = vrot.lane.b32.xlu2 %v5130_v43, %s5714_s13 }
0x4f56   :  { %5121 = vrot.lane.b32.xlu1 %v5108_v57, %s5714_s13  ;;  %5139 = vrot.lane.b32.xlu0 %v5134_v41, %s5713_s7 }
0x4f5d   :  { %5173 = vrot.lane.b32.xlu2 %v5158_v37, %s5714_s13 }
0x4f5e   :  { %5163 = vrot.lane.b32.xlu1 %v5157_v10, %s5713_s7  ;;  %5171 = vrot.lane.b32.xlu0 %v5157_v10, %s5714_s13 }
0x4f66   :  { %5165 = vrot.lane.b32.xlu1 %v5158_v37, %s5713_s7 }
0x4f9f   :  { %v5148_v21 = vpop.permute.xlu2 %5147 }
0x4fa7   :  { %v5114_v28 = vpop.permute.xlu2 %5113 }
0x4fa8   :  { %v5118_v25 = vadd.f32 %v5114_v28, %v5108_v57 }
0x4faf   :  { %v5150_v62 = vpop.permute.xlu2 %5149 }
0x4fb7   :  { %v5138_v58 = vpop.permute.xlu0 %5137  ;;  %v5174_v23 = vpop.permute.xlu2 %5173 }
0x4fc0   :  { %v5120_v26 = vpop.permute.xlu1 %5119  ;;  %v5112_v18 = vpop.permute.xlu0 %5111 }
0x4fc1   :  { %v5117_v12 = vadd.f32 %v5112_v18, %v5107_v2 }
0x4fc3   :  { %v5125_v27 = vadd.f32 %v5120_v26, %v5117_v12 }
0x4fc5   :  { %v5131_v5 = vadd.f32 %v5129_v17, %v5125_v27 }
0x4fc7   :  { %v5143_v42 = vadd.f32 %v5138_v58, %v5131_v5 }
0x4fc8   :  { %v5122_v14 = vpop.permute.xlu1 %5121  ;;  %v5140_v16 = vpop.permute.xlu0 %5139 }
0x4fc9   :  { %v5126_v54 = vadd.f32 %v5122_v14, %v5118_v25  ;;  %v5153_v34 = vadd.f32 %v5148_v21, %v5143_v42 }
0x4fcb   :  { %v5132_v55 = vadd.f32 %v5130_v43, %v5126_v54  ;;  %v5159_v40 = vadd.f32 %v5157_v10, %v5153_v34 }
0x4fcd   :  { %v5144_v0 = vadd.f32 %v5140_v16, %v5132_v55 }
0x4fcf   :  { %v5154_v60 = vadd.f32 %v5150_v62, %v5144_v0 }
0x4fd0   :  { %v5164_v50 = vpop.permute.xlu1 %5163  ;;  %v5172_v45 = vpop.permute.xlu0 %5171 }
0x4fd1   :  { %v5169_v56 = vadd.f32 %v5164_v50, %v5159_v40  ;;  %v5160_v39 = vadd.f32 %v5158_v37, %v5154_v60 }
0x4fd3   :  { %v5177_v15 = vadd.f32 %v5172_v45, %v5169_v56 }
0x4fd5   :  { %v5179_v36 = vadd.f32 %v5177_v15, %v7250_v6 }
0x4fd7   :  { %v7285_v59 = vadd.f32 %v5179_v36, %v6682_v63 }
0x4fd8   :  { %v5166_v30 = vpop.permute.xlu1 %5165 }
0x4fd9   :  { %v5170_v19 = vadd.f32 %v5166_v30, %v5160_v39  ;;  %5185 = vrot.lane.b32.xlu0 %v7285_v59, %s5712_s6 }
0x4fdb   :  { %v5178_v20 = vadd.f32 %v5174_v23, %v5170_v19 }
0x4fdd   :  { %v5180_v46 = vadd.f32 %v5178_v20, %v7255_v4 }
0x4fdf   :  { %v7291_v32 = vadd.f32 %v5180_v46, %v6692_v38 }
0x4fe1   :  { %5187 = vrot.lane.b32.xlu1 %v7291_v32, %s5712_s6 }
0x504b   :  { %v5186_v6 = vpop.permute.xlu0 %5185 }
0x504c   :  { %5191 = vst.msk [vmem:[#allocation2 + $0x1] sm:$0xff] %vm168_vm0, %v5186_v6 }
0x5053   :  { %v5188_v63 = vpop.permute.xlu1 %5187  ;;  %v5193_v29 = vld [vmem:[#allocation2 + $0x1] sm:$0xff] }
0x5054   :  { %5192 = vst.msk [vmem:[#allocation2 + $0x9] sm:$0xff] %vm168_vm0, %v5188_v63  ;;  %5197 = vrot.lane.b32.xlu2 %v5193_v29, %s5713_s7  ;;  %v5498_v29 = vld [vmem:[#allocation8] sm:$0xff]  ;;  %vm7383_vm0 = vmmov %vm7380_vm5 }
0x505b   :  { %v5194_v7 = vld [vmem:[#allocation2 + $0x9] sm:$0xff] }
0x505c   :  { %5199 = vrot.lane.b32.xlu0 %v5194_v7, %s5713_s7 }
0x50ae   :  { %v5198_v13 = vpop.permute.xlu2 %5197 }
0x50af   :  { %5203 = vst.msk [vmem:[#allocation2 + $0x1] sm:$0xff] %vm181_vm1, %v5198_v13  ;;  %v5499_v13 = vld [vmem:[#allocation8 + $0x8] sm:$0xff] }
0x50b6   :  { %v5205_v38 = vld [vmem:[#allocation2 + $0x1] sm:$0xff] }
0x50b7   :  { %5209 = vrot.lane.b32.xlu1 %v5205_v38, %s5712_s6 }
0x50ce   :  { %v5200_v4 = vpop.permute.xlu0 %5199 }
0x50cf   :  { %5204 = vst.msk [vmem:[#allocation2 + $0x9] sm:$0xff] %vm181_vm1, %v5200_v4  ;;  %vm7384_vm1 = vmmov %vm7383_vm0 }
0x50d6   :  { %v5206_v1 = vld [vmem:[#allocation2 + $0x9] sm:$0xff] }
0x50d7   :  { %5211 = vrot.lane.b32.xlu2 %v5206_v1, %s5712_s6 }
0x5129   :  { %v5210_v31 = vpop.permute.xlu1 %5209 }
0x512a   :  { %5215 = vst.msk [vmem:[#allocation2 + $0x1] sm:$0xff] %vm194_vm2, %v5210_v31 }
0x5131   :  { %v5212_v51 = vpop.permute.xlu2 %5211  ;;  %v5217_v8 = vld [vmem:[#allocation2 + $0x1] sm:$0x1] }
0x5132   :  { %5216 = vst.msk [vmem:[#allocation2 + $0x9] sm:$0xff] %vm194_vm2, %v5212_v51  ;;  %v5237_v43 = vld [vmem:[#allocation2 + $0x1] sm:$0xff]  ;;  %vm5329_vm2 = vcmask 523520  }
0x5133   :  { %5218 = vst.msk [vmem:[#allocation2] sm:$0x1] %vm198_vm3, %v5217_v8  ;;  %v5243_v47 = vmul.f32 -0.016666668, %v5237_v43  ;;  %v5239_v27 = vmul.f32 0.016666668, %v5237_v43 }
0x5139   :  { %v5222_v11 = vld [vmem:[#allocation2 + $0x8] sm:$0xff]  ;;  %v5219_v35 = vld [vmem:[#allocation2 + $0x10] sm:$0x1] }
0x513a   :  { %v5221_v3 = vld [vmem:[#allocation2] sm:$0xff]  ;;  %v5274_v53 = vmul.f32 -0.016666668, %v5222_v11  ;;  %v5226_v17 = vmul.f32 -0.004166667, %v5222_v11  ;;  %v5238_v37 = vld [vmem:[#allocation2 + $0x9] sm:$0xff] }
0x513b   :  { %v5225_v9 = vmul.f32 -0.004166667, %v5221_v3  ;;  %5220 = vst.msk [vmem:[#allocation2 + $0x11] sm:$0x1] %vm198_vm3, %v5219_v35  ;;  %v5255_v49 = vld [vmem:[#allocation2 + $0x2] sm:$0xff]  ;;  %vm5338_vm3 = vcmask 785920  }
0x513c   :  { %5279 = vrot.lane.b32.xlu1 %v5274_v53, %s5713_s7  ;;  %5231 = vrot.lane.b32.xlu0 %v5226_v17, %s5714_s13  ;;  %v5289_v57 = vmul.f32 0.016666668, %v5255_v49  ;;  %v5273_v33 = vmul.f32 -0.016666668, %v5221_v3  ;;  %v5257_v41 = vmul.f32 0.004166667, %v5255_v49 }
0x513d   :  { %5229 = vrot.lane.b32.xlu2 %v5225_v9, %s5714_s13  ;;  %v5244_v10 = vmul.f32 -0.016666668, %v5238_v37  ;;  %v5261_v58 = vmul.f32 -0.004166667, %v5255_v49  ;;  %v5223_v26 = vmul.f32 0.004166667, %v5221_v3 }
0x513e   :  { %v5224_v5 = vmul.f32 0.004166667, %v5222_v11  ;;  %v5240_v16 = vmul.f32 0.016666668, %v5238_v37 }
0x5142   :  { %v5256_v2 = vld [vmem:[#allocation2 + $0xa] sm:$0xff] }
0x5143   :  { %v5290_v48 = vmul.f32 0.016666668, %v5256_v2  ;;  %v5258_v52 = vmul.f32 0.004166667, %v5256_v2  ;;  %v5262_v21 = vmul.f32 -0.004166667, %v5256_v2 }
0x5144   :  { %5293 = vrot.lane.b32.xlu1 %v5289_v57, %s5713_s7  ;;  %5277 = vrot.lane.b32.xlu0 %v5273_v33, %s5713_s7 }
0x5145   :  { %5295 = vrot.lane.b32.xlu2 %v5290_v48, %s5713_s7 }
0x514c   :  { %5303 = vrot.lane.b32.xlu0 %v5257_v41, %s5714_s13  ;;  %5305 = vrot.lane.b32.xlu1 %v5258_v52, %s5714_s13 }
0x514d   :  { %5247 = vrot.lane.b32.xlu2 %v5243_v47, %s5714_s13 }
0x5154   :  { %5249 = vrot.lane.b32.xlu0 %v5244_v10, %s5714_s13  ;;  %5265 = vrot.lane.b32.xlu1 %v5261_v58, %s5714_s13 }
0x5155   :  { %5267 = vrot.lane.b32.xlu2 %v5262_v21, %s5714_s13 }
0x515d   :  { %5332 = vrot.lane.b32.xlu2 %v7285_v59, %s5717_s14 }
0x5165   :  { %5343 = vrot.lane.b32.xlu2 %v7291_v32, %s5718_s19 }
0x5197   :  { %v5230_v18 = vpop.permute.xlu2 %5229 }
0x5198   :  { %v5235_v12 = vadd.f32 %v5230_v18, %v5223_v26 }
0x519a   :  { %v5241_v28 = vadd.f32 %v5239_v27, %v5235_v12 }
0x519f   :  { %v5296_v34 = vpop.permute.xlu2 %5295 }
0x51a7   :  { %v5248_v15 = vpop.permute.xlu2 %5247 }
0x51a8   :  { %v5253_v46 = vadd.f32 %v5248_v15, %v5241_v28 }
0x51aa   :  { %v5259_v4 = vadd.f32 %v5257_v41, %v5253_v46 }
0x51ae   :  { %v5280_v25 = vpop.permute.xlu1 %5279  ;;  %v5232_v42 = vpop.permute.xlu0 %5231 }
0x51af   :  { %v5236_v14 = vadd.f32 %v5232_v42, %v5224_v5  ;;  %v5284_v54 = vadd.f32 %v5280_v25, %v5226_v17  ;;  %v5268_v3 = vpop.permute.xlu2 %5267 }
0x51b1   :  { %v5242_v55 = vadd.f32 %v5240_v16, %v5236_v14  ;;  %v5286_v0 = vadd.f32 %v5284_v54, %v5232_v42 }
0x51b3   :  { %v5288_v56 = vadd.f32 %v5286_v0, %v5258_v52 }
0x51b5   :  { %v5300_v39 = vadd.f32 %v5296_v34, %v5288_v56 }
0x51b6   :  { %v5294_v40 = vpop.permute.xlu1 %5293  ;;  %v5278_v62 = vpop.permute.xlu0 %5277 }
0x51b7   :  { %v5283_v50 = vadd.f32 %v5278_v62, %v5225_v9 }
0x51b9   :  { %v5285_v45 = vadd.f32 %v5283_v50, %v5230_v18 }
0x51bb   :  { %v5287_v60 = vadd.f32 %v5285_v45, %v5257_v41 }
0x51bd   :  { %v5299_v36 = vadd.f32 %v5294_v40, %v5287_v60 }
0x51be   :  { %v5304_v30 = vpop.permute.xlu0 %5303  ;;  %v5306_v19 = vpop.permute.xlu1 %5305 }
0x51bf   :  { %v5309_v23 = vadd.f32 %v5304_v30, %v5299_v36  ;;  %v5310_v20 = vadd.f32 %v5306_v19, %v5300_v39 }
0x51c1   :  { %v5315_v6 = vsub.f32 %v6401_v44, %v5309_v23  ;;  %v5316_v63 = vsub.f32 %v6410_v61, %v5310_v20 }
0x51c3   :  { %v5317_v7 = vmul.f32 %v5498_v29, %v5315_v6  ;;  %v5318_v38 = vmul.f32 %v5499_v13, %v5316_v63 }
0x51c5   :  { %5323 = vrot.lane.b32.xlu0 %v5317_v7, %s5719_s20  ;;  %5325 = vrot.lane.b32.xlu1 %v5318_v38, %s5719_s20 }
0x51c6   :  { %v5250_v1 = vpop.permute.xlu0 %5249  ;;  %v5266_v31 = vpop.permute.xlu1 %5265 }
0x51c7   :  { %v5254_v51 = vadd.f32 %v5250_v1, %v5242_v55  ;;  %v5271_v8 = vadd.f32 %v5266_v31, %v5259_v4 }
0x51c9   :  { %v5260_v11 = vadd.f32 %v5258_v52, %v5254_v51  ;;  %v5311_v35 = vsub.f32 %v6290_v24, %v5271_v8  ;;  %v5333_v24 = vpop.permute.xlu2 %5332 }
0x51cb   :  { %v5272_v53 = vadd.f32 %v5268_v3, %v5260_v11  ;;  %v5313_v44 = vmul.f32 %v5498_v29, %v5311_v35 }
0x51cd   :  { %v5312_v61 = vsub.f32 %v6299_v22, %v5272_v53  ;;  %5319 = vst.msk [vmem:[%s7365_s8] sm:$0xff] %vm7383_vm0, %v5313_v44  ;;  %5334 = vrot.lane.b32.xlu0 %v7291_v32, %s5717_s14  ;;  %5341 = vrot.lane.b32.xlu1 %v7285_v59, %s5718_s19 }
0x51cf   :  { %v5314_v17 = vmul.f32 %v5499_v13, %v5312_v61 }
0x51d1   :  { %5320 = vst.msk [vmem:[%s7365_s8 + $0x8] sm:$0xff] %vm7384_vm1, %v5314_v17  ;;  %v5344_v49 = vpop.permute.xlu2 %5343 }
0x5237   :  { %v5324_v22 = vpop.permute.xlu0 %5323  ;;  %v5326_v9 = vpop.permute.xlu1 %5325 }
0x5238   :  { %5330 = vst.msk [vmem:[%s7365_s8] sm:$0xff] %vm5329_vm2, %v5324_v22 }
0x5239   :  { %5331 = vst.msk [vmem:[%s7365_s8 + $0x8] sm:$0xff] %vm5329_vm2, %v5326_v9 }
0x523a   :  { %5339 = vst.msk [vmem:[%s7365_s8] sm:$0xff] %vm5338_vm3, %v5333_v24 }
0x523f   :  { %v5335_v59 = vpop.permute.xlu0 %5334  ;;  %v5342_v32 = vpop.permute.xlu1 %5341 }
0x5240   :  { %5340 = vst.msk [vmem:[%s7365_s8 + $0x8] sm:$0xff] %vm5338_vm3, %v5335_v59 }
0x5241   :  { %5349 = vst.msk [vmem:[%s7365_s8 + $0x8] sm:$0xff] %vm5347_vm7, %v5344_v49 }
0x5242   :  { %5348 = vst.msk [vmem:[%s7365_s8] sm:$0xff] %vm5347_vm7, %v5342_v32 }
0x5243   :  { %5354 = vsyncpa [#allocation4], 1 }
0x5244   :  { %5355 = vsyncpa [#allocation6], 1 }
0x5245   :  { %5356 = vsyncpa [#allocation9], 1 }
0x5246   :  { %5357 = vsyncpa [#allocation12], 1 }
0x5247   :  { %5358 = vsyncpa [#allocation15], 1 }

</bundles_post_ra>
